<compile_context>
chip_gen: v5e
topology: v5e:2x2
jax: 0.10.0
libtpu: 0.0.40
codegen_flags: <defaults>
</compile_context>

<pallas_src>
import functools

import numpy as np

import jax
import jax.numpy as jnp
from jax.experimental import pallas as pl
from jax.experimental.pallas import tpu as pltpu

_BN_EPS = 1e-5
_LANE = 128


def _round_up(x, m):
    return (x + m - 1) // m * m


# ----------------------------------------------------------------------------
# parameter init (deterministic, synthetic) + BN fold into kernel-ready form
# ----------------------------------------------------------------------------
def _init_conv(key, kh, kw, cin, cout):
    # kaiming_normal_(mode='fan_out', nonlinearity='relu')
    fan_out = kh * kw * cout
    std = (2.0 / fan_out) ** 0.5
    return jax.random.normal(key, (kh, kw, cin, cout), jnp.float32) * std


def _bn_stats(c):
    # PyTorch init: gamma=1, beta=0; eval-mode running stats mean=0, var=1.
    return (jnp.ones((c,), jnp.float32), jnp.zeros((c,), jnp.float32),
            jnp.zeros((c,), jnp.float32), jnp.ones((c,), jnp.float32))


def _fold_tap_conv(w, gamma, beta, mean, var):
    """(kh,kw,cin,cout) conv + eval BN -> per-tap weight (kh*kw, cin, cout) bf16 + f32 bias."""
    kh, kw, cin, cout = w.shape
    scale = gamma / jnp.sqrt(var + _BN_EPS)
    bias = beta - mean * scale
    w = (w * scale[None, None, None, :]).reshape(kh * kw, cin, cout)
    return {"w": w.astype(jnp.bfloat16),
            "b": bias.reshape(1, cout).astype(jnp.float32),
            "kh": kh, "kw": kw}


def _fold_stem(w, gamma, beta, mean, var):
    """7x7 stem conv + BN -> im2col weight (K_pad, cout) bf16 + f32 bias; K order (kh,kw,cin)."""
    kh, kw, cin, cout = w.shape
    scale = gamma / jnp.sqrt(var + _BN_EPS)
    bias = beta - mean * scale
    k_raw = kh * kw * cin
    k_pad = _round_up(k_raw, _LANE)
    w = (w * scale[None, None, None, :]).reshape(k_raw, cout)
    w = jnp.pad(w, ((0, k_pad - k_raw), (0, 0)))
    return {"w": w.astype(jnp.bfloat16),
            "b": bias.reshape(1, cout).astype(jnp.float32),
            "kh": kh, "kw": kw, "k_pad": k_pad}


def init_params(key, image_channels, num_clin_features, out_classes,
                latent_fc_features=64, channel_size_divide=2):
    keys = iter(jax.random.split(key, 64))
    d = channel_size_divide
    p = {}

    c_stem = 64 // d
    p["stem"] = _fold_stem(_init_conv(next(keys), 7, 7, image_channels, c_stem),
                           *_bn_stats(c_stem))

    inplanes = c_stem
    layer_cfg = [(64 // d, 1), (128 // d, 2), (256 // d, 2), (512 // d, 2)]
    layers = []
    for planes, stride in layer_cfg:
        blocks = []
        for b in range(2):                      # resnet18 -> 2 BasicBlocks per layer
            s = stride if b == 0 else 1
            blk = {"stride": s}
            blk["conv1"] = _fold_tap_conv(_init_conv(next(keys), 3, 3, inplanes, planes),
                                          *_bn_stats(planes))
            blk["conv2"] = _fold_tap_conv(_init_conv(next(keys), 3, 3, planes, planes),
                                          *_bn_stats(planes))
            if s != 1 or inplanes != planes:
                blk["down"] = _fold_tap_conv(_init_conv(next(keys), 1, 1, inplanes, planes),
                                             *_bn_stats(planes))
            blocks.append(blk)
            inplanes = planes
        layers.append(blocks)
    p["layers"] = layers

    feat_dim = 512 // d
    f_in = feat_dim + num_clin_features
    w1 = jax.random.normal(next(keys), (f_in, latent_fc_features), jnp.float32) * 0.02
    w2 = jax.random.normal(next(keys), (latent_fc_features, out_classes), jnp.float32) * 0.02
    p["head"] = {"w1f": w1[:feat_dim].astype(jnp.bfloat16),     # features part of fc1
                 "w1c": w1[feat_dim:].astype(jnp.bfloat16),     # clinical-data part of fc1
                 "b1": jnp.zeros((1, latent_fc_features), jnp.float32),
                 "w2": w2.astype(jnp.bfloat16),
                 "b2": jnp.zeros((1, out_classes), jnp.float32)}
    p["meta"] = dict(image_channels=image_channels, c_stem=c_stem, feat_dim=feat_dim,
                     num_clin_features=num_clin_features, out_classes=out_classes)
    return p


# ----------------------------------------------------------------------------
# trace-time plan: static 0/1 tap-selection matrices + const bookkeeping
# ----------------------------------------------------------------------------
def _select_mats(hi, wi, kh, kw, stride, pad):
    """Per-tap row-selection matrices mapping flattened (hi,wi) pixels -> (ho,wo) pixels.
    Returns ho, wo, [(tap_index, S | None-if-identity), ...]; all-padding taps are dropped."""
    ho = (hi + 2 * pad - kh) // stride + 1
    wo = (wi + 2 * pad - kw) // stride + 1
    eye = np.eye(hi * wi, dtype=np.float32)
    taps = []
    for di in range(kh):
        for dj in range(kw):
            s = np.zeros((ho * wo, hi * wi), np.float32)
            for oi in range(ho):
                ii = oi * stride + di - pad
                if not (0 <= ii < hi):
                    continue
                for oj in range(wo):
                    ij = oj * stride + dj - pad
                    if 0 <= ij < wi:
                        s[oi * wo + oj, ii * wi + ij] = 1.0
            if not s.any():
                continue                                   # tap falls entirely in padding
            is_id = (ho * wo == hi * wi) and np.array_equal(s, eye)
            taps.append((di * kw + dj, None if is_id else s))
    return ho, wo, taps


def _build_plan(folded, hs, ws):
    """Builds the op program + the flat list of constant arrays fed to the kernel."""
    consts = []

    def add(a):
        consts.append(a)
        return len(consts) - 1

    flops = 0

    def plan_conv(fc, hi, wi, stride, pad):
        nonlocal flops
        kh, kw = fc["kh"], fc["kw"]
        cin, cout = fc["w"].shape[1], fc["w"].shape[2]
        ho, wo, taps = _select_mats(hi, wi, kh, kw, stride, pad)
        gmats = [s for _, s in taps if s is not None]
        cp = {"w": add(fc["w"]), "b": add(fc["b"]), "s": None, "taps": []}
        if gmats:
            cp["s"] = add(jnp.asarray(np.stack(gmats), dtype=jnp.bfloat16))
        pos = 0
        for t, s in taps:
            if s is None:
                cp["taps"].append(("id", t, 0))
                flops += 2 * (ho * wo) * cin * cout
            else:
                cp["taps"].append(("g", t, pos))
                pos += 1
                flops += 2 * (ho * wo) * (hi * wi) * cin + 2 * (ho * wo) * cin * cout
        return cp, ho, wo

    plan = {}
    meta = folded["meta"]

    # stem (patches are built XLA-side from the HBM input; one MXU matmul in-kernel)
    plan["stem_w"] = add(folded["stem"]["w"])
    plan["stem_b"] = add(folded["stem"]["b"])
    flops += 2 * (hs * ws) * folded["stem"]["w"].shape[0] * folded["stem"]["w"].shape[1]

    # maxpool 3x3/s2/p1 (zero padding is exact: the pooled input is post-ReLU >= 0)
    hp, wp, ptaps = _select_mats(hs, ws, 3, 3, 2, 1)
    pg = [s for _, s in ptaps if s is not None]
    plan["pool_s"] = add(jnp.asarray(np.stack(pg), dtype=jnp.bfloat16)) if pg else None
    plan["pool_taps"] = []
    ppos = 0
    for _, s in ptaps:
        if s is None:
            plan["pool_taps"].append(("id", 0))
        else:
            plan["pool_taps"].append(("g", ppos))
            ppos += 1
    flops += 2 * (hp * wp) * (hs * ws) * meta["c_stem"] * max(len(pg), 1)

    # residual BasicBlocks
    hi, wi = hp, wp
    plan["blocks"] = []
    for layer in folded["layers"]:
        for blk in layer:
            s = blk["stride"]
            bp = {"down": None}
            if "down" in blk:
                bp["down"], _, _ = plan_conv(blk["down"], hi, wi, s, 0)
            bp["conv1"], h1, w1 = plan_conv(blk["conv1"], hi, wi, s, 1)
            bp["conv2"], h2, w2 = plan_conv(blk["conv2"], h1, w1, 1, 1)
            plan["blocks"].append(bp)
            hi, wi = h2, w2
    plan["final_spatial"] = hi * wi

    # head
    hd = folded["head"]
    plan["head"] = {k: add(hd[k]) for k in ("w1f", "w1c", "b1", "w2", "b2")}

    plan["n_consts"] = len(consts)
    plan["flops"] = flops
    return plan, consts


# ----------------------------------------------------------------------------
# the single fused kernel (one batch element per grid step)
# ----------------------------------------------------------------------------
def _make_kernel(plan):
    n_consts = plan["n_consts"]
    inv_spatial = 1.0 / float(plan["final_spatial"])

    def conv(cr, x, cp):
        # sum over kernel taps of (row-gather) @ (per-tap BN-folded weight), f32 accumulate
        w_ref = cr[cp["w"]]
        acc = None
        for kind, t, pos in cp["taps"]:
            if kind == "id":
                g = x
            else:
                g = jnp.dot(cr[cp["s"]][pos], x,
                            preferred_element_type=jnp.float32).astype(jnp.bfloat16)
            term = jnp.dot(g, w_ref[t], preferred_element_type=jnp.float32)
            acc = term if acc is None else acc + term
        return acc + cr[cp["b"]][...]

    def kernel(patches_ref, clin_ref, *rest):
        cr = rest[:n_consts]
        out_ref = rest[n_consts]

        # --- stem: im2col matmul + folded-BN bias + ReLU ---------------------
        x = jnp.dot(patches_ref[...], cr[plan["stem_w"]][...],
                    preferred_element_type=jnp.float32) + cr[plan["stem_b"]][...]
        x = jnp.maximum(x, 0.0).astype(jnp.bfloat16)

        # --- maxpool 3x3 stride 2 (tap gathers + running max) ----------------
        pooled = None
        for kind, pos in plan["pool_taps"]:
            if kind == "id":
                v = x.astype(jnp.float32)
            else:
                v = jnp.dot(cr[plan["pool_s"]][pos], x,
                            preferred_element_type=jnp.float32)
            pooled = v if pooled is None else jnp.maximum(pooled, v)
        x = pooled.astype(jnp.bfloat16)

        # --- 8 BasicBlocks, activations resident in VMEM/vregs ---------------
        for bp in plan["blocks"]:
            if bp["down"] is not None:
                identity = conv(cr, x, bp["down"])          # 1x1 downsample + BN (no relu)
            else:
                identity = x.astype(jnp.float32)
            y = jnp.maximum(conv(cr, x, bp["conv1"]), 0.0).astype(jnp.bfloat16)
            y = conv(cr, y, bp["conv2"])
            x = jnp.maximum(y + identity, 0.0).astype(jnp.bfloat16)

        # --- AdaptiveAvgPool2d((1,1)) -> (1, feat_dim) -----------------------
        feat = jnp.sum(x.astype(jnp.float32), axis=0, keepdims=True) * inv_spatial

        # --- fused MLP head: fc2(relu(fc1(cat[feat, clin]))) -----------------
        hd = plan["head"]
        h = (jnp.dot(feat.astype(jnp.bfloat16), cr[hd["w1f"]][...],
                     preferred_element_type=jnp.float32)
             + jnp.dot(clin_ref[...].astype(jnp.bfloat16), cr[hd["w1c"]][...],
                       preferred_element_type=jnp.float32)
             + cr[hd["b1"]][...])
        h = jnp.maximum(h, 0.0).astype(jnp.bfloat16)
        out_ref[...] = (jnp.dot(h, cr[hd["w2"]][...],
                                preferred_element_type=jnp.float32)
                        + cr[hd["b2"]][...])

    return kernel


# ----------------------------------------------------------------------------
# XLA-side glue: stem im2col (single concat, K padding folded into it)
# ----------------------------------------------------------------------------
def _stem_patches(x, kh, kw, stride, pad, k_pad):
    n, h, w, c = x.shape
    xp = jnp.pad(x, ((0, 0), (pad, pad), (pad, pad), (0, 0)))
    ho = (h + 2 * pad - kh) // stride + 1
    wo = (w + 2 * pad - kw) // stride + 1
    cols = [xp[:, i:i + stride * ho:stride, j:j + stride * wo:stride, :]
            for i in range(kh) for j in range(kw)]
    k_raw = kh * kw * c
    if k_pad > k_raw:
        cols.append(jnp.zeros((n, ho, wo, k_pad - k_raw), x.dtype))
    patches = jnp.concatenate(cols, axis=-1)
    return patches.reshape(n, ho * wo, k_pad), ho, wo


# ----------------------------------------------------------------------------
# forward
# ----------------------------------------------------------------------------
def prediction_model_forward(folded, x_nchw, clin_data):
    """x_nchw: (N, image_channels, H, W); clin_data: (N, num_clin_features)."""
    meta = folded["meta"]
    out_classes = meta["out_classes"]
    n = x_nchw.shape[0]

    x = jnp.transpose(x_nchw, (0, 2, 3, 1)).astype(jnp.bfloat16)     # NHWC, bf16 MXU input
    patches, hs, ws = _stem_patches(x, 7, 7, 2, 3, folded["stem"]["k_pad"])
    plan, consts = _build_plan(folded, hs, ws)

    m_stem, k_pad = hs * ws, folded["stem"]["k_pad"]
    nclin = clin_data.shape[1]
    clin3 = clin_data.reshape(n, 1, nclin).astype(jnp.float32)

    in_specs = [
        pl.BlockSpec((None, m_stem, k_pad), lambda b: (b, 0, 0)),
        pl.BlockSpec((None, 1, nclin), lambda b: (b, 0, 0)),
    ]
    for c in consts:
        in_specs.append(pl.BlockSpec(tuple(c.shape),
                                     lambda b, _nd=c.ndim: (0,) * _nd))

    const_bytes = sum(int(np.prod(c.shape)) * jnp.dtype(c.dtype).itemsize for c in consts)
    io_bytes = n * (m_stem * k_pad * 2 + nclin * 4 + out_classes * 4)
    vmem_limit = int(min(48 * 2 ** 20, const_bytes + 24 * 2 ** 20))

    out = pl.pallas_call(
        _make_kernel(plan),
        out_shape=jax.ShapeDtypeStruct((n, 1, out_classes), jnp.float32),
        grid=(n,),
        in_specs=in_specs,
        out_specs=pl.BlockSpec((None, 1, out_classes), lambda b: (b, 0, 0)),
        compiler_params=pltpu.CompilerParams(
            dimension_semantics=("parallel",),       # batch across v7x's 2 TensorCores
            vmem_limit_bytes=vmem_limit),
        cost_estimate=pl.CostEstimate(flops=n * plan["flops"],
                                      transcendentals=0,
                                      bytes_accessed=const_bytes + io_bytes),
    )(patches, clin3, *consts)
    return out.reshape(n, out_classes)


# ----------------------------------------------------------------------------
# main
# ----------------------------------------------------------------------------
if __name__ == "__main__":
    batch = 2
    image_channels = 4
    spatial = 16
    num_clin_features = 8
    out_classes = 4
    latent_fc_features = 64
    channel_size_divide = 2

    key = jax.random.PRNGKey(0)
    k_params, k_x, k_clin = jax.random.split(key, 3)

    params = init_params(k_params, image_channels, num_clin_features,
                         out_classes, latent_fc_features, channel_size_divide)

    x = jax.random.normal(k_x, (batch, image_channels, spatial, spatial), jnp.float32)
    clin = jax.random.normal(k_clin, (batch, num_clin_features), jnp.float32)

    fwd = jax.jit(functools.partial(prediction_model_forward, params))
    out = jax.block_until_ready(fwd(x, clin))
    assert out.shape == (batch, out_classes)
    assert bool(jnp.all(jnp.isfinite(out)))
    print("KERNEL_OK")
</pallas_src>

<mosaic_0001>
module attributes {stable_mosaic.version = 11 : i64} {
  func.func @kernel(%arg0: i32, %arg1: memref<1x64x256xbf16, #tpu.memory_space<vmem>>, %arg2: memref<1x1x8xf32, #tpu.memory_space<vmem>>, %arg3: memref<256x32xbf16, #tpu.memory_space<vmem>>, %arg4: memref<1x32xf32, #tpu.memory_space<vmem>>, %arg5: memref<9x16x64xbf16, #tpu.memory_space<vmem>>, %arg6: memref<9x32x32xbf16, #tpu.memory_space<vmem>>, %arg7: memref<1x32xf32, #tpu.memory_space<vmem>>, %arg8: memref<8x16x16xbf16, #tpu.memory_space<vmem>>, %arg9: memref<9x32x32xbf16, #tpu.memory_space<vmem>>, %arg10: memref<1x32xf32, #tpu.memory_space<vmem>>, %arg11: memref<8x16x16xbf16, #tpu.memory_space<vmem>>, %arg12: memref<9x32x32xbf16, #tpu.memory_space<vmem>>, %arg13: memref<1x32xf32, #tpu.memory_space<vmem>>, %arg14: memref<8x16x16xbf16, #tpu.memory_space<vmem>>, %arg15: memref<9x32x32xbf16, #tpu.memory_space<vmem>>, %arg16: memref<1x32xf32, #tpu.memory_space<vmem>>, %arg17: memref<8x16x16xbf16, #tpu.memory_space<vmem>>, %arg18: memref<1x32x64xbf16, #tpu.memory_space<vmem>>, %arg19: memref<1x64xf32, #tpu.memory_space<vmem>>, %arg20: memref<1x4x16xbf16, #tpu.memory_space<vmem>>, %arg21: memref<9x32x64xbf16, #tpu.memory_space<vmem>>, %arg22: memref<1x64xf32, #tpu.memory_space<vmem>>, %arg23: memref<9x4x16xbf16, #tpu.memory_space<vmem>>, %arg24: memref<9x64x64xbf16, #tpu.memory_space<vmem>>, %arg25: memref<1x64xf32, #tpu.memory_space<vmem>>, %arg26: memref<8x4x4xbf16, #tpu.memory_space<vmem>>, %arg27: memref<9x64x64xbf16, #tpu.memory_space<vmem>>, %arg28: memref<1x64xf32, #tpu.memory_space<vmem>>, %arg29: memref<8x4x4xbf16, #tpu.memory_space<vmem>>, %arg30: memref<9x64x64xbf16, #tpu.memory_space<vmem>>, %arg31: memref<1x64xf32, #tpu.memory_space<vmem>>, %arg32: memref<8x4x4xbf16, #tpu.memory_space<vmem>>, %arg33: memref<1x64x128xbf16, #tpu.memory_space<vmem>>, %arg34: memref<1x128xf32, #tpu.memory_space<vmem>>, %arg35: memref<1x1x4xbf16, #tpu.memory_space<vmem>>, %arg36: memref<9x64x128xbf16, #tpu.memory_space<vmem>>, %arg37: memref<1x128xf32, #tpu.memory_space<vmem>>, %arg38: memref<4x1x4xbf16, #tpu.memory_space<vmem>>, %arg39: memref<9x128x128xbf16, #tpu.memory_space<vmem>>, %arg40: memref<1x128xf32, #tpu.memory_space<vmem>>, %arg41: memref<9x128x128xbf16, #tpu.memory_space<vmem>>, %arg42: memref<1x128xf32, #tpu.memory_space<vmem>>, %arg43: memref<9x128x128xbf16, #tpu.memory_space<vmem>>, %arg44: memref<1x128xf32, #tpu.memory_space<vmem>>, %arg45: memref<1x128x256xbf16, #tpu.memory_space<vmem>>, %arg46: memref<1x256xf32, #tpu.memory_space<vmem>>, %arg47: memref<9x128x256xbf16, #tpu.memory_space<vmem>>, %arg48: memref<1x256xf32, #tpu.memory_space<vmem>>, %arg49: memref<9x256x256xbf16, #tpu.memory_space<vmem>>, %arg50: memref<1x256xf32, #tpu.memory_space<vmem>>, %arg51: memref<9x256x256xbf16, #tpu.memory_space<vmem>>, %arg52: memref<1x256xf32, #tpu.memory_space<vmem>>, %arg53: memref<9x256x256xbf16, #tpu.memory_space<vmem>>, %arg54: memref<1x256xf32, #tpu.memory_space<vmem>>, %arg55: memref<256x64xbf16, #tpu.memory_space<vmem>>, %arg56: memref<8x64xbf16, #tpu.memory_space<vmem>>, %arg57: memref<1x64xf32, #tpu.memory_space<vmem>>, %arg58: memref<64x4xbf16, #tpu.memory_space<vmem>>, %arg59: memref<1x4xf32, #tpu.memory_space<vmem>>, %arg60: memref<1x1x4xf32, #tpu.memory_space<vmem>>) attributes {dimension_semantics = [#tpu.dimension_semantics<parallel>], iteration_bounds = array<i64: 2>, scalar_prefetch = 0 : i64, scratch_operands = 0 : i64, tpu.core_type = #tpu.core_type<tc>, window_params = [{transform_indices = @transform_0, window_bounds = array<i64: 1, 64, 256>}, {transform_indices = @transform_1, window_bounds = array<i64: 1, 1, 8>}, {pipeline_mode = #tpu.pipeline_mode<synchronous>, transform_indices = @transform_2, window_bounds = array<i64: 256, 32>}, {pipeline_mode = #tpu.pipeline_mode<synchronous>, transform_indices = @transform_3, window_bounds = array<i64: 1, 32>}, {pipeline_mode = #tpu.pipeline_mode<synchronous>, transform_indices = @transform_4, window_bounds = array<i64: 9, 16, 64>}, {pipeline_mode = #tpu.pipeline_mode<synchronous>, transform_indices = @transform_5, window_bounds = array<i64: 9, 32, 32>}, {pipeline_mode = #tpu.pipeline_mode<synchronous>, transform_indices = @transform_6, window_bounds = array<i64: 1, 32>}, {pipeline_mode = #tpu.pipeline_mode<synchronous>, transform_indices = @transform_7, window_bounds = array<i64: 8, 16, 16>}, {pipeline_mode = #tpu.pipeline_mode<synchronous>, transform_indices = @transform_8, window_bounds = array<i64: 9, 32, 32>}, {pipeline_mode = #tpu.pipeline_mode<synchronous>, transform_indices = @transform_9, window_bounds = array<i64: 1, 32>}, {pipeline_mode = #tpu.pipeline_mode<synchronous>, transform_indices = @transform_10, window_bounds = array<i64: 8, 16, 16>}, {pipeline_mode = #tpu.pipeline_mode<synchronous>, transform_indices = @transform_11, window_bounds = array<i64: 9, 32, 32>}, {pipeline_mode = #tpu.pipeline_mode<synchronous>, transform_indices = @transform_12, window_bounds = array<i64: 1, 32>}, {pipeline_mode = #tpu.pipeline_mode<synchronous>, transform_indices = @transform_13, window_bounds = array<i64: 8, 16, 16>}, {pipeline_mode = #tpu.pipeline_mode<synchronous>, transform_indices = @transform_14, window_bounds = array<i64: 9, 32, 32>}, {pipeline_mode = #tpu.pipeline_mode<synchronous>, transform_indices = @transform_15, window_bounds = array<i64: 1, 32>}, {pipeline_mode = #tpu.pipeline_mode<synchronous>, transform_indices = @transform_16, window_bounds = array<i64: 8, 16, 16>}, {pipeline_mode = #tpu.pipeline_mode<synchronous>, transform_indices = @transform_17, window_bounds = array<i64: 1, 32, 64>}, {pipeline_mode = #tpu.pipeline_mode<synchronous>, transform_indices = @transform_18, window_bounds = array<i64: 1, 64>}, {pipeline_mode = #tpu.pipeline_mode<synchronous>, transform_indices = @transform_19, window_bounds = array<i64: 1, 4, 16>}, {pipeline_mode = #tpu.pipeline_mode<synchronous>, transform_indices = @transform_20, window_bounds = array<i64: 9, 32, 64>}, {pipeline_mode = #tpu.pipeline_mode<synchronous>, transform_indices = @transform_21, window_bounds = array<i64: 1, 64>}, {pipeline_mode = #tpu.pipeline_mode<synchronous>, transform_indices = @transform_22, window_bounds = array<i64: 9, 4, 16>}, {pipeline_mode = #tpu.pipeline_mode<synchronous>, transform_indices = @transform_23, window_bounds = array<i64: 9, 64, 64>}, {pipeline_mode = #tpu.pipeline_mode<synchronous>, transform_indices = @transform_24, window_bounds = array<i64: 1, 64>}, {pipeline_mode = #tpu.pipeline_mode<synchronous>, transform_indices = @transform_25, window_bounds = array<i64: 8, 4, 4>}, {pipeline_mode = #tpu.pipeline_mode<synchronous>, transform_indices = @transform_26, window_bounds = array<i64: 9, 64, 64>}, {pipeline_mode = #tpu.pipeline_mode<synchronous>, transform_indices = @transform_27, window_bounds = array<i64: 1, 64>}, {pipeline_mode = #tpu.pipeline_mode<synchronous>, transform_indices = @transform_28, window_bounds = array<i64: 8, 4, 4>}, {pipeline_mode = #tpu.pipeline_mode<synchronous>, transform_indices = @transform_29, window_bounds = array<i64: 9, 64, 64>}, {pipeline_mode = #tpu.pipeline_mode<synchronous>, transform_indices = @transform_30, window_bounds = array<i64: 1, 64>}, {pipeline_mode = #tpu.pipeline_mode<synchronous>, transform_indices = @transform_31, window_bounds = array<i64: 8, 4, 4>}, {pipeline_mode = #tpu.pipeline_mode<synchronous>, transform_indices = @transform_32, window_bounds = array<i64: 1, 64, 128>}, {pipeline_mode = #tpu.pipeline_mode<synchronous>, transform_indices = @transform_33, window_bounds = array<i64: 1, 128>}, {pipeline_mode = #tpu.pipeline_mode<synchronous>, transform_indices = @transform_34, window_bounds = array<i64: 1, 1, 4>}, {pipeline_mode = #tpu.pipeline_mode<synchronous>, transform_indices = @transform_35, window_bounds = array<i64: 9, 64, 128>}, {pipeline_mode = #tpu.pipeline_mode<synchronous>, transform_indices = @transform_36, window_bounds = array<i64: 1, 128>}, {pipeline_mode = #tpu.pipeline_mode<synchronous>, transform_indices = @transform_37, window_bounds = array<i64: 4, 1, 4>}, {pipeline_mode = #tpu.pipeline_mode<synchronous>, transform_indices = @transform_38, window_bounds = array<i64: 9, 128, 128>}, {pipeline_mode = #tpu.pipeline_mode<synchronous>, transform_indices = @transform_39, window_bounds = array<i64: 1, 128>}, {pipeline_mode = #tpu.pipeline_mode<synchronous>, transform_indices = @transform_40, window_bounds = array<i64: 9, 128, 128>}, {pipeline_mode = #tpu.pipeline_mode<synchronous>, transform_indices = @transform_41, window_bounds = array<i64: 1, 128>}, {pipeline_mode = #tpu.pipeline_mode<synchronous>, transform_indices = @transform_42, window_bounds = array<i64: 9, 128, 128>}, {pipeline_mode = #tpu.pipeline_mode<synchronous>, transform_indices = @transform_43, window_bounds = array<i64: 1, 128>}, {pipeline_mode = #tpu.pipeline_mode<synchronous>, transform_indices = @transform_44, window_bounds = array<i64: 1, 128, 256>}, {pipeline_mode = #tpu.pipeline_mode<synchronous>, transform_indices = @transform_45, window_bounds = array<i64: 1, 256>}, {pipeline_mode = #tpu.pipeline_mode<synchronous>, transform_indices = @transform_46, window_bounds = array<i64: 9, 128, 256>}, {pipeline_mode = #tpu.pipeline_mode<synchronous>, transform_indices = @transform_47, window_bounds = array<i64: 1, 256>}, {pipeline_mode = #tpu.pipeline_mode<synchronous>, transform_indices = @transform_48, window_bounds = array<i64: 9, 256, 256>}, {pipeline_mode = #tpu.pipeline_mode<synchronous>, transform_indices = @transform_49, window_bounds = array<i64: 1, 256>}, {pipeline_mode = #tpu.pipeline_mode<synchronous>, transform_indices = @transform_50, window_bounds = array<i64: 9, 256, 256>}, {pipeline_mode = #tpu.pipeline_mode<synchronous>, transform_indices = @transform_51, window_bounds = array<i64: 1, 256>}, {pipeline_mode = #tpu.pipeline_mode<synchronous>, transform_indices = @transform_52, window_bounds = array<i64: 9, 256, 256>}, {pipeline_mode = #tpu.pipeline_mode<synchronous>, transform_indices = @transform_53, window_bounds = array<i64: 1, 256>}, {pipeline_mode = #tpu.pipeline_mode<synchronous>, transform_indices = @transform_54, window_bounds = array<i64: 256, 64>}, {pipeline_mode = #tpu.pipeline_mode<synchronous>, transform_indices = @transform_55, window_bounds = array<i64: 8, 64>}, {pipeline_mode = #tpu.pipeline_mode<synchronous>, transform_indices = @transform_56, window_bounds = array<i64: 1, 64>}, {pipeline_mode = #tpu.pipeline_mode<synchronous>, transform_indices = @transform_57, window_bounds = array<i64: 64, 4>}, {pipeline_mode = #tpu.pipeline_mode<synchronous>, transform_indices = @transform_58, window_bounds = array<i64: 1, 4>}, {transform_indices = @transform_59, window_bounds = array<i64: 1, 1, 4>}]} {
    %c0 = arith.constant 0 : index
    %c0_0 = arith.constant 0 : index
    %c0_1 = arith.constant 0 : index
    %0 = vector.load %arg1[%c0, %c0_0, %c0_1] : memref<1x64x256xbf16, #tpu.memory_space<vmem>>, vector<1x64x256xbf16>
    %1 = vector.shape_cast %0 : vector<1x64x256xbf16> to vector<64x256xbf16>
    %c0_2 = arith.constant 0 : index
    %c0_3 = arith.constant 0 : index
    %2 = vector.load %arg3[%c0_2, %c0_3] : memref<256x32xbf16, #tpu.memory_space<vmem>>, vector<256x32xbf16>
    %cst = arith.constant dense<0.000000e+00> : vector<64x32xf32>
    %3 = tpu.matmul %1, %2, %cst {dimension_numbers = #tpu.dot_dimension_numbers<[1], [0], [0], [1], [0, 0, 1, 1], [], []>} : vector<64x256xbf16>, vector<256x32xbf16>, vector<64x32xf32> -> vector<64x32xf32>
    %c0_4 = arith.constant 0 : index
    %c0_5 = arith.constant 0 : index
    %4 = vector.load %arg4[%c0_4, %c0_5] : memref<1x32xf32, #tpu.memory_space<vmem>>, vector<1x32xf32>
    %5 = vector.broadcast %4 : vector<1x32xf32> to vector<64x32xf32>
    %6 = arith.addf %3, %5 : vector<64x32xf32>
    %cst_6 = arith.constant 0.000000e+00 : f32
    %7 = vector.broadcast %cst_6 : f32 to vector<64x32xf32>
    %8 = arith.maximumf %6, %7 : vector<64x32xf32>
    %9 = arith.truncf %8 : vector<64x32xf32> to vector<64x32xbf16>
    %c0_7 = arith.constant 0 : index
    %c0_8 = arith.constant 0 : index
    %c0_9 = arith.constant 0 : index
    %10 = vector.load %arg5[%c0_7, %c0_8, %c0_9] : memref<9x16x64xbf16, #tpu.memory_space<vmem>>, vector<1x16x64xbf16>
    %11 = vector.shape_cast %10 : vector<1x16x64xbf16> to vector<16x64xbf16>
    %cst_10 = arith.constant dense<0.000000e+00> : vector<16x32xf32>
    %12 = tpu.matmul %11, %9, %cst_10 {dimension_numbers = #tpu.dot_dimension_numbers<[1], [0], [0], [1], [0, 0, 1, 1], [], []>} : vector<16x64xbf16>, vector<64x32xbf16>, vector<16x32xf32> -> vector<16x32xf32>
    %c1 = arith.constant 1 : index
    %c0_11 = arith.constant 0 : index
    %c0_12 = arith.constant 0 : index
    %13 = vector.load %arg5[%c1, %c0_11, %c0_12] : memref<9x16x64xbf16, #tpu.memory_space<vmem>>, vector<1x16x64xbf16>
    %14 = vector.shape_cast %13 : vector<1x16x64xbf16> to vector<16x64xbf16>
    %cst_13 = arith.constant dense<0.000000e+00> : vector<16x32xf32>
    %15 = tpu.matmul %14, %9, %cst_13 {dimension_numbers = #tpu.dot_dimension_numbers<[1], [0], [0], [1], [0, 0, 1, 1], [], []>} : vector<16x64xbf16>, vector<64x32xbf16>, vector<16x32xf32> -> vector<16x32xf32>
    %16 = arith.maximumf %12, %15 : vector<16x32xf32>
    %c2 = arith.constant 2 : index
    %c0_14 = arith.constant 0 : index
    %c0_15 = arith.constant 0 : index
    %17 = vector.load %arg5[%c2, %c0_14, %c0_15] : memref<9x16x64xbf16, #tpu.memory_space<vmem>>, vector<1x16x64xbf16>
    %18 = vector.shape_cast %17 : vector<1x16x64xbf16> to vector<16x64xbf16>
    %cst_16 = arith.constant dense<0.000000e+00> : vector<16x32xf32>
    %19 = tpu.matmul %18, %9, %cst_16 {dimension_numbers = #tpu.dot_dimension_numbers<[1], [0], [0], [1], [0, 0, 1, 1], [], []>} : vector<16x64xbf16>, vector<64x32xbf16>, vector<16x32xf32> -> vector<16x32xf32>
    %20 = arith.maximumf %16, %19 : vector<16x32xf32>
    %c3 = arith.constant 3 : index
    %c0_17 = arith.constant 0 : index
    %c0_18 = arith.constant 0 : index
    %21 = vector.load %arg5[%c3, %c0_17, %c0_18] : memref<9x16x64xbf16, #tpu.memory_space<vmem>>, vector<1x16x64xbf16>
    %22 = vector.shape_cast %21 : vector<1x16x64xbf16> to vector<16x64xbf16>
    %cst_19 = arith.constant dense<0.000000e+00> : vector<16x32xf32>
    %23 = tpu.matmul %22, %9, %cst_19 {dimension_numbers = #tpu.dot_dimension_numbers<[1], [0], [0], [1], [0, 0, 1, 1], [], []>} : vector<16x64xbf16>, vector<64x32xbf16>, vector<16x32xf32> -> vector<16x32xf32>
    %24 = arith.maximumf %20, %23 : vector<16x32xf32>
    %c4 = arith.constant 4 : index
    %c0_20 = arith.constant 0 : index
    %c0_21 = arith.constant 0 : index
    %25 = vector.load %arg5[%c4, %c0_20, %c0_21] : memref<9x16x64xbf16, #tpu.memory_space<vmem>>, vector<1x16x64xbf16>
    %26 = vector.shape_cast %25 : vector<1x16x64xbf16> to vector<16x64xbf16>
    %cst_22 = arith.constant dense<0.000000e+00> : vector<16x32xf32>
    %27 = tpu.matmul %26, %9, %cst_22 {dimension_numbers = #tpu.dot_dimension_numbers<[1], [0], [0], [1], [0, 0, 1, 1], [], []>} : vector<16x64xbf16>, vector<64x32xbf16>, vector<16x32xf32> -> vector<16x32xf32>
    %28 = arith.maximumf %24, %27 : vector<16x32xf32>
    %c5 = arith.constant 5 : index
    %c0_23 = arith.constant 0 : index
    %c0_24 = arith.constant 0 : index
    %29 = vector.load %arg5[%c5, %c0_23, %c0_24] : memref<9x16x64xbf16, #tpu.memory_space<vmem>>, vector<1x16x64xbf16>
    %30 = vector.shape_cast %29 : vector<1x16x64xbf16> to vector<16x64xbf16>
    %cst_25 = arith.constant dense<0.000000e+00> : vector<16x32xf32>
    %31 = tpu.matmul %30, %9, %cst_25 {dimension_numbers = #tpu.dot_dimension_numbers<[1], [0], [0], [1], [0, 0, 1, 1], [], []>} : vector<16x64xbf16>, vector<64x32xbf16>, vector<16x32xf32> -> vector<16x32xf32>
    %32 = arith.maximumf %28, %31 : vector<16x32xf32>
    %c6 = arith.constant 6 : index
    %c0_26 = arith.constant 0 : index
    %c0_27 = arith.constant 0 : index
    %33 = vector.load %arg5[%c6, %c0_26, %c0_27] : memref<9x16x64xbf16, #tpu.memory_space<vmem>>, vector<1x16x64xbf16>
    %34 = vector.shape_cast %33 : vector<1x16x64xbf16> to vector<16x64xbf16>
    %cst_28 = arith.constant dense<0.000000e+00> : vector<16x32xf32>
    %35 = tpu.matmul %34, %9, %cst_28 {dimension_numbers = #tpu.dot_dimension_numbers<[1], [0], [0], [1], [0, 0, 1, 1], [], []>} : vector<16x64xbf16>, vector<64x32xbf16>, vector<16x32xf32> -> vector<16x32xf32>
    %36 = arith.maximumf %32, %35 : vector<16x32xf32>
    %c7 = arith.constant 7 : index
    %c0_29 = arith.constant 0 : index
    %c0_30 = arith.constant 0 : index
    %37 = vector.load %arg5[%c7, %c0_29, %c0_30] : memref<9x16x64xbf16, #tpu.memory_space<vmem>>, vector<1x16x64xbf16>
    %38 = vector.shape_cast %37 : vector<1x16x64xbf16> to vector<16x64xbf16>
    %cst_31 = arith.constant dense<0.000000e+00> : vector<16x32xf32>
    %39 = tpu.matmul %38, %9, %cst_31 {dimension_numbers = #tpu.dot_dimension_numbers<[1], [0], [0], [1], [0, 0, 1, 1], [], []>} : vector<16x64xbf16>, vector<64x32xbf16>, vector<16x32xf32> -> vector<16x32xf32>
    %40 = arith.maximumf %36, %39 : vector<16x32xf32>
    %c8 = arith.constant 8 : index
    %c0_32 = arith.constant 0 : index
    %c0_33 = arith.constant 0 : index
    %41 = vector.load %arg5[%c8, %c0_32, %c0_33] : memref<9x16x64xbf16, #tpu.memory_space<vmem>>, vector<1x16x64xbf16>
    %42 = vector.shape_cast %41 : vector<1x16x64xbf16> to vector<16x64xbf16>
    %cst_34 = arith.constant dense<0.000000e+00> : vector<16x32xf32>
    %43 = tpu.matmul %42, %9, %cst_34 {dimension_numbers = #tpu.dot_dimension_numbers<[1], [0], [0], [1], [0, 0, 1, 1], [], []>} : vector<16x64xbf16>, vector<64x32xbf16>, vector<16x32xf32> -> vector<16x32xf32>
    %44 = arith.maximumf %40, %43 : vector<16x32xf32>
    %45 = arith.truncf %44 : vector<16x32xf32> to vector<16x32xbf16>
    %46 = arith.extf %45 : vector<16x32xbf16> to vector<16x32xf32>
    %c0_35 = arith.constant 0 : index
    %c0_36 = arith.constant 0 : index
    %c0_37 = arith.constant 0 : index
    %47 = vector.load %arg8[%c0_35, %c0_36, %c0_37] : memref<8x16x16xbf16, #tpu.memory_space<vmem>>, vector<1x16x16xbf16>
    %48 = vector.shape_cast %47 : vector<1x16x16xbf16> to vector<16x16xbf16>
    %cst_38 = arith.constant dense<0.000000e+00> : vector<16x32xf32>
    %49 = tpu.matmul %48, %45, %cst_38 {dimension_numbers = #tpu.dot_dimension_numbers<[1], [0], [0], [1], [0, 0, 1, 1], [], []>} : vector<16x16xbf16>, vector<16x32xbf16>, vector<16x32xf32> -> vector<16x32xf32>
    %50 = arith.truncf %49 : vector<16x32xf32> to vector<16x32xbf16>
    %c0_39 = arith.constant 0 : index
    %c0_40 = arith.constant 0 : index
    %c0_41 = arith.constant 0 : index
    %51 = vector.load %arg6[%c0_39, %c0_40, %c0_41] : memref<9x32x32xbf16, #tpu.memory_space<vmem>>, vector<1x32x32xbf16>
    %52 = vector.shape_cast %51 : vector<1x32x32xbf16> to vector<32x32xbf16>
    %cst_42 = arith.constant dense<0.000000e+00> : vector<16x32xf32>
    %53 = tpu.matmul %50, %52, %cst_42 {dimension_numbers = #tpu.dot_dimension_numbers<[1], [0], [0], [1], [0, 0, 1, 1], [], []>} : vector<16x32xbf16>, vector<32x32xbf16>, vector<16x32xf32> -> vector<16x32xf32>
    %c1_43 = arith.constant 1 : index
    %c0_44 = arith.constant 0 : index
    %c0_45 = arith.constant 0 : index
    %54 = vector.load %arg8[%c1_43, %c0_44, %c0_45] : memref<8x16x16xbf16, #tpu.memory_space<vmem>>, vector<1x16x16xbf16>
    %55 = vector.shape_cast %54 : vector<1x16x16xbf16> to vector<16x16xbf16>
    %cst_46 = arith.constant dense<0.000000e+00> : vector<16x32xf32>
    %56 = tpu.matmul %55, %45, %cst_46 {dimension_numbers = #tpu.dot_dimension_numbers<[1], [0], [0], [1], [0, 0, 1, 1], [], []>} : vector<16x16xbf16>, vector<16x32xbf16>, vector<16x32xf32> -> vector<16x32xf32>
    %57 = arith.truncf %56 : vector<16x32xf32> to vector<16x32xbf16>
    %c1_47 = arith.constant 1 : index
    %c0_48 = arith.constant 0 : index
    %c0_49 = arith.constant 0 : index
    %58 = vector.load %arg6[%c1_47, %c0_48, %c0_49] : memref<9x32x32xbf16, #tpu.memory_space<vmem>>, vector<1x32x32xbf16>
    %59 = vector.shape_cast %58 : vector<1x32x32xbf16> to vector<32x32xbf16>
    %cst_50 = arith.constant dense<0.000000e+00> : vector<16x32xf32>
    %60 = tpu.matmul %57, %59, %cst_50 {dimension_numbers = #tpu.dot_dimension_numbers<[1], [0], [0], [1], [0, 0, 1, 1], [], []>} : vector<16x32xbf16>, vector<32x32xbf16>, vector<16x32xf32> -> vector<16x32xf32>
    %61 = arith.addf %53, %60 : vector<16x32xf32>
    %c2_51 = arith.constant 2 : index
    %c0_52 = arith.constant 0 : index
    %c0_53 = arith.constant 0 : index
    %62 = vector.load %arg8[%c2_51, %c0_52, %c0_53] : memref<8x16x16xbf16, #tpu.memory_space<vmem>>, vector<1x16x16xbf16>
    %63 = vector.shape_cast %62 : vector<1x16x16xbf16> to vector<16x16xbf16>
    %cst_54 = arith.constant dense<0.000000e+00> : vector<16x32xf32>
    %64 = tpu.matmul %63, %45, %cst_54 {dimension_numbers = #tpu.dot_dimension_numbers<[1], [0], [0], [1], [0, 0, 1, 1], [], []>} : vector<16x16xbf16>, vector<16x32xbf16>, vector<16x32xf32> -> vector<16x32xf32>
    %65 = arith.truncf %64 : vector<16x32xf32> to vector<16x32xbf16>
    %c2_55 = arith.constant 2 : index
    %c0_56 = arith.constant 0 : index
    %c0_57 = arith.constant 0 : index
    %66 = vector.load %arg6[%c2_55, %c0_56, %c0_57] : memref<9x32x32xbf16, #tpu.memory_space<vmem>>, vector<1x32x32xbf16>
    %67 = vector.shape_cast %66 : vector<1x32x32xbf16> to vector<32x32xbf16>
    %cst_58 = arith.constant dense<0.000000e+00> : vector<16x32xf32>
    %68 = tpu.matmul %65, %67, %cst_58 {dimension_numbers = #tpu.dot_dimension_numbers<[1], [0], [0], [1], [0, 0, 1, 1], [], []>} : vector<16x32xbf16>, vector<32x32xbf16>, vector<16x32xf32> -> vector<16x32xf32>
    %69 = arith.addf %61, %68 : vector<16x32xf32>
    %c3_59 = arith.constant 3 : index
    %c0_60 = arith.constant 0 : index
    %c0_61 = arith.constant 0 : index
    %70 = vector.load %arg8[%c3_59, %c0_60, %c0_61] : memref<8x16x16xbf16, #tpu.memory_space<vmem>>, vector<1x16x16xbf16>
    %71 = vector.shape_cast %70 : vector<1x16x16xbf16> to vector<16x16xbf16>
    %cst_62 = arith.constant dense<0.000000e+00> : vector<16x32xf32>
    %72 = tpu.matmul %71, %45, %cst_62 {dimension_numbers = #tpu.dot_dimension_numbers<[1], [0], [0], [1], [0, 0, 1, 1], [], []>} : vector<16x16xbf16>, vector<16x32xbf16>, vector<16x32xf32> -> vector<16x32xf32>
    %73 = arith.truncf %72 : vector<16x32xf32> to vector<16x32xbf16>
    %c3_63 = arith.constant 3 : index
    %c0_64 = arith.constant 0 : index
    %c0_65 = arith.constant 0 : index
    %74 = vector.load %arg6[%c3_63, %c0_64, %c0_65] : memref<9x32x32xbf16, #tpu.memory_space<vmem>>, vector<1x32x32xbf16>
    %75 = vector.shape_cast %74 : vector<1x32x32xbf16> to vector<32x32xbf16>
    %cst_66 = arith.constant dense<0.000000e+00> : vector<16x32xf32>
    %76 = tpu.matmul %73, %75, %cst_66 {dimension_numbers = #tpu.dot_dimension_numbers<[1], [0], [0], [1], [0, 0, 1, 1], [], []>} : vector<16x32xbf16>, vector<32x32xbf16>, vector<16x32xf32> -> vector<16x32xf32>
    %77 = arith.addf %69, %76 : vector<16x32xf32>
    %c4_67 = arith.constant 4 : index
    %c0_68 = arith.constant 0 : index
    %c0_69 = arith.constant 0 : index
    %78 = vector.load %arg6[%c4_67, %c0_68, %c0_69] : memref<9x32x32xbf16, #tpu.memory_space<vmem>>, vector<1x32x32xbf16>
    %79 = vector.shape_cast %78 : vector<1x32x32xbf16> to vector<32x32xbf16>
    %cst_70 = arith.constant dense<0.000000e+00> : vector<16x32xf32>
    %80 = tpu.matmul %45, %79, %cst_70 {dimension_numbers = #tpu.dot_dimension_numbers<[1], [0], [0], [1], [0, 0, 1, 1], [], []>} : vector<16x32xbf16>, vector<32x32xbf16>, vector<16x32xf32> -> vector<16x32xf32>
    %81 = arith.addf %77, %80 : vector<16x32xf32>
    %c4_71 = arith.constant 4 : index
    %c0_72 = arith.constant 0 : index
    %c0_73 = arith.constant 0 : index
    %82 = vector.load %arg8[%c4_71, %c0_72, %c0_73] : memref<8x16x16xbf16, #tpu.memory_space<vmem>>, vector<1x16x16xbf16>
    %83 = vector.shape_cast %82 : vector<1x16x16xbf16> to vector<16x16xbf16>
    %cst_74 = arith.constant dense<0.000000e+00> : vector<16x32xf32>
    %84 = tpu.matmul %83, %45, %cst_74 {dimension_numbers = #tpu.dot_dimension_numbers<[1], [0], [0], [1], [0, 0, 1, 1], [], []>} : vector<16x16xbf16>, vector<16x32xbf16>, vector<16x32xf32> -> vector<16x32xf32>
    %85 = arith.truncf %84 : vector<16x32xf32> to vector<16x32xbf16>
    %c5_75 = arith.constant 5 : index
    %c0_76 = arith.constant 0 : index
    %c0_77 = arith.constant 0 : index
    %86 = vector.load %arg6[%c5_75, %c0_76, %c0_77] : memref<9x32x32xbf16, #tpu.memory_space<vmem>>, vector<1x32x32xbf16>
    %87 = vector.shape_cast %86 : vector<1x32x32xbf16> to vector<32x32xbf16>
    %cst_78 = arith.constant dense<0.000000e+00> : vector<16x32xf32>
    %88 = tpu.matmul %85, %87, %cst_78 {dimension_numbers = #tpu.dot_dimension_numbers<[1], [0], [0], [1], [0, 0, 1, 1], [], []>} : vector<16x32xbf16>, vector<32x32xbf16>, vector<16x32xf32> -> vector<16x32xf32>
    %89 = arith.addf %81, %88 : vector<16x32xf32>
    %c5_79 = arith.constant 5 : index
    %c0_80 = arith.constant 0 : index
    %c0_81 = arith.constant 0 : index
    %90 = vector.load %arg8[%c5_79, %c0_80, %c0_81] : memref<8x16x16xbf16, #tpu.memory_space<vmem>>, vector<1x16x16xbf16>
    %91 = vector.shape_cast %90 : vector<1x16x16xbf16> to vector<16x16xbf16>
    %cst_82 = arith.constant dense<0.000000e+00> : vector<16x32xf32>
    %92 = tpu.matmul %91, %45, %cst_82 {dimension_numbers = #tpu.dot_dimension_numbers<[1], [0], [0], [1], [0, 0, 1, 1], [], []>} : vector<16x16xbf16>, vector<16x32xbf16>, vector<16x32xf32> -> vector<16x32xf32>
    %93 = arith.truncf %92 : vector<16x32xf32> to vector<16x32xbf16>
    %c6_83 = arith.constant 6 : index
    %c0_84 = arith.constant 0 : index
    %c0_85 = arith.constant 0 : index
    %94 = vector.load %arg6[%c6_83, %c0_84, %c0_85] : memref<9x32x32xbf16, #tpu.memory_space<vmem>>, vector<1x32x32xbf16>
    %95 = vector.shape_cast %94 : vector<1x32x32xbf16> to vector<32x32xbf16>
    %cst_86 = arith.constant dense<0.000000e+00> : vector<16x32xf32>
    %96 = tpu.matmul %93, %95, %cst_86 {dimension_numbers = #tpu.dot_dimension_numbers<[1], [0], [0], [1], [0, 0, 1, 1], [], []>} : vector<16x32xbf16>, vector<32x32xbf16>, vector<16x32xf32> -> vector<16x32xf32>
    %97 = arith.addf %89, %96 : vector<16x32xf32>
    %c6_87 = arith.constant 6 : index
    %c0_88 = arith.constant 0 : index
    %c0_89 = arith.constant 0 : index
    %98 = vector.load %arg8[%c6_87, %c0_88, %c0_89] : memref<8x16x16xbf16, #tpu.memory_space<vmem>>, vector<1x16x16xbf16>
    %99 = vector.shape_cast %98 : vector<1x16x16xbf16> to vector<16x16xbf16>
    %cst_90 = arith.constant dense<0.000000e+00> : vector<16x32xf32>
    %100 = tpu.matmul %99, %45, %cst_90 {dimension_numbers = #tpu.dot_dimension_numbers<[1], [0], [0], [1], [0, 0, 1, 1], [], []>} : vector<16x16xbf16>, vector<16x32xbf16>, vector<16x32xf32> -> vector<16x32xf32>
    %101 = arith.truncf %100 : vector<16x32xf32> to vector<16x32xbf16>
    %c7_91 = arith.constant 7 : index
    %c0_92 = arith.constant 0 : index
    %c0_93 = arith.constant 0 : index
    %102 = vector.load %arg6[%c7_91, %c0_92, %c0_93] : memref<9x32x32xbf16, #tpu.memory_space<vmem>>, vector<1x32x32xbf16>
    %103 = vector.shape_cast %102 : vector<1x32x32xbf16> to vector<32x32xbf16>
    %cst_94 = arith.constant dense<0.000000e+00> : vector<16x32xf32>
    %104 = tpu.matmul %101, %103, %cst_94 {dimension_numbers = #tpu.dot_dimension_numbers<[1], [0], [0], [1], [0, 0, 1, 1], [], []>} : vector<16x32xbf16>, vector<32x32xbf16>, vector<16x32xf32> -> vector<16x32xf32>
    %105 = arith.addf %97, %104 : vector<16x32xf32>
    %c7_95 = arith.constant 7 : index
    %c0_96 = arith.constant 0 : index
    %c0_97 = arith.constant 0 : index
    %106 = vector.load %arg8[%c7_95, %c0_96, %c0_97] : memref<8x16x16xbf16, #tpu.memory_space<vmem>>, vector<1x16x16xbf16>
    %107 = vector.shape_cast %106 : vector<1x16x16xbf16> to vector<16x16xbf16>
    %cst_98 = arith.constant dense<0.000000e+00> : vector<16x32xf32>
    %108 = tpu.matmul %107, %45, %cst_98 {dimension_numbers = #tpu.dot_dimension_numbers<[1], [0], [0], [1], [0, 0, 1, 1], [], []>} : vector<16x16xbf16>, vector<16x32xbf16>, vector<16x32xf32> -> vector<16x32xf32>
    %109 = arith.truncf %108 : vector<16x32xf32> to vector<16x32xbf16>
    %c8_99 = arith.constant 8 : index
    %c0_100 = arith.constant 0 : index
    %c0_101 = arith.constant 0 : index
    %110 = vector.load %arg6[%c8_99, %c0_100, %c0_101] : memref<9x32x32xbf16, #tpu.memory_space<vmem>>, vector<1x32x32xbf16>
    %111 = vector.shape_cast %110 : vector<1x32x32xbf16> to vector<32x32xbf16>
    %cst_102 = arith.constant dense<0.000000e+00> : vector<16x32xf32>
    %112 = tpu.matmul %109, %111, %cst_102 {dimension_numbers = #tpu.dot_dimension_numbers<[1], [0], [0], [1], [0, 0, 1, 1], [], []>} : vector<16x32xbf16>, vector<32x32xbf16>, vector<16x32xf32> -> vector<16x32xf32>
    %113 = arith.addf %105, %112 : vector<16x32xf32>
    %c0_103 = arith.constant 0 : index
    %c0_104 = arith.constant 0 : index
    %114 = vector.load %arg7[%c0_103, %c0_104] : memref<1x32xf32, #tpu.memory_space<vmem>>, vector<1x32xf32>
    %115 = vector.broadcast %114 : vector<1x32xf32> to vector<16x32xf32>
    %116 = arith.addf %113, %115 : vector<16x32xf32>
    %cst_105 = arith.constant 0.000000e+00 : f32
    %117 = vector.broadcast %cst_105 : f32 to vector<16x32xf32>
    %118 = arith.maximumf %116, %117 : vector<16x32xf32>
    %119 = arith.truncf %118 : vector<16x32xf32> to vector<16x32xbf16>
    %c0_106 = arith.constant 0 : index
    %c0_107 = arith.constant 0 : index
    %c0_108 = arith.constant 0 : index
    %120 = vector.load %arg11[%c0_106, %c0_107, %c0_108] : memref<8x16x16xbf16, #tpu.memory_space<vmem>>, vector<1x16x16xbf16>
    %121 = vector.shape_cast %120 : vector<1x16x16xbf16> to vector<16x16xbf16>
    %cst_109 = arith.constant dense<0.000000e+00> : vector<16x32xf32>
    %122 = tpu.matmul %121, %119, %cst_109 {dimension_numbers = #tpu.dot_dimension_numbers<[1], [0], [0], [1], [0, 0, 1, 1], [], []>} : vector<16x16xbf16>, vector<16x32xbf16>, vector<16x32xf32> -> vector<16x32xf32>
    %123 = arith.truncf %122 : vector<16x32xf32> to vector<16x32xbf16>
    %c0_110 = arith.constant 0 : index
    %c0_111 = arith.constant 0 : index
    %c0_112 = arith.constant 0 : index
    %124 = vector.load %arg9[%c0_110, %c0_111, %c0_112] : memref<9x32x32xbf16, #tpu.memory_space<vmem>>, vector<1x32x32xbf16>
    %125 = vector.shape_cast %124 : vector<1x32x32xbf16> to vector<32x32xbf16>
    %cst_113 = arith.constant dense<0.000000e+00> : vector<16x32xf32>
    %126 = tpu.matmul %123, %125, %cst_113 {dimension_numbers = #tpu.dot_dimension_numbers<[1], [0], [0], [1], [0, 0, 1, 1], [], []>} : vector<16x32xbf16>, vector<32x32xbf16>, vector<16x32xf32> -> vector<16x32xf32>
    %c1_114 = arith.constant 1 : index
    %c0_115 = arith.constant 0 : index
    %c0_116 = arith.constant 0 : index
    %127 = vector.load %arg11[%c1_114, %c0_115, %c0_116] : memref<8x16x16xbf16, #tpu.memory_space<vmem>>, vector<1x16x16xbf16>
    %128 = vector.shape_cast %127 : vector<1x16x16xbf16> to vector<16x16xbf16>
    %cst_117 = arith.constant dense<0.000000e+00> : vector<16x32xf32>
    %129 = tpu.matmul %128, %119, %cst_117 {dimension_numbers = #tpu.dot_dimension_numbers<[1], [0], [0], [1], [0, 0, 1, 1], [], []>} : vector<16x16xbf16>, vector<16x32xbf16>, vector<16x32xf32> -> vector<16x32xf32>
    %130 = arith.truncf %129 : vector<16x32xf32> to vector<16x32xbf16>
    %c1_118 = arith.constant 1 : index
    %c0_119 = arith.constant 0 : index
    %c0_120 = arith.constant 0 : index
    %131 = vector.load %arg9[%c1_118, %c0_119, %c0_120] : memref<9x32x32xbf16, #tpu.memory_space<vmem>>, vector<1x32x32xbf16>
    %132 = vector.shape_cast %131 : vector<1x32x32xbf16> to vector<32x32xbf16>
    %cst_121 = arith.constant dense<0.000000e+00> : vector<16x32xf32>
    %133 = tpu.matmul %130, %132, %cst_121 {dimension_numbers = #tpu.dot_dimension_numbers<[1], [0], [0], [1], [0, 0, 1, 1], [], []>} : vector<16x32xbf16>, vector<32x32xbf16>, vector<16x32xf32> -> vector<16x32xf32>
    %134 = arith.addf %126, %133 : vector<16x32xf32>
    %c2_122 = arith.constant 2 : index
    %c0_123 = arith.constant 0 : index
    %c0_124 = arith.constant 0 : index
    %135 = vector.load %arg11[%c2_122, %c0_123, %c0_124] : memref<8x16x16xbf16, #tpu.memory_space<vmem>>, vector<1x16x16xbf16>
    %136 = vector.shape_cast %135 : vector<1x16x16xbf16> to vector<16x16xbf16>
    %cst_125 = arith.constant dense<0.000000e+00> : vector<16x32xf32>
    %137 = tpu.matmul %136, %119, %cst_125 {dimension_numbers = #tpu.dot_dimension_numbers<[1], [0], [0], [1], [0, 0, 1, 1], [], []>} : vector<16x16xbf16>, vector<16x32xbf16>, vector<16x32xf32> -> vector<16x32xf32>
    %138 = arith.truncf %137 : vector<16x32xf32> to vector<16x32xbf16>
    %c2_126 = arith.constant 2 : index
    %c0_127 = arith.constant 0 : index
    %c0_128 = arith.constant 0 : index
    %139 = vector.load %arg9[%c2_126, %c0_127, %c0_128] : memref<9x32x32xbf16, #tpu.memory_space<vmem>>, vector<1x32x32xbf16>
    %140 = vector.shape_cast %139 : vector<1x32x32xbf16> to vector<32x32xbf16>
    %cst_129 = arith.constant dense<0.000000e+00> : vector<16x32xf32>
    %141 = tpu.matmul %138, %140, %cst_129 {dimension_numbers = #tpu.dot_dimension_numbers<[1], [0], [0], [1], [0, 0, 1, 1], [], []>} : vector<16x32xbf16>, vector<32x32xbf16>, vector<16x32xf32> -> vector<16x32xf32>
    %142 = arith.addf %134, %141 : vector<16x32xf32>
    %c3_130 = arith.constant 3 : index
    %c0_131 = arith.constant 0 : index
    %c0_132 = arith.constant 0 : index
    %143 = vector.load %arg11[%c3_130, %c0_131, %c0_132] : memref<8x16x16xbf16, #tpu.memory_space<vmem>>, vector<1x16x16xbf16>
    %144 = vector.shape_cast %143 : vector<1x16x16xbf16> to vector<16x16xbf16>
    %cst_133 = arith.constant dense<0.000000e+00> : vector<16x32xf32>
    %145 = tpu.matmul %144, %119, %cst_133 {dimension_numbers = #tpu.dot_dimension_numbers<[1], [0], [0], [1], [0, 0, 1, 1], [], []>} : vector<16x16xbf16>, vector<16x32xbf16>, vector<16x32xf32> -> vector<16x32xf32>
    %146 = arith.truncf %145 : vector<16x32xf32> to vector<16x32xbf16>
    %c3_134 = arith.constant 3 : index
    %c0_135 = arith.constant 0 : index
    %c0_136 = arith.constant 0 : index
    %147 = vector.load %arg9[%c3_134, %c0_135, %c0_136] : memref<9x32x32xbf16, #tpu.memory_space<vmem>>, vector<1x32x32xbf16>
    %148 = vector.shape_cast %147 : vector<1x32x32xbf16> to vector<32x32xbf16>
    %cst_137 = arith.constant dense<0.000000e+00> : vector<16x32xf32>
    %149 = tpu.matmul %146, %148, %cst_137 {dimension_numbers = #tpu.dot_dimension_numbers<[1], [0], [0], [1], [0, 0, 1, 1], [], []>} : vector<16x32xbf16>, vector<32x32xbf16>, vector<16x32xf32> -> vector<16x32xf32>
    %150 = arith.addf %142, %149 : vector<16x32xf32>
    %c4_138 = arith.constant 4 : index
    %c0_139 = arith.constant 0 : index
    %c0_140 = arith.constant 0 : index
    %151 = vector.load %arg9[%c4_138, %c0_139, %c0_140] : memref<9x32x32xbf16, #tpu.memory_space<vmem>>, vector<1x32x32xbf16>
    %152 = vector.shape_cast %151 : vector<1x32x32xbf16> to vector<32x32xbf16>
    %cst_141 = arith.constant dense<0.000000e+00> : vector<16x32xf32>
    %153 = tpu.matmul %119, %152, %cst_141 {dimension_numbers = #tpu.dot_dimension_numbers<[1], [0], [0], [1], [0, 0, 1, 1], [], []>} : vector<16x32xbf16>, vector<32x32xbf16>, vector<16x32xf32> -> vector<16x32xf32>
    %154 = arith.addf %150, %153 : vector<16x32xf32>
    %c4_142 = arith.constant 4 : index
    %c0_143 = arith.constant 0 : index
    %c0_144 = arith.constant 0 : index
    %155 = vector.load %arg11[%c4_142, %c0_143, %c0_144] : memref<8x16x16xbf16, #tpu.memory_space<vmem>>, vector<1x16x16xbf16>
    %156 = vector.shape_cast %155 : vector<1x16x16xbf16> to vector<16x16xbf16>
    %cst_145 = arith.constant dense<0.000000e+00> : vector<16x32xf32>
    %157 = tpu.matmul %156, %119, %cst_145 {dimension_numbers = #tpu.dot_dimension_numbers<[1], [0], [0], [1], [0, 0, 1, 1], [], []>} : vector<16x16xbf16>, vector<16x32xbf16>, vector<16x32xf32> -> vector<16x32xf32>
    %158 = arith.truncf %157 : vector<16x32xf32> to vector<16x32xbf16>
    %c5_146 = arith.constant 5 : index
    %c0_147 = arith.constant 0 : index
    %c0_148 = arith.constant 0 : index
    %159 = vector.load %arg9[%c5_146, %c0_147, %c0_148] : memref<9x32x32xbf16, #tpu.memory_space<vmem>>, vector<1x32x32xbf16>
    %160 = vector.shape_cast %159 : vector<1x32x32xbf16> to vector<32x32xbf16>
    %cst_149 = arith.constant dense<0.000000e+00> : vector<16x32xf32>
    %161 = tpu.matmul %158, %160, %cst_149 {dimension_numbers = #tpu.dot_dimension_numbers<[1], [0], [0], [1], [0, 0, 1, 1], [], []>} : vector<16x32xbf16>, vector<32x32xbf16>, vector<16x32xf32> -> vector<16x32xf32>
    %162 = arith.addf %154, %161 : vector<16x32xf32>
    %c5_150 = arith.constant 5 : index
    %c0_151 = arith.constant 0 : index
    %c0_152 = arith.constant 0 : index
    %163 = vector.load %arg11[%c5_150, %c0_151, %c0_152] : memref<8x16x16xbf16, #tpu.memory_space<vmem>>, vector<1x16x16xbf16>
    %164 = vector.shape_cast %163 : vector<1x16x16xbf16> to vector<16x16xbf16>
    %cst_153 = arith.constant dense<0.000000e+00> : vector<16x32xf32>
    %165 = tpu.matmul %164, %119, %cst_153 {dimension_numbers = #tpu.dot_dimension_numbers<[1], [0], [0], [1], [0, 0, 1, 1], [], []>} : vector<16x16xbf16>, vector<16x32xbf16>, vector<16x32xf32> -> vector<16x32xf32>
    %166 = arith.truncf %165 : vector<16x32xf32> to vector<16x32xbf16>
    %c6_154 = arith.constant 6 : index
    %c0_155 = arith.constant 0 : index
    %c0_156 = arith.constant 0 : index
    %167 = vector.load %arg9[%c6_154, %c0_155, %c0_156] : memref<9x32x32xbf16, #tpu.memory_space<vmem>>, vector<1x32x32xbf16>
    %168 = vector.shape_cast %167 : vector<1x32x32xbf16> to vector<32x32xbf16>
    %cst_157 = arith.constant dense<0.000000e+00> : vector<16x32xf32>
    %169 = tpu.matmul %166, %168, %cst_157 {dimension_numbers = #tpu.dot_dimension_numbers<[1], [0], [0], [1], [0, 0, 1, 1], [], []>} : vector<16x32xbf16>, vector<32x32xbf16>, vector<16x32xf32> -> vector<16x32xf32>
    %170 = arith.addf %162, %169 : vector<16x32xf32>
    %c6_158 = arith.constant 6 : index
    %c0_159 = arith.constant 0 : index
    %c0_160 = arith.constant 0 : index
    %171 = vector.load %arg11[%c6_158, %c0_159, %c0_160] : memref<8x16x16xbf16, #tpu.memory_space<vmem>>, vector<1x16x16xbf16>
    %172 = vector.shape_cast %171 : vector<1x16x16xbf16> to vector<16x16xbf16>
    %cst_161 = arith.constant dense<0.000000e+00> : vector<16x32xf32>
    %173 = tpu.matmul %172, %119, %cst_161 {dimension_numbers = #tpu.dot_dimension_numbers<[1], [0], [0], [1], [0, 0, 1, 1], [], []>} : vector<16x16xbf16>, vector<16x32xbf16>, vector<16x32xf32> -> vector<16x32xf32>
    %174 = arith.truncf %173 : vector<16x32xf32> to vector<16x32xbf16>
    %c7_162 = arith.constant 7 : index
    %c0_163 = arith.constant 0 : index
    %c0_164 = arith.constant 0 : index
    %175 = vector.load %arg9[%c7_162, %c0_163, %c0_164] : memref<9x32x32xbf16, #tpu.memory_space<vmem>>, vector<1x32x32xbf16>
    %176 = vector.shape_cast %175 : vector<1x32x32xbf16> to vector<32x32xbf16>
    %cst_165 = arith.constant dense<0.000000e+00> : vector<16x32xf32>
    %177 = tpu.matmul %174, %176, %cst_165 {dimension_numbers = #tpu.dot_dimension_numbers<[1], [0], [0], [1], [0, 0, 1, 1], [], []>} : vector<16x32xbf16>, vector<32x32xbf16>, vector<16x32xf32> -> vector<16x32xf32>
    %178 = arith.addf %170, %177 : vector<16x32xf32>
    %c7_166 = arith.constant 7 : index
    %c0_167 = arith.constant 0 : index
    %c0_168 = arith.constant 0 : index
    %179 = vector.load %arg11[%c7_166, %c0_167, %c0_168] : memref<8x16x16xbf16, #tpu.memory_space<vmem>>, vector<1x16x16xbf16>
    %180 = vector.shape_cast %179 : vector<1x16x16xbf16> to vector<16x16xbf16>
    %cst_169 = arith.constant dense<0.000000e+00> : vector<16x32xf32>
    %181 = tpu.matmul %180, %119, %cst_169 {dimension_numbers = #tpu.dot_dimension_numbers<[1], [0], [0], [1], [0, 0, 1, 1], [], []>} : vector<16x16xbf16>, vector<16x32xbf16>, vector<16x32xf32> -> vector<16x32xf32>
    %182 = arith.truncf %181 : vector<16x32xf32> to vector<16x32xbf16>
    %c8_170 = arith.constant 8 : index
    %c0_171 = arith.constant 0 : index
    %c0_172 = arith.constant 0 : index
    %183 = vector.load %arg9[%c8_170, %c0_171, %c0_172] : memref<9x32x32xbf16, #tpu.memory_space<vmem>>, vector<1x32x32xbf16>
    %184 = vector.shape_cast %183 : vector<1x32x32xbf16> to vector<32x32xbf16>
    %cst_173 = arith.constant dense<0.000000e+00> : vector<16x32xf32>
    %185 = tpu.matmul %182, %184, %cst_173 {dimension_numbers = #tpu.dot_dimension_numbers<[1], [0], [0], [1], [0, 0, 1, 1], [], []>} : vector<16x32xbf16>, vector<32x32xbf16>, vector<16x32xf32> -> vector<16x32xf32>
    %186 = arith.addf %178, %185 : vector<16x32xf32>
    %c0_174 = arith.constant 0 : index
    %c0_175 = arith.constant 0 : index
    %187 = vector.load %arg10[%c0_174, %c0_175] : memref<1x32xf32, #tpu.memory_space<vmem>>, vector<1x32xf32>
    %188 = vector.broadcast %187 : vector<1x32xf32> to vector<16x32xf32>
    %189 = arith.addf %186, %188 : vector<16x32xf32>
    %190 = arith.addf %189, %46 : vector<16x32xf32>
    %cst_176 = arith.constant 0.000000e+00 : f32
    %191 = vector.broadcast %cst_176 : f32 to vector<16x32xf32>
    %192 = arith.maximumf %190, %191 : vector<16x32xf32>
    %193 = arith.truncf %192 : vector<16x32xf32> to vector<16x32xbf16>
    %194 = arith.extf %193 : vector<16x32xbf16> to vector<16x32xf32>
    %c0_177 = arith.constant 0 : index
    %c0_178 = arith.constant 0 : index
    %c0_179 = arith.constant 0 : index
    %195 = vector.load %arg14[%c0_177, %c0_178, %c0_179] : memref<8x16x16xbf16, #tpu.memory_space<vmem>>, vector<1x16x16xbf16>
    %196 = vector.shape_cast %195 : vector<1x16x16xbf16> to vector<16x16xbf16>
    %cst_180 = arith.constant dense<0.000000e+00> : vector<16x32xf32>
    %197 = tpu.matmul %196, %193, %cst_180 {dimension_numbers = #tpu.dot_dimension_numbers<[1], [0], [0], [1], [0, 0, 1, 1], [], []>} : vector<16x16xbf16>, vector<16x32xbf16>, vector<16x32xf32> -> vector<16x32xf32>
    %198 = arith.truncf %197 : vector<16x32xf32> to vector<16x32xbf16>
    %c0_181 = arith.constant 0 : index
    %c0_182 = arith.constant 0 : index
    %c0_183 = arith.constant 0 : index
    %199 = vector.load %arg12[%c0_181, %c0_182, %c0_183] : memref<9x32x32xbf16, #tpu.memory_space<vmem>>, vector<1x32x32xbf16>
    %200 = vector.shape_cast %199 : vector<1x32x32xbf16> to vector<32x32xbf16>
    %cst_184 = arith.constant dense<0.000000e+00> : vector<16x32xf32>
    %201 = tpu.matmul %198, %200, %cst_184 {dimension_numbers = #tpu.dot_dimension_numbers<[1], [0], [0], [1], [0, 0, 1, 1], [], []>} : vector<16x32xbf16>, vector<32x32xbf16>, vector<16x32xf32> -> vector<16x32xf32>
    %c1_185 = arith.constant 1 : index
    %c0_186 = arith.constant 0 : index
    %c0_187 = arith.constant 0 : index
    %202 = vector.load %arg14[%c1_185, %c0_186, %c0_187] : memref<8x16x16xbf16, #tpu.memory_space<vmem>>, vector<1x16x16xbf16>
    %203 = vector.shape_cast %202 : vector<1x16x16xbf16> to vector<16x16xbf16>
    %cst_188 = arith.constant dense<0.000000e+00> : vector<16x32xf32>
    %204 = tpu.matmul %203, %193, %cst_188 {dimension_numbers = #tpu.dot_dimension_numbers<[1], [0], [0], [1], [0, 0, 1, 1], [], []>} : vector<16x16xbf16>, vector<16x32xbf16>, vector<16x32xf32> -> vector<16x32xf32>
    %205 = arith.truncf %204 : vector<16x32xf32> to vector<16x32xbf16>
    %c1_189 = arith.constant 1 : index
    %c0_190 = arith.constant 0 : index
    %c0_191 = arith.constant 0 : index
    %206 = vector.load %arg12[%c1_189, %c0_190, %c0_191] : memref<9x32x32xbf16, #tpu.memory_space<vmem>>, vector<1x32x32xbf16>
    %207 = vector.shape_cast %206 : vector<1x32x32xbf16> to vector<32x32xbf16>
    %cst_192 = arith.constant dense<0.000000e+00> : vector<16x32xf32>
    %208 = tpu.matmul %205, %207, %cst_192 {dimension_numbers = #tpu.dot_dimension_numbers<[1], [0], [0], [1], [0, 0, 1, 1], [], []>} : vector<16x32xbf16>, vector<32x32xbf16>, vector<16x32xf32> -> vector<16x32xf32>
    %209 = arith.addf %201, %208 : vector<16x32xf32>
    %c2_193 = arith.constant 2 : index
    %c0_194 = arith.constant 0 : index
    %c0_195 = arith.constant 0 : index
    %210 = vector.load %arg14[%c2_193, %c0_194, %c0_195] : memref<8x16x16xbf16, #tpu.memory_space<vmem>>, vector<1x16x16xbf16>
    %211 = vector.shape_cast %210 : vector<1x16x16xbf16> to vector<16x16xbf16>
    %cst_196 = arith.constant dense<0.000000e+00> : vector<16x32xf32>
    %212 = tpu.matmul %211, %193, %cst_196 {dimension_numbers = #tpu.dot_dimension_numbers<[1], [0], [0], [1], [0, 0, 1, 1], [], []>} : vector<16x16xbf16>, vector<16x32xbf16>, vector<16x32xf32> -> vector<16x32xf32>
    %213 = arith.truncf %212 : vector<16x32xf32> to vector<16x32xbf16>
    %c2_197 = arith.constant 2 : index
    %c0_198 = arith.constant 0 : index
    %c0_199 = arith.constant 0 : index
    %214 = vector.load %arg12[%c2_197, %c0_198, %c0_199] : memref<9x32x32xbf16, #tpu.memory_space<vmem>>, vector<1x32x32xbf16>
    %215 = vector.shape_cast %214 : vector<1x32x32xbf16> to vector<32x32xbf16>
    %cst_200 = arith.constant dense<0.000000e+00> : vector<16x32xf32>
    %216 = tpu.matmul %213, %215, %cst_200 {dimension_numbers = #tpu.dot_dimension_numbers<[1], [0], [0], [1], [0, 0, 1, 1], [], []>} : vector<16x32xbf16>, vector<32x32xbf16>, vector<16x32xf32> -> vector<16x32xf32>
    %217 = arith.addf %209, %216 : vector<16x32xf32>
    %c3_201 = arith.constant 3 : index
    %c0_202 = arith.constant 0 : index
    %c0_203 = arith.constant 0 : index
    %218 = vector.load %arg14[%c3_201, %c0_202, %c0_203] : memref<8x16x16xbf16, #tpu.memory_space<vmem>>, vector<1x16x16xbf16>
    %219 = vector.shape_cast %218 : vector<1x16x16xbf16> to vector<16x16xbf16>
    %cst_204 = arith.constant dense<0.000000e+00> : vector<16x32xf32>
    %220 = tpu.matmul %219, %193, %cst_204 {dimension_numbers = #tpu.dot_dimension_numbers<[1], [0], [0], [1], [0, 0, 1, 1], [], []>} : vector<16x16xbf16>, vector<16x32xbf16>, vector<16x32xf32> -> vector<16x32xf32>
    %221 = arith.truncf %220 : vector<16x32xf32> to vector<16x32xbf16>
    %c3_205 = arith.constant 3 : index
    %c0_206 = arith.constant 0 : index
    %c0_207 = arith.constant 0 : index
    %222 = vector.load %arg12[%c3_205, %c0_206, %c0_207] : memref<9x32x32xbf16, #tpu.memory_space<vmem>>, vector<1x32x32xbf16>
    %223 = vector.shape_cast %222 : vector<1x32x32xbf16> to vector<32x32xbf16>
    %cst_208 = arith.constant dense<0.000000e+00> : vector<16x32xf32>
    %224 = tpu.matmul %221, %223, %cst_208 {dimension_numbers = #tpu.dot_dimension_numbers<[1], [0], [0], [1], [0, 0, 1, 1], [], []>} : vector<16x32xbf16>, vector<32x32xbf16>, vector<16x32xf32> -> vector<16x32xf32>
    %225 = arith.addf %217, %224 : vector<16x32xf32>
    %c4_209 = arith.constant 4 : index
    %c0_210 = arith.constant 0 : index
    %c0_211 = arith.constant 0 : index
    %226 = vector.load %arg12[%c4_209, %c0_210, %c0_211] : memref<9x32x32xbf16, #tpu.memory_space<vmem>>, vector<1x32x32xbf16>
    %227 = vector.shape_cast %226 : vector<1x32x32xbf16> to vector<32x32xbf16>
    %cst_212 = arith.constant dense<0.000000e+00> : vector<16x32xf32>
    %228 = tpu.matmul %193, %227, %cst_212 {dimension_numbers = #tpu.dot_dimension_numbers<[1], [0], [0], [1], [0, 0, 1, 1], [], []>} : vector<16x32xbf16>, vector<32x32xbf16>, vector<16x32xf32> -> vector<16x32xf32>
    %229 = arith.addf %225, %228 : vector<16x32xf32>
    %c4_213 = arith.constant 4 : index
    %c0_214 = arith.constant 0 : index
    %c0_215 = arith.constant 0 : index
    %230 = vector.load %arg14[%c4_213, %c0_214, %c0_215] : memref<8x16x16xbf16, #tpu.memory_space<vmem>>, vector<1x16x16xbf16>
    %231 = vector.shape_cast %230 : vector<1x16x16xbf16> to vector<16x16xbf16>
    %cst_216 = arith.constant dense<0.000000e+00> : vector<16x32xf32>
    %232 = tpu.matmul %231, %193, %cst_216 {dimension_numbers = #tpu.dot_dimension_numbers<[1], [0], [0], [1], [0, 0, 1, 1], [], []>} : vector<16x16xbf16>, vector<16x32xbf16>, vector<16x32xf32> -> vector<16x32xf32>
    %233 = arith.truncf %232 : vector<16x32xf32> to vector<16x32xbf16>
    %c5_217 = arith.constant 5 : index
    %c0_218 = arith.constant 0 : index
    %c0_219 = arith.constant 0 : index
    %234 = vector.load %arg12[%c5_217, %c0_218, %c0_219] : memref<9x32x32xbf16, #tpu.memory_space<vmem>>, vector<1x32x32xbf16>
    %235 = vector.shape_cast %234 : vector<1x32x32xbf16> to vector<32x32xbf16>
    %cst_220 = arith.constant dense<0.000000e+00> : vector<16x32xf32>
    %236 = tpu.matmul %233, %235, %cst_220 {dimension_numbers = #tpu.dot_dimension_numbers<[1], [0], [0], [1], [0, 0, 1, 1], [], []>} : vector<16x32xbf16>, vector<32x32xbf16>, vector<16x32xf32> -> vector<16x32xf32>
    %237 = arith.addf %229, %236 : vector<16x32xf32>
    %c5_221 = arith.constant 5 : index
    %c0_222 = arith.constant 0 : index
    %c0_223 = arith.constant 0 : index
    %238 = vector.load %arg14[%c5_221, %c0_222, %c0_223] : memref<8x16x16xbf16, #tpu.memory_space<vmem>>, vector<1x16x16xbf16>
    %239 = vector.shape_cast %238 : vector<1x16x16xbf16> to vector<16x16xbf16>
    %cst_224 = arith.constant dense<0.000000e+00> : vector<16x32xf32>
    %240 = tpu.matmul %239, %193, %cst_224 {dimension_numbers = #tpu.dot_dimension_numbers<[1], [0], [0], [1], [0, 0, 1, 1], [], []>} : vector<16x16xbf16>, vector<16x32xbf16>, vector<16x32xf32> -> vector<16x32xf32>
    %241 = arith.truncf %240 : vector<16x32xf32> to vector<16x32xbf16>
    %c6_225 = arith.constant 6 : index
    %c0_226 = arith.constant 0 : index
    %c0_227 = arith.constant 0 : index
    %242 = vector.load %arg12[%c6_225, %c0_226, %c0_227] : memref<9x32x32xbf16, #tpu.memory_space<vmem>>, vector<1x32x32xbf16>
    %243 = vector.shape_cast %242 : vector<1x32x32xbf16> to vector<32x32xbf16>
    %cst_228 = arith.constant dense<0.000000e+00> : vector<16x32xf32>
    %244 = tpu.matmul %241, %243, %cst_228 {dimension_numbers = #tpu.dot_dimension_numbers<[1], [0], [0], [1], [0, 0, 1, 1], [], []>} : vector<16x32xbf16>, vector<32x32xbf16>, vector<16x32xf32> -> vector<16x32xf32>
    %245 = arith.addf %237, %244 : vector<16x32xf32>
    %c6_229 = arith.constant 6 : index
    %c0_230 = arith.constant 0 : index
    %c0_231 = arith.constant 0 : index
    %246 = vector.load %arg14[%c6_229, %c0_230, %c0_231] : memref<8x16x16xbf16, #tpu.memory_space<vmem>>, vector<1x16x16xbf16>
    %247 = vector.shape_cast %246 : vector<1x16x16xbf16> to vector<16x16xbf16>
    %cst_232 = arith.constant dense<0.000000e+00> : vector<16x32xf32>
    %248 = tpu.matmul %247, %193, %cst_232 {dimension_numbers = #tpu.dot_dimension_numbers<[1], [0], [0], [1], [0, 0, 1, 1], [], []>} : vector<16x16xbf16>, vector<16x32xbf16>, vector<16x32xf32> -> vector<16x32xf32>
    %249 = arith.truncf %248 : vector<16x32xf32> to vector<16x32xbf16>
    %c7_233 = arith.constant 7 : index
    %c0_234 = arith.constant 0 : index
    %c0_235 = arith.constant 0 : index
    %250 = vector.load %arg12[%c7_233, %c0_234, %c0_235] : memref<9x32x32xbf16, #tpu.memory_space<vmem>>, vector<1x32x32xbf16>
    %251 = vector.shape_cast %250 : vector<1x32x32xbf16> to vector<32x32xbf16>
    %cst_236 = arith.constant dense<0.000000e+00> : vector<16x32xf32>
    %252 = tpu.matmul %249, %251, %cst_236 {dimension_numbers = #tpu.dot_dimension_numbers<[1], [0], [0], [1], [0, 0, 1, 1], [], []>} : vector<16x32xbf16>, vector<32x32xbf16>, vector<16x32xf32> -> vector<16x32xf32>
    %253 = arith.addf %245, %252 : vector<16x32xf32>
    %c7_237 = arith.constant 7 : index
    %c0_238 = arith.constant 0 : index
    %c0_239 = arith.constant 0 : index
    %254 = vector.load %arg14[%c7_237, %c0_238, %c0_239] : memref<8x16x16xbf16, #tpu.memory_space<vmem>>, vector<1x16x16xbf16>
    %255 = vector.shape_cast %254 : vector<1x16x16xbf16> to vector<16x16xbf16>
    %cst_240 = arith.constant dense<0.000000e+00> : vector<16x32xf32>
    %256 = tpu.matmul %255, %193, %cst_240 {dimension_numbers = #tpu.dot_dimension_numbers<[1], [0], [0], [1], [0, 0, 1, 1], [], []>} : vector<16x16xbf16>, vector<16x32xbf16>, vector<16x32xf32> -> vector<16x32xf32>
    %257 = arith.truncf %256 : vector<16x32xf32> to vector<16x32xbf16>
    %c8_241 = arith.constant 8 : index
    %c0_242 = arith.constant 0 : index
    %c0_243 = arith.constant 0 : index
    %258 = vector.load %arg12[%c8_241, %c0_242, %c0_243] : memref<9x32x32xbf16, #tpu.memory_space<vmem>>, vector<1x32x32xbf16>
    %259 = vector.shape_cast %258 : vector<1x32x32xbf16> to vector<32x32xbf16>
    %cst_244 = arith.constant dense<0.000000e+00> : vector<16x32xf32>
    %260 = tpu.matmul %257, %259, %cst_244 {dimension_numbers = #tpu.dot_dimension_numbers<[1], [0], [0], [1], [0, 0, 1, 1], [], []>} : vector<16x32xbf16>, vector<32x32xbf16>, vector<16x32xf32> -> vector<16x32xf32>
    %261 = arith.addf %253, %260 : vector<16x32xf32>
    %c0_245 = arith.constant 0 : index
    %c0_246 = arith.constant 0 : index
    %262 = vector.load %arg13[%c0_245, %c0_246] : memref<1x32xf32, #tpu.memory_space<vmem>>, vector<1x32xf32>
    %263 = vector.broadcast %262 : vector<1x32xf32> to vector<16x32xf32>
    %264 = arith.addf %261, %263 : vector<16x32xf32>
    %cst_247 = arith.constant 0.000000e+00 : f32
    %265 = vector.broadcast %cst_247 : f32 to vector<16x32xf32>
    %266 = arith.maximumf %264, %265 : vector<16x32xf32>
    %267 = arith.truncf %266 : vector<16x32xf32> to vector<16x32xbf16>
    %c0_248 = arith.constant 0 : index
    %c0_249 = arith.constant 0 : index
    %c0_250 = arith.constant 0 : index
    %268 = vector.load %arg17[%c0_248, %c0_249, %c0_250] : memref<8x16x16xbf16, #tpu.memory_space<vmem>>, vector<1x16x16xbf16>
    %269 = vector.shape_cast %268 : vector<1x16x16xbf16> to vector<16x16xbf16>
    %cst_251 = arith.constant dense<0.000000e+00> : vector<16x32xf32>
    %270 = tpu.matmul %269, %267, %cst_251 {dimension_numbers = #tpu.dot_dimension_numbers<[1], [0], [0], [1], [0, 0, 1, 1], [], []>} : vector<16x16xbf16>, vector<16x32xbf16>, vector<16x32xf32> -> vector<16x32xf32>
    %271 = arith.truncf %270 : vector<16x32xf32> to vector<16x32xbf16>
    %c0_252 = arith.constant 0 : index
    %c0_253 = arith.constant 0 : index
    %c0_254 = arith.constant 0 : index
    %272 = vector.load %arg15[%c0_252, %c0_253, %c0_254] : memref<9x32x32xbf16, #tpu.memory_space<vmem>>, vector<1x32x32xbf16>
    %273 = vector.shape_cast %272 : vector<1x32x32xbf16> to vector<32x32xbf16>
    %cst_255 = arith.constant dense<0.000000e+00> : vector<16x32xf32>
    %274 = tpu.matmul %271, %273, %cst_255 {dimension_numbers = #tpu.dot_dimension_numbers<[1], [0], [0], [1], [0, 0, 1, 1], [], []>} : vector<16x32xbf16>, vector<32x32xbf16>, vector<16x32xf32> -> vector<16x32xf32>
    %c1_256 = arith.constant 1 : index
    %c0_257 = arith.constant 0 : index
    %c0_258 = arith.constant 0 : index
    %275 = vector.load %arg17[%c1_256, %c0_257, %c0_258] : memref<8x16x16xbf16, #tpu.memory_space<vmem>>, vector<1x16x16xbf16>
    %276 = vector.shape_cast %275 : vector<1x16x16xbf16> to vector<16x16xbf16>
    %cst_259 = arith.constant dense<0.000000e+00> : vector<16x32xf32>
    %277 = tpu.matmul %276, %267, %cst_259 {dimension_numbers = #tpu.dot_dimension_numbers<[1], [0], [0], [1], [0, 0, 1, 1], [], []>} : vector<16x16xbf16>, vector<16x32xbf16>, vector<16x32xf32> -> vector<16x32xf32>
    %278 = arith.truncf %277 : vector<16x32xf32> to vector<16x32xbf16>
    %c1_260 = arith.constant 1 : index
    %c0_261 = arith.constant 0 : index
    %c0_262 = arith.constant 0 : index
    %279 = vector.load %arg15[%c1_260, %c0_261, %c0_262] : memref<9x32x32xbf16, #tpu.memory_space<vmem>>, vector<1x32x32xbf16>
    %280 = vector.shape_cast %279 : vector<1x32x32xbf16> to vector<32x32xbf16>
    %cst_263 = arith.constant dense<0.000000e+00> : vector<16x32xf32>
    %281 = tpu.matmul %278, %280, %cst_263 {dimension_numbers = #tpu.dot_dimension_numbers<[1], [0], [0], [1], [0, 0, 1, 1], [], []>} : vector<16x32xbf16>, vector<32x32xbf16>, vector<16x32xf32> -> vector<16x32xf32>
    %282 = arith.addf %274, %281 : vector<16x32xf32>
    %c2_264 = arith.constant 2 : index
    %c0_265 = arith.constant 0 : index
    %c0_266 = arith.constant 0 : index
    %283 = vector.load %arg17[%c2_264, %c0_265, %c0_266] : memref<8x16x16xbf16, #tpu.memory_space<vmem>>, vector<1x16x16xbf16>
    %284 = vector.shape_cast %283 : vector<1x16x16xbf16> to vector<16x16xbf16>
    %cst_267 = arith.constant dense<0.000000e+00> : vector<16x32xf32>
    %285 = tpu.matmul %284, %267, %cst_267 {dimension_numbers = #tpu.dot_dimension_numbers<[1], [0], [0], [1], [0, 0, 1, 1], [], []>} : vector<16x16xbf16>, vector<16x32xbf16>, vector<16x32xf32> -> vector<16x32xf32>
    %286 = arith.truncf %285 : vector<16x32xf32> to vector<16x32xbf16>
    %c2_268 = arith.constant 2 : index
    %c0_269 = arith.constant 0 : index
    %c0_270 = arith.constant 0 : index
    %287 = vector.load %arg15[%c2_268, %c0_269, %c0_270] : memref<9x32x32xbf16, #tpu.memory_space<vmem>>, vector<1x32x32xbf16>
    %288 = vector.shape_cast %287 : vector<1x32x32xbf16> to vector<32x32xbf16>
    %cst_271 = arith.constant dense<0.000000e+00> : vector<16x32xf32>
    %289 = tpu.matmul %286, %288, %cst_271 {dimension_numbers = #tpu.dot_dimension_numbers<[1], [0], [0], [1], [0, 0, 1, 1], [], []>} : vector<16x32xbf16>, vector<32x32xbf16>, vector<16x32xf32> -> vector<16x32xf32>
    %290 = arith.addf %282, %289 : vector<16x32xf32>
    %c3_272 = arith.constant 3 : index
    %c0_273 = arith.constant 0 : index
    %c0_274 = arith.constant 0 : index
    %291 = vector.load %arg17[%c3_272, %c0_273, %c0_274] : memref<8x16x16xbf16, #tpu.memory_space<vmem>>, vector<1x16x16xbf16>
    %292 = vector.shape_cast %291 : vector<1x16x16xbf16> to vector<16x16xbf16>
    %cst_275 = arith.constant dense<0.000000e+00> : vector<16x32xf32>
    %293 = tpu.matmul %292, %267, %cst_275 {dimension_numbers = #tpu.dot_dimension_numbers<[1], [0], [0], [1], [0, 0, 1, 1], [], []>} : vector<16x16xbf16>, vector<16x32xbf16>, vector<16x32xf32> -> vector<16x32xf32>
    %294 = arith.truncf %293 : vector<16x32xf32> to vector<16x32xbf16>
    %c3_276 = arith.constant 3 : index
    %c0_277 = arith.constant 0 : index
    %c0_278 = arith.constant 0 : index
    %295 = vector.load %arg15[%c3_276, %c0_277, %c0_278] : memref<9x32x32xbf16, #tpu.memory_space<vmem>>, vector<1x32x32xbf16>
    %296 = vector.shape_cast %295 : vector<1x32x32xbf16> to vector<32x32xbf16>
    %cst_279 = arith.constant dense<0.000000e+00> : vector<16x32xf32>
    %297 = tpu.matmul %294, %296, %cst_279 {dimension_numbers = #tpu.dot_dimension_numbers<[1], [0], [0], [1], [0, 0, 1, 1], [], []>} : vector<16x32xbf16>, vector<32x32xbf16>, vector<16x32xf32> -> vector<16x32xf32>
    %298 = arith.addf %290, %297 : vector<16x32xf32>
    %c4_280 = arith.constant 4 : index
    %c0_281 = arith.constant 0 : index
    %c0_282 = arith.constant 0 : index
    %299 = vector.load %arg15[%c4_280, %c0_281, %c0_282] : memref<9x32x32xbf16, #tpu.memory_space<vmem>>, vector<1x32x32xbf16>
    %300 = vector.shape_cast %299 : vector<1x32x32xbf16> to vector<32x32xbf16>
    %cst_283 = arith.constant dense<0.000000e+00> : vector<16x32xf32>
    %301 = tpu.matmul %267, %300, %cst_283 {dimension_numbers = #tpu.dot_dimension_numbers<[1], [0], [0], [1], [0, 0, 1, 1], [], []>} : vector<16x32xbf16>, vector<32x32xbf16>, vector<16x32xf32> -> vector<16x32xf32>
    %302 = arith.addf %298, %301 : vector<16x32xf32>
    %c4_284 = arith.constant 4 : index
    %c0_285 = arith.constant 0 : index
    %c0_286 = arith.constant 0 : index
    %303 = vector.load %arg17[%c4_284, %c0_285, %c0_286] : memref<8x16x16xbf16, #tpu.memory_space<vmem>>, vector<1x16x16xbf16>
    %304 = vector.shape_cast %303 : vector<1x16x16xbf16> to vector<16x16xbf16>
    %cst_287 = arith.constant dense<0.000000e+00> : vector<16x32xf32>
    %305 = tpu.matmul %304, %267, %cst_287 {dimension_numbers = #tpu.dot_dimension_numbers<[1], [0], [0], [1], [0, 0, 1, 1], [], []>} : vector<16x16xbf16>, vector<16x32xbf16>, vector<16x32xf32> -> vector<16x32xf32>
    %306 = arith.truncf %305 : vector<16x32xf32> to vector<16x32xbf16>
    %c5_288 = arith.constant 5 : index
    %c0_289 = arith.constant 0 : index
    %c0_290 = arith.constant 0 : index
    %307 = vector.load %arg15[%c5_288, %c0_289, %c0_290] : memref<9x32x32xbf16, #tpu.memory_space<vmem>>, vector<1x32x32xbf16>
    %308 = vector.shape_cast %307 : vector<1x32x32xbf16> to vector<32x32xbf16>
    %cst_291 = arith.constant dense<0.000000e+00> : vector<16x32xf32>
    %309 = tpu.matmul %306, %308, %cst_291 {dimension_numbers = #tpu.dot_dimension_numbers<[1], [0], [0], [1], [0, 0, 1, 1], [], []>} : vector<16x32xbf16>, vector<32x32xbf16>, vector<16x32xf32> -> vector<16x32xf32>
    %310 = arith.addf %302, %309 : vector<16x32xf32>
    %c5_292 = arith.constant 5 : index
    %c0_293 = arith.constant 0 : index
    %c0_294 = arith.constant 0 : index
    %311 = vector.load %arg17[%c5_292, %c0_293, %c0_294] : memref<8x16x16xbf16, #tpu.memory_space<vmem>>, vector<1x16x16xbf16>
    %312 = vector.shape_cast %311 : vector<1x16x16xbf16> to vector<16x16xbf16>
    %cst_295 = arith.constant dense<0.000000e+00> : vector<16x32xf32>
    %313 = tpu.matmul %312, %267, %cst_295 {dimension_numbers = #tpu.dot_dimension_numbers<[1], [0], [0], [1], [0, 0, 1, 1], [], []>} : vector<16x16xbf16>, vector<16x32xbf16>, vector<16x32xf32> -> vector<16x32xf32>
    %314 = arith.truncf %313 : vector<16x32xf32> to vector<16x32xbf16>
    %c6_296 = arith.constant 6 : index
    %c0_297 = arith.constant 0 : index
    %c0_298 = arith.constant 0 : index
    %315 = vector.load %arg15[%c6_296, %c0_297, %c0_298] : memref<9x32x32xbf16, #tpu.memory_space<vmem>>, vector<1x32x32xbf16>
    %316 = vector.shape_cast %315 : vector<1x32x32xbf16> to vector<32x32xbf16>
    %cst_299 = arith.constant dense<0.000000e+00> : vector<16x32xf32>
    %317 = tpu.matmul %314, %316, %cst_299 {dimension_numbers = #tpu.dot_dimension_numbers<[1], [0], [0], [1], [0, 0, 1, 1], [], []>} : vector<16x32xbf16>, vector<32x32xbf16>, vector<16x32xf32> -> vector<16x32xf32>
    %318 = arith.addf %310, %317 : vector<16x32xf32>
    %c6_300 = arith.constant 6 : index
    %c0_301 = arith.constant 0 : index
    %c0_302 = arith.constant 0 : index
    %319 = vector.load %arg17[%c6_300, %c0_301, %c0_302] : memref<8x16x16xbf16, #tpu.memory_space<vmem>>, vector<1x16x16xbf16>
    %320 = vector.shape_cast %319 : vector<1x16x16xbf16> to vector<16x16xbf16>
    %cst_303 = arith.constant dense<0.000000e+00> : vector<16x32xf32>
    %321 = tpu.matmul %320, %267, %cst_303 {dimension_numbers = #tpu.dot_dimension_numbers<[1], [0], [0], [1], [0, 0, 1, 1], [], []>} : vector<16x16xbf16>, vector<16x32xbf16>, vector<16x32xf32> -> vector<16x32xf32>
    %322 = arith.truncf %321 : vector<16x32xf32> to vector<16x32xbf16>
    %c7_304 = arith.constant 7 : index
    %c0_305 = arith.constant 0 : index
    %c0_306 = arith.constant 0 : index
    %323 = vector.load %arg15[%c7_304, %c0_305, %c0_306] : memref<9x32x32xbf16, #tpu.memory_space<vmem>>, vector<1x32x32xbf16>
    %324 = vector.shape_cast %323 : vector<1x32x32xbf16> to vector<32x32xbf16>
    %cst_307 = arith.constant dense<0.000000e+00> : vector<16x32xf32>
    %325 = tpu.matmul %322, %324, %cst_307 {dimension_numbers = #tpu.dot_dimension_numbers<[1], [0], [0], [1], [0, 0, 1, 1], [], []>} : vector<16x32xbf16>, vector<32x32xbf16>, vector<16x32xf32> -> vector<16x32xf32>
    %326 = arith.addf %318, %325 : vector<16x32xf32>
    %c7_308 = arith.constant 7 : index
    %c0_309 = arith.constant 0 : index
    %c0_310 = arith.constant 0 : index
    %327 = vector.load %arg17[%c7_308, %c0_309, %c0_310] : memref<8x16x16xbf16, #tpu.memory_space<vmem>>, vector<1x16x16xbf16>
    %328 = vector.shape_cast %327 : vector<1x16x16xbf16> to vector<16x16xbf16>
    %cst_311 = arith.constant dense<0.000000e+00> : vector<16x32xf32>
    %329 = tpu.matmul %328, %267, %cst_311 {dimension_numbers = #tpu.dot_dimension_numbers<[1], [0], [0], [1], [0, 0, 1, 1], [], []>} : vector<16x16xbf16>, vector<16x32xbf16>, vector<16x32xf32> -> vector<16x32xf32>
    %330 = arith.truncf %329 : vector<16x32xf32> to vector<16x32xbf16>
    %c8_312 = arith.constant 8 : index
    %c0_313 = arith.constant 0 : index
    %c0_314 = arith.constant 0 : index
    %331 = vector.load %arg15[%c8_312, %c0_313, %c0_314] : memref<9x32x32xbf16, #tpu.memory_space<vmem>>, vector<1x32x32xbf16>
    %332 = vector.shape_cast %331 : vector<1x32x32xbf16> to vector<32x32xbf16>
    %cst_315 = arith.constant dense<0.000000e+00> : vector<16x32xf32>
    %333 = tpu.matmul %330, %332, %cst_315 {dimension_numbers = #tpu.dot_dimension_numbers<[1], [0], [0], [1], [0, 0, 1, 1], [], []>} : vector<16x32xbf16>, vector<32x32xbf16>, vector<16x32xf32> -> vector<16x32xf32>
    %334 = arith.addf %326, %333 : vector<16x32xf32>
    %c0_316 = arith.constant 0 : index
    %c0_317 = arith.constant 0 : index
    %335 = vector.load %arg16[%c0_316, %c0_317] : memref<1x32xf32, #tpu.memory_space<vmem>>, vector<1x32xf32>
    %336 = vector.broadcast %335 : vector<1x32xf32> to vector<16x32xf32>
    %337 = arith.addf %334, %336 : vector<16x32xf32>
    %338 = arith.addf %337, %194 : vector<16x32xf32>
    %cst_318 = arith.constant 0.000000e+00 : f32
    %339 = vector.broadcast %cst_318 : f32 to vector<16x32xf32>
    %340 = arith.maximumf %338, %339 : vector<16x32xf32>
    %341 = arith.truncf %340 : vector<16x32xf32> to vector<16x32xbf16>
    %c0_319 = arith.constant 0 : index
    %c0_320 = arith.constant 0 : index
    %c0_321 = arith.constant 0 : index
    %342 = vector.load %arg20[%c0_319, %c0_320, %c0_321] : memref<1x4x16xbf16, #tpu.memory_space<vmem>>, vector<1x4x16xbf16>
    %343 = vector.shape_cast %342 : vector<1x4x16xbf16> to vector<4x16xbf16>
    %cst_322 = arith.constant dense<0.000000e+00> : vector<4x32xf32>
    %344 = tpu.matmul %343, %341, %cst_322 {dimension_numbers = #tpu.dot_dimension_numbers<[1], [0], [0], [1], [0, 0, 1, 1], [], []>} : vector<4x16xbf16>, vector<16x32xbf16>, vector<4x32xf32> -> vector<4x32xf32>
    %345 = arith.truncf %344 : vector<4x32xf32> to vector<4x32xbf16>
    %c0_323 = arith.constant 0 : index
    %c0_324 = arith.constant 0 : index
    %c0_325 = arith.constant 0 : index
    %346 = vector.load %arg18[%c0_323, %c0_324, %c0_325] : memref<1x32x64xbf16, #tpu.memory_space<vmem>>, vector<1x32x64xbf16>
    %347 = vector.shape_cast %346 : vector<1x32x64xbf16> to vector<32x64xbf16>
    %cst_326 = arith.constant dense<0.000000e+00> : vector<4x64xf32>
    %348 = tpu.matmul %345, %347, %cst_326 {dimension_numbers = #tpu.dot_dimension_numbers<[1], [0], [0], [1], [0, 0, 1, 1], [], []>} : vector<4x32xbf16>, vector<32x64xbf16>, vector<4x64xf32> -> vector<4x64xf32>
    %c0_327 = arith.constant 0 : index
    %c0_328 = arith.constant 0 : index
    %349 = vector.load %arg19[%c0_327, %c0_328] : memref<1x64xf32, #tpu.memory_space<vmem>>, vector<1x64xf32>
    %350 = vector.broadcast %349 : vector<1x64xf32> to vector<4x64xf32>
    %351 = arith.addf %348, %350 : vector<4x64xf32>
    %c0_329 = arith.constant 0 : index
    %c0_330 = arith.constant 0 : index
    %c0_331 = arith.constant 0 : index
    %352 = vector.load %arg23[%c0_329, %c0_330, %c0_331] : memref<9x4x16xbf16, #tpu.memory_space<vmem>>, vector<1x4x16xbf16>
    %353 = vector.shape_cast %352 : vector<1x4x16xbf16> to vector<4x16xbf16>
    %cst_332 = arith.constant dense<0.000000e+00> : vector<4x32xf32>
    %354 = tpu.matmul %353, %341, %cst_332 {dimension_numbers = #tpu.dot_dimension_numbers<[1], [0], [0], [1], [0, 0, 1, 1], [], []>} : vector<4x16xbf16>, vector<16x32xbf16>, vector<4x32xf32> -> vector<4x32xf32>
    %355 = arith.truncf %354 : vector<4x32xf32> to vector<4x32xbf16>
    %c0_333 = arith.constant 0 : index
    %c0_334 = arith.constant 0 : index
    %c0_335 = arith.constant 0 : index
    %356 = vector.load %arg21[%c0_333, %c0_334, %c0_335] : memref<9x32x64xbf16, #tpu.memory_space<vmem>>, vector<1x32x64xbf16>
    %357 = vector.shape_cast %356 : vector<1x32x64xbf16> to vector<32x64xbf16>
    %cst_336 = arith.constant dense<0.000000e+00> : vector<4x64xf32>
    %358 = tpu.matmul %355, %357, %cst_336 {dimension_numbers = #tpu.dot_dimension_numbers<[1], [0], [0], [1], [0, 0, 1, 1], [], []>} : vector<4x32xbf16>, vector<32x64xbf16>, vector<4x64xf32> -> vector<4x64xf32>
    %c1_337 = arith.constant 1 : index
    %c0_338 = arith.constant 0 : index
    %c0_339 = arith.constant 0 : index
    %359 = vector.load %arg23[%c1_337, %c0_338, %c0_339] : memref<9x4x16xbf16, #tpu.memory_space<vmem>>, vector<1x4x16xbf16>
    %360 = vector.shape_cast %359 : vector<1x4x16xbf16> to vector<4x16xbf16>
    %cst_340 = arith.constant dense<0.000000e+00> : vector<4x32xf32>
    %361 = tpu.matmul %360, %341, %cst_340 {dimension_numbers = #tpu.dot_dimension_numbers<[1], [0], [0], [1], [0, 0, 1, 1], [], []>} : vector<4x16xbf16>, vector<16x32xbf16>, vector<4x32xf32> -> vector<4x32xf32>
    %362 = arith.truncf %361 : vector<4x32xf32> to vector<4x32xbf16>
    %c1_341 = arith.constant 1 : index
    %c0_342 = arith.constant 0 : index
    %c0_343 = arith.constant 0 : index
    %363 = vector.load %arg21[%c1_341, %c0_342, %c0_343] : memref<9x32x64xbf16, #tpu.memory_space<vmem>>, vector<1x32x64xbf16>
    %364 = vector.shape_cast %363 : vector<1x32x64xbf16> to vector<32x64xbf16>
    %cst_344 = arith.constant dense<0.000000e+00> : vector<4x64xf32>
    %365 = tpu.matmul %362, %364, %cst_344 {dimension_numbers = #tpu.dot_dimension_numbers<[1], [0], [0], [1], [0, 0, 1, 1], [], []>} : vector<4x32xbf16>, vector<32x64xbf16>, vector<4x64xf32> -> vector<4x64xf32>
    %366 = arith.addf %358, %365 : vector<4x64xf32>
    %c2_345 = arith.constant 2 : index
    %c0_346 = arith.constant 0 : index
    %c0_347 = arith.constant 0 : index
    %367 = vector.load %arg23[%c2_345, %c0_346, %c0_347] : memref<9x4x16xbf16, #tpu.memory_space<vmem>>, vector<1x4x16xbf16>
    %368 = vector.shape_cast %367 : vector<1x4x16xbf16> to vector<4x16xbf16>
    %cst_348 = arith.constant dense<0.000000e+00> : vector<4x32xf32>
    %369 = tpu.matmul %368, %341, %cst_348 {dimension_numbers = #tpu.dot_dimension_numbers<[1], [0], [0], [1], [0, 0, 1, 1], [], []>} : vector<4x16xbf16>, vector<16x32xbf16>, vector<4x32xf32> -> vector<4x32xf32>
    %370 = arith.truncf %369 : vector<4x32xf32> to vector<4x32xbf16>
    %c2_349 = arith.constant 2 : index
    %c0_350 = arith.constant 0 : index
    %c0_351 = arith.constant 0 : index
    %371 = vector.load %arg21[%c2_349, %c0_350, %c0_351] : memref<9x32x64xbf16, #tpu.memory_space<vmem>>, vector<1x32x64xbf16>
    %372 = vector.shape_cast %371 : vector<1x32x64xbf16> to vector<32x64xbf16>
    %cst_352 = arith.constant dense<0.000000e+00> : vector<4x64xf32>
    %373 = tpu.matmul %370, %372, %cst_352 {dimension_numbers = #tpu.dot_dimension_numbers<[1], [0], [0], [1], [0, 0, 1, 1], [], []>} : vector<4x32xbf16>, vector<32x64xbf16>, vector<4x64xf32> -> vector<4x64xf32>
    %374 = arith.addf %366, %373 : vector<4x64xf32>
    %c3_353 = arith.constant 3 : index
    %c0_354 = arith.constant 0 : index
    %c0_355 = arith.constant 0 : index
    %375 = vector.load %arg23[%c3_353, %c0_354, %c0_355] : memref<9x4x16xbf16, #tpu.memory_space<vmem>>, vector<1x4x16xbf16>
    %376 = vector.shape_cast %375 : vector<1x4x16xbf16> to vector<4x16xbf16>
    %cst_356 = arith.constant dense<0.000000e+00> : vector<4x32xf32>
    %377 = tpu.matmul %376, %341, %cst_356 {dimension_numbers = #tpu.dot_dimension_numbers<[1], [0], [0], [1], [0, 0, 1, 1], [], []>} : vector<4x16xbf16>, vector<16x32xbf16>, vector<4x32xf32> -> vector<4x32xf32>
    %378 = arith.truncf %377 : vector<4x32xf32> to vector<4x32xbf16>
    %c3_357 = arith.constant 3 : index
    %c0_358 = arith.constant 0 : index
    %c0_359 = arith.constant 0 : index
    %379 = vector.load %arg21[%c3_357, %c0_358, %c0_359] : memref<9x32x64xbf16, #tpu.memory_space<vmem>>, vector<1x32x64xbf16>
    %380 = vector.shape_cast %379 : vector<1x32x64xbf16> to vector<32x64xbf16>
    %cst_360 = arith.constant dense<0.000000e+00> : vector<4x64xf32>
    %381 = tpu.matmul %378, %380, %cst_360 {dimension_numbers = #tpu.dot_dimension_numbers<[1], [0], [0], [1], [0, 0, 1, 1], [], []>} : vector<4x32xbf16>, vector<32x64xbf16>, vector<4x64xf32> -> vector<4x64xf32>
    %382 = arith.addf %374, %381 : vector<4x64xf32>
    %c4_361 = arith.constant 4 : index
    %c0_362 = arith.constant 0 : index
    %c0_363 = arith.constant 0 : index
    %383 = vector.load %arg23[%c4_361, %c0_362, %c0_363] : memref<9x4x16xbf16, #tpu.memory_space<vmem>>, vector<1x4x16xbf16>
    %384 = vector.shape_cast %383 : vector<1x4x16xbf16> to vector<4x16xbf16>
    %cst_364 = arith.constant dense<0.000000e+00> : vector<4x32xf32>
    %385 = tpu.matmul %384, %341, %cst_364 {dimension_numbers = #tpu.dot_dimension_numbers<[1], [0], [0], [1], [0, 0, 1, 1], [], []>} : vector<4x16xbf16>, vector<16x32xbf16>, vector<4x32xf32> -> vector<4x32xf32>
    %386 = arith.truncf %385 : vector<4x32xf32> to vector<4x32xbf16>
    %c4_365 = arith.constant 4 : index
    %c0_366 = arith.constant 0 : index
    %c0_367 = arith.constant 0 : index
    %387 = vector.load %arg21[%c4_365, %c0_366, %c0_367] : memref<9x32x64xbf16, #tpu.memory_space<vmem>>, vector<1x32x64xbf16>
    %388 = vector.shape_cast %387 : vector<1x32x64xbf16> to vector<32x64xbf16>
    %cst_368 = arith.constant dense<0.000000e+00> : vector<4x64xf32>
    %389 = tpu.matmul %386, %388, %cst_368 {dimension_numbers = #tpu.dot_dimension_numbers<[1], [0], [0], [1], [0, 0, 1, 1], [], []>} : vector<4x32xbf16>, vector<32x64xbf16>, vector<4x64xf32> -> vector<4x64xf32>
    %390 = arith.addf %382, %389 : vector<4x64xf32>
    %c5_369 = arith.constant 5 : index
    %c0_370 = arith.constant 0 : index
    %c0_371 = arith.constant 0 : index
    %391 = vector.load %arg23[%c5_369, %c0_370, %c0_371] : memref<9x4x16xbf16, #tpu.memory_space<vmem>>, vector<1x4x16xbf16>
    %392 = vector.shape_cast %391 : vector<1x4x16xbf16> to vector<4x16xbf16>
    %cst_372 = arith.constant dense<0.000000e+00> : vector<4x32xf32>
    %393 = tpu.matmul %392, %341, %cst_372 {dimension_numbers = #tpu.dot_dimension_numbers<[1], [0], [0], [1], [0, 0, 1, 1], [], []>} : vector<4x16xbf16>, vector<16x32xbf16>, vector<4x32xf32> -> vector<4x32xf32>
    %394 = arith.truncf %393 : vector<4x32xf32> to vector<4x32xbf16>
    %c5_373 = arith.constant 5 : index
    %c0_374 = arith.constant 0 : index
    %c0_375 = arith.constant 0 : index
    %395 = vector.load %arg21[%c5_373, %c0_374, %c0_375] : memref<9x32x64xbf16, #tpu.memory_space<vmem>>, vector<1x32x64xbf16>
    %396 = vector.shape_cast %395 : vector<1x32x64xbf16> to vector<32x64xbf16>
    %cst_376 = arith.constant dense<0.000000e+00> : vector<4x64xf32>
    %397 = tpu.matmul %394, %396, %cst_376 {dimension_numbers = #tpu.dot_dimension_numbers<[1], [0], [0], [1], [0, 0, 1, 1], [], []>} : vector<4x32xbf16>, vector<32x64xbf16>, vector<4x64xf32> -> vector<4x64xf32>
    %398 = arith.addf %390, %397 : vector<4x64xf32>
    %c6_377 = arith.constant 6 : index
    %c0_378 = arith.constant 0 : index
    %c0_379 = arith.constant 0 : index
    %399 = vector.load %arg23[%c6_377, %c0_378, %c0_379] : memref<9x4x16xbf16, #tpu.memory_space<vmem>>, vector<1x4x16xbf16>
    %400 = vector.shape_cast %399 : vector<1x4x16xbf16> to vector<4x16xbf16>
    %cst_380 = arith.constant dense<0.000000e+00> : vector<4x32xf32>
    %401 = tpu.matmul %400, %341, %cst_380 {dimension_numbers = #tpu.dot_dimension_numbers<[1], [0], [0], [1], [0, 0, 1, 1], [], []>} : vector<4x16xbf16>, vector<16x32xbf16>, vector<4x32xf32> -> vector<4x32xf32>
    %402 = arith.truncf %401 : vector<4x32xf32> to vector<4x32xbf16>
    %c6_381 = arith.constant 6 : index
    %c0_382 = arith.constant 0 : index
    %c0_383 = arith.constant 0 : index
    %403 = vector.load %arg21[%c6_381, %c0_382, %c0_383] : memref<9x32x64xbf16, #tpu.memory_space<vmem>>, vector<1x32x64xbf16>
    %404 = vector.shape_cast %403 : vector<1x32x64xbf16> to vector<32x64xbf16>
    %cst_384 = arith.constant dense<0.000000e+00> : vector<4x64xf32>
    %405 = tpu.matmul %402, %404, %cst_384 {dimension_numbers = #tpu.dot_dimension_numbers<[1], [0], [0], [1], [0, 0, 1, 1], [], []>} : vector<4x32xbf16>, vector<32x64xbf16>, vector<4x64xf32> -> vector<4x64xf32>
    %406 = arith.addf %398, %405 : vector<4x64xf32>
    %c7_385 = arith.constant 7 : index
    %c0_386 = arith.constant 0 : index
    %c0_387 = arith.constant 0 : index
    %407 = vector.load %arg23[%c7_385, %c0_386, %c0_387] : memref<9x4x16xbf16, #tpu.memory_space<vmem>>, vector<1x4x16xbf16>
    %408 = vector.shape_cast %407 : vector<1x4x16xbf16> to vector<4x16xbf16>
    %cst_388 = arith.constant dense<0.000000e+00> : vector<4x32xf32>
    %409 = tpu.matmul %408, %341, %cst_388 {dimension_numbers = #tpu.dot_dimension_numbers<[1], [0], [0], [1], [0, 0, 1, 1], [], []>} : vector<4x16xbf16>, vector<16x32xbf16>, vector<4x32xf32> -> vector<4x32xf32>
    %410 = arith.truncf %409 : vector<4x32xf32> to vector<4x32xbf16>
    %c7_389 = arith.constant 7 : index
    %c0_390 = arith.constant 0 : index
    %c0_391 = arith.constant 0 : index
    %411 = vector.load %arg21[%c7_389, %c0_390, %c0_391] : memref<9x32x64xbf16, #tpu.memory_space<vmem>>, vector<1x32x64xbf16>
    %412 = vector.shape_cast %411 : vector<1x32x64xbf16> to vector<32x64xbf16>
    %cst_392 = arith.constant dense<0.000000e+00> : vector<4x64xf32>
    %413 = tpu.matmul %410, %412, %cst_392 {dimension_numbers = #tpu.dot_dimension_numbers<[1], [0], [0], [1], [0, 0, 1, 1], [], []>} : vector<4x32xbf16>, vector<32x64xbf16>, vector<4x64xf32> -> vector<4x64xf32>
    %414 = arith.addf %406, %413 : vector<4x64xf32>
    %c8_393 = arith.constant 8 : index
    %c0_394 = arith.constant 0 : index
    %c0_395 = arith.constant 0 : index
    %415 = vector.load %arg23[%c8_393, %c0_394, %c0_395] : memref<9x4x16xbf16, #tpu.memory_space<vmem>>, vector<1x4x16xbf16>
    %416 = vector.shape_cast %415 : vector<1x4x16xbf16> to vector<4x16xbf16>
    %cst_396 = arith.constant dense<0.000000e+00> : vector<4x32xf32>
    %417 = tpu.matmul %416, %341, %cst_396 {dimension_numbers = #tpu.dot_dimension_numbers<[1], [0], [0], [1], [0, 0, 1, 1], [], []>} : vector<4x16xbf16>, vector<16x32xbf16>, vector<4x32xf32> -> vector<4x32xf32>
    %418 = arith.truncf %417 : vector<4x32xf32> to vector<4x32xbf16>
    %c8_397 = arith.constant 8 : index
    %c0_398 = arith.constant 0 : index
    %c0_399 = arith.constant 0 : index
    %419 = vector.load %arg21[%c8_397, %c0_398, %c0_399] : memref<9x32x64xbf16, #tpu.memory_space<vmem>>, vector<1x32x64xbf16>
    %420 = vector.shape_cast %419 : vector<1x32x64xbf16> to vector<32x64xbf16>
    %cst_400 = arith.constant dense<0.000000e+00> : vector<4x64xf32>
    %421 = tpu.matmul %418, %420, %cst_400 {dimension_numbers = #tpu.dot_dimension_numbers<[1], [0], [0], [1], [0, 0, 1, 1], [], []>} : vector<4x32xbf16>, vector<32x64xbf16>, vector<4x64xf32> -> vector<4x64xf32>
    %422 = arith.addf %414, %421 : vector<4x64xf32>
    %c0_401 = arith.constant 0 : index
    %c0_402 = arith.constant 0 : index
    %423 = vector.load %arg22[%c0_401, %c0_402] : memref<1x64xf32, #tpu.memory_space<vmem>>, vector<1x64xf32>
    %424 = vector.broadcast %423 : vector<1x64xf32> to vector<4x64xf32>
    %425 = arith.addf %422, %424 : vector<4x64xf32>
    %cst_403 = arith.constant 0.000000e+00 : f32
    %426 = vector.broadcast %cst_403 : f32 to vector<4x64xf32>
    %427 = arith.maximumf %425, %426 : vector<4x64xf32>
    %428 = arith.truncf %427 : vector<4x64xf32> to vector<4x64xbf16>
    %c0_404 = arith.constant 0 : index
    %c0_405 = arith.constant 0 : index
    %c0_406 = arith.constant 0 : index
    %429 = vector.load %arg26[%c0_404, %c0_405, %c0_406] : memref<8x4x4xbf16, #tpu.memory_space<vmem>>, vector<1x4x4xbf16>
    %430 = vector.shape_cast %429 : vector<1x4x4xbf16> to vector<4x4xbf16>
    %cst_407 = arith.constant dense<0.000000e+00> : vector<4x64xf32>
    %431 = tpu.matmul %430, %428, %cst_407 {dimension_numbers = #tpu.dot_dimension_numbers<[1], [0], [0], [1], [0, 0, 1, 1], [], []>} : vector<4x4xbf16>, vector<4x64xbf16>, vector<4x64xf32> -> vector<4x64xf32>
    %432 = arith.truncf %431 : vector<4x64xf32> to vector<4x64xbf16>
    %c0_408 = arith.constant 0 : index
    %c0_409 = arith.constant 0 : index
    %c0_410 = arith.constant 0 : index
    %433 = vector.load %arg24[%c0_408, %c0_409, %c0_410] : memref<9x64x64xbf16, #tpu.memory_space<vmem>>, vector<1x64x64xbf16>
    %434 = vector.shape_cast %433 : vector<1x64x64xbf16> to vector<64x64xbf16>
    %cst_411 = arith.constant dense<0.000000e+00> : vector<4x64xf32>
    %435 = tpu.matmul %432, %434, %cst_411 {dimension_numbers = #tpu.dot_dimension_numbers<[1], [0], [0], [1], [0, 0, 1, 1], [], []>} : vector<4x64xbf16>, vector<64x64xbf16>, vector<4x64xf32> -> vector<4x64xf32>
    %c1_412 = arith.constant 1 : index
    %c0_413 = arith.constant 0 : index
    %c0_414 = arith.constant 0 : index
    %436 = vector.load %arg26[%c1_412, %c0_413, %c0_414] : memref<8x4x4xbf16, #tpu.memory_space<vmem>>, vector<1x4x4xbf16>
    %437 = vector.shape_cast %436 : vector<1x4x4xbf16> to vector<4x4xbf16>
    %cst_415 = arith.constant dense<0.000000e+00> : vector<4x64xf32>
    %438 = tpu.matmul %437, %428, %cst_415 {dimension_numbers = #tpu.dot_dimension_numbers<[1], [0], [0], [1], [0, 0, 1, 1], [], []>} : vector<4x4xbf16>, vector<4x64xbf16>, vector<4x64xf32> -> vector<4x64xf32>
    %439 = arith.truncf %438 : vector<4x64xf32> to vector<4x64xbf16>
    %c1_416 = arith.constant 1 : index
    %c0_417 = arith.constant 0 : index
    %c0_418 = arith.constant 0 : index
    %440 = vector.load %arg24[%c1_416, %c0_417, %c0_418] : memref<9x64x64xbf16, #tpu.memory_space<vmem>>, vector<1x64x64xbf16>
    %441 = vector.shape_cast %440 : vector<1x64x64xbf16> to vector<64x64xbf16>
    %cst_419 = arith.constant dense<0.000000e+00> : vector<4x64xf32>
    %442 = tpu.matmul %439, %441, %cst_419 {dimension_numbers = #tpu.dot_dimension_numbers<[1], [0], [0], [1], [0, 0, 1, 1], [], []>} : vector<4x64xbf16>, vector<64x64xbf16>, vector<4x64xf32> -> vector<4x64xf32>
    %443 = arith.addf %435, %442 : vector<4x64xf32>
    %c2_420 = arith.constant 2 : index
    %c0_421 = arith.constant 0 : index
    %c0_422 = arith.constant 0 : index
    %444 = vector.load %arg26[%c2_420, %c0_421, %c0_422] : memref<8x4x4xbf16, #tpu.memory_space<vmem>>, vector<1x4x4xbf16>
    %445 = vector.shape_cast %444 : vector<1x4x4xbf16> to vector<4x4xbf16>
    %cst_423 = arith.constant dense<0.000000e+00> : vector<4x64xf32>
    %446 = tpu.matmul %445, %428, %cst_423 {dimension_numbers = #tpu.dot_dimension_numbers<[1], [0], [0], [1], [0, 0, 1, 1], [], []>} : vector<4x4xbf16>, vector<4x64xbf16>, vector<4x64xf32> -> vector<4x64xf32>
    %447 = arith.truncf %446 : vector<4x64xf32> to vector<4x64xbf16>
    %c2_424 = arith.constant 2 : index
    %c0_425 = arith.constant 0 : index
    %c0_426 = arith.constant 0 : index
    %448 = vector.load %arg24[%c2_424, %c0_425, %c0_426] : memref<9x64x64xbf16, #tpu.memory_space<vmem>>, vector<1x64x64xbf16>
    %449 = vector.shape_cast %448 : vector<1x64x64xbf16> to vector<64x64xbf16>
    %cst_427 = arith.constant dense<0.000000e+00> : vector<4x64xf32>
    %450 = tpu.matmul %447, %449, %cst_427 {dimension_numbers = #tpu.dot_dimension_numbers<[1], [0], [0], [1], [0, 0, 1, 1], [], []>} : vector<4x64xbf16>, vector<64x64xbf16>, vector<4x64xf32> -> vector<4x64xf32>
    %451 = arith.addf %443, %450 : vector<4x64xf32>
    %c3_428 = arith.constant 3 : index
    %c0_429 = arith.constant 0 : index
    %c0_430 = arith.constant 0 : index
    %452 = vector.load %arg26[%c3_428, %c0_429, %c0_430] : memref<8x4x4xbf16, #tpu.memory_space<vmem>>, vector<1x4x4xbf16>
    %453 = vector.shape_cast %452 : vector<1x4x4xbf16> to vector<4x4xbf16>
    %cst_431 = arith.constant dense<0.000000e+00> : vector<4x64xf32>
    %454 = tpu.matmul %453, %428, %cst_431 {dimension_numbers = #tpu.dot_dimension_numbers<[1], [0], [0], [1], [0, 0, 1, 1], [], []>} : vector<4x4xbf16>, vector<4x64xbf16>, vector<4x64xf32> -> vector<4x64xf32>
    %455 = arith.truncf %454 : vector<4x64xf32> to vector<4x64xbf16>
    %c3_432 = arith.constant 3 : index
    %c0_433 = arith.constant 0 : index
    %c0_434 = arith.constant 0 : index
    %456 = vector.load %arg24[%c3_432, %c0_433, %c0_434] : memref<9x64x64xbf16, #tpu.memory_space<vmem>>, vector<1x64x64xbf16>
    %457 = vector.shape_cast %456 : vector<1x64x64xbf16> to vector<64x64xbf16>
    %cst_435 = arith.constant dense<0.000000e+00> : vector<4x64xf32>
    %458 = tpu.matmul %455, %457, %cst_435 {dimension_numbers = #tpu.dot_dimension_numbers<[1], [0], [0], [1], [0, 0, 1, 1], [], []>} : vector<4x64xbf16>, vector<64x64xbf16>, vector<4x64xf32> -> vector<4x64xf32>
    %459 = arith.addf %451, %458 : vector<4x64xf32>
    %c4_436 = arith.constant 4 : index
    %c0_437 = arith.constant 0 : index
    %c0_438 = arith.constant 0 : index
    %460 = vector.load %arg24[%c4_436, %c0_437, %c0_438] : memref<9x64x64xbf16, #tpu.memory_space<vmem>>, vector<1x64x64xbf16>
    %461 = vector.shape_cast %460 : vector<1x64x64xbf16> to vector<64x64xbf16>
    %cst_439 = arith.constant dense<0.000000e+00> : vector<4x64xf32>
    %462 = tpu.matmul %428, %461, %cst_439 {dimension_numbers = #tpu.dot_dimension_numbers<[1], [0], [0], [1], [0, 0, 1, 1], [], []>} : vector<4x64xbf16>, vector<64x64xbf16>, vector<4x64xf32> -> vector<4x64xf32>
    %463 = arith.addf %459, %462 : vector<4x64xf32>
    %c4_440 = arith.constant 4 : index
    %c0_441 = arith.constant 0 : index
    %c0_442 = arith.constant 0 : index
    %464 = vector.load %arg26[%c4_440, %c0_441, %c0_442] : memref<8x4x4xbf16, #tpu.memory_space<vmem>>, vector<1x4x4xbf16>
    %465 = vector.shape_cast %464 : vector<1x4x4xbf16> to vector<4x4xbf16>
    %cst_443 = arith.constant dense<0.000000e+00> : vector<4x64xf32>
    %466 = tpu.matmul %465, %428, %cst_443 {dimension_numbers = #tpu.dot_dimension_numbers<[1], [0], [0], [1], [0, 0, 1, 1], [], []>} : vector<4x4xbf16>, vector<4x64xbf16>, vector<4x64xf32> -> vector<4x64xf32>
    %467 = arith.truncf %466 : vector<4x64xf32> to vector<4x64xbf16>
    %c5_444 = arith.constant 5 : index
    %c0_445 = arith.constant 0 : index
    %c0_446 = arith.constant 0 : index
    %468 = vector.load %arg24[%c5_444, %c0_445, %c0_446] : memref<9x64x64xbf16, #tpu.memory_space<vmem>>, vector<1x64x64xbf16>
    %469 = vector.shape_cast %468 : vector<1x64x64xbf16> to vector<64x64xbf16>
    %cst_447 = arith.constant dense<0.000000e+00> : vector<4x64xf32>
    %470 = tpu.matmul %467, %469, %cst_447 {dimension_numbers = #tpu.dot_dimension_numbers<[1], [0], [0], [1], [0, 0, 1, 1], [], []>} : vector<4x64xbf16>, vector<64x64xbf16>, vector<4x64xf32> -> vector<4x64xf32>
    %471 = arith.addf %463, %470 : vector<4x64xf32>
    %c5_448 = arith.constant 5 : index
    %c0_449 = arith.constant 0 : index
    %c0_450 = arith.constant 0 : index
    %472 = vector.load %arg26[%c5_448, %c0_449, %c0_450] : memref<8x4x4xbf16, #tpu.memory_space<vmem>>, vector<1x4x4xbf16>
    %473 = vector.shape_cast %472 : vector<1x4x4xbf16> to vector<4x4xbf16>
    %cst_451 = arith.constant dense<0.000000e+00> : vector<4x64xf32>
    %474 = tpu.matmul %473, %428, %cst_451 {dimension_numbers = #tpu.dot_dimension_numbers<[1], [0], [0], [1], [0, 0, 1, 1], [], []>} : vector<4x4xbf16>, vector<4x64xbf16>, vector<4x64xf32> -> vector<4x64xf32>
    %475 = arith.truncf %474 : vector<4x64xf32> to vector<4x64xbf16>
    %c6_452 = arith.constant 6 : index
    %c0_453 = arith.constant 0 : index
    %c0_454 = arith.constant 0 : index
    %476 = vector.load %arg24[%c6_452, %c0_453, %c0_454] : memref<9x64x64xbf16, #tpu.memory_space<vmem>>, vector<1x64x64xbf16>
    %477 = vector.shape_cast %476 : vector<1x64x64xbf16> to vector<64x64xbf16>
    %cst_455 = arith.constant dense<0.000000e+00> : vector<4x64xf32>
    %478 = tpu.matmul %475, %477, %cst_455 {dimension_numbers = #tpu.dot_dimension_numbers<[1], [0], [0], [1], [0, 0, 1, 1], [], []>} : vector<4x64xbf16>, vector<64x64xbf16>, vector<4x64xf32> -> vector<4x64xf32>
    %479 = arith.addf %471, %478 : vector<4x64xf32>
    %c6_456 = arith.constant 6 : index
    %c0_457 = arith.constant 0 : index
    %c0_458 = arith.constant 0 : index
    %480 = vector.load %arg26[%c6_456, %c0_457, %c0_458] : memref<8x4x4xbf16, #tpu.memory_space<vmem>>, vector<1x4x4xbf16>
    %481 = vector.shape_cast %480 : vector<1x4x4xbf16> to vector<4x4xbf16>
    %cst_459 = arith.constant dense<0.000000e+00> : vector<4x64xf32>
    %482 = tpu.matmul %481, %428, %cst_459 {dimension_numbers = #tpu.dot_dimension_numbers<[1], [0], [0], [1], [0, 0, 1, 1], [], []>} : vector<4x4xbf16>, vector<4x64xbf16>, vector<4x64xf32> -> vector<4x64xf32>
    %483 = arith.truncf %482 : vector<4x64xf32> to vector<4x64xbf16>
    %c7_460 = arith.constant 7 : index
    %c0_461 = arith.constant 0 : index
    %c0_462 = arith.constant 0 : index
    %484 = vector.load %arg24[%c7_460, %c0_461, %c0_462] : memref<9x64x64xbf16, #tpu.memory_space<vmem>>, vector<1x64x64xbf16>
    %485 = vector.shape_cast %484 : vector<1x64x64xbf16> to vector<64x64xbf16>
    %cst_463 = arith.constant dense<0.000000e+00> : vector<4x64xf32>
    %486 = tpu.matmul %483, %485, %cst_463 {dimension_numbers = #tpu.dot_dimension_numbers<[1], [0], [0], [1], [0, 0, 1, 1], [], []>} : vector<4x64xbf16>, vector<64x64xbf16>, vector<4x64xf32> -> vector<4x64xf32>
    %487 = arith.addf %479, %486 : vector<4x64xf32>
    %c7_464 = arith.constant 7 : index
    %c0_465 = arith.constant 0 : index
    %c0_466 = arith.constant 0 : index
    %488 = vector.load %arg26[%c7_464, %c0_465, %c0_466] : memref<8x4x4xbf16, #tpu.memory_space<vmem>>, vector<1x4x4xbf16>
    %489 = vector.shape_cast %488 : vector<1x4x4xbf16> to vector<4x4xbf16>
    %cst_467 = arith.constant dense<0.000000e+00> : vector<4x64xf32>
    %490 = tpu.matmul %489, %428, %cst_467 {dimension_numbers = #tpu.dot_dimension_numbers<[1], [0], [0], [1], [0, 0, 1, 1], [], []>} : vector<4x4xbf16>, vector<4x64xbf16>, vector<4x64xf32> -> vector<4x64xf32>
    %491 = arith.truncf %490 : vector<4x64xf32> to vector<4x64xbf16>
    %c8_468 = arith.constant 8 : index
    %c0_469 = arith.constant 0 : index
    %c0_470 = arith.constant 0 : index
    %492 = vector.load %arg24[%c8_468, %c0_469, %c0_470] : memref<9x64x64xbf16, #tpu.memory_space<vmem>>, vector<1x64x64xbf16>
    %493 = vector.shape_cast %492 : vector<1x64x64xbf16> to vector<64x64xbf16>
    %cst_471 = arith.constant dense<0.000000e+00> : vector<4x64xf32>
    %494 = tpu.matmul %491, %493, %cst_471 {dimension_numbers = #tpu.dot_dimension_numbers<[1], [0], [0], [1], [0, 0, 1, 1], [], []>} : vector<4x64xbf16>, vector<64x64xbf16>, vector<4x64xf32> -> vector<4x64xf32>
    %495 = arith.addf %487, %494 : vector<4x64xf32>
    %c0_472 = arith.constant 0 : index
    %c0_473 = arith.constant 0 : index
    %496 = vector.load %arg25[%c0_472, %c0_473] : memref<1x64xf32, #tpu.memory_space<vmem>>, vector<1x64xf32>
    %497 = vector.broadcast %496 : vector<1x64xf32> to vector<4x64xf32>
    %498 = arith.addf %495, %497 : vector<4x64xf32>
    %499 = arith.addf %498, %351 : vector<4x64xf32>
    %cst_474 = arith.constant 0.000000e+00 : f32
    %500 = vector.broadcast %cst_474 : f32 to vector<4x64xf32>
    %501 = arith.maximumf %499, %500 : vector<4x64xf32>
    %502 = arith.truncf %501 : vector<4x64xf32> to vector<4x64xbf16>
    %503 = arith.extf %502 : vector<4x64xbf16> to vector<4x64xf32>
    %c0_475 = arith.constant 0 : index
    %c0_476 = arith.constant 0 : index
    %c0_477 = arith.constant 0 : index
    %504 = vector.load %arg29[%c0_475, %c0_476, %c0_477] : memref<8x4x4xbf16, #tpu.memory_space<vmem>>, vector<1x4x4xbf16>
    %505 = vector.shape_cast %504 : vector<1x4x4xbf16> to vector<4x4xbf16>
    %cst_478 = arith.constant dense<0.000000e+00> : vector<4x64xf32>
    %506 = tpu.matmul %505, %502, %cst_478 {dimension_numbers = #tpu.dot_dimension_numbers<[1], [0], [0], [1], [0, 0, 1, 1], [], []>} : vector<4x4xbf16>, vector<4x64xbf16>, vector<4x64xf32> -> vector<4x64xf32>
    %507 = arith.truncf %506 : vector<4x64xf32> to vector<4x64xbf16>
    %c0_479 = arith.constant 0 : index
    %c0_480 = arith.constant 0 : index
    %c0_481 = arith.constant 0 : index
    %508 = vector.load %arg27[%c0_479, %c0_480, %c0_481] : memref<9x64x64xbf16, #tpu.memory_space<vmem>>, vector<1x64x64xbf16>
    %509 = vector.shape_cast %508 : vector<1x64x64xbf16> to vector<64x64xbf16>
    %cst_482 = arith.constant dense<0.000000e+00> : vector<4x64xf32>
    %510 = tpu.matmul %507, %509, %cst_482 {dimension_numbers = #tpu.dot_dimension_numbers<[1], [0], [0], [1], [0, 0, 1, 1], [], []>} : vector<4x64xbf16>, vector<64x64xbf16>, vector<4x64xf32> -> vector<4x64xf32>
    %c1_483 = arith.constant 1 : index
    %c0_484 = arith.constant 0 : index
    %c0_485 = arith.constant 0 : index
    %511 = vector.load %arg29[%c1_483, %c0_484, %c0_485] : memref<8x4x4xbf16, #tpu.memory_space<vmem>>, vector<1x4x4xbf16>
    %512 = vector.shape_cast %511 : vector<1x4x4xbf16> to vector<4x4xbf16>
    %cst_486 = arith.constant dense<0.000000e+00> : vector<4x64xf32>
    %513 = tpu.matmul %512, %502, %cst_486 {dimension_numbers = #tpu.dot_dimension_numbers<[1], [0], [0], [1], [0, 0, 1, 1], [], []>} : vector<4x4xbf16>, vector<4x64xbf16>, vector<4x64xf32> -> vector<4x64xf32>
    %514 = arith.truncf %513 : vector<4x64xf32> to vector<4x64xbf16>
    %c1_487 = arith.constant 1 : index
    %c0_488 = arith.constant 0 : index
    %c0_489 = arith.constant 0 : index
    %515 = vector.load %arg27[%c1_487, %c0_488, %c0_489] : memref<9x64x64xbf16, #tpu.memory_space<vmem>>, vector<1x64x64xbf16>
    %516 = vector.shape_cast %515 : vector<1x64x64xbf16> to vector<64x64xbf16>
    %cst_490 = arith.constant dense<0.000000e+00> : vector<4x64xf32>
    %517 = tpu.matmul %514, %516, %cst_490 {dimension_numbers = #tpu.dot_dimension_numbers<[1], [0], [0], [1], [0, 0, 1, 1], [], []>} : vector<4x64xbf16>, vector<64x64xbf16>, vector<4x64xf32> -> vector<4x64xf32>
    %518 = arith.addf %510, %517 : vector<4x64xf32>
    %c2_491 = arith.constant 2 : index
    %c0_492 = arith.constant 0 : index
    %c0_493 = arith.constant 0 : index
    %519 = vector.load %arg29[%c2_491, %c0_492, %c0_493] : memref<8x4x4xbf16, #tpu.memory_space<vmem>>, vector<1x4x4xbf16>
    %520 = vector.shape_cast %519 : vector<1x4x4xbf16> to vector<4x4xbf16>
    %cst_494 = arith.constant dense<0.000000e+00> : vector<4x64xf32>
    %521 = tpu.matmul %520, %502, %cst_494 {dimension_numbers = #tpu.dot_dimension_numbers<[1], [0], [0], [1], [0, 0, 1, 1], [], []>} : vector<4x4xbf16>, vector<4x64xbf16>, vector<4x64xf32> -> vector<4x64xf32>
    %522 = arith.truncf %521 : vector<4x64xf32> to vector<4x64xbf16>
    %c2_495 = arith.constant 2 : index
    %c0_496 = arith.constant 0 : index
    %c0_497 = arith.constant 0 : index
    %523 = vector.load %arg27[%c2_495, %c0_496, %c0_497] : memref<9x64x64xbf16, #tpu.memory_space<vmem>>, vector<1x64x64xbf16>
    %524 = vector.shape_cast %523 : vector<1x64x64xbf16> to vector<64x64xbf16>
    %cst_498 = arith.constant dense<0.000000e+00> : vector<4x64xf32>
    %525 = tpu.matmul %522, %524, %cst_498 {dimension_numbers = #tpu.dot_dimension_numbers<[1], [0], [0], [1], [0, 0, 1, 1], [], []>} : vector<4x64xbf16>, vector<64x64xbf16>, vector<4x64xf32> -> vector<4x64xf32>
    %526 = arith.addf %518, %525 : vector<4x64xf32>
    %c3_499 = arith.constant 3 : index
    %c0_500 = arith.constant 0 : index
    %c0_501 = arith.constant 0 : index
    %527 = vector.load %arg29[%c3_499, %c0_500, %c0_501] : memref<8x4x4xbf16, #tpu.memory_space<vmem>>, vector<1x4x4xbf16>
    %528 = vector.shape_cast %527 : vector<1x4x4xbf16> to vector<4x4xbf16>
    %cst_502 = arith.constant dense<0.000000e+00> : vector<4x64xf32>
    %529 = tpu.matmul %528, %502, %cst_502 {dimension_numbers = #tpu.dot_dimension_numbers<[1], [0], [0], [1], [0, 0, 1, 1], [], []>} : vector<4x4xbf16>, vector<4x64xbf16>, vector<4x64xf32> -> vector<4x64xf32>
    %530 = arith.truncf %529 : vector<4x64xf32> to vector<4x64xbf16>
    %c3_503 = arith.constant 3 : index
    %c0_504 = arith.constant 0 : index
    %c0_505 = arith.constant 0 : index
    %531 = vector.load %arg27[%c3_503, %c0_504, %c0_505] : memref<9x64x64xbf16, #tpu.memory_space<vmem>>, vector<1x64x64xbf16>
    %532 = vector.shape_cast %531 : vector<1x64x64xbf16> to vector<64x64xbf16>
    %cst_506 = arith.constant dense<0.000000e+00> : vector<4x64xf32>
    %533 = tpu.matmul %530, %532, %cst_506 {dimension_numbers = #tpu.dot_dimension_numbers<[1], [0], [0], [1], [0, 0, 1, 1], [], []>} : vector<4x64xbf16>, vector<64x64xbf16>, vector<4x64xf32> -> vector<4x64xf32>
    %534 = arith.addf %526, %533 : vector<4x64xf32>
    %c4_507 = arith.constant 4 : index
    %c0_508 = arith.constant 0 : index
    %c0_509 = arith.constant 0 : index
    %535 = vector.load %arg27[%c4_507, %c0_508, %c0_509] : memref<9x64x64xbf16, #tpu.memory_space<vmem>>, vector<1x64x64xbf16>
    %536 = vector.shape_cast %535 : vector<1x64x64xbf16> to vector<64x64xbf16>
    %cst_510 = arith.constant dense<0.000000e+00> : vector<4x64xf32>
    %537 = tpu.matmul %502, %536, %cst_510 {dimension_numbers = #tpu.dot_dimension_numbers<[1], [0], [0], [1], [0, 0, 1, 1], [], []>} : vector<4x64xbf16>, vector<64x64xbf16>, vector<4x64xf32> -> vector<4x64xf32>
    %538 = arith.addf %534, %537 : vector<4x64xf32>
    %c4_511 = arith.constant 4 : index
    %c0_512 = arith.constant 0 : index
    %c0_513 = arith.constant 0 : index
    %539 = vector.load %arg29[%c4_511, %c0_512, %c0_513] : memref<8x4x4xbf16, #tpu.memory_space<vmem>>, vector<1x4x4xbf16>
    %540 = vector.shape_cast %539 : vector<1x4x4xbf16> to vector<4x4xbf16>
    %cst_514 = arith.constant dense<0.000000e+00> : vector<4x64xf32>
    %541 = tpu.matmul %540, %502, %cst_514 {dimension_numbers = #tpu.dot_dimension_numbers<[1], [0], [0], [1], [0, 0, 1, 1], [], []>} : vector<4x4xbf16>, vector<4x64xbf16>, vector<4x64xf32> -> vector<4x64xf32>
    %542 = arith.truncf %541 : vector<4x64xf32> to vector<4x64xbf16>
    %c5_515 = arith.constant 5 : index
    %c0_516 = arith.constant 0 : index
    %c0_517 = arith.constant 0 : index
    %543 = vector.load %arg27[%c5_515, %c0_516, %c0_517] : memref<9x64x64xbf16, #tpu.memory_space<vmem>>, vector<1x64x64xbf16>
    %544 = vector.shape_cast %543 : vector<1x64x64xbf16> to vector<64x64xbf16>
    %cst_518 = arith.constant dense<0.000000e+00> : vector<4x64xf32>
    %545 = tpu.matmul %542, %544, %cst_518 {dimension_numbers = #tpu.dot_dimension_numbers<[1], [0], [0], [1], [0, 0, 1, 1], [], []>} : vector<4x64xbf16>, vector<64x64xbf16>, vector<4x64xf32> -> vector<4x64xf32>
    %546 = arith.addf %538, %545 : vector<4x64xf32>
    %c5_519 = arith.constant 5 : index
    %c0_520 = arith.constant 0 : index
    %c0_521 = arith.constant 0 : index
    %547 = vector.load %arg29[%c5_519, %c0_520, %c0_521] : memref<8x4x4xbf16, #tpu.memory_space<vmem>>, vector<1x4x4xbf16>
    %548 = vector.shape_cast %547 : vector<1x4x4xbf16> to vector<4x4xbf16>
    %cst_522 = arith.constant dense<0.000000e+00> : vector<4x64xf32>
    %549 = tpu.matmul %548, %502, %cst_522 {dimension_numbers = #tpu.dot_dimension_numbers<[1], [0], [0], [1], [0, 0, 1, 1], [], []>} : vector<4x4xbf16>, vector<4x64xbf16>, vector<4x64xf32> -> vector<4x64xf32>
    %550 = arith.truncf %549 : vector<4x64xf32> to vector<4x64xbf16>
    %c6_523 = arith.constant 6 : index
    %c0_524 = arith.constant 0 : index
    %c0_525 = arith.constant 0 : index
    %551 = vector.load %arg27[%c6_523, %c0_524, %c0_525] : memref<9x64x64xbf16, #tpu.memory_space<vmem>>, vector<1x64x64xbf16>
    %552 = vector.shape_cast %551 : vector<1x64x64xbf16> to vector<64x64xbf16>
    %cst_526 = arith.constant dense<0.000000e+00> : vector<4x64xf32>
    %553 = tpu.matmul %550, %552, %cst_526 {dimension_numbers = #tpu.dot_dimension_numbers<[1], [0], [0], [1], [0, 0, 1, 1], [], []>} : vector<4x64xbf16>, vector<64x64xbf16>, vector<4x64xf32> -> vector<4x64xf32>
    %554 = arith.addf %546, %553 : vector<4x64xf32>
    %c6_527 = arith.constant 6 : index
    %c0_528 = arith.constant 0 : index
    %c0_529 = arith.constant 0 : index
    %555 = vector.load %arg29[%c6_527, %c0_528, %c0_529] : memref<8x4x4xbf16, #tpu.memory_space<vmem>>, vector<1x4x4xbf16>
    %556 = vector.shape_cast %555 : vector<1x4x4xbf16> to vector<4x4xbf16>
    %cst_530 = arith.constant dense<0.000000e+00> : vector<4x64xf32>
    %557 = tpu.matmul %556, %502, %cst_530 {dimension_numbers = #tpu.dot_dimension_numbers<[1], [0], [0], [1], [0, 0, 1, 1], [], []>} : vector<4x4xbf16>, vector<4x64xbf16>, vector<4x64xf32> -> vector<4x64xf32>
    %558 = arith.truncf %557 : vector<4x64xf32> to vector<4x64xbf16>
    %c7_531 = arith.constant 7 : index
    %c0_532 = arith.constant 0 : index
    %c0_533 = arith.constant 0 : index
    %559 = vector.load %arg27[%c7_531, %c0_532, %c0_533] : memref<9x64x64xbf16, #tpu.memory_space<vmem>>, vector<1x64x64xbf16>
    %560 = vector.shape_cast %559 : vector<1x64x64xbf16> to vector<64x64xbf16>
    %cst_534 = arith.constant dense<0.000000e+00> : vector<4x64xf32>
    %561 = tpu.matmul %558, %560, %cst_534 {dimension_numbers = #tpu.dot_dimension_numbers<[1], [0], [0], [1], [0, 0, 1, 1], [], []>} : vector<4x64xbf16>, vector<64x64xbf16>, vector<4x64xf32> -> vector<4x64xf32>
    %562 = arith.addf %554, %561 : vector<4x64xf32>
    %c7_535 = arith.constant 7 : index
    %c0_536 = arith.constant 0 : index
    %c0_537 = arith.constant 0 : index
    %563 = vector.load %arg29[%c7_535, %c0_536, %c0_537] : memref<8x4x4xbf16, #tpu.memory_space<vmem>>, vector<1x4x4xbf16>
    %564 = vector.shape_cast %563 : vector<1x4x4xbf16> to vector<4x4xbf16>
    %cst_538 = arith.constant dense<0.000000e+00> : vector<4x64xf32>
    %565 = tpu.matmul %564, %502, %cst_538 {dimension_numbers = #tpu.dot_dimension_numbers<[1], [0], [0], [1], [0, 0, 1, 1], [], []>} : vector<4x4xbf16>, vector<4x64xbf16>, vector<4x64xf32> -> vector<4x64xf32>
    %566 = arith.truncf %565 : vector<4x64xf32> to vector<4x64xbf16>
    %c8_539 = arith.constant 8 : index
    %c0_540 = arith.constant 0 : index
    %c0_541 = arith.constant 0 : index
    %567 = vector.load %arg27[%c8_539, %c0_540, %c0_541] : memref<9x64x64xbf16, #tpu.memory_space<vmem>>, vector<1x64x64xbf16>
    %568 = vector.shape_cast %567 : vector<1x64x64xbf16> to vector<64x64xbf16>
    %cst_542 = arith.constant dense<0.000000e+00> : vector<4x64xf32>
    %569 = tpu.matmul %566, %568, %cst_542 {dimension_numbers = #tpu.dot_dimension_numbers<[1], [0], [0], [1], [0, 0, 1, 1], [], []>} : vector<4x64xbf16>, vector<64x64xbf16>, vector<4x64xf32> -> vector<4x64xf32>
    %570 = arith.addf %562, %569 : vector<4x64xf32>
    %c0_543 = arith.constant 0 : index
    %c0_544 = arith.constant 0 : index
    %571 = vector.load %arg28[%c0_543, %c0_544] : memref<1x64xf32, #tpu.memory_space<vmem>>, vector<1x64xf32>
    %572 = vector.broadcast %571 : vector<1x64xf32> to vector<4x64xf32>
    %573 = arith.addf %570, %572 : vector<4x64xf32>
    %cst_545 = arith.constant 0.000000e+00 : f32
    %574 = vector.broadcast %cst_545 : f32 to vector<4x64xf32>
    %575 = arith.maximumf %573, %574 : vector<4x64xf32>
    %576 = arith.truncf %575 : vector<4x64xf32> to vector<4x64xbf16>
    %c0_546 = arith.constant 0 : index
    %c0_547 = arith.constant 0 : index
    %c0_548 = arith.constant 0 : index
    %577 = vector.load %arg32[%c0_546, %c0_547, %c0_548] : memref<8x4x4xbf16, #tpu.memory_space<vmem>>, vector<1x4x4xbf16>
    %578 = vector.shape_cast %577 : vector<1x4x4xbf16> to vector<4x4xbf16>
    %cst_549 = arith.constant dense<0.000000e+00> : vector<4x64xf32>
    %579 = tpu.matmul %578, %576, %cst_549 {dimension_numbers = #tpu.dot_dimension_numbers<[1], [0], [0], [1], [0, 0, 1, 1], [], []>} : vector<4x4xbf16>, vector<4x64xbf16>, vector<4x64xf32> -> vector<4x64xf32>
    %580 = arith.truncf %579 : vector<4x64xf32> to vector<4x64xbf16>
    %c0_550 = arith.constant 0 : index
    %c0_551 = arith.constant 0 : index
    %c0_552 = arith.constant 0 : index
    %581 = vector.load %arg30[%c0_550, %c0_551, %c0_552] : memref<9x64x64xbf16, #tpu.memory_space<vmem>>, vector<1x64x64xbf16>
    %582 = vector.shape_cast %581 : vector<1x64x64xbf16> to vector<64x64xbf16>
    %cst_553 = arith.constant dense<0.000000e+00> : vector<4x64xf32>
    %583 = tpu.matmul %580, %582, %cst_553 {dimension_numbers = #tpu.dot_dimension_numbers<[1], [0], [0], [1], [0, 0, 1, 1], [], []>} : vector<4x64xbf16>, vector<64x64xbf16>, vector<4x64xf32> -> vector<4x64xf32>
    %c1_554 = arith.constant 1 : index
    %c0_555 = arith.constant 0 : index
    %c0_556 = arith.constant 0 : index
    %584 = vector.load %arg32[%c1_554, %c0_555, %c0_556] : memref<8x4x4xbf16, #tpu.memory_space<vmem>>, vector<1x4x4xbf16>
    %585 = vector.shape_cast %584 : vector<1x4x4xbf16> to vector<4x4xbf16>
    %cst_557 = arith.constant dense<0.000000e+00> : vector<4x64xf32>
    %586 = tpu.matmul %585, %576, %cst_557 {dimension_numbers = #tpu.dot_dimension_numbers<[1], [0], [0], [1], [0, 0, 1, 1], [], []>} : vector<4x4xbf16>, vector<4x64xbf16>, vector<4x64xf32> -> vector<4x64xf32>
    %587 = arith.truncf %586 : vector<4x64xf32> to vector<4x64xbf16>
    %c1_558 = arith.constant 1 : index
    %c0_559 = arith.constant 0 : index
    %c0_560 = arith.constant 0 : index
    %588 = vector.load %arg30[%c1_558, %c0_559, %c0_560] : memref<9x64x64xbf16, #tpu.memory_space<vmem>>, vector<1x64x64xbf16>
    %589 = vector.shape_cast %588 : vector<1x64x64xbf16> to vector<64x64xbf16>
    %cst_561 = arith.constant dense<0.000000e+00> : vector<4x64xf32>
    %590 = tpu.matmul %587, %589, %cst_561 {dimension_numbers = #tpu.dot_dimension_numbers<[1], [0], [0], [1], [0, 0, 1, 1], [], []>} : vector<4x64xbf16>, vector<64x64xbf16>, vector<4x64xf32> -> vector<4x64xf32>
    %591 = arith.addf %583, %590 : vector<4x64xf32>
    %c2_562 = arith.constant 2 : index
    %c0_563 = arith.constant 0 : index
    %c0_564 = arith.constant 0 : index
    %592 = vector.load %arg32[%c2_562, %c0_563, %c0_564] : memref<8x4x4xbf16, #tpu.memory_space<vmem>>, vector<1x4x4xbf16>
    %593 = vector.shape_cast %592 : vector<1x4x4xbf16> to vector<4x4xbf16>
    %cst_565 = arith.constant dense<0.000000e+00> : vector<4x64xf32>
    %594 = tpu.matmul %593, %576, %cst_565 {dimension_numbers = #tpu.dot_dimension_numbers<[1], [0], [0], [1], [0, 0, 1, 1], [], []>} : vector<4x4xbf16>, vector<4x64xbf16>, vector<4x64xf32> -> vector<4x64xf32>
    %595 = arith.truncf %594 : vector<4x64xf32> to vector<4x64xbf16>
    %c2_566 = arith.constant 2 : index
    %c0_567 = arith.constant 0 : index
    %c0_568 = arith.constant 0 : index
    %596 = vector.load %arg30[%c2_566, %c0_567, %c0_568] : memref<9x64x64xbf16, #tpu.memory_space<vmem>>, vector<1x64x64xbf16>
    %597 = vector.shape_cast %596 : vector<1x64x64xbf16> to vector<64x64xbf16>
    %cst_569 = arith.constant dense<0.000000e+00> : vector<4x64xf32>
    %598 = tpu.matmul %595, %597, %cst_569 {dimension_numbers = #tpu.dot_dimension_numbers<[1], [0], [0], [1], [0, 0, 1, 1], [], []>} : vector<4x64xbf16>, vector<64x64xbf16>, vector<4x64xf32> -> vector<4x64xf32>
    %599 = arith.addf %591, %598 : vector<4x64xf32>
    %c3_570 = arith.constant 3 : index
    %c0_571 = arith.constant 0 : index
    %c0_572 = arith.constant 0 : index
    %600 = vector.load %arg32[%c3_570, %c0_571, %c0_572] : memref<8x4x4xbf16, #tpu.memory_space<vmem>>, vector<1x4x4xbf16>
    %601 = vector.shape_cast %600 : vector<1x4x4xbf16> to vector<4x4xbf16>
    %cst_573 = arith.constant dense<0.000000e+00> : vector<4x64xf32>
    %602 = tpu.matmul %601, %576, %cst_573 {dimension_numbers = #tpu.dot_dimension_numbers<[1], [0], [0], [1], [0, 0, 1, 1], [], []>} : vector<4x4xbf16>, vector<4x64xbf16>, vector<4x64xf32> -> vector<4x64xf32>
    %603 = arith.truncf %602 : vector<4x64xf32> to vector<4x64xbf16>
    %c3_574 = arith.constant 3 : index
    %c0_575 = arith.constant 0 : index
    %c0_576 = arith.constant 0 : index
    %604 = vector.load %arg30[%c3_574, %c0_575, %c0_576] : memref<9x64x64xbf16, #tpu.memory_space<vmem>>, vector<1x64x64xbf16>
    %605 = vector.shape_cast %604 : vector<1x64x64xbf16> to vector<64x64xbf16>
    %cst_577 = arith.constant dense<0.000000e+00> : vector<4x64xf32>
    %606 = tpu.matmul %603, %605, %cst_577 {dimension_numbers = #tpu.dot_dimension_numbers<[1], [0], [0], [1], [0, 0, 1, 1], [], []>} : vector<4x64xbf16>, vector<64x64xbf16>, vector<4x64xf32> -> vector<4x64xf32>
    %607 = arith.addf %599, %606 : vector<4x64xf32>
    %c4_578 = arith.constant 4 : index
    %c0_579 = arith.constant 0 : index
    %c0_580 = arith.constant 0 : index
    %608 = vector.load %arg30[%c4_578, %c0_579, %c0_580] : memref<9x64x64xbf16, #tpu.memory_space<vmem>>, vector<1x64x64xbf16>
    %609 = vector.shape_cast %608 : vector<1x64x64xbf16> to vector<64x64xbf16>
    %cst_581 = arith.constant dense<0.000000e+00> : vector<4x64xf32>
    %610 = tpu.matmul %576, %609, %cst_581 {dimension_numbers = #tpu.dot_dimension_numbers<[1], [0], [0], [1], [0, 0, 1, 1], [], []>} : vector<4x64xbf16>, vector<64x64xbf16>, vector<4x64xf32> -> vector<4x64xf32>
    %611 = arith.addf %607, %610 : vector<4x64xf32>
    %c4_582 = arith.constant 4 : index
    %c0_583 = arith.constant 0 : index
    %c0_584 = arith.constant 0 : index
    %612 = vector.load %arg32[%c4_582, %c0_583, %c0_584] : memref<8x4x4xbf16, #tpu.memory_space<vmem>>, vector<1x4x4xbf16>
    %613 = vector.shape_cast %612 : vector<1x4x4xbf16> to vector<4x4xbf16>
    %cst_585 = arith.constant dense<0.000000e+00> : vector<4x64xf32>
    %614 = tpu.matmul %613, %576, %cst_585 {dimension_numbers = #tpu.dot_dimension_numbers<[1], [0], [0], [1], [0, 0, 1, 1], [], []>} : vector<4x4xbf16>, vector<4x64xbf16>, vector<4x64xf32> -> vector<4x64xf32>
    %615 = arith.truncf %614 : vector<4x64xf32> to vector<4x64xbf16>
    %c5_586 = arith.constant 5 : index
    %c0_587 = arith.constant 0 : index
    %c0_588 = arith.constant 0 : index
    %616 = vector.load %arg30[%c5_586, %c0_587, %c0_588] : memref<9x64x64xbf16, #tpu.memory_space<vmem>>, vector<1x64x64xbf16>
    %617 = vector.shape_cast %616 : vector<1x64x64xbf16> to vector<64x64xbf16>
    %cst_589 = arith.constant dense<0.000000e+00> : vector<4x64xf32>
    %618 = tpu.matmul %615, %617, %cst_589 {dimension_numbers = #tpu.dot_dimension_numbers<[1], [0], [0], [1], [0, 0, 1, 1], [], []>} : vector<4x64xbf16>, vector<64x64xbf16>, vector<4x64xf32> -> vector<4x64xf32>
    %619 = arith.addf %611, %618 : vector<4x64xf32>
    %c5_590 = arith.constant 5 : index
    %c0_591 = arith.constant 0 : index
    %c0_592 = arith.constant 0 : index
    %620 = vector.load %arg32[%c5_590, %c0_591, %c0_592] : memref<8x4x4xbf16, #tpu.memory_space<vmem>>, vector<1x4x4xbf16>
    %621 = vector.shape_cast %620 : vector<1x4x4xbf16> to vector<4x4xbf16>
    %cst_593 = arith.constant dense<0.000000e+00> : vector<4x64xf32>
    %622 = tpu.matmul %621, %576, %cst_593 {dimension_numbers = #tpu.dot_dimension_numbers<[1], [0], [0], [1], [0, 0, 1, 1], [], []>} : vector<4x4xbf16>, vector<4x64xbf16>, vector<4x64xf32> -> vector<4x64xf32>
    %623 = arith.truncf %622 : vector<4x64xf32> to vector<4x64xbf16>
    %c6_594 = arith.constant 6 : index
    %c0_595 = arith.constant 0 : index
    %c0_596 = arith.constant 0 : index
    %624 = vector.load %arg30[%c6_594, %c0_595, %c0_596] : memref<9x64x64xbf16, #tpu.memory_space<vmem>>, vector<1x64x64xbf16>
    %625 = vector.shape_cast %624 : vector<1x64x64xbf16> to vector<64x64xbf16>
    %cst_597 = arith.constant dense<0.000000e+00> : vector<4x64xf32>
    %626 = tpu.matmul %623, %625, %cst_597 {dimension_numbers = #tpu.dot_dimension_numbers<[1], [0], [0], [1], [0, 0, 1, 1], [], []>} : vector<4x64xbf16>, vector<64x64xbf16>, vector<4x64xf32> -> vector<4x64xf32>
    %627 = arith.addf %619, %626 : vector<4x64xf32>
    %c6_598 = arith.constant 6 : index
    %c0_599 = arith.constant 0 : index
    %c0_600 = arith.constant 0 : index
    %628 = vector.load %arg32[%c6_598, %c0_599, %c0_600] : memref<8x4x4xbf16, #tpu.memory_space<vmem>>, vector<1x4x4xbf16>
    %629 = vector.shape_cast %628 : vector<1x4x4xbf16> to vector<4x4xbf16>
    %cst_601 = arith.constant dense<0.000000e+00> : vector<4x64xf32>
    %630 = tpu.matmul %629, %576, %cst_601 {dimension_numbers = #tpu.dot_dimension_numbers<[1], [0], [0], [1], [0, 0, 1, 1], [], []>} : vector<4x4xbf16>, vector<4x64xbf16>, vector<4x64xf32> -> vector<4x64xf32>
    %631 = arith.truncf %630 : vector<4x64xf32> to vector<4x64xbf16>
    %c7_602 = arith.constant 7 : index
    %c0_603 = arith.constant 0 : index
    %c0_604 = arith.constant 0 : index
    %632 = vector.load %arg30[%c7_602, %c0_603, %c0_604] : memref<9x64x64xbf16, #tpu.memory_space<vmem>>, vector<1x64x64xbf16>
    %633 = vector.shape_cast %632 : vector<1x64x64xbf16> to vector<64x64xbf16>
    %cst_605 = arith.constant dense<0.000000e+00> : vector<4x64xf32>
    %634 = tpu.matmul %631, %633, %cst_605 {dimension_numbers = #tpu.dot_dimension_numbers<[1], [0], [0], [1], [0, 0, 1, 1], [], []>} : vector<4x64xbf16>, vector<64x64xbf16>, vector<4x64xf32> -> vector<4x64xf32>
    %635 = arith.addf %627, %634 : vector<4x64xf32>
    %c7_606 = arith.constant 7 : index
    %c0_607 = arith.constant 0 : index
    %c0_608 = arith.constant 0 : index
    %636 = vector.load %arg32[%c7_606, %c0_607, %c0_608] : memref<8x4x4xbf16, #tpu.memory_space<vmem>>, vector<1x4x4xbf16>
    %637 = vector.shape_cast %636 : vector<1x4x4xbf16> to vector<4x4xbf16>
    %cst_609 = arith.constant dense<0.000000e+00> : vector<4x64xf32>
    %638 = tpu.matmul %637, %576, %cst_609 {dimension_numbers = #tpu.dot_dimension_numbers<[1], [0], [0], [1], [0, 0, 1, 1], [], []>} : vector<4x4xbf16>, vector<4x64xbf16>, vector<4x64xf32> -> vector<4x64xf32>
    %639 = arith.truncf %638 : vector<4x64xf32> to vector<4x64xbf16>
    %c8_610 = arith.constant 8 : index
    %c0_611 = arith.constant 0 : index
    %c0_612 = arith.constant 0 : index
    %640 = vector.load %arg30[%c8_610, %c0_611, %c0_612] : memref<9x64x64xbf16, #tpu.memory_space<vmem>>, vector<1x64x64xbf16>
    %641 = vector.shape_cast %640 : vector<1x64x64xbf16> to vector<64x64xbf16>
    %cst_613 = arith.constant dense<0.000000e+00> : vector<4x64xf32>
    %642 = tpu.matmul %639, %641, %cst_613 {dimension_numbers = #tpu.dot_dimension_numbers<[1], [0], [0], [1], [0, 0, 1, 1], [], []>} : vector<4x64xbf16>, vector<64x64xbf16>, vector<4x64xf32> -> vector<4x64xf32>
    %643 = arith.addf %635, %642 : vector<4x64xf32>
    %c0_614 = arith.constant 0 : index
    %c0_615 = arith.constant 0 : index
    %644 = vector.load %arg31[%c0_614, %c0_615] : memref<1x64xf32, #tpu.memory_space<vmem>>, vector<1x64xf32>
    %645 = vector.broadcast %644 : vector<1x64xf32> to vector<4x64xf32>
    %646 = arith.addf %643, %645 : vector<4x64xf32>
    %647 = arith.addf %646, %503 : vector<4x64xf32>
    %cst_616 = arith.constant 0.000000e+00 : f32
    %648 = vector.broadcast %cst_616 : f32 to vector<4x64xf32>
    %649 = arith.maximumf %647, %648 : vector<4x64xf32>
    %650 = arith.truncf %649 : vector<4x64xf32> to vector<4x64xbf16>
    %c0_617 = arith.constant 0 : index
    %c0_618 = arith.constant 0 : index
    %c0_619 = arith.constant 0 : index
    %651 = vector.load %arg35[%c0_617, %c0_618, %c0_619] : memref<1x1x4xbf16, #tpu.memory_space<vmem>>, vector<1x1x4xbf16>
    %652 = vector.shape_cast %651 : vector<1x1x4xbf16> to vector<1x4xbf16>
    %cst_620 = arith.constant dense<0.000000e+00> : vector<1x64xf32>
    %653 = tpu.matmul %652, %650, %cst_620 {dimension_numbers = #tpu.dot_dimension_numbers<[1], [0], [0], [1], [0, 0, 1, 1], [], []>} : vector<1x4xbf16>, vector<4x64xbf16>, vector<1x64xf32> -> vector<1x64xf32>
    %654 = arith.truncf %653 : vector<1x64xf32> to vector<1x64xbf16>
    %c0_621 = arith.constant 0 : index
    %c0_622 = arith.constant 0 : index
    %c0_623 = arith.constant 0 : index
    %655 = vector.load %arg33[%c0_621, %c0_622, %c0_623] : memref<1x64x128xbf16, #tpu.memory_space<vmem>>, vector<1x64x128xbf16>
    %656 = vector.shape_cast %655 : vector<1x64x128xbf16> to vector<64x128xbf16>
    %cst_624 = arith.constant dense<0.000000e+00> : vector<1x128xf32>
    %657 = tpu.matmul %654, %656, %cst_624 {dimension_numbers = #tpu.dot_dimension_numbers<[1], [0], [0], [1], [0, 0, 1, 1], [], []>} : vector<1x64xbf16>, vector<64x128xbf16>, vector<1x128xf32> -> vector<1x128xf32>
    %c0_625 = arith.constant 0 : index
    %c0_626 = arith.constant 0 : index
    %658 = vector.load %arg34[%c0_625, %c0_626] : memref<1x128xf32, #tpu.memory_space<vmem>>, vector<1x128xf32>
    %659 = arith.addf %657, %658 : vector<1x128xf32>
    %c0_627 = arith.constant 0 : index
    %c0_628 = arith.constant 0 : index
    %c0_629 = arith.constant 0 : index
    %660 = vector.load %arg38[%c0_627, %c0_628, %c0_629] : memref<4x1x4xbf16, #tpu.memory_space<vmem>>, vector<1x1x4xbf16>
    %661 = vector.shape_cast %660 : vector<1x1x4xbf16> to vector<1x4xbf16>
    %cst_630 = arith.constant dense<0.000000e+00> : vector<1x64xf32>
    %662 = tpu.matmul %661, %650, %cst_630 {dimension_numbers = #tpu.dot_dimension_numbers<[1], [0], [0], [1], [0, 0, 1, 1], [], []>} : vector<1x4xbf16>, vector<4x64xbf16>, vector<1x64xf32> -> vector<1x64xf32>
    %663 = arith.truncf %662 : vector<1x64xf32> to vector<1x64xbf16>
    %c4_631 = arith.constant 4 : index
    %c0_632 = arith.constant 0 : index
    %c0_633 = arith.constant 0 : index
    %664 = vector.load %arg36[%c4_631, %c0_632, %c0_633] : memref<9x64x128xbf16, #tpu.memory_space<vmem>>, vector<1x64x128xbf16>
    %665 = vector.shape_cast %664 : vector<1x64x128xbf16> to vector<64x128xbf16>
    %cst_634 = arith.constant dense<0.000000e+00> : vector<1x128xf32>
    %666 = tpu.matmul %663, %665, %cst_634 {dimension_numbers = #tpu.dot_dimension_numbers<[1], [0], [0], [1], [0, 0, 1, 1], [], []>} : vector<1x64xbf16>, vector<64x128xbf16>, vector<1x128xf32> -> vector<1x128xf32>
    %c1_635 = arith.constant 1 : index
    %c0_636 = arith.constant 0 : index
    %c0_637 = arith.constant 0 : index
    %667 = vector.load %arg38[%c1_635, %c0_636, %c0_637] : memref<4x1x4xbf16, #tpu.memory_space<vmem>>, vector<1x1x4xbf16>
    %668 = vector.shape_cast %667 : vector<1x1x4xbf16> to vector<1x4xbf16>
    %cst_638 = arith.constant dense<0.000000e+00> : vector<1x64xf32>
    %669 = tpu.matmul %668, %650, %cst_638 {dimension_numbers = #tpu.dot_dimension_numbers<[1], [0], [0], [1], [0, 0, 1, 1], [], []>} : vector<1x4xbf16>, vector<4x64xbf16>, vector<1x64xf32> -> vector<1x64xf32>
    %670 = arith.truncf %669 : vector<1x64xf32> to vector<1x64xbf16>
    %c5_639 = arith.constant 5 : index
    %c0_640 = arith.constant 0 : index
    %c0_641 = arith.constant 0 : index
    %671 = vector.load %arg36[%c5_639, %c0_640, %c0_641] : memref<9x64x128xbf16, #tpu.memory_space<vmem>>, vector<1x64x128xbf16>
    %672 = vector.shape_cast %671 : vector<1x64x128xbf16> to vector<64x128xbf16>
    %cst_642 = arith.constant dense<0.000000e+00> : vector<1x128xf32>
    %673 = tpu.matmul %670, %672, %cst_642 {dimension_numbers = #tpu.dot_dimension_numbers<[1], [0], [0], [1], [0, 0, 1, 1], [], []>} : vector<1x64xbf16>, vector<64x128xbf16>, vector<1x128xf32> -> vector<1x128xf32>
    %674 = arith.addf %666, %673 : vector<1x128xf32>
    %c2_643 = arith.constant 2 : index
    %c0_644 = arith.constant 0 : index
    %c0_645 = arith.constant 0 : index
    %675 = vector.load %arg38[%c2_643, %c0_644, %c0_645] : memref<4x1x4xbf16, #tpu.memory_space<vmem>>, vector<1x1x4xbf16>
    %676 = vector.shape_cast %675 : vector<1x1x4xbf16> to vector<1x4xbf16>
    %cst_646 = arith.constant dense<0.000000e+00> : vector<1x64xf32>
    %677 = tpu.matmul %676, %650, %cst_646 {dimension_numbers = #tpu.dot_dimension_numbers<[1], [0], [0], [1], [0, 0, 1, 1], [], []>} : vector<1x4xbf16>, vector<4x64xbf16>, vector<1x64xf32> -> vector<1x64xf32>
    %678 = arith.truncf %677 : vector<1x64xf32> to vector<1x64xbf16>
    %c7_647 = arith.constant 7 : index
    %c0_648 = arith.constant 0 : index
    %c0_649 = arith.constant 0 : index
    %679 = vector.load %arg36[%c7_647, %c0_648, %c0_649] : memref<9x64x128xbf16, #tpu.memory_space<vmem>>, vector<1x64x128xbf16>
    %680 = vector.shape_cast %679 : vector<1x64x128xbf16> to vector<64x128xbf16>
    %cst_650 = arith.constant dense<0.000000e+00> : vector<1x128xf32>
    %681 = tpu.matmul %678, %680, %cst_650 {dimension_numbers = #tpu.dot_dimension_numbers<[1], [0], [0], [1], [0, 0, 1, 1], [], []>} : vector<1x64xbf16>, vector<64x128xbf16>, vector<1x128xf32> -> vector<1x128xf32>
    %682 = arith.addf %674, %681 : vector<1x128xf32>
    %c3_651 = arith.constant 3 : index
    %c0_652 = arith.constant 0 : index
    %c0_653 = arith.constant 0 : index
    %683 = vector.load %arg38[%c3_651, %c0_652, %c0_653] : memref<4x1x4xbf16, #tpu.memory_space<vmem>>, vector<1x1x4xbf16>
    %684 = vector.shape_cast %683 : vector<1x1x4xbf16> to vector<1x4xbf16>
    %cst_654 = arith.constant dense<0.000000e+00> : vector<1x64xf32>
    %685 = tpu.matmul %684, %650, %cst_654 {dimension_numbers = #tpu.dot_dimension_numbers<[1], [0], [0], [1], [0, 0, 1, 1], [], []>} : vector<1x4xbf16>, vector<4x64xbf16>, vector<1x64xf32> -> vector<1x64xf32>
    %686 = arith.truncf %685 : vector<1x64xf32> to vector<1x64xbf16>
    %c8_655 = arith.constant 8 : index
    %c0_656 = arith.constant 0 : index
    %c0_657 = arith.constant 0 : index
    %687 = vector.load %arg36[%c8_655, %c0_656, %c0_657] : memref<9x64x128xbf16, #tpu.memory_space<vmem>>, vector<1x64x128xbf16>
    %688 = vector.shape_cast %687 : vector<1x64x128xbf16> to vector<64x128xbf16>
    %cst_658 = arith.constant dense<0.000000e+00> : vector<1x128xf32>
    %689 = tpu.matmul %686, %688, %cst_658 {dimension_numbers = #tpu.dot_dimension_numbers<[1], [0], [0], [1], [0, 0, 1, 1], [], []>} : vector<1x64xbf16>, vector<64x128xbf16>, vector<1x128xf32> -> vector<1x128xf32>
    %690 = arith.addf %682, %689 : vector<1x128xf32>
    %c0_659 = arith.constant 0 : index
    %c0_660 = arith.constant 0 : index
    %691 = vector.load %arg37[%c0_659, %c0_660] : memref<1x128xf32, #tpu.memory_space<vmem>>, vector<1x128xf32>
    %692 = arith.addf %690, %691 : vector<1x128xf32>
    %cst_661 = arith.constant 0.000000e+00 : f32
    %693 = vector.broadcast %cst_661 : f32 to vector<1x128xf32>
    %694 = arith.maximumf %692, %693 : vector<1x128xf32>
    %695 = arith.truncf %694 : vector<1x128xf32> to vector<1x128xbf16>
    %c4_662 = arith.constant 4 : index
    %c0_663 = arith.constant 0 : index
    %c0_664 = arith.constant 0 : index
    %696 = vector.load %arg39[%c4_662, %c0_663, %c0_664] : memref<9x128x128xbf16, #tpu.memory_space<vmem>>, vector<1x128x128xbf16>
    %697 = vector.shape_cast %696 : vector<1x128x128xbf16> to vector<128x128xbf16>
    %cst_665 = arith.constant dense<0.000000e+00> : vector<1x128xf32>
    %698 = tpu.matmul %695, %697, %cst_665 {dimension_numbers = #tpu.dot_dimension_numbers<[1], [0], [0], [1], [0, 0, 1, 1], [], []>} : vector<1x128xbf16>, vector<128x128xbf16>, vector<1x128xf32> -> vector<1x128xf32>
    %c0_666 = arith.constant 0 : index
    %c0_667 = arith.constant 0 : index
    %699 = vector.load %arg40[%c0_666, %c0_667] : memref<1x128xf32, #tpu.memory_space<vmem>>, vector<1x128xf32>
    %700 = arith.addf %698, %699 : vector<1x128xf32>
    %701 = arith.addf %700, %659 : vector<1x128xf32>
    %cst_668 = arith.constant 0.000000e+00 : f32
    %702 = vector.broadcast %cst_668 : f32 to vector<1x128xf32>
    %703 = arith.maximumf %701, %702 : vector<1x128xf32>
    %704 = arith.truncf %703 : vector<1x128xf32> to vector<1x128xbf16>
    %705 = arith.extf %704 : vector<1x128xbf16> to vector<1x128xf32>
    %c4_669 = arith.constant 4 : index
    %c0_670 = arith.constant 0 : index
    %c0_671 = arith.constant 0 : index
    %706 = vector.load %arg41[%c4_669, %c0_670, %c0_671] : memref<9x128x128xbf16, #tpu.memory_space<vmem>>, vector<1x128x128xbf16>
    %707 = vector.shape_cast %706 : vector<1x128x128xbf16> to vector<128x128xbf16>
    %cst_672 = arith.constant dense<0.000000e+00> : vector<1x128xf32>
    %708 = tpu.matmul %704, %707, %cst_672 {dimension_numbers = #tpu.dot_dimension_numbers<[1], [0], [0], [1], [0, 0, 1, 1], [], []>} : vector<1x128xbf16>, vector<128x128xbf16>, vector<1x128xf32> -> vector<1x128xf32>
    %c0_673 = arith.constant 0 : index
    %c0_674 = arith.constant 0 : index
    %709 = vector.load %arg42[%c0_673, %c0_674] : memref<1x128xf32, #tpu.memory_space<vmem>>, vector<1x128xf32>
    %710 = arith.addf %708, %709 : vector<1x128xf32>
    %cst_675 = arith.constant 0.000000e+00 : f32
    %711 = vector.broadcast %cst_675 : f32 to vector<1x128xf32>
    %712 = arith.maximumf %710, %711 : vector<1x128xf32>
    %713 = arith.truncf %712 : vector<1x128xf32> to vector<1x128xbf16>
    %c4_676 = arith.constant 4 : index
    %c0_677 = arith.constant 0 : index
    %c0_678 = arith.constant 0 : index
    %714 = vector.load %arg43[%c4_676, %c0_677, %c0_678] : memref<9x128x128xbf16, #tpu.memory_space<vmem>>, vector<1x128x128xbf16>
    %715 = vector.shape_cast %714 : vector<1x128x128xbf16> to vector<128x128xbf16>
    %cst_679 = arith.constant dense<0.000000e+00> : vector<1x128xf32>
    %716 = tpu.matmul %713, %715, %cst_679 {dimension_numbers = #tpu.dot_dimension_numbers<[1], [0], [0], [1], [0, 0, 1, 1], [], []>} : vector<1x128xbf16>, vector<128x128xbf16>, vector<1x128xf32> -> vector<1x128xf32>
    %c0_680 = arith.constant 0 : index
    %c0_681 = arith.constant 0 : index
    %717 = vector.load %arg44[%c0_680, %c0_681] : memref<1x128xf32, #tpu.memory_space<vmem>>, vector<1x128xf32>
    %718 = arith.addf %716, %717 : vector<1x128xf32>
    %719 = arith.addf %718, %705 : vector<1x128xf32>
    %cst_682 = arith.constant 0.000000e+00 : f32
    %720 = vector.broadcast %cst_682 : f32 to vector<1x128xf32>
    %721 = arith.maximumf %719, %720 : vector<1x128xf32>
    %722 = arith.truncf %721 : vector<1x128xf32> to vector<1x128xbf16>
    %c0_683 = arith.constant 0 : index
    %c0_684 = arith.constant 0 : index
    %c0_685 = arith.constant 0 : index
    %723 = vector.load %arg45[%c0_683, %c0_684, %c0_685] : memref<1x128x256xbf16, #tpu.memory_space<vmem>>, vector<1x128x256xbf16>
    %724 = vector.shape_cast %723 : vector<1x128x256xbf16> to vector<128x256xbf16>
    %cst_686 = arith.constant dense<0.000000e+00> : vector<1x256xf32>
    %725 = tpu.matmul %722, %724, %cst_686 {dimension_numbers = #tpu.dot_dimension_numbers<[1], [0], [0], [1], [0, 0, 1, 1], [], []>} : vector<1x128xbf16>, vector<128x256xbf16>, vector<1x256xf32> -> vector<1x256xf32>
    %c0_687 = arith.constant 0 : index
    %c0_688 = arith.constant 0 : index
    %726 = vector.load %arg46[%c0_687, %c0_688] : memref<1x256xf32, #tpu.memory_space<vmem>>, vector<1x256xf32>
    %727 = arith.addf %725, %726 : vector<1x256xf32>
    %c4_689 = arith.constant 4 : index
    %c0_690 = arith.constant 0 : index
    %c0_691 = arith.constant 0 : index
    %728 = vector.load %arg47[%c4_689, %c0_690, %c0_691] : memref<9x128x256xbf16, #tpu.memory_space<vmem>>, vector<1x128x256xbf16>
    %729 = vector.shape_cast %728 : vector<1x128x256xbf16> to vector<128x256xbf16>
    %cst_692 = arith.constant dense<0.000000e+00> : vector<1x256xf32>
    %730 = tpu.matmul %722, %729, %cst_692 {dimension_numbers = #tpu.dot_dimension_numbers<[1], [0], [0], [1], [0, 0, 1, 1], [], []>} : vector<1x128xbf16>, vector<128x256xbf16>, vector<1x256xf32> -> vector<1x256xf32>
    %c0_693 = arith.constant 0 : index
    %c0_694 = arith.constant 0 : index
    %731 = vector.load %arg48[%c0_693, %c0_694] : memref<1x256xf32, #tpu.memory_space<vmem>>, vector<1x256xf32>
    %732 = arith.addf %730, %731 : vector<1x256xf32>
    %cst_695 = arith.constant 0.000000e+00 : f32
    %733 = vector.broadcast %cst_695 : f32 to vector<1x256xf32>
    %734 = arith.maximumf %732, %733 : vector<1x256xf32>
    %735 = arith.truncf %734 : vector<1x256xf32> to vector<1x256xbf16>
    %c4_696 = arith.constant 4 : index
    %c0_697 = arith.constant 0 : index
    %c0_698 = arith.constant 0 : index
    %736 = vector.load %arg49[%c4_696, %c0_697, %c0_698] : memref<9x256x256xbf16, #tpu.memory_space<vmem>>, vector<1x256x256xbf16>
    %737 = vector.shape_cast %736 : vector<1x256x256xbf16> to vector<256x256xbf16>
    %cst_699 = arith.constant dense<0.000000e+00> : vector<1x256xf32>
    %738 = tpu.matmul %735, %737, %cst_699 {dimension_numbers = #tpu.dot_dimension_numbers<[1], [0], [0], [1], [0, 0, 1, 1], [], []>} : vector<1x256xbf16>, vector<256x256xbf16>, vector<1x256xf32> -> vector<1x256xf32>
    %c0_700 = arith.constant 0 : index
    %c0_701 = arith.constant 0 : index
    %739 = vector.load %arg50[%c0_700, %c0_701] : memref<1x256xf32, #tpu.memory_space<vmem>>, vector<1x256xf32>
    %740 = arith.addf %738, %739 : vector<1x256xf32>
    %741 = arith.addf %740, %727 : vector<1x256xf32>
    %cst_702 = arith.constant 0.000000e+00 : f32
    %742 = vector.broadcast %cst_702 : f32 to vector<1x256xf32>
    %743 = arith.maximumf %741, %742 : vector<1x256xf32>
    %744 = arith.truncf %743 : vector<1x256xf32> to vector<1x256xbf16>
    %745 = arith.extf %744 : vector<1x256xbf16> to vector<1x256xf32>
    %c4_703 = arith.constant 4 : index
    %c0_704 = arith.constant 0 : index
    %c0_705 = arith.constant 0 : index
    %746 = vector.load %arg51[%c4_703, %c0_704, %c0_705] : memref<9x256x256xbf16, #tpu.memory_space<vmem>>, vector<1x256x256xbf16>
    %747 = vector.shape_cast %746 : vector<1x256x256xbf16> to vector<256x256xbf16>
    %cst_706 = arith.constant dense<0.000000e+00> : vector<1x256xf32>
    %748 = tpu.matmul %744, %747, %cst_706 {dimension_numbers = #tpu.dot_dimension_numbers<[1], [0], [0], [1], [0, 0, 1, 1], [], []>} : vector<1x256xbf16>, vector<256x256xbf16>, vector<1x256xf32> -> vector<1x256xf32>
    %c0_707 = arith.constant 0 : index
    %c0_708 = arith.constant 0 : index
    %749 = vector.load %arg52[%c0_707, %c0_708] : memref<1x256xf32, #tpu.memory_space<vmem>>, vector<1x256xf32>
    %750 = arith.addf %748, %749 : vector<1x256xf32>
    %cst_709 = arith.constant 0.000000e+00 : f32
    %751 = vector.broadcast %cst_709 : f32 to vector<1x256xf32>
    %752 = arith.maximumf %750, %751 : vector<1x256xf32>
    %753 = arith.truncf %752 : vector<1x256xf32> to vector<1x256xbf16>
    %c4_710 = arith.constant 4 : index
    %c0_711 = arith.constant 0 : index
    %c0_712 = arith.constant 0 : index
    %754 = vector.load %arg53[%c4_710, %c0_711, %c0_712] : memref<9x256x256xbf16, #tpu.memory_space<vmem>>, vector<1x256x256xbf16>
    %755 = vector.shape_cast %754 : vector<1x256x256xbf16> to vector<256x256xbf16>
    %cst_713 = arith.constant dense<0.000000e+00> : vector<1x256xf32>
    %756 = tpu.matmul %753, %755, %cst_713 {dimension_numbers = #tpu.dot_dimension_numbers<[1], [0], [0], [1], [0, 0, 1, 1], [], []>} : vector<1x256xbf16>, vector<256x256xbf16>, vector<1x256xf32> -> vector<1x256xf32>
    %c0_714 = arith.constant 0 : index
    %c0_715 = arith.constant 0 : index
    %757 = vector.load %arg54[%c0_714, %c0_715] : memref<1x256xf32, #tpu.memory_space<vmem>>, vector<1x256xf32>
    %758 = arith.addf %756, %757 : vector<1x256xf32>
    %759 = arith.addf %758, %745 : vector<1x256xf32>
    %cst_716 = arith.constant 0.000000e+00 : f32
    %760 = vector.broadcast %cst_716 : f32 to vector<1x256xf32>
    %761 = arith.maximumf %759, %760 : vector<1x256xf32>
    %762 = arith.truncf %761 : vector<1x256xf32> to vector<1x256xbf16>
    %763 = arith.extf %762 : vector<1x256xbf16> to vector<1x256xf32>
    %cst_717 = arith.constant dense<0.000000e+00> : vector<256xf32>
    %764 = vector.multi_reduction <add>, %763, %cst_717 [0] : vector<1x256xf32> to vector<256xf32>
    %765 = vector.shape_cast %764 : vector<256xf32> to vector<1x256xf32>
    %cst_718 = arith.constant 1.000000e+00 : f32
    %766 = vector.broadcast %cst_718 : f32 to vector<1x256xf32>
    %767 = arith.mulf %765, %766 : vector<1x256xf32>
    %768 = arith.truncf %767 : vector<1x256xf32> to vector<1x256xbf16>
    %c0_719 = arith.constant 0 : index
    %c0_720 = arith.constant 0 : index
    %769 = vector.load %arg55[%c0_719, %c0_720] : memref<256x64xbf16, #tpu.memory_space<vmem>>, vector<256x64xbf16>
    %cst_721 = arith.constant dense<0.000000e+00> : vector<1x64xf32>
    %770 = tpu.matmul %768, %769, %cst_721 {dimension_numbers = #tpu.dot_dimension_numbers<[1], [0], [0], [1], [0, 0, 1, 1], [], []>} : vector<1x256xbf16>, vector<256x64xbf16>, vector<1x64xf32> -> vector<1x64xf32>
    %c0_722 = arith.constant 0 : index
    %c0_723 = arith.constant 0 : index
    %c0_724 = arith.constant 0 : index
    %771 = vector.load %arg2[%c0_722, %c0_723, %c0_724] : memref<1x1x8xf32, #tpu.memory_space<vmem>>, vector<1x1x8xf32>
    %772 = vector.shape_cast %771 : vector<1x1x8xf32> to vector<1x8xf32>
    %773 = arith.truncf %772 : vector<1x8xf32> to vector<1x8xbf16>
    %c0_725 = arith.constant 0 : index
    %c0_726 = arith.constant 0 : index
    %774 = vector.load %arg56[%c0_725, %c0_726] : memref<8x64xbf16, #tpu.memory_space<vmem>>, vector<8x64xbf16>
    %cst_727 = arith.constant dense<0.000000e+00> : vector<1x64xf32>
    %775 = tpu.matmul %773, %774, %cst_727 {dimension_numbers = #tpu.dot_dimension_numbers<[1], [0], [0], [1], [0, 0, 1, 1], [], []>} : vector<1x8xbf16>, vector<8x64xbf16>, vector<1x64xf32> -> vector<1x64xf32>
    %776 = arith.addf %770, %775 : vector<1x64xf32>
    %c0_728 = arith.constant 0 : index
    %c0_729 = arith.constant 0 : index
    %777 = vector.load %arg57[%c0_728, %c0_729] : memref<1x64xf32, #tpu.memory_space<vmem>>, vector<1x64xf32>
    %778 = arith.addf %776, %777 : vector<1x64xf32>
    %cst_730 = arith.constant 0.000000e+00 : f32
    %779 = vector.broadcast %cst_730 : f32 to vector<1x64xf32>
    %780 = arith.maximumf %778, %779 : vector<1x64xf32>
    %781 = arith.truncf %780 : vector<1x64xf32> to vector<1x64xbf16>
    %c0_731 = arith.constant 0 : index
    %c0_732 = arith.constant 0 : index
    %782 = vector.load %arg58[%c0_731, %c0_732] : memref<64x4xbf16, #tpu.memory_space<vmem>>, vector<64x4xbf16>
    %cst_733 = arith.constant dense<0.000000e+00> : vector<1x4xf32>
    %783 = tpu.matmul %781, %782, %cst_733 {dimension_numbers = #tpu.dot_dimension_numbers<[1], [0], [0], [1], [0, 0, 1, 1], [], []>} : vector<1x64xbf16>, vector<64x4xbf16>, vector<1x4xf32> -> vector<1x4xf32>
    %c0_734 = arith.constant 0 : index
    %c0_735 = arith.constant 0 : index
    %784 = vector.load %arg59[%c0_734, %c0_735] : memref<1x4xf32, #tpu.memory_space<vmem>>, vector<1x4xf32>
    %785 = arith.addf %783, %784 : vector<1x4xf32>
    %c0_736 = arith.constant 0 : index
    %c0_737 = arith.constant 0 : index
    %c0_738 = arith.constant 0 : index
    %786 = vector.load %arg60[%c0_736, %c0_737, %c0_738] : memref<1x1x4xf32, #tpu.memory_space<vmem>>, vector<1x1x4xf32>
    %787 = vector.shape_cast %786 : vector<1x1x4xf32> to vector<1x4xf32>
    %788 = vector.shape_cast %785 : vector<1x4xf32> to vector<1x1x4xf32>
    tpu.vector_store %arg60[%c0_736, %c0_737, %c0_738], %788 {strides = array<i32>} : memref<1x1x4xf32, #tpu.memory_space<vmem>>, vector<1x1x4xf32>,
    return
  }
  func.func @transform_0(%arg0: i32) -> (i32, i32, i32) {
    %c0_i32 = arith.constant 0 : i32
    %c0_i32_0 = arith.constant 0 : i32
    %c0_i32_1 = arith.constant 0 : i32
    return %arg0, %c0_i32, %c0_i32_0 : i32, i32, i32
  }
  func.func @transform_1(%arg0: i32) -> (i32, i32, i32) {
    %c0_i32 = arith.constant 0 : i32
    %c0_i32_0 = arith.constant 0 : i32
    %c0_i32_1 = arith.constant 0 : i32
    return %arg0, %c0_i32, %c0_i32_0 : i32, i32, i32
  }
  func.func @transform_2(%arg0: i32) -> (i32, i32) {
    %c0_i32 = arith.constant 0 : i32
    %c0_i32_0 = arith.constant 0 : i32
    %c0_i32_1 = arith.constant 0 : i32
    return %c0_i32, %c0_i32_0 : i32, i32
  }
  func.func @transform_3(%arg0: i32) -> (i32, i32) {
    %c0_i32 = arith.constant 0 : i32
    %c0_i32_0 = arith.constant 0 : i32
    %c0_i32_1 = arith.constant 0 : i32
    return %c0_i32, %c0_i32_0 : i32, i32
  }
  func.func @transform_4(%arg0: i32) -> (i32, i32, i32) {
    %c0_i32 = arith.constant 0 : i32
    %c0_i32_0 = arith.constant 0 : i32
    %c0_i32_1 = arith.constant 0 : i32
    %c0_i32_2 = arith.constant 0 : i32
    return %c0_i32, %c0_i32_0, %c0_i32_1 : i32, i32, i32
  }
  func.func @transform_5(%arg0: i32) -> (i32, i32, i32) {
    %c0_i32 = arith.constant 0 : i32
    %c0_i32_0 = arith.constant 0 : i32
    %c0_i32_1 = arith.constant 0 : i32
    %c0_i32_2 = arith.constant 0 : i32
    return %c0_i32, %c0_i32_0, %c0_i32_1 : i32, i32, i32
  }
  func.func @transform_6(%arg0: i32) -> (i32, i32) {
    %c0_i32 = arith.constant 0 : i32
    %c0_i32_0 = arith.constant 0 : i32
    %c0_i32_1 = arith.constant 0 : i32
    return %c0_i32, %c0_i32_0 : i32, i32
  }
  func.func @transform_7(%arg0: i32) -> (i32, i32, i32) {
    %c0_i32 = arith.constant 0 : i32
    %c0_i32_0 = arith.constant 0 : i32
    %c0_i32_1 = arith.constant 0 : i32
    %c0_i32_2 = arith.constant 0 : i32
    return %c0_i32, %c0_i32_0, %c0_i32_1 : i32, i32, i32
  }
  func.func @transform_8(%arg0: i32) -> (i32, i32, i32) {
    %c0_i32 = arith.constant 0 : i32
    %c0_i32_0 = arith.constant 0 : i32
    %c0_i32_1 = arith.constant 0 : i32
    %c0_i32_2 = arith.constant 0 : i32
    return %c0_i32, %c0_i32_0, %c0_i32_1 : i32, i32, i32
  }
  func.func @transform_9(%arg0: i32) -> (i32, i32) {
    %c0_i32 = arith.constant 0 : i32
    %c0_i32_0 = arith.constant 0 : i32
    %c0_i32_1 = arith.constant 0 : i32
    return %c0_i32, %c0_i32_0 : i32, i32
  }
  func.func @transform_10(%arg0: i32) -> (i32, i32, i32) {
    %c0_i32 = arith.constant 0 : i32
    %c0_i32_0 = arith.constant 0 : i32
    %c0_i32_1 = arith.constant 0 : i32
    %c0_i32_2 = arith.constant 0 : i32
    return %c0_i32, %c0_i32_0, %c0_i32_1 : i32, i32, i32
  }
  func.func @transform_11(%arg0: i32) -> (i32, i32, i32) {
    %c0_i32 = arith.constant 0 : i32
    %c0_i32_0 = arith.constant 0 : i32
    %c0_i32_1 = arith.constant 0 : i32
    %c0_i32_2 = arith.constant 0 : i32
    return %c0_i32, %c0_i32_0, %c0_i32_1 : i32, i32, i32
  }
  func.func @transform_12(%arg0: i32) -> (i32, i32) {
    %c0_i32 = arith.constant 0 : i32
    %c0_i32_0 = arith.constant 0 : i32
    %c0_i32_1 = arith.constant 0 : i32
    return %c0_i32, %c0_i32_0 : i32, i32
  }
  func.func @transform_13(%arg0: i32) -> (i32, i32, i32) {
    %c0_i32 = arith.constant 0 : i32
    %c0_i32_0 = arith.constant 0 : i32
    %c0_i32_1 = arith.constant 0 : i32
    %c0_i32_2 = arith.constant 0 : i32
    return %c0_i32, %c0_i32_0, %c0_i32_1 : i32, i32, i32
  }
  func.func @transform_14(%arg0: i32) -> (i32, i32, i32) {
    %c0_i32 = arith.constant 0 : i32
    %c0_i32_0 = arith.constant 0 : i32
    %c0_i32_1 = arith.constant 0 : i32
    %c0_i32_2 = arith.constant 0 : i32
    return %c0_i32, %c0_i32_0, %c0_i32_1 : i32, i32, i32
  }
  func.func @transform_15(%arg0: i32) -> (i32, i32) {
    %c0_i32 = arith.constant 0 : i32
    %c0_i32_0 = arith.constant 0 : i32
    %c0_i32_1 = arith.constant 0 : i32
    return %c0_i32, %c0_i32_0 : i32, i32
  }
  func.func @transform_16(%arg0: i32) -> (i32, i32, i32) {
    %c0_i32 = arith.constant 0 : i32
    %c0_i32_0 = arith.constant 0 : i32
    %c0_i32_1 = arith.constant 0 : i32
    %c0_i32_2 = arith.constant 0 : i32
    return %c0_i32, %c0_i32_0, %c0_i32_1 : i32, i32, i32
  }
  func.func @transform_17(%arg0: i32) -> (i32, i32, i32) {
    %c0_i32 = arith.constant 0 : i32
    %c0_i32_0 = arith.constant 0 : i32
    %c0_i32_1 = arith.constant 0 : i32
    %c0_i32_2 = arith.constant 0 : i32
    return %c0_i32, %c0_i32_0, %c0_i32_1 : i32, i32, i32
  }
  func.func @transform_18(%arg0: i32) -> (i32, i32) {
    %c0_i32 = arith.constant 0 : i32
    %c0_i32_0 = arith.constant 0 : i32
    %c0_i32_1 = arith.constant 0 : i32
    return %c0_i32, %c0_i32_0 : i32, i32
  }
  func.func @transform_19(%arg0: i32) -> (i32, i32, i32) {
    %c0_i32 = arith.constant 0 : i32
    %c0_i32_0 = arith.constant 0 : i32
    %c0_i32_1 = arith.constant 0 : i32
    %c0_i32_2 = arith.constant 0 : i32
    return %c0_i32, %c0_i32_0, %c0_i32_1 : i32, i32, i32
  }
  func.func @transform_20(%arg0: i32) -> (i32, i32, i32) {
    %c0_i32 = arith.constant 0 : i32
    %c0_i32_0 = arith.constant 0 : i32
    %c0_i32_1 = arith.constant 0 : i32
    %c0_i32_2 = arith.constant 0 : i32
    return %c0_i32, %c0_i32_0, %c0_i32_1 : i32, i32, i32
  }
  func.func @transform_21(%arg0: i32) -> (i32, i32) {
    %c0_i32 = arith.constant 0 : i32
    %c0_i32_0 = arith.constant 0 : i32
    %c0_i32_1 = arith.constant 0 : i32
    return %c0_i32, %c0_i32_0 : i32, i32
  }
  func.func @transform_22(%arg0: i32) -> (i32, i32, i32) {
    %c0_i32 = arith.constant 0 : i32
    %c0_i32_0 = arith.constant 0 : i32
    %c0_i32_1 = arith.constant 0 : i32
    %c0_i32_2 = arith.constant 0 : i32
    return %c0_i32, %c0_i32_0, %c0_i32_1 : i32, i32, i32
  }
  func.func @transform_23(%arg0: i32) -> (i32, i32, i32) {
    %c0_i32 = arith.constant 0 : i32
    %c0_i32_0 = arith.constant 0 : i32
    %c0_i32_1 = arith.constant 0 : i32
    %c0_i32_2 = arith.constant 0 : i32
    return %c0_i32, %c0_i32_0, %c0_i32_1 : i32, i32, i32
  }
  func.func @transform_24(%arg0: i32) -> (i32, i32) {
    %c0_i32 = arith.constant 0 : i32
    %c0_i32_0 = arith.constant 0 : i32
    %c0_i32_1 = arith.constant 0 : i32
    return %c0_i32, %c0_i32_0 : i32, i32
  }
  func.func @transform_25(%arg0: i32) -> (i32, i32, i32) {
    %c0_i32 = arith.constant 0 : i32
    %c0_i32_0 = arith.constant 0 : i32
    %c0_i32_1 = arith.constant 0 : i32
    %c0_i32_2 = arith.constant 0 : i32
    return %c0_i32, %c0_i32_0, %c0_i32_1 : i32, i32, i32
  }
  func.func @transform_26(%arg0: i32) -> (i32, i32, i32) {
    %c0_i32 = arith.constant 0 : i32
    %c0_i32_0 = arith.constant 0 : i32
    %c0_i32_1 = arith.constant 0 : i32
    %c0_i32_2 = arith.constant 0 : i32
    return %c0_i32, %c0_i32_0, %c0_i32_1 : i32, i32, i32
  }
  func.func @transform_27(%arg0: i32) -> (i32, i32) {
    %c0_i32 = arith.constant 0 : i32
    %c0_i32_0 = arith.constant 0 : i32
    %c0_i32_1 = arith.constant 0 : i32
    return %c0_i32, %c0_i32_0 : i32, i32
  }
  func.func @transform_28(%arg0: i32) -> (i32, i32, i32) {
    %c0_i32 = arith.constant 0 : i32
    %c0_i32_0 = arith.constant 0 : i32
    %c0_i32_1 = arith.constant 0 : i32
    %c0_i32_2 = arith.constant 0 : i32
    return %c0_i32, %c0_i32_0, %c0_i32_1 : i32, i32, i32
  }
  func.func @transform_29(%arg0: i32) -> (i32, i32, i32) {
    %c0_i32 = arith.constant 0 : i32
    %c0_i32_0 = arith.constant 0 : i32
    %c0_i32_1 = arith.constant 0 : i32
    %c0_i32_2 = arith.constant 0 : i32
    return %c0_i32, %c0_i32_0, %c0_i32_1 : i32, i32, i32
  }
  func.func @transform_30(%arg0: i32) -> (i32, i32) {
    %c0_i32 = arith.constant 0 : i32
    %c0_i32_0 = arith.constant 0 : i32
    %c0_i32_1 = arith.constant 0 : i32
    return %c0_i32, %c0_i32_0 : i32, i32
  }
  func.func @transform_31(%arg0: i32) -> (i32, i32, i32) {
    %c0_i32 = arith.constant 0 : i32
    %c0_i32_0 = arith.constant 0 : i32
    %c0_i32_1 = arith.constant 0 : i32
    %c0_i32_2 = arith.constant 0 : i32
    return %c0_i32, %c0_i32_0, %c0_i32_1 : i32, i32, i32
  }
  func.func @transform_32(%arg0: i32) -> (i32, i32, i32) {
    %c0_i32 = arith.constant 0 : i32
    %c0_i32_0 = arith.constant 0 : i32
    %c0_i32_1 = arith.constant 0 : i32
    %c0_i32_2 = arith.constant 0 : i32
    return %c0_i32, %c0_i32_0, %c0_i32_1 : i32, i32, i32
  }
  func.func @transform_33(%arg0: i32) -> (i32, i32) {
    %c0_i32 = arith.constant 0 : i32
    %c0_i32_0 = arith.constant 0 : i32
    %c0_i32_1 = arith.constant 0 : i32
    return %c0_i32, %c0_i32_0 : i32, i32
  }
  func.func @transform_34(%arg0: i32) -> (i32, i32, i32) {
    %c0_i32 = arith.constant 0 : i32
    %c0_i32_0 = arith.constant 0 : i32
    %c0_i32_1 = arith.constant 0 : i32
    %c0_i32_2 = arith.constant 0 : i32
    return %c0_i32, %c0_i32_0, %c0_i32_1 : i32, i32, i32
  }
  func.func @transform_35(%arg0: i32) -> (i32, i32, i32) {
    %c0_i32 = arith.constant 0 : i32
    %c0_i32_0 = arith.constant 0 : i32
    %c0_i32_1 = arith.constant 0 : i32
    %c0_i32_2 = arith.constant 0 : i32
    return %c0_i32, %c0_i32_0, %c0_i32_1 : i32, i32, i32
  }
  func.func @transform_36(%arg0: i32) -> (i32, i32) {
    %c0_i32 = arith.constant 0 : i32
    %c0_i32_0 = arith.constant 0 : i32
    %c0_i32_1 = arith.constant 0 : i32
    return %c0_i32, %c0_i32_0 : i32, i32
  }
  func.func @transform_37(%arg0: i32) -> (i32, i32, i32) {
    %c0_i32 = arith.constant 0 : i32
    %c0_i32_0 = arith.constant 0 : i32
    %c0_i32_1 = arith.constant 0 : i32
    %c0_i32_2 = arith.constant 0 : i32
    return %c0_i32, %c0_i32_0, %c0_i32_1 : i32, i32, i32
  }
  func.func @transform_38(%arg0: i32) -> (i32, i32, i32) {
    %c0_i32 = arith.constant 0 : i32
    %c0_i32_0 = arith.constant 0 : i32
    %c0_i32_1 = arith.constant 0 : i32
    %c0_i32_2 = arith.constant 0 : i32
    return %c0_i32, %c0_i32_0, %c0_i32_1 : i32, i32, i32
  }
  func.func @transform_39(%arg0: i32) -> (i32, i32) {
    %c0_i32 = arith.constant 0 : i32
    %c0_i32_0 = arith.constant 0 : i32
    %c0_i32_1 = arith.constant 0 : i32
    return %c0_i32, %c0_i32_0 : i32, i32
  }
  func.func @transform_40(%arg0: i32) -> (i32, i32, i32) {
    %c0_i32 = arith.constant 0 : i32
    %c0_i32_0 = arith.constant 0 : i32
    %c0_i32_1 = arith.constant 0 : i32
    %c0_i32_2 = arith.constant 0 : i32
    return %c0_i32, %c0_i32_0, %c0_i32_1 : i32, i32, i32
  }
  func.func @transform_41(%arg0: i32) -> (i32, i32) {
    %c0_i32 = arith.constant 0 : i32
    %c0_i32_0 = arith.constant 0 : i32
    %c0_i32_1 = arith.constant 0 : i32
    return %c0_i32, %c0_i32_0 : i32, i32
  }
  func.func @transform_42(%arg0: i32) -> (i32, i32, i32) {
    %c0_i32 = arith.constant 0 : i32
    %c0_i32_0 = arith.constant 0 : i32
    %c0_i32_1 = arith.constant 0 : i32
    %c0_i32_2 = arith.constant 0 : i32
    return %c0_i32, %c0_i32_0, %c0_i32_1 : i32, i32, i32
  }
  func.func @transform_43(%arg0: i32) -> (i32, i32) {
    %c0_i32 = arith.constant 0 : i32
    %c0_i32_0 = arith.constant 0 : i32
    %c0_i32_1 = arith.constant 0 : i32
    return %c0_i32, %c0_i32_0 : i32, i32
  }
  func.func @transform_44(%arg0: i32) -> (i32, i32, i32) {
    %c0_i32 = arith.constant 0 : i32
    %c0_i32_0 = arith.constant 0 : i32
    %c0_i32_1 = arith.constant 0 : i32
    %c0_i32_2 = arith.constant 0 : i32
    return %c0_i32, %c0_i32_0, %c0_i32_1 : i32, i32, i32
  }
  func.func @transform_45(%arg0: i32) -> (i32, i32) {
    %c0_i32 = arith.constant 0 : i32
    %c0_i32_0 = arith.constant 0 : i32
    %c0_i32_1 = arith.constant 0 : i32
    return %c0_i32, %c0_i32_0 : i32, i32
  }
  func.func @transform_46(%arg0: i32) -> (i32, i32, i32) {
    %c0_i32 = arith.constant 0 : i32
    %c0_i32_0 = arith.constant 0 : i32
    %c0_i32_1 = arith.constant 0 : i32
    %c0_i32_2 = arith.constant 0 : i32
    return %c0_i32, %c0_i32_0, %c0_i32_1 : i32, i32, i32
  }
  func.func @transform_47(%arg0: i32) -> (i32, i32) {
    %c0_i32 = arith.constant 0 : i32
    %c0_i32_0 = arith.constant 0 : i32
    %c0_i32_1 = arith.constant 0 : i32
    return %c0_i32, %c0_i32_0 : i32, i32
  }
  func.func @transform_48(%arg0: i32) -> (i32, i32, i32) {
    %c0_i32 = arith.constant 0 : i32
    %c0_i32_0 = arith.constant 0 : i32
    %c0_i32_1 = arith.constant 0 : i32
    %c0_i32_2 = arith.constant 0 : i32
    return %c0_i32, %c0_i32_0, %c0_i32_1 : i32, i32, i32
  }
  func.func @transform_49(%arg0: i32) -> (i32, i32) {
    %c0_i32 = arith.constant 0 : i32
    %c0_i32_0 = arith.constant 0 : i32
    %c0_i32_1 = arith.constant 0 : i32
    return %c0_i32, %c0_i32_0 : i32, i32
  }
  func.func @transform_50(%arg0: i32) -> (i32, i32, i32) {
    %c0_i32 = arith.constant 0 : i32
    %c0_i32_0 = arith.constant 0 : i32
    %c0_i32_1 = arith.constant 0 : i32
    %c0_i32_2 = arith.constant 0 : i32
    return %c0_i32, %c0_i32_0, %c0_i32_1 : i32, i32, i32
  }
  func.func @transform_51(%arg0: i32) -> (i32, i32) {
    %c0_i32 = arith.constant 0 : i32
    %c0_i32_0 = arith.constant 0 : i32
    %c0_i32_1 = arith.constant 0 : i32
    return %c0_i32, %c0_i32_0 : i32, i32
  }
  func.func @transform_52(%arg0: i32) -> (i32, i32, i32) {
    %c0_i32 = arith.constant 0 : i32
    %c0_i32_0 = arith.constant 0 : i32
    %c0_i32_1 = arith.constant 0 : i32
    %c0_i32_2 = arith.constant 0 : i32
    return %c0_i32, %c0_i32_0, %c0_i32_1 : i32, i32, i32
  }
  func.func @transform_53(%arg0: i32) -> (i32, i32) {
    %c0_i32 = arith.constant 0 : i32
    %c0_i32_0 = arith.constant 0 : i32
    %c0_i32_1 = arith.constant 0 : i32
    return %c0_i32, %c0_i32_0 : i32, i32
  }
  func.func @transform_54(%arg0: i32) -> (i32, i32) {
    %c0_i32 = arith.constant 0 : i32
    %c0_i32_0 = arith.constant 0 : i32
    %c0_i32_1 = arith.constant 0 : i32
    return %c0_i32, %c0_i32_0 : i32, i32
  }
  func.func @transform_55(%arg0: i32) -> (i32, i32) {
    %c0_i32 = arith.constant 0 : i32
    %c0_i32_0 = arith.constant 0 : i32
    %c0_i32_1 = arith.constant 0 : i32
    return %c0_i32, %c0_i32_0 : i32, i32
  }
  func.func @transform_56(%arg0: i32) -> (i32, i32) {
    %c0_i32 = arith.constant 0 : i32
    %c0_i32_0 = arith.constant 0 : i32
    %c0_i32_1 = arith.constant 0 : i32
    return %c0_i32, %c0_i32_0 : i32, i32
  }
  func.func @transform_57(%arg0: i32) -> (i32, i32) {
    %c0_i32 = arith.constant 0 : i32
    %c0_i32_0 = arith.constant 0 : i32
    %c0_i32_1 = arith.constant 0 : i32
    return %c0_i32, %c0_i32_0 : i32, i32
  }
  func.func @transform_58(%arg0: i32) -> (i32, i32) {
    %c0_i32 = arith.constant 0 : i32
    %c0_i32_0 = arith.constant 0 : i32
    %c0_i32_1 = arith.constant 0 : i32
    return %c0_i32, %c0_i32_0 : i32, i32
  }
  func.func @transform_59(%arg0: i32) -> (i32, i32, i32) {
    %c0_i32 = arith.constant 0 : i32
    %c0_i32_0 = arith.constant 0 : i32
    %c0_i32_1 = arith.constant 0 : i32
    return %arg0, %c0_i32, %c0_i32_0 : i32, i32, i32
  }
}

</mosaic_0001>

<bundles_post_ra>
// kernel: prediction_model_forward.1
= control target key start
LH: loop header
LB: loop body
LE: loop exit
PB: predicated region body
PF: predicated region fallthrough
CT: control target
= control target key end

     0   :  { %s12604_s6 = smov 1   ;;  %s12605_s10 = smov 2   ;;  %s14040_s0 = inlined_call_operand.smem [shape: u32[60], index: -1, kind: input, shape index: {}] }
   0x1   :  { %s12686_s5 = sld [smem:[%s14040_s0]]   ;;  %s12606_s14 = smov 3  }
   0x2   :  { %s12691_s9 = sld [smem:[%s14040_s0 + %s12604_s6]]   ;;  %s12607_s18 = smov 4  }
   0x3   :  { %s12696_s13 = sld [smem:[%s14040_s0 + %s12605_s10]]   ;;  %s12608_s22 = smov 5  }
   0x4   :  { %s12701_s17 = sld [smem:[%s14040_s0 + %s12606_s14]]   ;;  %s12609_s26 = smov 6  }
   0x5   :  { %s12706_s21 = sld [smem:[%s14040_s0 + %s12607_s18]]   ;;  %s12610_s30 = smov 7  }
   0x6   :  { %s12711_s25 = sld [smem:[%s14040_s0 + %s12608_s22]]   ;;  %s12611_s4 = smov 8  }
   0x7   :  { %14087 = sst [smem:[#allocation24_spill]] %s12686_s5  ;;  %s12612_s10 = smov 9  }
   0x8   :  { %14088 = sst [smem:[#allocation25_spill]] %s12691_s9  ;;  %s12613_s15 = smov 10  }
   0x9   :  { %s12716_s29 = sld [smem:[%s14040_s0 + %s12609_s26]]   ;;  %s12614_s20 = smov 11  }
   0xa   :  { %s12721_s3 = sld [smem:[%s14040_s0 + %s12610_s30]]   ;;  %s12615_s26 = smov 12  }
   0xb   :  { %s12726_s8 = sld [smem:[%s14040_s0 + %s12611_s4]]   ;;  %s12616_s1 = smov 13  }
   0xc   :  { %s12731_s14 = sld [smem:[%s14040_s0 + %s12612_s10]]   ;;  %s12617_s7 = smov 14  }
   0xd   :  { %s12736_s19 = sld [smem:[%s14040_s0 + %s12613_s15]]   ;;  %s12618_s15 = smov 15  }
   0xe   :  { %s12741_s24 = sld [smem:[%s14040_s0 + %s12614_s20]]   ;;  %s12619_s22 = smov 16  }
   0xf   :  { %14089 = sst [smem:[#allocation26_spill]] %s12716_s29  ;;  %s12620_s28 = smov 17  }
  0x10   :  { %14090 = sst [smem:[#allocation27_spill]] %s12721_s3 }
  0x11   :  { %14091 = sst [smem:[#allocation28_spill]] %s12726_s8 }
  0x12   :  { %14092 = sst [smem:[#allocation29_spill]] %s12731_s14 }
  0x13   :  { %14093 = sst [smem:[#allocation30_spill]] %s12736_s19 }
  0x14   :  { %14094 = sst [smem:[#allocation31_spill]] %s12741_s24 }
  0x15   :  { %s12746_s30 = sld [smem:[%s14040_s0 + %s12615_s26]]  }
  0x16   :  { %s12751_s6 = sld [smem:[%s14040_s0 + %s12616_s1]]  }
  0x17   :  { %s12756_s12 = sld [smem:[%s14040_s0 + %s12617_s7]]   ;;  %s12621_s7 = smov 18  }
  0x18   :  { %s12761_s20 = sld [smem:[%s14040_s0 + %s12618_s15]]   ;;  %s12622_s15 = smov 19  }
  0x19   :  { %s12766_s27 = sld [smem:[%s14040_s0 + %s12619_s22]]   ;;  %s12623_s22 = smov 20  }
  0x1a   :  { %s12771_s4 = sld [smem:[%s14040_s0 + %s12620_s28]]   ;;  %s12624_s28 = smov 21  }
  0x1b   :  { %14095 = sst [smem:[#allocation32_spill]] %s12746_s30 }
  0x1c   :  { %14096 = sst [smem:[#allocation33_spill]] %s12751_s6 }
  0x1d   :  { %14097 = sst [smem:[#allocation34_spill]] %s12756_s12 }
  0x1e   :  { %14098 = sst [smem:[#allocation35_spill]] %s12761_s20 }
  0x1f   :  { %14099 = sst [smem:[#allocation36_spill]] %s12766_s27 }
  0x20   :  { %14100 = sst [smem:[#allocation37_spill]] %s12771_s4 }
  0x21   :  { %s12776_s9 = sld [smem:[%s14040_s0 + %s12621_s7]]   ;;  %s12625_s7 = smov 22  }
  0x22   :  { %s12781_s20 = sld [smem:[%s14040_s0 + %s12622_s15]]   ;;  %s12626_s15 = smov 23  }
  0x23   :  { %s12786_s27 = sld [smem:[%s14040_s0 + %s12623_s22]]   ;;  %s12627_s22 = smov 24  }
  0x24   :  { %s12791_s30 = sld [smem:[%s14040_s0 + %s12624_s28]]   ;;  %s12628_s28 = smov 25  }
  0x25   :  { %s12806_s6 = sld [smem:[%s14040_s0 + %s12627_s22]]   ;;  %s12631_s22 = smov 28  }
  0x27   :  { %14101 = sst [smem:[#allocation38_spill]] %s12776_s9 }
  0x28   :  { %14102 = sst [smem:[#allocation39_spill]] %s12781_s20 }
  0x29   :  { %s12796_s9 = sld [smem:[%s14040_s0 + %s12625_s7]]   ;;  %s12629_s7 = smov 26  }
  0x2a   :  { %14103 = sst [smem:[#allocation40_spill]] %s12791_s30 }
  0x2b   :  { %s12801_s20 = sld [smem:[%s14040_s0 + %s12626_s15]]   ;;  %s12630_s15 = smov 27  }
  0x2c   :  { %14106 = sst [smem:[#allocation43_spill]] %s12806_s6 }
  0x2d   :  { %s12811_s30 = sld [smem:[%s14040_s0 + %s12628_s28]]   ;;  %s12632_s28 = smov 29  }
  0x2e   :  { %s12816_s14 = sld [smem:[%s14040_s0 + %s12629_s7]]   ;;  %s12633_s7 = smov 30  }
  0x2f   :  { %14104 = sst [smem:[#allocation41_spill]] %s12796_s9 }
  0x30   :  { %s12826_s6 = sld [smem:[%s14040_s0 + %s12631_s22]]   ;;  %s12635_s22 = smov 32  }
  0x31   :  { %14105 = sst [smem:[#allocation42_spill]] %s12801_s20 }
  0x32   :  { %s12821_s20 = sld [smem:[%s14040_s0 + %s12630_s15]]   ;;  %s12634_s15 = smov 31  }
  0x33   :  { %14107 = sst [smem:[#allocation44_spill]] %s12811_s30 }
  0x34   :  { %14108 = sst [smem:[#allocation45_spill]] %s12816_s14 }
  0x35   :  { %s12831_s30 = sld [smem:[%s14040_s0 + %s12632_s28]]   ;;  %s12636_s28 = smov 33  }
  0x36   :  { %14110 = sst [smem:[#allocation47_spill]] %s12826_s6 }
  0x37   :  { %s12836_s14 = sld [smem:[%s14040_s0 + %s12633_s7]]   ;;  %s12637_s7 = smov 34  }
  0x38   :  { %14109 = sst [smem:[#allocation46_spill]] %s12821_s20 }
  0x39   :  { %s12841_s20 = sld [smem:[%s14040_s0 + %s12634_s15]]   ;;  %s12638_s15 = smov 35  }
  0x3a   :  { %s12846_s6 = sld [smem:[%s14040_s0 + %s12635_s22]]   ;;  %s12639_s22 = smov 36  }
  0x3b   :  { %14111 = sst [smem:[#allocation48_spill]] %s12831_s30 }
  0x3c   :  { %s12851_s30 = sld [smem:[%s14040_s0 + %s12636_s28]]   ;;  %s12640_s28 = smov 37  }
  0x3d   :  { %14112 = sst [smem:[#allocation49_spill]] %s12836_s14 }
  0x3e   :  { %s12856_s14 = sld [smem:[%s14040_s0 + %s12637_s7]]   ;;  %s12641_s7 = smov 38  }
  0x3f   :  { %14113 = sst [smem:[#allocation50_spill]] %s12841_s20 }
  0x40   :  { %14114 = sst [smem:[#allocation51_spill]] %s12846_s6 }
  0x41   :  { %s12861_s20 = sld [smem:[%s14040_s0 + %s12638_s15]]   ;;  %s12642_s15 = smov 39  }
  0x42   :  { %14115 = sst [smem:[#allocation52_spill]] %s12851_s30 }
  0x43   :  { %s12866_s24 = sld [smem:[%s14040_s0 + %s12639_s22]]   ;;  %s12643_s22 = smov 40  }
  0x44   :  { %14116 = sst [smem:[#allocation53_spill]] %s12856_s14 }
  0x45   :  { %s12871_s30 = sld [smem:[%s14040_s0 + %s12640_s28]]   ;;  %s12644_s28 = smov 41  }
  0x46   :  { %s12876_s14 = sld [smem:[%s14040_s0 + %s12641_s7]]   ;;  %s12645_s7 = smov 42  }
  0x47   :  { %14117 = sst [smem:[#allocation54_spill]] %s12861_s20 }
  0x48   :  { %s12881_s20 = sld [smem:[%s14040_s0 + %s12642_s15]]   ;;  %s12646_s15 = smov 43  }
  0x49   :  { %14118 = sst [smem:[#allocation55_spill]] %s12866_s24 }
  0x4a   :  { %s12886_s24 = sld [smem:[%s14040_s0 + %s12643_s22]]   ;;  %s12647_s22 = smov 44  }
  0x4b   :  { %14119 = sst [smem:[#allocation56_spill]] %s12871_s30 }
  0x4c   :  { %14120 = sst [smem:[#allocation57_spill]] %s12876_s14 }
  0x4d   :  { %s12891_s30 = sld [smem:[%s14040_s0 + %s12644_s28]]   ;;  %s12648_s28 = smov 45  }
  0x4e   :  { %14121 = sst [smem:[#allocation58_spill]] %s12881_s20 }
  0x4f   :  { %s12896_s14 = sld [smem:[%s14040_s0 + %s12645_s7]]   ;;  %s12649_s7 = smov 46  }
  0x50   :  { %14122 = sst [smem:[#allocation59_spill]] %s12886_s24 }
  0x51   :  { %s12901_s20 = sld [smem:[%s14040_s0 + %s12646_s15]]   ;;  %s12650_s15 = smov 47  }
  0x52   :  { %s12906_s24 = sld [smem:[%s14040_s0 + %s12647_s22]]   ;;  %s12651_s22 = smov 48  }
  0x53   :  { %14123 = sst [smem:[#allocation60_spill]] %s12891_s30 }
  0x54   :  { %s12911_s30 = sld [smem:[%s14040_s0 + %s12648_s28]]   ;;  %s12652_s28 = smov 49  }
  0x55   :  { %14124 = sst [smem:[#allocation61_spill]] %s12896_s14 }
  0x56   :  { %s12916_s14 = sld [smem:[%s14040_s0 + %s12649_s7]]   ;;  %s12653_s7 = smov 50  }
  0x57   :  { %14125 = sst [smem:[#allocation62_spill]] %s12901_s20 }
  0x58   :  { %s12921_s20 = sld [smem:[%s14040_s0 + %s12650_s15]]   ;;  %s12654_s15 = smov 51  }
  0x59   :  { %s12926_s19 = sld [smem:[%s14040_s0 + %s12651_s22]]   ;;  %s12655_s22 = smov 52  }
  0x5a   :  { %14126 = sst [smem:[#allocation63_spill]] %s12911_s30 }
  0x5b   :  { %s12931_s30 = sld [smem:[%s14040_s0 + %s12652_s28]]   ;;  %s12656_s28 = smov 53  }
  0x5c   :  { %14127 = sst [smem:[#allocation64_spill]] %s12916_s14 }
  0x5d   :  { %s12936_s14 = sld [smem:[%s14040_s0 + %s12653_s7]]   ;;  %s12657_s7 = smov 54  }
  0x5e   :  { %14128 = sst [smem:[#allocation65_spill]] %s12921_s20 }
  0x5f   :  { %14129 = sst [smem:[#allocation66_spill]] %s12926_s19 }
  0x60   :  { %s12941_s20 = sld [smem:[%s14040_s0 + %s12654_s15]]   ;;  %s12658_s15 = smov 55  }
  0x61   :  { %14130 = sst [smem:[#allocation67_spill]] %s12931_s30 }
  0x62   :  { %s12946_s19 = sld [smem:[%s14040_s0 + %s12655_s22]]   ;;  %s12659_s22 = smov 56  }
  0x63   :  { %14131 = sst [smem:[#allocation68_spill]] %s12936_s14 }
  0x64   :  { %s12951_s30 = sld [smem:[%s14040_s0 + %s12656_s28]]   ;;  %s12660_s28 = smov 57  }
  0x65   :  { %s12956_s14 = sld [smem:[%s14040_s0 + %s12657_s7]]   ;;  %s12661_s7 = smov 58  }
  0x66   :  { %14132 = sst [smem:[#allocation69_spill]] %s12941_s20 }
  0x67   :  { %s12961_s20 = sld [smem:[%s14040_s0 + %s12658_s15]]   ;;  %s12662_s15 = smov 59  }
  0x68   :  { %14133 = sst [smem:[#allocation70_spill]] %s12946_s19 }
  0x69   :  { %s12966_s19 = sld [smem:[%s14040_s0 + %s12659_s22]]  }
  0x6a   :  { %14134 = sst [smem:[#allocation71_spill]] %s12951_s30 }
  0x6b   :  { %s12971_s30 = sld [smem:[%s14040_s0 + %s12660_s28]]  }
  0x6c   :  { %s12976_s29 = sld [smem:[%s14040_s0 + %s12661_s7]]  }
  0x6d   :  { %14135 = sst [smem:[#allocation72_spill]] %s12961_s20 }
  0x6e   :  { %s12981_s20 = sld [smem:[%s14040_s0 + %s12662_s15]]  }
  0x72   :  { %14136 = sst [smem:[#allocation73_spill]] %s12976_s29 }
  0x74   :  { %14137 = sst [smem:[#allocation74_spill]] %s12981_s20 }
  0x75   :  { %124 = vsyncpa [#allocation3], 0 }
  0x76   :  { %125 = vsyncpa [#allocation6], 0 }
  0x77   :  { %126 = vsyncpa [#allocation9], 0 }
  0x78   :  { %127 = vsyncpa [#allocation12], 0 }
  0x79   :  { %128 = vsyncpa [#allocation15], 0 }
  0x7a   :  { %129 = vsyncpa [#allocation4], 0 }
  0x7b   :  { %131 = vsyncpa [#allocation4 + $0x1], 0  ;;  %s12983_s22 = smov 0   ;;  %s12985_s23 = smov 0  }
  0x7c   :  { %s12987_s26 = smov 0   ;;  %s12989_s28 = smov 0  }
  0x7d LB: > { %s14138_s9 = sld [smem:[#allocation41_spill]]  ;;  %s13004_s0 = sadd.s32 4294967295, %s12602_s28   ;;  %s12594_s23 = sphi %s12985_s23, %s14219_s23   ;;  %s12590_s22 = sphi %s12983_s22, %s14218_s22   ;;  %s12602_s28 = sphi %s12989_s28, %s14215_s28   ;;  %s12598_s26 = sphi %s12987_s26, %s14217_s26  }
  0x7e   : > { %s14139_s8 = sld [smem:[#allocation28_spill]]  ;;  %s9013_s1 = sadd.s32 4294967294, %s12602_s28  }
  0x7f   : > { %s14140_s6 = sld [smem:[#allocation51_spill]]  ;;  %s13008_s2 = sadd.s32 1, %s12602_s28  }
  0x80   : > { %s14141_s3 = sld [smem:[#allocation27_spill]]  ;;  %s1393_s7 = sadd.s32 1, %s12598_s26 }
  0x81   : > { %s14142_s4 = sld [smem:[#allocation37_spill]]  ;;  %s1390_s10 = ssub.s32 %s12602_s28, %s13008_s2 }
  0x82   : > { %s14143_s12 = sld [smem:[#allocation34_spill]]  ;;  %p1403_p0 = scmp.ne.s32.totalorder %s12598_s26, %s12594_s23 }
  0x83   : > { %14144 = sst [smem:[#allocation75_spill]] %s12590_s22  ;;  %p1391_p1 = scmp.eq.s32.totalorder %s1390_s10, 0 }
  0x84   : > { %14145 = sst [smem:[#allocation76_spill]] %s12598_s26  ;;  %p1404_p2 = scmp.eq.s32.totalorder %s13004_s0, 1 }
  0x85   : > { %14146 = sst [smem:[#allocation77_spill]] %s12602_s28  ;;  %p1409_p3 = scmp.ne.s32.totalorder %s12594_s23, %s12590_s22 }
  0x86   : > { %14147 = sst [smem:[#allocation78_spill]] %s13008_s2  ;;  %p1410_p4 = scmp.eq.s32.totalorder %s9013_s1, 1 }
  0x87   : > { %s13019_s11 = scalar_select %p1391_p1, %s12598_s26, %s1393_s7  }
  0x88   : > { %p13021_p5 = por %p1404_p2, %p1403_p0  ;;  %p13025_p6 = por %p1410_p4, %p1409_p3 }
  0x89   : > { %14148 = sst [smem:[#allocation79_spill]] %s13019_s11  ;;  %p9014_p7 = scmp.ge.s32.totalorder %s12602_s28, 1 }
  0x8a   : > { %s14149_s15 = scalar_select %p13021_p5, 1, 0 }
  0x8b   : > { %s14151_s16 = scalar_select %p13025_p6, 1, 0 }
  0x8c   : > { %14150 = sst [smem:[#allocation80_spill]] %s14149_s15  ;;  %p1417_p8 = scmp.lt.s32.totalorder %s12602_s28, 3 }
  0x8d   : > { %14152 = sst [smem:[#allocation81_spill]] %s14151_s16  ;;  %p12115_p9 = scmp.eq.s32.totalorder %s13004_s0, 0 }
  0x8e   : > { %p13032_p10 = pnand %p9014_p7, %p1417_p8  ;;  %s1475_s10 = sshll.u32 %s14143_s12, 4  ;;  %s1476_s10 = int_to_ptr.hbm [resolvable:$true] %s1475_s10 }
  0x8f   : > { %s1515_s1 = sshll.u32 %s12786_s27, 4  ;;  %s12663_s11 = smov [#allocation5]   ;;  %s13046_s1 = int_to_ptr.hbm [resolvable:$true] %s1515_s1 }
  0x90   : > { %p12083_p11 = pneg %p13032_p10  ;;  %s1477_s26 = sshll.u32 %s12663_s11, 4  ;;  %s1478_s26 = int_to_ptr.vmem [resolvable:$true] %s1477_s26 }
  0x91   : > { %s12250_s2 = sshra.s32 %s1476_s10, 4  ;;  %s12257_s28 = scalar_lea.hbm %s14143_s12, 144  ;;  %s12251_s2 = int_to_ptr.hbm [resolvable:$true] %s12250_s2 }
  0x92   : > { %p13042_p12 = pnand %p12115_p9, %p12083_p11  ;;  %s12252_s16 = scalar_lea.hbm %s12251_s2, 144 }
  0x93   : > { %p12253_p13 = scmp.ne.s32.totalorder %s12251_s2, %s12252_s16  ;;  %p12258_p3 = scmp.lt.s32.totalorder %s12251_s2, %s14143_s12 }
  0x94   : > { %p13050_p0 = pneg %p13042_p12  ;;  %p12259_p4 = scmp.lt.s32.totalorder %s12257_s28, %s12252_s16 }
  0x96   : > { %p12255_p1 = pnand %p13050_p0, %p12253_p13  ;;  %p12260_p7 = por %p12259_p4, %p12258_p3 }
  0x98   : > { %p12256_p2 = pneg %p12255_p1 }
  0x9a   : > { %p12261_p8 = pnand %p12260_p7, %p12256_p2 }
  0x9c   : > { %12264 = shalt.err (!%p12261_p8)
}
  0x9d   : > { %s14071_s11 = smov 64   ;;  %s12665_s15 = smov 4  }
  0x9e   : > { %12089 = dma.hbm_to_vmem [thread:$0]  (!%p13042_p12), %s1476_s10, 2304, %s1478_s26, [#allocation6], %s14071_s11, %s14071_s11, %s12665_s15  }
  0x9f   : > { %s12666_s29 = smov [#allocation8]   ;;  %s1573_s2 = sshll.u32 %s14140_s6, 4  ;;  %s13064_s2 = int_to_ptr.hbm [resolvable:$true] %s1573_s2 }
  0xa0   : > { %s1517_s20 = sshll.u32 %s12666_s29, 4  ;;  %s12280_s28 = sshra.s32 %s13046_s1, 4  ;;  %s1518_s20 = int_to_ptr.vmem [resolvable:$true] %s1517_s20  ;;  %s12281_s28 = int_to_ptr.hbm [resolvable:$true] %s12280_s28 }
  0xa1   : > { %s12282_s16 = scalar_lea.hbm %s12281_s28, 144  ;;  %s12287_s12 = scalar_lea.hbm %s12786_s27, 144 }
  0xa2   : > { %p12283_p11 = scmp.ne.s32.totalorder %s12281_s28, %s12282_s16  ;;  %p12288_p2 = scmp.lt.s32.totalorder %s12281_s28, %s12786_s27 }
  0xa3   : > { %p12289_p3 = scmp.lt.s32.totalorder %s12287_s12, %s12282_s16 }
  0xa4   : > { %p12285_p13 = pnand %p12283_p11, %p13050_p0 }
  0xa5   : > { %p12290_p4 = por %p12289_p3, %p12288_p2 }
  0xa6   : > { %p12286_p1 = pneg %p12285_p13 }
  0xa8   : > { %p12291_p7 = pnand %p12290_p4, %p12286_p1 }
  0xaa   : > { %12294 = shalt.err (!%p12291_p7)
}
  0xab   : > { %12095 = dma.hbm_to_vmem [thread:$0]  (!%p13042_p12), %s13046_s1, 2304, %s1518_s20, [#allocation9], %s14071_s11, %s14071_s11, %s12665_s15  }
  0xac   : > { %s1661_s29 = sshll.u32 %s12956_s14, 4  ;;  %s12667_s26 = smov [#allocation11]   ;;  %s13078_s29 = int_to_ptr.hbm [resolvable:$true] %s1661_s29 }
  0xad   : > { %s1575_s10 = sshll.u32 %s12667_s26, 4  ;;  %s12310_s12 = sshra.s32 %s13064_s2, 4  ;;  %s1576_s10 = int_to_ptr.vmem [resolvable:$true] %s1575_s10  ;;  %s12311_s12 = int_to_ptr.hbm [resolvable:$true] %s12310_s12 }
  0xae   : > { %s12312_s28 = scalar_lea.hbm %s12311_s12, 32  ;;  %s12317_s16 = scalar_lea.hbm %s14140_s6, 32 }
  0xaf   : > { %p12313_p8 = scmp.ne.s32.totalorder %s12311_s12, %s12312_s28  ;;  %p12318_p1 = scmp.lt.s32.totalorder %s12311_s12, %s14140_s6 }
  0xb0   : > { %p12319_p2 = scmp.lt.s32.totalorder %s12317_s16, %s12312_s28 }
  0xb1   : > { %p12315_p11 = pnand %p12313_p8, %p13050_p0 }
  0xb2   : > { %p12320_p3 = por %p12319_p2, %p12318_p1 }
  0xb3   : > { %p12316_p13 = pneg %p12315_p11 }
  0xb5   : > { %p12321_p4 = pnand %p12320_p3, %p12316_p13 }
  0xb7   : > { %12324 = shalt.err (!%p12321_p4)
}
  0xb8   : > { %12101 = dma.hbm_to_vmem [thread:$0]  (!%p13042_p12), %s13064_s2, 512, %s1576_s10, [#allocation12], %s14071_s11, %s14071_s11, %s12665_s15  }
  0xb9   : > { %s12668_s20 = smov [#allocation14]   ;;  %s1434_s26 = sshll.u32 %s12706_s21, 4  ;;  %s13092_s26 = int_to_ptr.hbm [resolvable:$true] %s1434_s26 }
  0xba   : > { %s1663_s1 = sshll.u32 %s12668_s20, 4  ;;  %s12340_s12 = sshra.s32 %s13078_s29, 4  ;;  %s1664_s1 = int_to_ptr.vmem [resolvable:$true] %s1663_s1  ;;  %s12341_s12 = int_to_ptr.hbm [resolvable:$true] %s12340_s12 }
  0xbb   : > { %s12342_s28 = scalar_lea.hbm %s12341_s12, 128  ;;  %s12347_s16 = scalar_lea.hbm %s12956_s14, 128 }
  0xbc   : > { %p12343_p7 = scmp.ne.s32.totalorder %s12341_s12, %s12342_s28  ;;  %p12348_p13 = scmp.lt.s32.totalorder %s12341_s12, %s12956_s14 }
  0xbd   : > { %p12349_p1 = scmp.lt.s32.totalorder %s12347_s16, %s12342_s28 }
  0xbe   : > { %p12345_p8 = pnand %p12343_p7, %p13050_p0 }
  0xbf   : > { %p12350_p2 = por %p12349_p1, %p12348_p13 }
  0xc0   : > { %p12346_p11 = pneg %p12345_p8 }
  0xc2   : > { %p12351_p3 = pnand %p12350_p2, %p12346_p11 }
  0xc4   : > { %12354 = shalt.err (!%p12351_p3)
}
  0xc5   : > { %12107 = dma.hbm_to_vmem [thread:$0]  (!%p13042_p12), %s13078_s29, 2048, %s1664_s1, [#allocation15], %s14071_s11, %s14071_s11, %s12665_s15  }
  0xc6   : > { %s1495_s2 = sshll.u32 %s14142_s4, 4  ;;  %s12669_s10 = smov [#allocation2]   ;;  %s13106_s2 = int_to_ptr.hbm [resolvable:$true] %s1495_s2 }
  0xc7   : > { %s1436_s20 = sshll.u32 %s12669_s10, 4  ;;  %s12370_s12 = sshra.s32 %s13092_s26, 4  ;;  %s1437_s20 = int_to_ptr.vmem [resolvable:$true] %s1436_s20  ;;  %s12371_s12 = int_to_ptr.hbm [resolvable:$true] %s12370_s12 }
  0xc8   : > { %s12372_s28 = scalar_lea.hbm %s12371_s12, 72  ;;  %s12377_s16 = scalar_lea.hbm %s12706_s21, 72 }
  0xc9   : > { %p12373_p4 = scmp.ne.s32.totalorder %s12371_s12, %s12372_s28  ;;  %p12378_p11 = scmp.lt.s32.totalorder %s12371_s12, %s12706_s21 }
  0xca   : > { %p12379_p13 = scmp.lt.s32.totalorder %s12377_s16, %s12372_s28 }
  0xcb   : > { %p12375_p7 = pnand %p12373_p4, %p13050_p0 }
  0xcc   : > { %p12380_p1 = por %p12379_p13, %p12378_p11 }
  0xcd   : > { %p12376_p8 = pneg %p12375_p7 }
  0xcf   : > { %p12381_p2 = pnand %p12380_p1, %p12376_p8 }
  0xd1   : > { %12384 = shalt.err (!%p12381_p2)
}
  0xd2   : > { %12086 = dma.hbm_to_vmem [thread:$0]  (!%p13042_p12), %s13092_s26, 1152, %s1437_s20, [#allocation3], %s14071_s11, %s14071_s11, %s12665_s15  }
  0xd3   : > { %s12670_s29 = smov [#allocation7]   ;;  %s1532_s10 = sshll.u32 %s14138_s9, 4  ;;  %s13120_s10 = int_to_ptr.hbm [resolvable:$true] %s1532_s10 }
  0xd4   : > { %s1497_s1 = sshll.u32 %s12670_s29, 4  ;;  %s12400_s12 = sshra.s32 %s13106_s2, 4  ;;  %s1498_s1 = int_to_ptr.vmem [resolvable:$true] %s1497_s1  ;;  %s12401_s12 = int_to_ptr.hbm [resolvable:$true] %s12400_s12 }
  0xd5   : > { %s12402_s28 = scalar_lea.hbm %s12401_s12, 16  ;;  %s12407_s16 = scalar_lea.hbm %s14142_s4, 16 }
  0xd6   : > { %p12403_p3 = scmp.ne.s32.totalorder %s12401_s12, %s12402_s28  ;;  %p12408_p8 = scmp.lt.s32.totalorder %s12401_s12, %s14142_s4 }
  0xd7   : > { %p12409_p11 = scmp.lt.s32.totalorder %s12407_s16, %s12402_s28 }
  0xd8   : > { %p12405_p4 = pnand %p12403_p3, %p13050_p0 }
  0xd9   : > { %p12410_p13 = por %p12409_p11, %p12408_p8 }
  0xda   : > { %p12406_p7 = pneg %p12405_p4 }
  0xdc   : > { %p12411_p1 = pnand %p12410_p13, %p12406_p7 }
  0xde   : > { %12414 = shalt.err (!%p12411_p1)
}
  0xdf   : > { %12092 = dma.hbm_to_vmem [thread:$0]  (!%p13042_p12), %s13106_s2, 256, %s1498_s1, [#allocation6], %s14071_s11, %s14071_s11, %s12665_s15  }
  0xe0   : > { %s12671_s26 = smov [#allocation10]   ;;  %s1620_s29 = sshll.u32 %s12906_s24, 4  ;;  %s1621_s29 = int_to_ptr.hbm [resolvable:$true] %s1620_s29 }
  0xe1   : > { %s1534_s20 = sshll.u32 %s12671_s26, 4  ;;  %s12430_s12 = sshra.s32 %s13120_s10, 4  ;;  %s1535_s20 = int_to_ptr.vmem [resolvable:$true] %s1534_s20  ;;  %s12431_s12 = int_to_ptr.hbm [resolvable:$true] %s12430_s12 }
  0xe2   : > { %s12432_s28 = scalar_lea.hbm %s12431_s12, 18  ;;  %s12437_s16 = scalar_lea.hbm %s14138_s9, 18 }
  0xe3   : > { %p12433_p2 = scmp.ne.s32.totalorder %s12431_s12, %s12432_s28  ;;  %p12438_p7 = scmp.lt.s32.totalorder %s12431_s12, %s14138_s9 }
  0xe4   : > { %p12439_p8 = scmp.lt.s32.totalorder %s12437_s16, %s12432_s28 }
  0xe5   : > { %p12435_p3 = pnand %p12433_p2, %p13050_p0 }
  0xe6   : > { %p12440_p11 = por %p12439_p8, %p12438_p7 }
  0xe7   : > { %p12436_p4 = pneg %p12435_p3 }
  0xe9   : > { %p12441_p13 = pnand %p12440_p11, %p12436_p4 }
  0xeb   : > { %12444 = shalt.err (!%p12441_p13)
}
  0xec   : > { %s12672_s4 = smov 32   ;;  %s12673_s2 = smov 2  }
  0xed   : > { %12098 = dma.hbm_to_vmem [thread:$0]  (!%p13042_p12), %s13120_s10, 288, %s1535_s20, [#allocation9], %s12672_s4, %s12672_s4, %s12673_s2  }
  0xee   : > { %s12674_s1 = smov [#allocation13]   ;;  %s12460_s11 = sshra.s32 %s1621_s29, 4  ;;  %s12461_s11 = int_to_ptr.hbm [resolvable:$true] %s12460_s11 }
  0xef   : > { %s1622_s26 = sshll.u32 %s12674_s1, 4  ;;  %s12462_s12 = scalar_lea.hbm %s12461_s11, 128  ;;  %s1623_s26 = int_to_ptr.vmem [resolvable:$true] %s1622_s26 }
  0xf0   : > { %p12463_p1 = scmp.ne.s32.totalorder %s12461_s11, %s12462_s12  ;;  %s12467_s28 = scalar_lea.hbm %s12906_s24, 128 }
  0xf1   : > { %p12468_p4 = scmp.lt.s32.totalorder %s12461_s11, %s12906_s24  ;;  %p12469_p7 = scmp.lt.s32.totalorder %s12467_s28, %s12462_s12 }
  0xf2   : > { %p12465_p2 = pnand %p12463_p1, %p13050_p0 }
  0xf3   : > { %p12470_p8 = por %p12469_p7, %p12468_p4 }
  0xf4   : > { %p12466_p3 = pneg %p12465_p2 }
  0xf6   : > { %p12471_p11 = pnand %p12470_p8, %p12466_p3 }
  0xf8   : > { %12474 = shalt.err (!%p12471_p11)
}
  0xf9   : > { %s12675_s16 = smov 128   ;;  %s12676_s4 = smov 8  }
  0xfa   : > { %12104 = dma.hbm_to_vmem [thread:$0]  (!%p13042_p12), %s1621_s29, 2048, %s1623_s26, [#allocation12], %s12675_s16, %s12675_s16, %s12676_s4  }
  0xfb   : > { %s1681_s10 = sshll.u32 %s12971_s30, 4  ;;  %s12677_s20 = smov [#allocation16]   ;;  %s1682_s10 = int_to_ptr.hbm [resolvable:$true] %s1681_s10 }
  0xfc   : > { %s1683_s2 = sshll.u32 %s12677_s20, 4  ;;  %s12490_s1 = sshra.s32 %s1682_s10, 4  ;;  %s1684_s2 = int_to_ptr.vmem [resolvable:$true] %s1683_s2  ;;  %s12491_s1 = int_to_ptr.hbm [resolvable:$true] %s12490_s1 }
  0xfd   : > { %s12492_s11 = scalar_lea.hbm %s12491_s1, 32  ;;  %s12497_s12 = scalar_lea.hbm %s12971_s30, 32 }
  0xfe   : > { %p12493_p13 = scmp.ne.s32.totalorder %s12491_s1, %s12492_s11  ;;  %p12498_p3 = scmp.lt.s32.totalorder %s12491_s1, %s12971_s30 }
  0xff   : > { %p12499_p4 = scmp.lt.s32.totalorder %s12497_s12, %s12492_s11 }
 0x100   : > { %p12495_p1 = pnand %p12493_p13, %p13050_p0 }
 0x101   : > { %p12500_p7 = por %p12499_p4, %p12498_p3 }
 0x102   : > { %p12496_p2 = pneg %p12495_p1 }
 0x104   : > { %p12501_p8 = pnand %p12500_p7, %p12496_p2 }
 0x106   : > { %12504 = shalt.err (!%p12501_p8)
}
 0x107   : > { %s14156_s29 = smov 64   ;;  %1716 = sbr.rel (%p13032_p10) target bundleno = 7070 (0x1b9e), region = 256 }
 0x108   : > { %12110 = dma.hbm_to_vmem [thread:$0]  (!%p13042_p12), %s1682_s10, 512, %s1684_s2, [#allocation15], %s14156_s29, %s14156_s29, %s12665_s15  }
 0x10c   : > { %12565 = dma.done.wait (%p12115_p9), [#allocation3], 1152  }
 0x10d   : > { %12567 = vsyncadd (%p12115_p9), [#allocation3], 4294966144 }
 0x10e   : > { %12569 = dma.done.wait (%p12115_p9), [#allocation6], 2560  }
 0x10f   : > { %12571 = vsyncadd (%p12115_p9), [#allocation6], 4294964736 }
 0x110   : > { %12573 = dma.done.wait (%p12115_p9), [#allocation9], 2592  }
 0x111   : > { %12575 = vsyncadd (%p12115_p9), [#allocation9], 4294964704 }
 0x112   : > { %12577 = dma.done.wait (%p12115_p9), [#allocation12], 2560  }
 0x113   : > { %12579 = vsyncadd (%p12115_p9), [#allocation12], 4294964736 }
 0x114   : > { %12581 = dma.done.wait (%p12115_p9), [#allocation15], 2560  }
 0x115   : > { %12583 = vsyncadd (%p12115_p9), [#allocation15], 4294964736  ;;  %v11603_v0 = vld [vmem:[%s12696_s13 + $0x38] sm:$0xff]  ;;  %v11602_v2 = vld [vmem:[%s12696_s13 + $0x30] sm:$0xff]  ;;  %s14157_s5 = sld [smem:[#allocation24_spill]]  ;;  %p1895_p9 = scmp.lt.s32.totalorder %s13004_s0, 1 }
 0x116   : > { %v11611_v1 = vld [vmem:[%s12696_s13 + $0x78] sm:$0xff]  ;;  %2084 = vmatpush.bf16.msra.mxu0 %v11603_v0  ;;  %v11610_v3 = vld [vmem:[%s12696_s13 + $0x70] sm:$0xff]  ;;  %v11601_v4 = vld [vmem:[%s12696_s13 + $0x28] sm:$0xff]  ;;  %vm2161_vm0 = vcmask 523264   ;;  %vm2412_vm1 = vcmask 130048   ;;  %vm2478_vm2 = vcmask 261120  }
 0x117   : > { %2113 = vmatpush.bf16.msra.mxu1 %v11611_v1  ;;  %v11609_v5 = vld [vmem:[%s12696_s13 + $0x68] sm:$0xff]  ;;  %v11600_v6 = vld [vmem:[%s12696_s13 + $0x20] sm:$0xff]  ;;  %v11599_v8 = vld [vmem:[%s12696_s13 + $0x18] sm:$0xff]  ;;  %s13192_s22 = scalar_select %p1895_p9, %s13004_s0, 1  ;;  %vm5099_vm3 = vcmask 1041408   ;;  %vm5095_vm4 = vcmask 31744  }
 0x118   : > { %v11608_v7 = vld [vmem:[%s12696_s13 + $0x60] sm:$0xff]  ;;  %v11607_v9 = vld [vmem:[%s12696_s13 + $0x58] sm:$0xff]  ;;  %v11598_v10 = vld [vmem:[%s12696_s13 + $0x10] sm:$0xff]  ;;  %s14158_s7 = sld [smem:[#allocation26_spill]]  ;;  %vm8595_vm5 = vcmask 1043456   ;;  %vm8591_vm6 = vcmask 64512  }
 0x119   : > { %v11606_v11 = vld [vmem:[%s12696_s13 + $0x50] sm:$0xff]  ;;  %s11587_s15 = sshll.u32 %s13192_s22, 6  ;;  %v11597_v12 = vld [vmem:[%s12696_s13 + $0x8] sm:$0xff]  ;;  %v11596_v14 = vld [vmem:[%s12696_s13] sm:$0xff]  ;;  %s14159_s26 = sld [smem:[#allocation30_spill]]  ;;  %vm8787_vm7 = vcmask 24576  }
 0x11a   : > { %2085 = vmatpush.bf16.msra.mxu0 %v11602_v2  ;;  %v11605_v13 = vld [vmem:[%s12696_s13 + $0x48] sm:$0xff]  ;;  %v11604_v15 = vld [vmem:[%s12696_s13 + $0x40] sm:$0xff]  ;;  %s14161_s28 = sld [smem:[#allocation31_spill]] }
 0x11b   : > { %2114 = vmatpush.bf16.msra.mxu1 %v11610_v3  ;;  %s13200_s18 = scalar_lea.vmem %s14157_s5, %s11587_s15  ;;  %v12240_v40 = vld [vmem:[%s12701_s17] ss:$0 sm:$0xff]  ;;  %s14163_s10 = sld [smem:[#allocation29_spill]] }
 0x11c   : > { %v9039_v16 = vld [vmem:[%s13200_s18] sm:$0xf]  ;;  %v11589_v17 = vld [vmem:[%s13200_s18 + $0x4] sm:$0xf0]  ;;  %v11588_v18 = vld [vmem:[%s13200_s18 + $0x4] sm:$0xf] }
 0x11d   : > { %v9041_v19 = vld [vmem:[%s13200_s18 + $0x8] sm:$0xf0]  ;;  %v9040_v20 = vor.u32 %v11589_v17, %v9039_v16  ;;  %v9047_v22 = vld [vmem:[%s13200_s18 + $0x10] sm:$0xf]  ;;  %v11591_v23 = vld [vmem:[%s13200_s18 + $0x14] sm:$0xf0] }
 0x11e   : > { %2086 = vmatpush.bf16.msra.mxu0 %v11601_v4  ;;  %v9044_v21 = vor.u32 %v11588_v18, %v9041_v19  ;;  %v11590_v24 = vld [vmem:[%s13200_s18 + $0x14] sm:$0xf]  ;;  %v9049_v25 = vld [vmem:[%s13200_s18 + $0x18] sm:$0xf0]  ;;  %v9048_v26 = vor.u32 %v11591_v23, %v9047_v22  ;;  %v9055_v28 = vld [vmem:[%s13200_s18 + $0x20] sm:$0xf] }
 0x11f   : > { %2115 = vmatpush.bf16.msra.mxu1 %v11609_v5  ;;  %v9052_v27 = vor.u32 %v11590_v24, %v9049_v25  ;;  %v11593_v29 = vld [vmem:[%s13200_s18 + $0x24] sm:$0xf0]  ;;  %v11592_v30 = vld [vmem:[%s13200_s18 + $0x24] sm:$0xf]  ;;  %v9057_v31 = vld [vmem:[%s13200_s18 + $0x28] sm:$0xf0]  ;;  %s14160_s16 = smov %s14159_s26 }
 0x120   : > { %v9056_v32 = vor.u32 %v11593_v29, %v9055_v28  ;;  %v9060_v33 = vor.u32 %v11592_v30, %v9057_v31  ;;  %v9063_v34 = vld [vmem:[%s13200_s18 + $0x30] sm:$0xf]  ;;  %v11595_v35 = vld [vmem:[%s13200_s18 + $0x34] sm:$0xf0]  ;;  %v11594_v36 = vld [vmem:[%s13200_s18 + $0x34] sm:$0xf]  ;;  %s14162_s4 = smov %s14161_s28 }
 0x121   : > { %v9065_v37 = vld [vmem:[%s13200_s18 + $0x38] sm:$0xf0]  ;;  %v9064_v38 = vor.u32 %v11595_v35, %v9063_v34  ;;  %v11613_v22 = vld [vmem:[#allocation2 + $0x8] sm:$0xff]  ;;  %v11614_v23 = vld [vmem:[#allocation2 + $0x10] sm:$0xff]  ;;  %s14164_s20 = sld [smem:[#allocation33_spill]] }
 0x122   : > { %2087 = vmatpush.bf16.msra.mxu0 %v11600_v6  ;;  %v9068_v39 = vor.u32 %v11594_v36, %v9065_v37  ;;  %v11615_v24 = vld [vmem:[#allocation2 + $0x18] sm:$0xff]  ;;  %v11616_v25 = vld [vmem:[#allocation2 + $0x20] sm:$0xff]  ;;  %s14165_s2 = sld [smem:[#allocation32_spill]] }
 0x123   : > { %2116 = vmatpush.bf16.msra.mxu1 %v11608_v7  ;;  %v11619_v28 = vld [vmem:[#allocation2 + $0x38] sm:$0xff]  ;;  %v11620_v29 = vld [vmem:[#allocation2 + $0x40] sm:$0xff]  ;;  %s14166_s1 = sld [smem:[#allocation36_spill]] }
 0x124   : > { %s14167_s11 = sld [smem:[#allocation35_spill]] }
 0x125   : > { %s14168_s12 = sld [smem:[#allocation39_spill]] }
 0x126   : > { %2088 = vmatpush.bf16.msra.mxu0 %v11599_v8  ;;  %s14169_s29 = sld [smem:[#allocation42_spill]] }
 0x127   : > { %2117 = vmatpush.bf16.msra.mxu1 %v11607_v9  ;;  %s14170_s15 = sld [smem:[#allocation40_spill]] }
 0x128   : > { %s14171_s18 = sld [smem:[#allocation44_spill]] }
 0x12a   : > { %2089 = vmatpush.bf16.msra.mxu0 %v11598_v10 }
 0x12b   : > { %2118 = vmatpush.bf16.msra.mxu1 %v11606_v11 }
 0x12e   : > { %2090 = vmatpush.bf16.msra.mxu0 %v11597_v12 }
 0x12f   : > { %2119 = vmatpush.bf16.msra.mxu1 %v11605_v13 }
 0x132   : > { %2091 = vmatpush.bf16.msra.mxu0 %v11596_v14 }
 0x133   : > { %2120 = vmatpush.bf16.msra.mxu1 %v11604_v15 }
 0x135   : > { %2092 = vmatmul.bf16.vlgmr.msra.gmra.mxu0 %v9040_v20 }
 0x136   : > { %2121 = vmatmul.bf16.vlgmr.msra.gmra.mxu1 %v9044_v21  ;;  %v11612_v21 = vld [vmem:[#allocation2] sm:$0xff] }
 0x145   : > { %2097 = vmatmul.bf16.gmra.mxu0 %v9048_v26  ;;  %v11617_v26 = vld [vmem:[#allocation2 + $0x28] sm:$0xff] }
 0x146   : > { %2126 = vmatmul.bf16.gmra.mxu1 %v9052_v27  ;;  %v11618_v27 = vld [vmem:[#allocation2 + $0x30] sm:$0xff] }
 0x155   : > { %2102 = vmatmul.bf16.gmra.mxu0 %v9056_v32 }
 0x156   : > { %2131 = vmatmul.bf16.gmra.mxu1 %v9060_v33 }
 0x165   : > { %2107 = vmatmul.bf16.gmra.mxu0 %v9064_v38 }
 0x166   : > { %2136 = vmatmul.bf16.gmra.mxu1 %v9068_v39 }
 0x1b2   : > { %v2093_v41 = vpop.f32.mrf.mxu0 }
 0x1b3   : > { %v2122_v42 = vpop.f32.mrf.mxu1  ;;  %v2094_v43 = vadd.f32 %v12240_v40, %v2093_v41  ;;  %v11626_v41 = vld [vmem:[%s12711_s25 + $0x18] sm:$0xff] }
 0x1b4   : > { %2488 = vmatpush.bf16.msrb.mxu1 %v11626_v41 }
 0x1b5   : > { %v2123_v44 = vadd.f32 %v2122_v42, %v2094_v43  ;;  %v11629_v42 = vld [vmem:[%s12711_s25 + $0x28] sm:$0xff]  ;;  %v11625_v43 = vld [vmem:[%s12711_s25 + $0x10] sm:$0xff] }
 0x1b6   : > { %2577 = vmatpush.bf16.msrb.mxu0 %v11629_v42 }
 0x1b7   : > { %v2142_v19 = vmax.f32 %v2123_v44, 0.0  ;;  %v11628_v44 = vld [vmem:[%s12711_s25 + $0x20] sm:$0xff] }
 0x1b8   : > { %2489 = vmatpush.bf16.msrb.mxu1 %v11625_v43  ;;  %v11638_v43 = vld [vmem:[%s14141_s3 + $0x28] sm:$0xff] }
 0x1ba   : > { %v2095_v45 = vpop.f32.mrf.mxu0  ;;  %2578 = vmatpush.bf16.msrb.mxu0 %v11628_v44 }
 0x1bb   : > { %v2124_v46 = vpop.f32.mrf.mxu1  ;;  %v2096_v7 = vadd.f32 %v12240_v40, %v2095_v45 }
 0x1bd   : > { %v2125_v13 = vadd.f32 %v2124_v46, %v2096_v7 }
 0x1bf   : > { %v2143_v17 = vmax.f32 %v2125_v13, 0.0  ;;  %v11627_v13 = vld [vmem:[%s14141_s3 + $0x10] sm:$0xff] }
 0x1c1   : > { %v2150_v20 = vpack.c.bf16 %v2143_v17, %v2142_v19  ;;  %v11631_v17 = vld [vmem:[%s12711_s25 + $0x30] sm:$0xff] }
 0x1c2   : > { %v2098_v47 = vpop.f32.mrf.mxu0 }
 0x1c3   : > { %v2127_v48 = vpop.f32.mrf.mxu1  ;;  %v2099_v3 = vadd.f32 %v12240_v40, %v2098_v47 }
 0x1c5   : > { %v2128_v11 = vadd.f32 %v2127_v48, %v2099_v3 }
 0x1c7   : > { %v2144_v16 = vmax.f32 %v2128_v11, 0.0  ;;  %v11634_v11 = vld [vmem:[%s12711_s25 + $0x48] sm:$0xff] }
 0x1ca   : > { %v2100_v49 = vpop.f32.mrf.mxu0 }
 0x1cb   : > { %v2129_v50 = vpop.f32.mrf.mxu1  ;;  %v2101_v0 = vadd.f32 %v12240_v40, %v2100_v49 }
 0x1cd   : > { %v2130_v8 = vadd.f32 %v2129_v50, %v2101_v0 }
 0x1cf   : > { %v2145_v14 = vmax.f32 %v2130_v8, 0.0 }
 0x1d1   : > { %v2151_v18 = vpack.c.bf16 %v2145_v14, %v2144_v16  ;;  %v11623_v14 = vld [vmem:[%s12711_s25 + $0x8] sm:$0xff]  ;;  %v11632_v16 = vld [vmem:[%s12711_s25 + $0x38] sm:$0xff] }
 0x1d2   : > { %v2103_v51 = vpop.f32.mrf.mxu0 }
 0x1d3   : > { %v2132_v52 = vpop.f32.mrf.mxu1  ;;  %v2104_v60 = vadd.f32 %v12240_v40, %v2103_v51 }
 0x1d5   : > { %v2133_v4 = vadd.f32 %v2132_v52, %v2104_v60 }
 0x1d7   : > { %v2146_v12 = vmax.f32 %v2133_v4, 0.0 }
 0x1da   : > { %v2105_v53 = vpop.f32.mrf.mxu0 }
 0x1db   : > { %v2134_v54 = vpop.f32.mrf.mxu1  ;;  %v2106_v58 = vadd.f32 %v12240_v40, %v2105_v53 }
 0x1dd   : > { %v2135_v1 = vadd.f32 %v2134_v54, %v2106_v58 }
 0x1df   : > { %v2147_v9 = vmax.f32 %v2135_v1, 0.0 }
 0x1e1   : > { %v2152_v15 = vpack.c.bf16 %v2147_v9, %v2146_v12  ;;  %v11621_v9 = vld [vmem:[%s14141_s3] sm:$0xff] }
 0x1e2   : > { %v2108_v55 = vpop.f32.mrf.mxu0  ;;  %v11633_v12 = vld [vmem:[%s12711_s25 + $0x40] sm:$0xff] }
 0x1e3   : > { %v2137_v56 = vpop.f32.mrf.mxu1  ;;  %v2109_v57 = vadd.f32 %v12240_v40, %v2108_v55 }
 0x1e5   : > { %v2138_v61 = vadd.f32 %v2137_v56, %v2109_v57 }
 0x1e7   : > { %v2148_v5 = vmax.f32 %v2138_v61, 0.0 }
 0x1ea   : > { %v2110_v59 = vpop.f32.mrf.mxu0 }
 0x1eb   : > { %v2111_v62 = vadd.f32 %v12240_v40, %v2110_v59  ;;  %v2139_v63 = vpop.f32.mrf.mxu1 }
 0x1ed   : > { %v2140_v2 = vadd.f32 %v2139_v63, %v2111_v62 }
 0x1ef   : > { %v2149_v6 = vmax.f32 %v2140_v2, 0.0 }
 0x1f1   : > { %v2153_v10 = vpack.c.bf16 %v2149_v6, %v2148_v5 }
 0x1f3   : > { %2169 = vmatpush.bf16.msra.mxu2 %v2153_v10  ;;  %2194 = vmatpush.bf16.msra.mxu3 %v2153_v10 }
 0x1f7   : > { %2170 = vmatpush.bf16.msra.mxu2 %v2152_v15  ;;  %2195 = vmatpush.bf16.msra.mxu3 %v2152_v15 }
 0x1fb   : > { %2171 = vmatpush.bf16.msra.mxu2 %v2151_v18  ;;  %2196 = vmatpush.bf16.msra.mxu3 %v2151_v18 }
 0x1ff   : > { %2172 = vmatpush.bf16.msra.mxu2 %v2150_v20  ;;  %2197 = vmatpush.bf16.msra.mxu3 %v2150_v20 }
 0x202   : > { %9137 = vmatmul.msk.bf16.vlgmr.msra.gmra.mxu2 %vm2161_vm0, %v11612_v21  ;;  %9142 = vmatmul.msk.bf16.vlgmr.msra.gmra.mxu3 %vm2161_vm0, %v11613_v22 }
 0x203   : > { %2221 = vmatpush.bf16.msrb.mxu2 %v2153_v10  ;;  %2248 = vmatpush.bf16.msrb.mxu3 %v2153_v10 }
 0x207   : > { %2222 = vmatpush.bf16.msrb.mxu2 %v2152_v15  ;;  %2249 = vmatpush.bf16.msrb.mxu3 %v2152_v15 }
 0x20b   : > { %2223 = vmatpush.bf16.msrb.mxu2 %v2151_v18  ;;  %2250 = vmatpush.bf16.msrb.mxu3 %v2151_v18 }
 0x20f   : > { %2224 = vmatpush.bf16.msrb.mxu2 %v2150_v20  ;;  %2251 = vmatpush.bf16.msrb.mxu3 %v2150_v20 }
 0x212   : > { %9147 = vmatmul.msk.bf16.vlgmr.msrb.gmra.mxu2 %vm2161_vm0, %v11614_v23  ;;  %9152 = vmatmul.msk.bf16.vlgmr.msrb.gmra.mxu3 %vm2161_vm0, %v11615_v24 }
 0x213   : > { %2275 = vmatpush.bf16.msra.mxu2 %v2153_v10  ;;  %2302 = vmatpush.bf16.msra.mxu3 %v2153_v10 }
 0x217   : > { %2276 = vmatpush.bf16.msra.mxu2 %v2152_v15  ;;  %2303 = vmatpush.bf16.msra.mxu3 %v2152_v15 }
 0x21b   : > { %2277 = vmatpush.bf16.msra.mxu2 %v2151_v18  ;;  %2304 = vmatpush.bf16.msra.mxu3 %v2151_v18 }
 0x21f   : > { %2278 = vmatpush.bf16.msra.mxu2 %v2150_v20  ;;  %2305 = vmatpush.bf16.msra.mxu3 %v2150_v20 }
 0x222   : > { %9157 = vmatmul.msk.bf16.vlgmr.msra.gmra.mxu2 %vm2161_vm0, %v11616_v25  ;;  %9162 = vmatmul.msk.bf16.vlgmr.msra.gmra.mxu3 %vm2161_vm0, %v11617_v26  ;;  %v11630_v25 = vld [vmem:[%s14141_s3 + $0x18] sm:$0xff] }
 0x223   : > { %2329 = vmatpush.bf16.msrb.mxu2 %v2153_v10  ;;  %2356 = vmatpush.bf16.msrb.mxu3 %v2153_v10 }
 0x227   : > { %2330 = vmatpush.bf16.msrb.mxu2 %v2152_v15  ;;  %2357 = vmatpush.bf16.msrb.mxu3 %v2152_v15 }
 0x22b   : > { %2358 = vmatpush.bf16.msrb.mxu3 %v2151_v18  ;;  %2331 = vmatpush.bf16.msrb.mxu2 %v2151_v18 }
 0x22f   : > { %2359 = vmatpush.bf16.msrb.mxu3 %v2150_v20  ;;  %2332 = vmatpush.bf16.msrb.mxu2 %v2150_v20 }
 0x232   : > { %9167 = vmatmul.msk.bf16.vlgmr.msrb.gmra.mxu2 %vm2161_vm0, %v11618_v27  ;;  %9172 = vmatmul.msk.bf16.vlgmr.msrb.gmra.mxu3 %vm2161_vm0, %v11619_v28  ;;  %v11635_v28 = vld [vmem:[%s14141_s3 + $0x20] sm:$0xff] }
 0x233   : > { %2383 = vmatpush.bf16.msra.mxu2 %v2153_v10  ;;  %v11624_v10 = vld [vmem:[%s14141_s3 + $0x8] sm:$0xff] }
 0x237   : > { %2384 = vmatpush.bf16.msra.mxu2 %v2152_v15  ;;  %v11622_v15 = vld [vmem:[%s12711_s25] sm:$0xff] }
 0x23b   : > { %2385 = vmatpush.bf16.msra.mxu2 %v2151_v18 }
 0x23f   : > { %2386 = vmatpush.bf16.msra.mxu2 %v2150_v20 }
 0x242   : > { %9177 = vmatmul.msk.bf16.vlgmr.msra.gmra.mxu2 %vm2161_vm0, %v11620_v29 }
 0x285   : > { %v2174_v30 = vpop.f32.mrf.mxu2  ;;  %v2199_v31 = vpop.f32.mrf.mxu3 }
 0x286   : > { %v2204_v47 = vmax.f32 %v2174_v30, %v2199_v31  ;;  %v11637_v30 = vld [vmem:[%s12711_s25 + $0x58] sm:$0xff] }
 0x28d   : > { %v2176_v32 = vpop.f32.mrf.mxu2  ;;  %v2201_v33 = vpop.f32.mrf.mxu3 }
 0x28e   : > { %v2205_v49 = vmax.f32 %v2176_v32, %v2201_v33  ;;  %v11636_v33 = vld [vmem:[%s12711_s25 + $0x50] sm:$0xff] }
 0x295   : > { %v2226_v34 = vpop.f32.mrf.mxu2  ;;  %v2253_v35 = vpop.f32.mrf.mxu3 }
 0x296   : > { %v2231_v48 = vmax.f32 %v2204_v47, %v2226_v34  ;;  %v11640_v47 = vld [vmem:[%s12711_s25 + $0x68] sm:$0xff] }
 0x298   : > { %v2258_v50 = vmax.f32 %v2231_v48, %v2253_v35  ;;  %v11641_v35 = vld [vmem:[%s14141_s3 + $0x30] sm:$0xff] }
 0x29d   : > { %v2228_v36 = vpop.f32.mrf.mxu2  ;;  %v2255_v37 = vpop.f32.mrf.mxu3 }
 0x29e   : > { %v2232_v51 = vmax.f32 %v2205_v49, %v2228_v36  ;;  %v11639_v49 = vld [vmem:[%s12711_s25 + $0x60] sm:$0xff] }
 0x2a0   : > { %v2259_v55 = vmax.f32 %v2232_v51, %v2255_v37 }
 0x2a5   : > { %v2280_v38 = vpop.f32.mrf.mxu2  ;;  %v2307_v39 = vpop.f32.mrf.mxu3 }
 0x2a6   : > { %v2285_v53 = vmax.f32 %v2258_v50, %v2280_v38  ;;  %v11643_v50 = vld [vmem:[%s12711_s25 + $0x78] sm:$0xff] }
 0x2a8   : > { %v2312_v56 = vmax.f32 %v2285_v53, %v2307_v39  ;;  %v11642_v53 = vld [vmem:[%s12711_s25 + $0x70] sm:$0xff] }
 0x2ad   : > { %v2282_v40 = vpop.f32.mrf.mxu2  ;;  %v2309_v45 = vpop.f32.mrf.mxu3 }
 0x2ae   : > { %v2286_v57 = vmax.f32 %v2259_v55, %v2282_v40 }
 0x2b0   : > { %v2313_v60 = vmax.f32 %v2286_v57, %v2309_v45 }
 0x2b5   : > { %v2334_v46 = vpop.f32.mrf.mxu2  ;;  %v2361_v54 = vpop.f32.mrf.mxu3 }
 0x2b6   : > { %v2339_v58 = vmax.f32 %v2312_v56, %v2334_v46  ;;  %v11644_v46 = vld [vmem:[%s14141_s3 + $0x38] sm:$0xff]  ;;  %v11646_v56 = vld [vmem:[%s12711_s25 + $0x88] sm:$0xff]  ;;  %s14190_s3 = sld [smem:[#allocation58_spill]] }
 0x2b8   : > { %v2366_v61 = vmax.f32 %v2339_v58, %v2361_v54  ;;  %v11645_v58 = vld [vmem:[%s12711_s25 + $0x80] sm:$0xff] }
 0x2bd   : > { %v2336_v52 = vpop.f32.mrf.mxu2  ;;  %v2363_v63 = vpop.f32.mrf.mxu3 }
 0x2be   : > { %v2340_v62 = vmax.f32 %v2313_v60, %v2336_v52 }
 0x2c0   : > { %v2367_v1 = vmax.f32 %v2340_v62, %v2363_v63 }
 0x2c5   : > { %v2388_v59 = vpop.f32.mrf.mxu2 }
 0x2c6   : > { %v2393_v0 = vmax.f32 %v2366_v61, %v2388_v59 }
 0x2c8   : > { %v13234_v3 = vpack.c.bf16 %v2393_v0, %v2393_v0 }
 0x2ca   : > { %v2408_v6 = vunpack.c.l.b16 %v13234_v3 }
 0x2cd   : > { %v2390_v2 = vpop.f32.mrf.mxu2 }
 0x2ce   : > { %v2394_v4 = vmax.f32 %v2367_v1, %v2390_v2 }
 0x2d0   : > { %v13236_v5 = vpack.c.bf16 %v2394_v4, %v2394_v4 }
 0x2d2   : > { %v2409_v7 = vunpack.c.l.b16 %v13236_v5 }
 0x2d4   : > { %v2410_v8 = vpack.c.b16 %v2409_v7, %v2408_v6  ;;  %v11652_v7 = vld [vmem:[%s14139_s8 + $0x18] sm:$0xff] }
 0x2d6   : > { %2423 = vmatpush.bf16.msra.mxu3 %v2410_v8  ;;  %2453 = vmatpush.bf16.msrb.mxu2 %v2410_v8 }
 0x2d7   : > { %2605 = vmatpush.bf16.msra.mxu1 %v2410_v8  ;;  %2703 = vmatpush.bf16.msra.mxu0 %v2410_v8 }
 0x2d9   : > { %9182 = vmatmul.msk.bf16.vlgmr.msra.gmra.mxu3 %vm2412_vm1, %v11621_v9  ;;  %9189 = vmatmul.msk.bf16.vlgmr.msrb.gmra.mxu2 %vm2412_vm1, %v11624_v10 }
 0x2da   : > { %2543 = vmatpush.bf16.msrb.mxu3 %v2410_v8  ;;  %2517 = vmatpush.bf16.msra.mxu2 %v11623_v14 }
 0x2de   : > { %2675 = vmatpush.bf16.msra.mxu3 %v11634_v11  ;;  %2518 = vmatpush.bf16.msra.mxu2 %v11622_v15 }
 0x2e2   : > { %2676 = vmatpush.bf16.msra.mxu3 %v11633_v12  ;;  %2639 = vmatpush.bf16.msrb.mxu2 %v11632_v16 }
 0x2e6   : > { %2640 = vmatpush.bf16.msrb.mxu2 %v11631_v17 }
 0x2e9   : > { %9218 = vmatmul.msk.bf16.vlgmr.msrb.gmra.mxu3 %vm2412_vm1, %v11627_v13 }
 0x2ea   : > { %2799 = vmatpush.bf16.msrb.mxu3 %v11640_v47 }
 0x2ee   : > { %2800 = vmatpush.bf16.msrb.mxu3 %v11639_v49 }
 0x2f9   : > { %9264 = vmatmul.msk.bf16.vlgmr.msra.gmra.mxu3 %vm2478_vm2, %v2410_v8 }
 0x2fa   : > { %2923 = vmatpush.bf16.msra.mxu3 %v11646_v56  ;;  %v11661_v56 = vld [vmem:[%s14160_s16 + $0x20] sm:$0xff] }
 0x2fe   : > { %2924 = vmatpush.bf16.msra.mxu3 %v11645_v58 }
 0x35c   : > { %v2425_v18 = vpop.f32.mrf.mxu3  ;;  %v2455_v19 = vpop.f32.mrf.mxu2 }
 0x364   : > { %v2427_v20 = vpop.f32.mrf.mxu3  ;;  %v2457_v21 = vpop.f32.mrf.mxu2 }
 0x365   : > { %v2430_v22 = vpack.c.bf16 %v2427_v20, %v2425_v18  ;;  %v2460_v23 = vpack.c.bf16 %v2457_v21, %v2455_v19 }
 0x367   : > { %9202 = vmatmul.msk.bf16.vlgmr.msrb.gmra.mxu1 %vm2478_vm2, %v2460_v23  ;;  %9211 = vmatmul.msk.bf16.vlgmr.msra.gmra.mxu2 %vm2478_vm2, %v2430_v22 }
 0x368   : > { %2765 = vmatpush.bf16.msra.mxu2 %v2410_v8  ;;  %2737 = vmatpush.bf16.msrb.mxu1 %v11637_v30 }
 0x36c   : > { %v2545_v24 = vpop.f32.mrf.mxu3  ;;  %2738 = vmatpush.bf16.msrb.mxu1 %v11636_v33 }
 0x374   : > { %v2547_v26 = vpop.f32.mrf.mxu3 }
 0x375   : > { %v2550_v27 = vpack.c.bf16 %v2547_v26, %v2545_v24 }
 0x377   : > { %9231 = vmatmul.msk.bf16.vlgmr.msrb.gmra.mxu0 %vm2478_vm2, %v2550_v27  ;;  %9238 = vmatmul.msk.bf16.vlgmr.msra.gmra.mxu1 %vm2412_vm1, %v11630_v25  ;;  %v12241_v25 = vld [vmem:[%s14158_s7] ss:$0 sm:$0xff]  ;;  %s14172_s7 = sld [smem:[#allocation45_spill]] }
 0x378   : > { %2827 = vmatpush.bf16.msrb.mxu0 %v2410_v8  ;;  %2861 = vmatpush.bf16.msra.mxu1 %v11643_v50 }
 0x37c   : > { %2862 = vmatpush.bf16.msra.mxu1 %v11642_v53  ;;  %v2678_v2 = vpop.f32.mrf.mxu3  ;;  %v11656_v53 = vld [vmem:[%s14160_s16 + $0x18] sm:$0xff] }
 0x384   : > { %v2680_v4 = vpop.f32.mrf.mxu3 }
 0x387   : > { %9271 = vmatmul.msk.bf16.vlgmr.msra.gmra.mxu0 %vm2412_vm1, %v11635_v28 }
 0x397   : > { %9311 = vmatmul.msk.bf16.vlgmr.msrb.gmra.mxu0 %vm2412_vm1, %v11641_v35  ;;  %v11655_v35 = vld [vmem:[%s14139_s8 + $0x28] sm:$0xff] }
 0x3e4   : > { %v2491_v29 = vpop.f32.mrf.mxu1 }
 0x3ea   : > { %v2520_v31 = vpop.f32.mrf.mxu2 }
 0x3eb   : > { %v2521_v32 = vadd.f32 %v2520_v31, %v2491_v29 }
 0x3ec   : > { %v2493_v34 = vpop.f32.mrf.mxu1 }
 0x3f2   : > { %v2522_v51 = vpop.f32.mrf.mxu2 }
 0x3f3   : > { %v2523_v11 = vadd.f32 %v2522_v51, %v2493_v34 }
 0x3f4   : > { %v2580_v36 = vpop.f32.mrf.mxu0  ;;  %v2607_v37 = vpop.f32.mrf.mxu1 }
 0x3f5   : > { %v2585_v38 = vadd.f32 %v2580_v36, %v2521_v32  ;;  %v11647_v36 = vld [vmem:[%s14159_s26] sm:$0xff]  ;;  %s14173_s26 = sld [smem:[#allocation38_spill]] }
 0x3fc   : > { %v2582_v39 = vpop.f32.mrf.mxu0  ;;  %v2609_v40 = vpop.f32.mrf.mxu1 }
 0x3fd   : > { %v2612_v41 = vpack.c.bf16 %v2609_v40, %v2607_v37  ;;  %v2586_v13 = vadd.f32 %v2582_v39, %v2523_v11  ;;  %v11650_v37 = vld [vmem:[%s14160_s16 + $0x8] sm:$0xff]  ;;  %v11654_v39 = vld [vmem:[%s14139_s8 + $0x20] sm:$0xff] }
 0x3fe   : > { %v11659_v40 = vld [vmem:[%s14139_s8 + $0x40] sm:$0xff]  ;;  %v11664_v11 = vld [vmem:[%s14160_s16 + $0x28] sm:$0xff] }
 0x3ff   : > { %9251 = vmatmul.msk.bf16.vlgmr.msrb.gmra.mxu2 %vm2478_vm2, %v2612_v41  ;;  %v11653_v41 = vld [vmem:[%s14160_s16 + $0x10] sm:$0xff] }
 0x400   : > { %2889 = vmatpush.bf16.msrb.mxu2 %v2410_v8  ;;  %v11651_v8 = vld [vmem:[%s14139_s8 + $0x10] sm:$0xff] }
 0x404   : > { %v2705_v42 = vpop.f32.mrf.mxu0 }
 0x40c   : > { %v2707_v44 = vpop.f32.mrf.mxu0 }
 0x40d   : > { %v2710_v45 = vpack.c.bf16 %v2707_v44, %v2705_v42  ;;  %v11649_v42 = vld [vmem:[%s14139_s8 + $0x8] sm:$0xff]  ;;  %v11658_v44 = vld [vmem:[%s14139_s8 + $0x38] sm:$0xff] }
 0x40f   : > { %9284 = vmatmul.msk.bf16.vlgmr.msrb.gmra.mxu1 %vm2478_vm2, %v2710_v45  ;;  %9291 = vmatmul.msk.bf16.vlgmr.msra.gmra.mxu2 %vm2412_vm1, %v11638_v43  ;;  %v11648_v43 = vld [vmem:[%s14139_s8] sm:$0xff]  ;;  %v11657_v45 = vld [vmem:[%s14139_s8 + $0x30] sm:$0xff] }
 0x410   : > { %3023 = vmatpush.bf16.msra.mxu2 %v11652_v7 }
 0x414   : > { %v2829_v48 = vpop.f32.mrf.mxu0  ;;  %3024 = vmatpush.bf16.msra.mxu2 %v11651_v8 }
 0x41c   : > { %v2831_v52 = vpop.f32.mrf.mxu0 }
 0x41d   : > { %v2834_v54 = vpack.c.bf16 %v2831_v52, %v2829_v48 }
 0x41f   : > { %9331 = vmatmul.msk.bf16.vlgmr.msrb.gmra.mxu2 %vm2412_vm1, %v11644_v46  ;;  %9324 = vmatmul.msk.bf16.vlgmr.msra.gmra.mxu1 %vm2478_vm2, %v2834_v54 }
 0x482   : > { %v2642_v55 = vpop.f32.mrf.mxu2 }
 0x483   : > { %v2647_v57 = vadd.f32 %v2642_v55, %v2585_v38  ;;  %v11660_v38 = vld [vmem:[%s14139_s8 + $0x48] sm:$0xff] }
 0x485   : > { %v2683_v15 = vadd.f32 %v2678_v2, %v2647_v57  ;;  %v11663_v57 = vld [vmem:[%s14139_s8 + $0x58] sm:$0xff] }
 0x48a   : > { %v2644_v59 = vpop.f32.mrf.mxu2 }
 0x48b   : > { %v2648_v14 = vadd.f32 %v2644_v59, %v2586_v13 }
 0x48c   : > { %v2740_v6 = vpop.f32.mrf.mxu1 }
 0x48d   : > { %v2745_v17 = vadd.f32 %v2740_v6, %v2683_v15  ;;  %v2684_v18 = vadd.f32 %v2680_v4, %v2648_v14  ;;  %v11669_v14 = vld [vmem:[%s14139_s8 + $0x78] sm:$0xff]  ;;  %v11668_v15 = vld [vmem:[%s14139_s8 + $0x70] sm:$0xff] }
 0x492   : > { %v2767_v60 = vpop.f32.mrf.mxu2 }
 0x494   : > { %v2742_v10 = vpop.f32.mrf.mxu1 }
 0x495   : > { %v2746_v21 = vadd.f32 %v2742_v10, %v2684_v18  ;;  %v11666_v18 = vld [vmem:[%s14139_s8 + $0x68] sm:$0xff] }
 0x49a   : > { %v2769_v61 = vpop.f32.mrf.mxu2 }
 0x49b   : > { %v2772_v62 = vpack.c.bf16 %v2769_v61, %v2767_v60  ;;  %v11662_v61 = vld [vmem:[%s14139_s8 + $0x50] sm:$0xff] }
 0x49c   : > { %v2864_v16 = vpop.f32.mrf.mxu1 }
 0x49d   : > { %9304 = vmatmul.msk.bf16.vlgmr.msrb.gmra.mxu3 %vm2478_vm2, %v2772_v62  ;;  %v11667_v62 = vld [vmem:[%s14160_s16 + $0x30] sm:$0xff] }
 0x49e   : > { %3052 = vmatpush.bf16.msrb.mxu3 %v11649_v42 }
 0x4a2   : > { %v2891_v63 = vpop.f32.mrf.mxu2  ;;  %3053 = vmatpush.bf16.msrb.mxu3 %v11648_v43 }
 0x4a4   : > { %v2866_v26 = vpop.f32.mrf.mxu1 }
 0x4aa   : > { %v2893_v0 = vpop.f32.mrf.mxu2 }
 0x4ab   : > { %v2896_v1 = vpack.c.bf16 %v2893_v0, %v2891_v63 }
 0x4ad   : > { %9344 = vmatmul.msk.bf16.vlgmr.msra.gmra.mxu3 %vm2478_vm2, %v2896_v1 }
 0x4ae   : > { %3174 = vmatpush.bf16.msra.mxu3 %v11658_v44 }
 0x4b2   : > { %3175 = vmatpush.bf16.msra.mxu3 %v11657_v45 }
 0x520   : > { %v2802_v9 = vpop.f32.mrf.mxu3 }
 0x521   : > { %v2807_v19 = vadd.f32 %v2802_v9, %v2745_v17 }
 0x523   : > { %v2869_v23 = vadd.f32 %v2864_v16, %v2807_v19  ;;  %v11665_v19 = vld [vmem:[%s14139_s8 + $0x60] sm:$0xff] }
 0x528   : > { %v2804_v12 = vpop.f32.mrf.mxu3 }
 0x529   : > { %v2808_v22 = vadd.f32 %v2804_v12, %v2746_v21  ;;  %v11670_v12 = vld [vmem:[%s14160_s16 + $0x38] sm:$0xff] }
 0x52b   : > { %v2870_v27 = vadd.f32 %v2866_v26, %v2808_v22  ;;  %v11672_v22 = vld [vmem:[%s14139_s8 + $0x88] sm:$0xff] }
 0x530   : > { %v2926_v20 = vpop.f32.mrf.mxu3 }
 0x531   : > { %v2931_v24 = vadd.f32 %v2926_v20, %v2869_v23 }
 0x533   : > { %v2937_v29 = vadd.f32 %v12241_v25, %v2931_v24  ;;  %v11671_v24 = vld [vmem:[%s14139_s8 + $0x80] sm:$0xff] }
 0x535   : > { %v2939_v32 = vmax.f32 %v2937_v29, 0.0 }
 0x538   : > { %v2928_v28 = vpop.f32.mrf.mxu3 }
 0x539   : > { %v2932_v30 = vadd.f32 %v2928_v28, %v2870_v27 }
 0x53b   : > { %v2938_v31 = vadd.f32 %v12241_v25, %v2932_v30 }
 0x53d   : > { %v2940_v33 = vmax.f32 %v2938_v31, 0.0 }
 0x53f   : > { %v13282_v34 = vpack.c.bf16 %v2940_v33, %v2939_v32 }
 0x541   : > { %2959 = vmatpush.bf16.msra.mxu0 %v13282_v34  ;;  %2989 = vmatpush.bf16.msrb.mxu1 %v13282_v34 }
 0x542   : > { %3140 = vmatpush.bf16.msrb.mxu2 %v13282_v34 }
 0x544   : > { %9349 = vmatmul.msk.bf16.vlgmr.msra.gmra.mxu0 %vm2412_vm1, %v11647_v36  ;;  %9356 = vmatmul.msk.bf16.vlgmr.msrb.gmra.mxu1 %vm2412_vm1, %v11650_v37  ;;  %v11678_v36 = vld [vmem:[%s14161_s28 + $0x18] sm:$0xff]  ;;  %s14174_s28 = sld [smem:[#allocation43_spill]] }
 0x545   : > { %3078 = vmatpush.bf16.msrb.mxu0 %v13282_v34  ;;  %3112 = vmatpush.bf16.msra.mxu1 %v11655_v35 }
 0x549   : > { %3210 = vmatpush.bf16.msra.mxu0 %v11660_v38  ;;  %3113 = vmatpush.bf16.msra.mxu1 %v11654_v39  ;;  %v11677_v38 = vld [vmem:[%s14162_s4 + $0x10] sm:$0xff] }
 0x54d   : > { %3238 = vmatpush.bf16.msrb.mxu1 %v13282_v34  ;;  %3211 = vmatpush.bf16.msra.mxu0 %v11659_v40 }
 0x554   : > { %9385 = vmatmul.msk.bf16.vlgmr.msrb.gmra.mxu0 %vm2412_vm1, %v11653_v41 }
 0x555   : > { %3334 = vmatpush.bf16.msrb.mxu0 %v11666_v18 }
 0x559   : > { %3335 = vmatpush.bf16.msrb.mxu0 %v11665_v19 }
 0x564   : > { %9431 = vmatmul.msk.bf16.vlgmr.msra.gmra.mxu0 %vm2478_vm2, %v13282_v34 }
 0x565   : > { %3458 = vmatpush.bf16.msra.mxu0 %v11672_v22 }
 0x569   : > { %3459 = vmatpush.bf16.msra.mxu0 %v11671_v24 }
 0x5c1   : > { %v2961_v46 = vpop.f32.mrf.mxu0  ;;  %v2991_v47 = vpop.f32.mrf.mxu1 }
 0x5c9   : > { %v2963_v48 = vpop.f32.mrf.mxu0  ;;  %v2993_v49 = vpop.f32.mrf.mxu1 }
 0x5ca   : > { %v2966_v50 = vpack.c.bf16 %v2963_v48, %v2961_v46  ;;  %v2996_v51 = vpack.c.bf16 %v2993_v49, %v2991_v47  ;;  %v12242_v49 = vld [vmem:[%s14163_s10] ss:$0 sm:$0xff]  ;;  %s14175_s10 = sld [smem:[#allocation47_spill]] }
 0x5cc   : > { %9369 = vmatmul.msk.bf16.vlgmr.msra.gmra.mxu2 %vm2478_vm2, %v2996_v51  ;;  %9378 = vmatmul.msk.bf16.vlgmr.msrb.gmra.mxu3 %vm2478_vm2, %v2966_v50 }
 0x5cd   : > { %3300 = vmatpush.bf16.msrb.mxu3 %v13282_v34  ;;  %3272 = vmatpush.bf16.msra.mxu2 %v11663_v57 }
 0x5d1   : > { %v3080_v52 = vpop.f32.mrf.mxu0  ;;  %3273 = vmatpush.bf16.msra.mxu2 %v11662_v61  ;;  %v2398_v61 = vunpack.c.l.bf16 %v13236_v5  ;;  %v11676_v5 = vld [vmem:[%s14164_s20 + $0x8] sm:$0xff] }
 0x5d9   : > { %v3082_v54 = vpop.f32.mrf.mxu0 }
 0x5da   : > { %v3085_v55 = vpack.c.bf16 %v3082_v54, %v3080_v52 }
 0x5dc   : > { %9398 = vmatmul.msk.bf16.vlgmr.msra.gmra.mxu1 %vm2478_vm2, %v3085_v55  ;;  %9405 = vmatmul.msk.bf16.vlgmr.msrb.gmra.mxu2 %vm2412_vm1, %v11656_v53  ;;  %v2397_v53 = vunpack.c.l.bf16 %v13234_v3 }
 0x5dd   : > { %3362 = vmatpush.bf16.msra.mxu1 %v13282_v34  ;;  %3396 = vmatpush.bf16.msrb.mxu2 %v11669_v14  ;;  %v11675_v14 = vld [vmem:[%s14162_s4 + $0x8] sm:$0xff] }
 0x5e1   : > { %3397 = vmatpush.bf16.msrb.mxu2 %v11668_v15  ;;  %v3213_v32 = vpop.f32.mrf.mxu0  ;;  %v11674_v15 = vld [vmem:[%s14162_s4] sm:$0xff] }
 0x5e9   : > { %v3215_v33 = vpop.f32.mrf.mxu0 }
 0x5ec   : > { %9438 = vmatmul.msk.bf16.vlgmr.msrb.gmra.mxu1 %vm2412_vm1, %v11661_v56 }
 0x5fc   : > { %9478 = vmatmul.msk.bf16.vlgmr.msra.gmra.mxu1 %vm2412_vm1, %v11667_v62 }
 0x64f   : > { %v3026_v58 = vpop.f32.mrf.mxu2  ;;  %v3055_v59 = vpop.f32.mrf.mxu3 }
 0x650   : > { %v3056_v60 = vadd.f32 %v3055_v59, %v3026_v58 }
 0x657   : > { %v3028_v63 = vpop.f32.mrf.mxu2  ;;  %v3057_v20 = vpop.f32.mrf.mxu3 }
 0x658   : > { %v3058_v39 = vadd.f32 %v3057_v20, %v3028_v63 }
 0x659   : > { %v3115_v0 = vpop.f32.mrf.mxu1 }
 0x65a   : > { %v3120_v1 = vadd.f32 %v3115_v0, %v3056_v60 }
 0x65f   : > { %v3142_v2 = vpop.f32.mrf.mxu2 }
 0x661   : > { %v3117_v4 = vpop.f32.mrf.mxu1 }
 0x662   : > { %v3121_v42 = vadd.f32 %v3117_v4, %v3058_v39 }
 0x667   : > { %v3144_v6 = vpop.f32.mrf.mxu2 }
 0x668   : > { %v3147_v7 = vpack.c.bf16 %v3144_v6, %v3142_v2 }
 0x669   : > { %v3240_v8 = vpop.f32.mrf.mxu1 }
 0x66a   : > { %9418 = vmatmul.msk.bf16.vlgmr.msra.gmra.mxu3 %vm2478_vm2, %v3147_v7 }
 0x66b   : > { %3424 = vmatpush.bf16.msra.mxu3 %v13282_v34 }
 0x671   : > { %v3242_v9 = vpop.f32.mrf.mxu1 }
 0x672   : > { %v3245_v10 = vpack.c.bf16 %v3242_v9, %v3240_v8  ;;  %v11681_v8 = vld [vmem:[%s14162_s4 + $0x28] sm:$0xff]  ;;  %v11673_v9 = vld [vmem:[%s14164_s20] sm:$0xff] }
 0x674   : > { %9451 = vmatmul.msk.bf16.vlgmr.msra.gmra.mxu2 %vm2478_vm2, %v3245_v10  ;;  %v11686_v10 = vld [vmem:[%s14162_s4 + $0x48] sm:$0xff] }
 0x679   : > { %v3364_v13 = vpop.f32.mrf.mxu1 }
 0x67a   : > { %9458 = vmatmul.msk.bf16.vlgmr.msrb.gmra.mxu3 %vm2412_vm1, %v11664_v11  ;;  %v11680_v11 = vld [vmem:[%s14162_s4 + $0x20] sm:$0xff] }
 0x67b   : > { %3569 = vmatpush.bf16.msrb.mxu3 %v11678_v36 }
 0x67f   : > { %3570 = vmatpush.bf16.msrb.mxu3 %v11677_v38 }
 0x681   : > { %v3366_v16 = vpop.f32.mrf.mxu1 }
 0x682   : > { %v3369_v17 = vpack.c.bf16 %v3366_v16, %v3364_v13  ;;  %v11679_v13 = vld [vmem:[%s14164_s20 + $0x10] sm:$0xff]  ;;  %v11684_v16 = vld [vmem:[%s14162_s4 + $0x38] sm:$0xff] }
 0x684   : > { %9491 = vmatmul.msk.bf16.vlgmr.msrb.gmra.mxu2 %vm2478_vm2, %v3369_v17  ;;  %v11683_v17 = vld [vmem:[%s14162_s4 + $0x30] sm:$0xff] }
 0x68a   : > { %9498 = vmatmul.msk.bf16.vlgmr.msra.gmra.mxu3 %vm2412_vm1, %v11670_v12  ;;  %v11685_v12 = vld [vmem:[%s14162_s4 + $0x40] sm:$0xff] }
 0x6ed   : > { %v3177_v21 = vpop.f32.mrf.mxu3 }
 0x6ee   : > { %v3182_v23 = vadd.f32 %v3177_v21, %v3120_v1 }
 0x6f0   : > { %v3218_v40 = vadd.f32 %v3213_v32, %v3182_v23 }
 0x6f5   : > { %v3179_v25 = vpop.f32.mrf.mxu3 }
 0x6f6   : > { %v3183_v44 = vadd.f32 %v3179_v25, %v3121_v42 }
 0x6f7   : > { %v3275_v34 = vpop.f32.mrf.mxu2 }
 0x6f8   : > { %v3280_v43 = vadd.f32 %v3275_v34, %v3218_v40  ;;  %v3219_v47 = vadd.f32 %v3215_v33, %v3183_v44  ;;  %v11688_v34 = vld [vmem:[%s14162_s4 + $0x50] sm:$0xff] }
 0x6fd   : > { %v3302_v26 = vpop.f32.mrf.mxu3 }
 0x6ff   : > { %v3277_v37 = vpop.f32.mrf.mxu2 }
 0x700   : > { %v3281_v51 = vadd.f32 %v3277_v37, %v3219_v47 }
 0x705   : > { %v3304_v27 = vpop.f32.mrf.mxu3 }
 0x706   : > { %v3307_v28 = vpack.c.bf16 %v3304_v27, %v3302_v26  ;;  %v11682_v27 = vld [vmem:[%s14164_s20 + $0x18] sm:$0xff] }
 0x707   : > { %v3399_v46 = vpop.f32.mrf.mxu2 }
 0x708   : > { %9471 = vmatmul.msk.bf16.vlgmr.msrb.gmra.mxu0 %vm2478_vm2, %v3307_v28  ;;  %v11687_v28 = vld [vmem:[%s14164_s20 + $0x20] sm:$0xff] }
 0x709   : > { %3598 = vmatpush.bf16.msrb.mxu0 %v11675_v14 }
 0x70d   : > { %v3426_v29 = vpop.f32.mrf.mxu3  ;;  %3599 = vmatpush.bf16.msrb.mxu0 %v11674_v15 }
 0x70f   : > { %v3401_v57 = vpop.f32.mrf.mxu2 }
 0x715   : > { %v3428_v30 = vpop.f32.mrf.mxu3 }
 0x716   : > { %v3431_v31 = vpack.c.bf16 %v3428_v30, %v3426_v29  ;;  %v11693_v29 = vld [vmem:[%s14164_s20 + $0x30] sm:$0xff]  ;;  %v11689_v30 = vld [vmem:[%s14162_s4 + $0x58] sm:$0xff] }
 0x718   : > { %9511 = vmatmul.msk.bf16.vlgmr.msra.gmra.mxu0 %vm2478_vm2, %v3431_v31 }
 0x719   : > { %3720 = vmatpush.bf16.msra.mxu0 %v11684_v16 }
 0x71d   : > { %3721 = vmatpush.bf16.msra.mxu0 %v11683_v17 }
 0x785   : > { %v3337_v35 = vpop.f32.mrf.mxu0 }
 0x786   : > { %v3342_v45 = vadd.f32 %v3337_v35, %v3280_v43 }
 0x788   : > { %v3404_v48 = vadd.f32 %v3399_v46, %v3342_v45  ;;  %v11690_v45 = vld [vmem:[%s14164_s20 + $0x28] sm:$0xff]  ;;  %v11696_v46 = vld [vmem:[%s14164_s20 + $0x38] sm:$0xff] }
 0x78d   : > { %v3339_v41 = vpop.f32.mrf.mxu0 }
 0x78e   : > { %v3343_v54 = vadd.f32 %v3339_v41, %v3281_v51  ;;  %v11692_v51 = vld [vmem:[%s14162_s4 + $0x68] sm:$0xff] }
 0x790   : > { %v3405_v58 = vadd.f32 %v3401_v57, %v3343_v54 }
 0x795   : > { %v3461_v50 = vpop.f32.mrf.mxu0 }
 0x796   : > { %v3466_v52 = vadd.f32 %v3461_v50, %v3404_v48  ;;  %v11695_v48 = vld [vmem:[%s14162_s4 + $0x78] sm:$0xff] }
 0x798   : > { %v3472_v55 = vadd.f32 %v12242_v49, %v3466_v52 }
 0x79a   : > { %v3474_v56 = vadd.f32 %v3472_v55, %v2397_v53  ;;  %v11691_v53 = vld [vmem:[%s14162_s4 + $0x60] sm:$0xff] }
 0x79c   : > { %v3476_v62 = vmax.f32 %v3474_v56, 0.0  ;;  %v11698_v56 = vld [vmem:[%s14162_s4 + $0x88] sm:$0xff] }
 0x79d   : > { %v3463_v59 = vpop.f32.mrf.mxu0 }
 0x79e   : > { %v3467_v60 = vadd.f32 %v3463_v59, %v3405_v58  ;;  %v13339_v1 = vpack.c.bf16 %v3476_v62, %v3476_v62  ;;  %v11697_v58 = vld [vmem:[%s14162_s4 + $0x80] sm:$0xff] }
 0x7a0   : > { %v3473_v63 = vadd.f32 %v12242_v49, %v3467_v60  ;;  %v3491_v4 = vunpack.c.l.b16 %v13339_v1  ;;  %v11694_v49 = vld [vmem:[%s14162_s4 + $0x70] sm:$0xff] }
 0x7a2   : > { %v3475_v0 = vadd.f32 %v3473_v63, %v2398_v61 }
 0x7a4   : > { %v3477_v3 = vmax.f32 %v3475_v0, 0.0 }
 0x7a6   : > { %v13341_v2 = vpack.c.bf16 %v3477_v3, %v3477_v3 }
 0x7a8   : > { %v3492_v6 = vunpack.c.l.b16 %v13341_v2 }
 0x7aa   : > { %v13345_v7 = vpack.c.b16 %v3492_v6, %v3491_v4 }
 0x7ac   : > { %3505 = vmatpush.bf16.msrb.mxu1 %v13345_v7  ;;  %3535 = vmatpush.bf16.msra.mxu2 %v13345_v7 }
 0x7ad   : > { %3686 = vmatpush.bf16.msra.mxu3 %v13345_v7 }
 0x7af   : > { %9516 = vmatmul.msk.bf16.vlgmr.msrb.gmra.mxu1 %vm2412_vm1, %v11673_v9  ;;  %9523 = vmatmul.msk.bf16.vlgmr.msra.gmra.mxu2 %vm2412_vm1, %v11676_v5  ;;  %v11703_v9 = vld [vmem:[#allocation5 + $0x10] sm:$0xff] }
 0x7b0   : > { %3624 = vmatpush.bf16.msra.mxu1 %v13345_v7  ;;  %3658 = vmatpush.bf16.msrb.mxu2 %v11681_v8  ;;  %v11704_v8 = vld [vmem:[#allocation5 + $0x18] sm:$0xff] }
 0x7b4   : > { %3756 = vmatpush.bf16.msrb.mxu1 %v11686_v10  ;;  %3659 = vmatpush.bf16.msrb.mxu2 %v11680_v11 }
 0x7b8   : > { %3784 = vmatpush.bf16.msra.mxu2 %v13345_v7  ;;  %3757 = vmatpush.bf16.msrb.mxu1 %v11685_v12 }
 0x7bf   : > { %9552 = vmatmul.msk.bf16.vlgmr.msra.gmra.mxu1 %vm2412_vm1, %v11679_v13 }
 0x7c0   : > { %3880 = vmatpush.bf16.msra.mxu1 %v11692_v51 }
 0x7c4   : > { %3881 = vmatpush.bf16.msra.mxu1 %v11691_v53  ;;  %v11708_v53 = vld [vmem:[%s14166_s1 + $0x18] sm:$0xff] }
 0x7cf   : > { %9598 = vmatmul.msk.bf16.vlgmr.msrb.gmra.mxu1 %vm2478_vm2, %v13345_v7 }
 0x7d0   : > { %4004 = vmatpush.bf16.msrb.mxu1 %v11698_v56  ;;  %v11713_v56 = vld [vmem:[%s14166_s1 + $0x20] sm:$0xff] }
 0x7d4   : > { %4005 = vmatpush.bf16.msrb.mxu1 %v11697_v58 }
 0x82c   : > { %v3507_v18 = vpop.f32.mrf.mxu1 }
 0x832   : > { %v3537_v19 = vpop.f32.mrf.mxu2 }
 0x834   : > { %v3509_v20 = vpop.f32.mrf.mxu1 }
 0x835   : > { %v3512_v21 = vpack.c.bf16 %v3509_v20, %v3507_v18 }
 0x837   : > { %9545 = vmatmul.msk.bf16.vlgmr.msrb.gmra.mxu0 %vm2478_vm2, %v3512_v21 }
 0x838   : > { %3846 = vmatpush.bf16.msrb.mxu0 %v13345_v7 }
 0x83a   : > { %v3539_v22 = vpop.f32.mrf.mxu2 }
 0x83b   : > { %v3542_v23 = vpack.c.bf16 %v3539_v22, %v3537_v19 }
 0x83c   : > { %v3626_v24 = vpop.f32.mrf.mxu1 }
 0x83d   : > { %9536 = vmatmul.msk.bf16.vlgmr.msrb.gmra.mxu3 %vm2478_vm2, %v3542_v23 }
 0x83e   : > { %3818 = vmatpush.bf16.msrb.mxu3 %v11689_v30 }
 0x842   : > { %3819 = vmatpush.bf16.msrb.mxu3 %v11688_v34 }
 0x844   : > { %v3628_v25 = vpop.f32.mrf.mxu1 }
 0x845   : > { %v3631_v26 = vpack.c.bf16 %v3628_v25, %v3626_v24  ;;  %v12243_v25 = vld [vmem:[%s14165_s2] ss:$0 sm:$0xff]  ;;  %s14176_s2 = sld [smem:[#allocation48_spill]] }
 0x847   : > { %9565 = vmatmul.msk.bf16.vlgmr.msrb.gmra.mxu2 %vm2478_vm2, %v3631_v26 }
 0x848   : > { %3908 = vmatpush.bf16.msrb.mxu2 %v13345_v7 }
 0x84c   : > { %v3759_v4 = vpop.f32.mrf.mxu1 }
 0x84d   : > { %9572 = vmatmul.msk.bf16.vlgmr.msra.gmra.mxu3 %vm2412_vm1, %v11682_v27 }
 0x84e   : > { %3942 = vmatpush.bf16.msra.mxu3 %v11695_v48 }
 0x852   : > { %3943 = vmatpush.bf16.msra.mxu3 %v11694_v49 }
 0x854   : > { %v3761_v6 = vpop.f32.mrf.mxu1 }
 0x857   : > { %9605 = vmatmul.msk.bf16.vlgmr.msra.gmra.mxu2 %vm2412_vm1, %v11687_v28 }
 0x867   : > { %9645 = vmatmul.msk.bf16.vlgmr.msrb.gmra.mxu2 %vm2412_vm1, %v11693_v29 }
 0x8b4   : > { %v3601_v31 = vpop.f32.mrf.mxu0 }
 0x8bc   : > { %v3603_v54 = vpop.f32.mrf.mxu0 }
 0x8c0   : > { %v3572_v32 = vpop.f32.mrf.mxu3 }
 0x8c1   : > { %v3602_v33 = vadd.f32 %v3601_v31, %v3572_v32 }
 0x8c8   : > { %v3574_v35 = vpop.f32.mrf.mxu3 }
 0x8c9   : > { %v3604_v11 = vadd.f32 %v3603_v54, %v3574_v35  ;;  %v11707_v35 = vld [vmem:[#allocation5 + $0x28] sm:$0xff] }
 0x8ca   : > { %v3661_v36 = vpop.f32.mrf.mxu2 }
 0x8cb   : > { %v3666_v37 = vadd.f32 %v3661_v36, %v3602_v33  ;;  %v11699_v36 = vld [vmem:[%s14166_s1] sm:$0xff] }
 0x8d0   : > { %v3688_v38 = vpop.f32.mrf.mxu3 }
 0x8d2   : > { %v3663_v39 = vpop.f32.mrf.mxu2 }
 0x8d3   : > { %v3667_v13 = vadd.f32 %v3663_v39, %v3604_v11  ;;  %v11706_v39 = vld [vmem:[#allocation5 + $0x20] sm:$0xff] }
 0x8d8   : > { %v3690_v40 = vpop.f32.mrf.mxu3 }
 0x8d9   : > { %v3693_v41 = vpack.c.bf16 %v3690_v40, %v3688_v38  ;;  %v11712_v38 = vld [vmem:[#allocation5 + $0x48] sm:$0xff]  ;;  %v11711_v40 = vld [vmem:[#allocation5 + $0x40] sm:$0xff] }
 0x8da   : > { %v3786_v42 = vpop.f32.mrf.mxu2 }
 0x8db   : > { %9585 = vmatmul.msk.bf16.vlgmr.msra.gmra.mxu0 %vm2478_vm2, %v3693_v41  ;;  %v11705_v41 = vld [vmem:[%s14166_s1 + $0x10] sm:$0xff] }
 0x8dc   : > { %3970 = vmatpush.bf16.msra.mxu0 %v13345_v7 }
 0x8e2   : > { %v3788_v43 = vpop.f32.mrf.mxu2 }
 0x8e3   : > { %v3791_v44 = vpack.c.bf16 %v3788_v43, %v3786_v42  ;;  %v11701_v42 = vld [vmem:[#allocation5 + $0x8] sm:$0xff]  ;;  %v11700_v43 = vld [vmem:[#allocation5] sm:$0xff] }
 0x8e5   : > { %9618 = vmatmul.msk.bf16.vlgmr.msrb.gmra.mxu3 %vm2478_vm2, %v3791_v44  ;;  %v11710_v44 = vld [vmem:[#allocation5 + $0x38] sm:$0xff] }
 0x8ea   : > { %v3910_v47 = vpop.f32.mrf.mxu2 }
 0x8eb   : > { %9625 = vmatmul.msk.bf16.vlgmr.msrb.gmra.mxu0 %vm2412_vm1, %v11690_v45  ;;  %v11709_v45 = vld [vmem:[#allocation5 + $0x30] sm:$0xff] }
 0x8ec   : > { %4104 = vmatpush.bf16.msrb.mxu0 %v11704_v8 }
 0x8f0   : > { %4105 = vmatpush.bf16.msrb.mxu0 %v11703_v9 }
 0x8f2   : > { %v3912_v50 = vpop.f32.mrf.mxu2 }
 0x8f3   : > { %v3915_v52 = vpack.c.bf16 %v3912_v50, %v3910_v47 }
 0x8f5   : > { %9658 = vmatmul.msk.bf16.vlgmr.msra.gmra.mxu3 %vm2478_vm2, %v3915_v52 }
 0x8fb   : > { %9665 = vmatmul.msk.bf16.vlgmr.msra.gmra.mxu0 %vm2412_vm1, %v11696_v46 }
 0x958   : > { %v3723_v55 = vpop.f32.mrf.mxu0 }
 0x959   : > { %v3728_v57 = vadd.f32 %v3723_v55, %v3666_v37  ;;  %v11702_v37 = vld [vmem:[%s14166_s1 + $0x8] sm:$0xff] }
 0x95b   : > { %v3764_v15 = vadd.f32 %v3759_v4, %v3728_v57 }
 0x960   : > { %v3725_v59 = vpop.f32.mrf.mxu0 }
 0x961   : > { %v3729_v14 = vadd.f32 %v3725_v59, %v3667_v13  ;;  %v11718_v13 = vld [vmem:[#allocation5 + $0x68] sm:$0xff] }
 0x963   : > { %v3765_v18 = vadd.f32 %v3761_v6, %v3729_v14 }
 0x968   : > { %v3848_v60 = vpop.f32.mrf.mxu0  ;;  %v3821_v7 = vpop.f32.mrf.mxu3 }
 0x969   : > { %v3826_v17 = vadd.f32 %v3821_v7, %v3764_v15  ;;  %v11717_v15 = vld [vmem:[#allocation5 + $0x60] sm:$0xff] }
 0x970   : > { %v3850_v61 = vpop.f32.mrf.mxu0  ;;  %v3823_v10 = vpop.f32.mrf.mxu3 }
 0x971   : > { %v3853_v62 = vpack.c.bf16 %v3850_v61, %v3848_v60  ;;  %v3827_v21 = vadd.f32 %v3823_v10, %v3765_v18  ;;  %v11719_v60 = vld [vmem:[%s14166_s1 + $0x30] sm:$0xff]  ;;  %v11715_v61 = vld [vmem:[#allocation5 + $0x58] sm:$0xff] }
 0x973   : > { %9638 = vmatmul.msk.bf16.vlgmr.msra.gmra.mxu1 %vm2478_vm2, %v3853_v62 }
 0x974   : > { %4133 = vmatpush.bf16.msra.mxu1 %v11701_v42 }
 0x978   : > { %v3972_v63 = vpop.f32.mrf.mxu0  ;;  %v3945_v16 = vpop.f32.mrf.mxu3  ;;  %4134 = vmatpush.bf16.msra.mxu1 %v11700_v43 }
 0x980   : > { %v3974_v0 = vpop.f32.mrf.mxu0  ;;  %v3947_v26 = vpop.f32.mrf.mxu3 }
 0x981   : > { %v3977_v3 = vpack.c.bf16 %v3974_v0, %v3972_v63  ;;  %v11714_v63 = vld [vmem:[#allocation5 + $0x50] sm:$0xff] }
 0x983   : > { %9678 = vmatmul.msk.bf16.vlgmr.msrb.gmra.mxu1 %vm2478_vm2, %v3977_v3 }
 0x984   : > { %4255 = vmatpush.bf16.msrb.mxu1 %v11710_v44 }
 0x988   : > { %4256 = vmatpush.bf16.msrb.mxu1 %v11709_v45 }
 0x9f0   : > { %v3883_v5 = vpop.f32.mrf.mxu1 }
 0x9f1   : > { %v3888_v19 = vadd.f32 %v3883_v5, %v3826_v17  ;;  %v11716_v5 = vld [vmem:[%s14166_s1 + $0x28] sm:$0xff] }
 0x9f3   : > { %v3950_v23 = vadd.f32 %v3945_v16, %v3888_v19  ;;  %v11721_v16 = vld [vmem:[#allocation5 + $0x78] sm:$0xff]  ;;  %v11720_v19 = vld [vmem:[#allocation5 + $0x70] sm:$0xff] }
 0x9f8   : > { %v3885_v12 = vpop.f32.mrf.mxu1 }
 0x9f9   : > { %v3889_v22 = vadd.f32 %v3885_v12, %v3827_v21  ;;  %v11722_v12 = vld [vmem:[%s14166_s1 + $0x38] sm:$0xff]  ;;  %s14183_s1 = sld [smem:[#allocation56_spill]] }
 0x9fb   : > { %v3951_v27 = vadd.f32 %v3947_v26, %v3889_v22  ;;  %v11724_v22 = vld [vmem:[#allocation5 + $0x88] sm:$0xff] }
 0xa00   : > { %v4007_v20 = vpop.f32.mrf.mxu1 }
 0xa01   : > { %v4012_v24 = vadd.f32 %v4007_v20, %v3950_v23 }
 0xa03   : > { %v4018_v29 = vadd.f32 %v12243_v25, %v4012_v24  ;;  %v11723_v24 = vld [vmem:[#allocation5 + $0x80] sm:$0xff] }
 0xa05   : > { %v4020_v32 = vmax.f32 %v4018_v29, 0.0 }
 0xa08   : > { %v4009_v28 = vpop.f32.mrf.mxu1 }
 0xa09   : > { %v4013_v30 = vadd.f32 %v4009_v28, %v3951_v27 }
 0xa0b   : > { %v4019_v31 = vadd.f32 %v12243_v25, %v4013_v30 }
 0xa0d   : > { %v4021_v33 = vmax.f32 %v4019_v31, 0.0 }
 0xa0f   : > { %v13398_v34 = vpack.c.bf16 %v4021_v33, %v4020_v32 }
 0xa11   : > { %4040 = vmatpush.bf16.msra.mxu2 %v13398_v34  ;;  %4070 = vmatpush.bf16.msrb.mxu3 %v13398_v34 }
 0xa12   : > { %4221 = vmatpush.bf16.msra.mxu0 %v13398_v34 }
 0xa14   : > { %9683 = vmatmul.msk.bf16.vlgmr.msra.gmra.mxu2 %vm2412_vm1, %v11699_v36  ;;  %9690 = vmatmul.msk.bf16.vlgmr.msrb.gmra.mxu3 %vm2412_vm1, %v11702_v37 }
 0xa15   : > { %4159 = vmatpush.bf16.msrb.mxu2 %v13398_v34  ;;  %4193 = vmatpush.bf16.msra.mxu3 %v11707_v35 }
 0xa19   : > { %4291 = vmatpush.bf16.msra.mxu2 %v11712_v38  ;;  %4194 = vmatpush.bf16.msra.mxu3 %v11706_v39 }
 0xa1d   : > { %4319 = vmatpush.bf16.msrb.mxu3 %v13398_v34  ;;  %4292 = vmatpush.bf16.msra.mxu2 %v11711_v40 }
 0xa24   : > { %9715 = vmatmul.msk.bf16.vlgmr.msrb.gmra.mxu2 %vm2412_vm1, %v11705_v41 }
 0xa25   : > { %4415 = vmatpush.bf16.msrb.mxu2 %v11718_v13  ;;  %v11727_v13 = vld [vmem:[#allocation8] sm:$0xff] }
 0xa29   : > { %4416 = vmatpush.bf16.msrb.mxu2 %v11717_v15 }
 0xa34   : > { %9749 = vmatmul.msk.bf16.vlgmr.msra.gmra.mxu2 %vm2478_vm2, %v13398_v34 }
 0xa35   : > { %4539 = vmatpush.bf16.msra.mxu2 %v11724_v22 }
 0xa39   : > { %4540 = vmatpush.bf16.msra.mxu2 %v11723_v24 }
 0xa97   : > { %v4042_v46 = vpop.f32.mrf.mxu2  ;;  %v4072_v47 = vpop.f32.mrf.mxu3 }
 0xa9f   : > { %v4044_v48 = vpop.f32.mrf.mxu2  ;;  %v4074_v49 = vpop.f32.mrf.mxu3 }
 0xaa0   : > { %v4047_v50 = vpack.c.bf16 %v4044_v48, %v4042_v46  ;;  %v4077_v51 = vpack.c.bf16 %v4074_v49, %v4072_v47  ;;  %v12244_v47 = vld [vmem:[%s14167_s11] ss:$0 sm:$0xff]  ;;  %s14177_s11 = sld [smem:[#allocation46_spill]] }
 0xaa2   : > { %9699 = vmatmul.msk.bf16.vlgmr.msrb.gmra.mxu0 %vm2478_vm2, %v4077_v51  ;;  %9708 = vmatmul.msk.bf16.vlgmr.msra.gmra.mxu1 %vm2478_vm2, %v4047_v50 }
 0xaa3   : > { %4381 = vmatpush.bf16.msra.mxu1 %v13398_v34  ;;  %4353 = vmatpush.bf16.msrb.mxu0 %v11715_v61 }
 0xaa7   : > { %v4161_v52 = vpop.f32.mrf.mxu2  ;;  %4354 = vmatpush.bf16.msrb.mxu0 %v11714_v63 }
 0xaaf   : > { %v4163_v54 = vpop.f32.mrf.mxu2 }
 0xab0   : > { %v4166_v55 = vpack.c.bf16 %v4163_v54, %v4161_v52  ;;  %v3480_v52 = vunpack.c.l.bf16 %v13339_v1  ;;  %v4637_v1 = vld [vmem:[#allocation10 + $0x2] sm:$0x3] }
 0xab2   : > { %9724 = vmatmul.msk.bf16.vlgmr.msra.gmra.mxu3 %vm2478_vm2, %v4166_v55  ;;  %9731 = vmatmul.msk.bf16.vlgmr.msra.gmra.mxu0 %vm2412_vm1, %v11708_v53 }
 0xab3   : > { %4443 = vmatpush.bf16.msra.mxu3 %v13398_v34  ;;  %4477 = vmatpush.bf16.msra.mxu0 %v11721_v16 }
 0xab7   : > { %4478 = vmatpush.bf16.msra.mxu0 %v11720_v19  ;;  %v4294_v32 = vpop.f32.mrf.mxu2 }
 0xabf   : > { %v4296_v33 = vpop.f32.mrf.mxu2 }
 0xac2   : > { %9756 = vmatmul.msk.bf16.vlgmr.msrb.gmra.mxu3 %vm2412_vm1, %v11713_v56 }
 0xad2   : > { %9788 = vmatmul.msk.bf16.vlgmr.msra.gmra.mxu3 %vm2412_vm1, %v11719_v60 }
 0xb1f   : > { %v4107_v57 = vpop.f32.mrf.mxu0  ;;  %v4136_v58 = vpop.f32.mrf.mxu1 }
 0xb20   : > { %v4137_v59 = vadd.f32 %v4136_v58, %v4107_v57 }
 0xb27   : > { %v4109_v62 = vpop.f32.mrf.mxu0  ;;  %v4138_v17 = vpop.f32.mrf.mxu1 }
 0xb28   : > { %v4139_v37 = vadd.f32 %v4138_v17, %v4109_v62 }
 0xb2f   : > { %v4223_v0 = vpop.f32.mrf.mxu0 }
 0xb35   : > { %v4196_v3 = vpop.f32.mrf.mxu3 }
 0xb36   : > { %v4201_v4 = vadd.f32 %v4196_v3, %v4137_v59  ;;  %v3481_v59 = vunpack.c.l.bf16 %v13341_v2  ;;  %v11726_v2 = vld [vmem:[#allocation7 + $0x8] sm:$0xff] }
 0xb37   : > { %v4225_v6 = vpop.f32.mrf.mxu0 }
 0xb38   : > { %v4228_v7 = vpack.c.bf16 %v4225_v6, %v4223_v0  ;;  %v11730_v0 = vld [vmem:[#allocation8 + $0x18] sm:$0xff]  ;;  %v4614_v6 = vld [vmem:[#allocation10] sm:$0x3] }
 0xb3a   : > { %9740 = vmatmul.msk.bf16.vlgmr.msrb.gmra.mxu1 %vm2478_vm2, %v4228_v7  ;;  %v11729_v7 = vld [vmem:[#allocation8 + $0x10] sm:$0xff] }
 0xb3b   : > { %4505 = vmatpush.bf16.msrb.mxu1 %v13398_v34 }
 0xb3d   : > { %v4198_v8 = vpop.f32.mrf.mxu3 }
 0xb3e   : > { %v4202_v40 = vadd.f32 %v4198_v8, %v4139_v37  ;;  %v4717_v8 = vld [vmem:[#allocation10 + $0x4] sm:$0x3] }
 0xb3f   : > { %v11733_v37 = vld [vmem:[#allocation8 + $0x30] sm:$0xff] }
 0xb45   : > { %v4321_v9 = vpop.f32.mrf.mxu3 }
 0xb4a   : > { %9772 = vmatmul.msk.bf16.vlgmr.msra.gmra.mxu1 %vm2412_vm1, %v11716_v5  ;;  %v11725_v5 = vld [vmem:[#allocation7] sm:$0xff] }
 0xb4d   : > { %v4323_v10 = vpop.f32.mrf.mxu3 }
 0xb4e   : > { %v4326_v11 = vpack.c.bf16 %v4323_v10, %v4321_v9  ;;  %v4823_v9 = vld [vmem:[#allocation10 + $0x8] sm:$0x3]  ;;  %v11732_v10 = vld [vmem:[#allocation8 + $0x28] sm:$0xff] }
 0xb50   : > { %9765 = vmatmul.msk.bf16.vlgmr.msrb.gmra.mxu0 %vm2478_vm2, %v4326_v11  ;;  %v11728_v11 = vld [vmem:[#allocation8 + $0x8] sm:$0xff] }
 0xb51   : > { %4607 = vmatpush.bf16.msrb.mxu0 %v11726_v2 }
 0xb55   : > { %v4445_v14 = vpop.f32.mrf.mxu3  ;;  %4608 = vmatpush.bf16.msrb.mxu0 %v11725_v5 }
 0xb5a   : > { %9804 = vmatmul.msk.bf16.vlgmr.msrb.gmra.mxu1 %vm2412_vm1, %v11722_v12  ;;  %v11731_v12 = vld [vmem:[#allocation8 + $0x20] sm:$0xff] }
 0xb5d   : > { %v4447_v18 = vpop.f32.mrf.mxu3 }
 0xb5e   : > { %v4450_v20 = vpack.c.bf16 %v4447_v18, %v4445_v14  ;;  %v4929_v14 = vld [vmem:[#allocation10 + $0xc] sm:$0x3] }
 0xb60   : > { %9797 = vmatmul.msk.bf16.vlgmr.msra.gmra.mxu0 %vm2478_vm2, %v4450_v20 }
 0xb61   : > { %4709 = vmatpush.bf16.msra.mxu0 %v11728_v11  ;;  %v11752_v11 = vld [vmem:[%s14169_s29 + $0x38] sm:$0xff] }
 0xb65   : > { %4710 = vmatpush.bf16.msra.mxu0 %v11727_v13 }
 0xbb7   : > { %v4258_v21 = vpop.f32.mrf.mxu1 }
 0xbb8   : > { %v4263_v23 = vadd.f32 %v4258_v21, %v4201_v4  ;;  %v4560_v4 = vld [vmem:[%s14168_s12] sm:$0x3]  ;;  %v5035_v21 = vld [vmem:[#allocation10 + $0x10] sm:$0x3]  ;;  %s14178_s12 = sld [smem:[#allocation50_spill]] }
 0xbba   : > { %v4299_v38 = vadd.f32 %v4294_v32, %v4263_v23 }
 0xbbf   : > { %v4260_v25 = vpop.f32.mrf.mxu1 }
 0xbc0   : > { %v4264_v42 = vadd.f32 %v4260_v25, %v4202_v40  ;;  %v11739_v40 = vld [vmem:[#allocation8 + $0x60] sm:$0xff] }
 0xbc2   : > { %v4300_v45 = vadd.f32 %v4296_v33, %v4264_v42  ;;  %v11735_v33 = vld [vmem:[#allocation8 + $0x40] sm:$0xff]  ;;  %v11738_v42 = vld [vmem:[#allocation8 + $0x58] sm:$0xff] }
 0xbc7   : > { %v4383_v26 = vpop.f32.mrf.mxu1 }
 0xbcd   : > { %v4356_v34 = vpop.f32.mrf.mxu0 }
 0xbce   : > { %v4361_v41 = vadd.f32 %v4356_v34, %v4299_v38  ;;  %v11740_v38 = vld [vmem:[#allocation8 + $0x68] sm:$0xff] }
 0xbcf   : > { %v4385_v27 = vpop.f32.mrf.mxu1 }
 0xbd0   : > { %v4388_v28 = vpack.c.bf16 %v4385_v27, %v4383_v26  ;;  %v4770_v27 = vld [vmem:[#allocation10 + $0x6] sm:$0x3] }
 0xbd2   : > { %9781 = vmatmul.msk.bf16.vlgmr.msrb.gmra.mxu2 %vm2478_vm2, %v4388_v28 }
 0xbd5   : > { %v4358_v36 = vpop.f32.mrf.mxu0 }
 0xbd6   : > { %v4362_v49 = vadd.f32 %v4358_v36, %v4300_v45  ;;  %v11734_v36 = vld [vmem:[#allocation8 + $0x38] sm:$0xff]  ;;  %v11737_v45 = vld [vmem:[#allocation8 + $0x50] sm:$0xff] }
 0xbd7   : > { %v4507_v29 = vpop.f32.mrf.mxu1 }
 0xbdd   : > { %v4480_v44 = vpop.f32.mrf.mxu0 }
 0xbdf   : > { %v4509_v30 = vpop.f32.mrf.mxu1 }
 0xbe0   : > { %v4512_v31 = vpack.c.bf16 %v4509_v30, %v4507_v29  ;;  %v4876_v29 = vld [vmem:[#allocation10 + $0xa] sm:$0x3]  ;;  %v4982_v30 = vld [vmem:[#allocation10 + $0xe] sm:$0x3] }
 0xbe2   : > { %9813 = vmatmul.msk.bf16.vlgmr.msra.gmra.mxu2 %vm2478_vm2, %v4512_v31  ;;  %v11736_v31 = vld [vmem:[#allocation8 + $0x48] sm:$0xff] }
 0xbe5   : > { %v4482_v55 = vpop.f32.mrf.mxu0 }
 0xc55   : > { %v4418_v35 = vpop.f32.mrf.mxu2 }
 0xc56   : > { %v4423_v43 = vadd.f32 %v4418_v35, %v4361_v41 }
 0xc58   : > { %v4485_v46 = vadd.f32 %v4480_v44, %v4423_v43 }
 0xc5d   : > { %v4420_v39 = vpop.f32.mrf.mxu2 }
 0xc5e   : > { %v4424_v51 = vadd.f32 %v4420_v39, %v4362_v49 }
 0xc60   : > { %v4486_v56 = vadd.f32 %v4482_v55, %v4424_v51 }
 0xc65   : > { %v4542_v48 = vpop.f32.mrf.mxu2 }
 0xc66   : > { %v4547_v50 = vadd.f32 %v4542_v48, %v4485_v46  ;;  %v11744_v46 = vld [vmem:[#allocation8 + $0x88] sm:$0xff] }
 0xc68   : > { %v4553_v53 = vadd.f32 %v12244_v47, %v4547_v50  ;;  %v11743_v50 = vld [vmem:[#allocation8 + $0x80] sm:$0xff] }
 0xc6a   : > { %v4555_v54 = vadd.f32 %v4553_v53, %v3480_v52 }
 0xc6c   : > { %v4557_v62 = vmax.f32 %v4555_v54, 0.0 }
 0xc6d   : > { %v4544_v57 = vpop.f32.mrf.mxu2 }
 0xc6e   : > { %v4548_v58 = vadd.f32 %v4544_v57, %v4486_v56 }
 0xc70   : > { %v4554_v60 = vadd.f32 %v12244_v47, %v4548_v58 }
 0xc72   : > { %v4556_v61 = vadd.f32 %v4554_v60, %v3481_v59  ;;  %v11742_v59 = vld [vmem:[#allocation8 + $0x78] sm:$0xff] }
 0xc74   : > { %v4558_v63 = vmax.f32 %v4556_v61, 0.0 }
 0xc76   : > { %v4559_v3 = vpack.c.bf16 %v4558_v63, %v4557_v62  ;;  %v11741_v63 = vld [vmem:[#allocation8 + $0x70] sm:$0xff] }
 0xc78   : > { %4571 = vmatpush.bf16.msrb.mxu3 %v4559_v3  ;;  %4625 = vmatpush.bf16.msra.mxu1 %v4559_v3 }
 0xc79   : > { %4648 = vmatpush.bf16.msrb.mxu2 %v4559_v3 }
 0xc7b   : > { %9814 = vmatmul.msk.bf16.vlgmr.msrb.gmra.mxu3 %vm2412_vm1, %v4560_v4  ;;  %9824 = vmatmul.msk.bf16.vlgmr.msra.gmra.mxu1 %vm2412_vm1, %v4614_v6 }
 0xc7c   : > { %4681 = vmatpush.bf16.msra.mxu3 %v11730_v0  ;;  %4728 = vmatpush.bf16.msrb.mxu1 %v4559_v3 }
 0xc7d   : > { %9825 = vmatmul.msk.bf16.vlgmr.msrb.gmra.mxu2 %vm2412_vm1, %v4637_v1 }
 0xc7e   : > { %4761 = vmatpush.bf16.msra.mxu2 %v11732_v10 }
 0xc80   : > { %4834 = vmatpush.bf16.msra.mxu1 %v4559_v3  ;;  %4682 = vmatpush.bf16.msra.mxu3 %v11729_v7 }
 0xc82   : > { %4762 = vmatpush.bf16.msra.mxu2 %v11731_v12 }
 0xc84   : > { %4781 = vmatpush.bf16.msrb.mxu3 %v4559_v3 }
 0xc86   : > { %4867 = vmatpush.bf16.msrb.mxu2 %v11736_v31 }
 0xc8a   : > { %4868 = vmatpush.bf16.msrb.mxu2 %v11735_v33  ;;  %v11756_v33 = vld [vmem:[%s14169_s29 + $0x58] sm:$0xff] }
 0xc8b   : > { %9844 = vmatmul.msk.bf16.vlgmr.msrb.gmra.mxu1 %vm2412_vm1, %v4717_v8 }
 0xc8c   : > { %4940 = vmatpush.bf16.msrb.mxu1 %v4559_v3 }
 0xc9b   : > { %9864 = vmatmul.msk.bf16.vlgmr.msra.gmra.mxu1 %vm2412_vm1, %v4823_v9 }
 0xc9c   : > { %5046 = vmatpush.bf16.msra.mxu1 %v4559_v3 }
 0xcab   : > { %9884 = vmatmul.msk.bf16.vlgmr.msrb.gmra.mxu1 %vm2412_vm1, %v4929_v14  ;;  %v11751_v14 = vld [vmem:[%s14169_s29 + $0x30] sm:$0xff] }
 0xcac   : > { %5184 = vmatpush.bf16.msrb.mxu1 %v11752_v11 }
 0xcb0   : > { %5185 = vmatpush.bf16.msrb.mxu1 %v11751_v14 }
 0xcbb   : > { %9904 = vmatmul.msk.bf16.vlgmr.msra.gmra.mxu1 %vm2412_vm1, %v5035_v21 }
 0xcf8   : > { %v4627_v15 = vpop.f32.mrf.mxu1 }
 0xcf9   : > { %v4631_v26 = vpack.c.bf16 %v4627_v15, %v4627_v15 }
 0xcfe   : > { %v4573_v16 = vpop.f32.mrf.mxu3 }
 0xcff   : > { %v4577_v17 = vpack.c.bf16 %v4573_v16, %v4573_v16  ;;  %v11750_v16 = vld [vmem:[%s14169_s29 + $0x28] sm:$0xff] }
 0xd00   : > { %v4650_v18 = vpop.f32.mrf.mxu2  ;;  %v4629_v20 = vpop.f32.mrf.mxu1  ;;  %5186 = vmatpush.bf16.msrb.mxu1 %v11750_v16 }
 0xd01   : > { %v4654_v19 = vpack.c.bf16 %v4650_v18, %v4650_v18  ;;  %9823 = vmatmul.msk.bf16.vlgmr.msrb.gmra.mxu0 %vm2478_vm2, %v4577_v17  ;;  %v11749_v18 = vld [vmem:[%s14169_s29 + $0x20] sm:$0xff] }
 0xd02   : > { %4814 = vmatpush.bf16.msrb.mxu0 %v11734_v36  ;;  %v9915_v36 = vld [vmem:[%s14171_s18 + $0x2] sm:$0x3] }
 0xd03   : > { %9834 = vmatmul.msk.bf16.vlgmr.msra.gmra.mxu3 %vm2478_vm2, %v4654_v19 }
 0xd04   : > { %4887 = vmatpush.bf16.msra.mxu3 %v4559_v3  ;;  %5187 = vmatpush.bf16.msrb.mxu1 %v11749_v18 }
 0xd06   : > { %v4575_v22 = vpop.f32.mrf.mxu3  ;;  %4815 = vmatpush.bf16.msrb.mxu0 %v11733_v37  ;;  %v11764_v37 = vld [vmem:[%s14169_s29 + $0x98] sm:$0xff] }
 0xd08   : > { %v4652_v23 = vpop.f32.mrf.mxu2  ;;  %v4730_v24 = vpop.f32.mrf.mxu1 }
 0xd09   : > { %v4734_v25 = vpack.c.bf16 %v4730_v24, %v4730_v24 }
 0xd0b   : > { %9853 = vmatmul.msk.bf16.vlgmr.msra.gmra.mxu2 %vm2478_vm2, %v4734_v25 }
 0xd0c   : > { %4973 = vmatpush.bf16.msra.mxu2 %v11740_v38  ;;  %v11755_v38 = vld [vmem:[%s14169_s29 + $0x50] sm:$0xff] }
 0xd10   : > { %v4732_v28 = vpop.f32.mrf.mxu1  ;;  %4974 = vmatpush.bf16.msra.mxu2 %v11739_v40  ;;  %v11763_v40 = vld [vmem:[%s14169_s29 + $0x90] sm:$0xff] }
 0xd11   : > { %9843 = vmatmul.msk.bf16.vlgmr.msra.gmra.mxu0 %vm2478_vm2, %v4631_v26 }
 0xd12   : > { %4920 = vmatpush.bf16.msra.mxu0 %v11738_v42  ;;  %v11754_v42 = vld [vmem:[%s14169_s29 + $0x48] sm:$0xff] }
 0xd13   : > { %9854 = vmatmul.msk.bf16.vlgmr.msrb.gmra.mxu3 %vm2412_vm1, %v4770_v27  ;;  %v12246_v27 = vld [vmem:[%s14170_s15] ss:$0 sm:$0xff]  ;;  %s14179_s15 = sld [smem:[#allocation49_spill]] }
 0xd14   : > { %4993 = vmatpush.bf16.msrb.mxu3 %v4559_v3 }
 0xd16   : > { %4921 = vmatpush.bf16.msra.mxu0 %v11737_v45  ;;  %v11746_v45 = vld [vmem:[%s14169_s29 + $0x8] sm:$0xff] }
 0xd18   : > { %v4836_v32 = vpop.f32.mrf.mxu1 }
 0xd19   : > { %v4840_v34 = vpack.c.bf16 %v4836_v32, %v4836_v32 }
 0xd1b   : > { %9873 = vmatmul.msk.bf16.vlgmr.msrb.gmra.mxu2 %vm2478_vm2, %v4840_v34 }
 0xd1c   : > { %5079 = vmatpush.bf16.msrb.mxu2 %v11744_v46  ;;  %v11753_v46 = vld [vmem:[%s14169_s29 + $0x40] sm:$0xff] }
 0xd20   : > { %v4838_v35 = vpop.f32.mrf.mxu1  ;;  %5080 = vmatpush.bf16.msrb.mxu2 %v11743_v50  ;;  %v9959_v50 = vld [vmem:[%s14171_s18 + $0x4] sm:$0x3] }
 0xd21   : > { %v5094_v35 = vld [vmem:[%s14171_s18] sm:$0x3] }
 0xd23   : > { %9874 = vmatmul.msk.bf16.vlgmr.msra.gmra.mxu3 %vm2412_vm1, %v4876_v29 }
 0xd28   : > { %v4942_v39 = vpop.f32.mrf.mxu1 }
 0xd29   : > { %v4946_v41 = vpack.c.bf16 %v4942_v39, %v4942_v39  ;;  %v11748_v39 = vld [vmem:[%s14169_s29 + $0x18] sm:$0xff] }
 0xd2b   : > { %9893 = vmatmul.msk.bf16.vlgmr.msra.gmra.mxu2 %vm2478_vm2, %v4946_v41  ;;  %v11747_v41 = vld [vmem:[%s14169_s29 + $0x10] sm:$0xff] }
 0xd2c   : > { %5224 = vmatpush.bf16.msra.mxu2 %v11748_v39 }
 0xd30   : > { %v4944_v44 = vpop.f32.mrf.mxu1  ;;  %5225 = vmatpush.bf16.msra.mxu2 %v11747_v41 }
 0xd31   : > { %v11762_v44 = vld [vmem:[%s14169_s29 + $0x88] sm:$0xff] }
 0xd33   : > { %9894 = vmatmul.msk.bf16.vlgmr.msrb.gmra.mxu3 %vm2412_vm1, %v4982_v30 }
 0xd34   : > { %5226 = vmatpush.bf16.msra.mxu2 %v11746_v45 }
 0xd38   : > { %v5048_v49 = vpop.f32.mrf.mxu1 }
 0xd39   : > { %v5052_v51 = vpack.c.bf16 %v5048_v49, %v5048_v49  ;;  %v11760_v49 = vld [vmem:[%s14169_s29 + $0x78] sm:$0xff] }
 0xd3b   : > { %9913 = vmatmul.msk.bf16.vlgmr.msrb.gmra.mxu2 %vm2478_vm2, %v5052_v51  ;;  %v11759_v51 = vld [vmem:[%s14169_s29 + $0x70] sm:$0xff] }
 0xd40   : > { %v5050_v56 = vpop.f32.mrf.mxu1 }
 0xd7e   : > { %v13454_v43 = vpop.f32.mrf.mxu0 }
 0xd86   : > { %v4684_v47 = vpop.f32.mrf.mxu3  ;;  %v4612_v48 = vpop.f32.mrf.mxu0 }
 0xd87   : > { %v11745_v48 = vld [vmem:[%s14169_s29] sm:$0xff] }
 0xd88   : > { %5227 = vmatpush.bf16.msra.mxu2 %v11745_v48 }
 0xd8c   : > { %5361 = vmatpush.bf16.msrb.mxu2 %v11760_v49 }
 0xd8e   : > { %v4686_v52 = vpop.f32.mrf.mxu3  ;;  %v4712_v53 = vpop.f32.mrf.mxu0 }
 0xd8f   : > { %v4764_v54 = vpop.f32.mrf.mxu2  ;;  %v4713_v55 = vadd.f32 %v4712_v53, %v4684_v47  ;;  %v11761_v47 = vld [vmem:[%s14169_s29 + $0x80] sm:$0xff]  ;;  %v11758_v52 = vld [vmem:[%s14169_s29 + $0x68] sm:$0xff] }
 0xd90   : > { %5362 = vmatpush.bf16.msrb.mxu2 %v11759_v51  ;;  %v11757_v53 = vld [vmem:[%s14169_s29 + $0x60] sm:$0xff] }
 0xd91   : > { %v4768_v57 = vadd.f32 %v4764_v54, %v4713_v55 }
 0xd94   : > { %5363 = vmatpush.bf16.msrb.mxu2 %v11758_v52 }
 0xd96   : > { %v4783_v58 = vpop.f32.mrf.mxu3  ;;  %v4714_v61 = vpop.f32.mrf.mxu0 }
 0xd97   : > { %v4787_v60 = vpack.c.bf16 %v4783_v58, %v4783_v58  ;;  %v4766_v62 = vpop.f32.mrf.mxu2 }
 0xd98   : > { %5364 = vmatpush.bf16.msrb.mxu2 %v11757_v53 }
 0xd99   : > { %9863 = vmatmul.msk.bf16.vlgmr.msrb.gmra.mxu0 %vm2478_vm2, %v4787_v60  ;;  %v9986_v60 = vld [vmem:[%s14171_s18 + $0x6] sm:$0x3] }
 0xd9a   : > { %5026 = vmatpush.bf16.msrb.mxu0 %v11742_v59 }
 0xd9e   : > { %v4785_v0 = vpop.f32.mrf.mxu3  ;;  %5027 = vmatpush.bf16.msrb.mxu0 %v11741_v63 }
 0xd9f   : > { %v4870_v8 = vpop.f32.mrf.mxu2 }
 0xda6   : > { %v4889_v3 = vpop.f32.mrf.mxu3 }
 0xda7   : > { %v4893_v4 = vpack.c.bf16 %v4889_v3, %v4889_v3  ;;  %v4872_v9 = vpop.f32.mrf.mxu2  ;;  %v10038_v3 = vld [vmem:[%s14171_s18 + $0x8] sm:$0x3] }
 0xda9   : > { %9883 = vmatmul.msk.bf16.vlgmr.msra.gmra.mxu0 %vm2478_vm2, %v4893_v4 }
 0xdae   : > { %v4891_v6 = vpop.f32.mrf.mxu3 }
 0xdaf   : > { %v4976_v5 = vpop.f32.mrf.mxu2  ;;  %v11768_v6 = vld [vmem:[%s14169_s29 + $0xb8] sm:$0xff] }
 0xdb6   : > { %v4995_v1 = vpop.f32.mrf.mxu3 }
 0xdb7   : > { %v4999_v7 = vpack.c.bf16 %v4995_v1, %v4995_v1  ;;  %v4978_v10 = vpop.f32.mrf.mxu2  ;;  %v11767_v1 = vld [vmem:[%s14169_s29 + $0xb0] sm:$0xff] }
 0xdb9   : > { %9903 = vmatmul.msk.bf16.vlgmr.msrb.gmra.mxu0 %vm2478_vm2, %v4999_v7  ;;  %v11766_v7 = vld [vmem:[%s14169_s29 + $0xa8] sm:$0xff] }
 0xdbe   : > { %v4997_v2 = vpop.f32.mrf.mxu3 }
 0xdbf   : > { %v5082_v12 = vpop.f32.mrf.mxu2 }
 0xdc7   : > { %v5084_v15 = vpop.f32.mrf.mxu2 }
 0xe16   : > { %v4817_v13 = vpop.f32.mrf.mxu0 }
 0xe17   : > { %v4821_v20 = vadd.f32 %v4817_v13, %v4768_v57 }
 0xe19   : > { %v4874_v22 = vadd.f32 %v4870_v8, %v4821_v20  ;;  %v11765_v8 = vld [vmem:[%s14169_s29 + $0xa0] sm:$0xff] }
 0xe1e   : > { %v4819_v17 = vpop.f32.mrf.mxu0 }
 0xe26   : > { %v4923_v19 = vpop.f32.mrf.mxu0 }
 0xe27   : > { %v4927_v23 = vadd.f32 %v4923_v19, %v4874_v22  ;;  %v10065_v19 = vld [vmem:[%s14171_s18 + $0xa] sm:$0x3] }
 0xe29   : > { %v4980_v24 = vadd.f32 %v4976_v5, %v4927_v23  ;;  %v10092_v5 = vld [vmem:[%s14171_s18 + $0xc] sm:$0x3]  ;;  %v10119_v23 = vld [vmem:[%s14171_s18 + $0xe] sm:$0x3] }
 0xe2e   : > { %v4925_v21 = vpop.f32.mrf.mxu0 }
 0xe36   : > { %v5029_v25 = vpop.f32.mrf.mxu0 }
 0xe37   : > { %v5033_v26 = vadd.f32 %v5029_v25, %v4980_v24  ;;  %v11772_v24 = vld [vmem:[%s14169_s29 + $0xd8] sm:$0xff]  ;;  %v11771_v25 = vld [vmem:[%s14169_s29 + $0xd0] sm:$0xff] }
 0xe39   : > { %v5086_v28 = vadd.f32 %v5082_v12, %v5033_v26  ;;  %v11776_v26 = vld [vmem:[%s14169_s29 + $0xf8] sm:$0xff] }
 0xe3b   : > { %v5091_v29 = vadd.f32 %v12246_v27, %v5086_v28  ;;  %v11770_v27 = vld [vmem:[%s14169_s29 + $0xc8] sm:$0xff]  ;;  %v11769_v28 = vld [vmem:[%s14169_s29 + $0xc0] sm:$0xff] }
 0xe3d   : > { %v5092_v30 = vmax.f32 %v5091_v29, 0.0  ;;  %v11775_v29 = vld [vmem:[%s14169_s29 + $0xf0] sm:$0xff] }
 0xe3e   : > { %v5031_v31 = vpop.f32.mrf.mxu0 }
 0xe3f   : > { %v5093_v32 = vpack.c.bf16 %v5092_v30, %v5092_v30  ;;  %v11774_v30 = vld [vmem:[%s14169_s29 + $0xe8] sm:$0xff]  ;;  %v11780_v31 = vld [vmem:[%s14169_s29 + $0x118] sm:$0xff] }
 0xe41   : > { %v13467_v34 = vsel %vm5099_vm3, %v5093_v32, 0 }
 0xe42   : > { %5110 = vmatpush.bf16.msra.mxu3 %v13467_v34  ;;  %5137 = vmatpush.bf16.msra.mxu0 %v13467_v34 }
 0xe43   : > { %5314 = vmatpush.bf16.msra.mxu1 %v13467_v34 }
 0xe45   : > { %9914 = vmatmul.msk.bf16.vlgmr.msra.gmra.mxu3 %vm5095_vm4, %v5094_v35  ;;  %9916 = vmatmul.msk.bf16.vlgmr.msra.gmra.mxu0 %vm5095_vm4, %v9915_v36  ;;  %v11778_v36 = vld [vmem:[%s14169_s29 + $0x108] sm:$0xff] }
 0xe46   : > { %5245 = vmatpush.bf16.msrb.mxu3 %v13467_v34  ;;  %5292 = vmatpush.bf16.msrb.mxu0 %v11756_v33  ;;  %v11779_v33 = vld [vmem:[%s14169_s29 + $0x110] sm:$0xff] }
 0xe4a   : > { %5410 = vmatpush.bf16.msra.mxu3 %v11764_v37  ;;  %5293 = vmatpush.bf16.msrb.mxu0 %v11755_v38  ;;  %v11777_v37 = vld [vmem:[%s14169_s29 + $0x100] sm:$0xff] }
 0xe4e   : > { %5411 = vmatpush.bf16.msra.mxu3 %v11763_v40  ;;  %5294 = vmatpush.bf16.msrb.mxu0 %v11754_v42 }
 0xe52   : > { %5412 = vmatpush.bf16.msra.mxu3 %v11762_v44  ;;  %5295 = vmatpush.bf16.msrb.mxu0 %v11753_v46 }
 0xe55   : > { %9960 = vmatmul.msk.bf16.vlgmr.msrb.gmra.mxu3 %vm5095_vm4, %v9959_v50 }
 0xe56   : > { %5432 = vmatpush.bf16.msra.mxu0 %v13467_v34  ;;  %5413 = vmatpush.bf16.msra.mxu3 %v11761_v47 }
 0xe5a   : > { %5548 = vmatpush.bf16.msrb.mxu3 %v11772_v24  ;;  %v10191_v24 = vld [vmem:[%s14175_s10 + $0x4] sm:$0x3] }
 0xe5e   : > { %5549 = vmatpush.bf16.msrb.mxu3 %v11771_v25  ;;  %v11795_v25 = vld [vmem:[%s14172_s7 + $0x70] sm:$0xff] }
 0xe62   : > { %5550 = vmatpush.bf16.msrb.mxu3 %v11770_v27  ;;  %v11793_v27 = vld [vmem:[%s14172_s7 + $0x60] sm:$0xff] }
 0xe65   : > { %10037 = vmatmul.msk.bf16.vlgmr.msra.gmra.mxu3 %vm2161_vm0, %v5093_v32  ;;  %v11773_v32 = vld [vmem:[%s14169_s29 + $0xe0] sm:$0xff] }
 0xe66   : > { %5551 = vmatpush.bf16.msrb.mxu3 %v11769_v28 }
 0xe6a   : > { %5686 = vmatpush.bf16.msra.mxu3 %v11780_v31 }
 0xe6e   : > { %5687 = vmatpush.bf16.msra.mxu3 %v11779_v33 }
 0xe72   : > { %5688 = vmatpush.bf16.msra.mxu3 %v11778_v36 }
 0xe76   : > { %5689 = vmatpush.bf16.msra.mxu3 %v11777_v37 }
 0xec2   : > { %v5139_v54 = vpop.f32.mrf.mxu0 }
 0xec3   : > { %v5143_v55 = vpack.c.bf16 %v5139_v54, %v5139_v54  ;;  %v11788_v54 = vld [vmem:[%s14172_s7 + $0x38] sm:$0xff] }
 0xec5   : > { %9941 = vmatmul.msk.bf16.vlgmr.msrb.gmra.mxu1 %vm2161_vm0, %v5143_v55 }
 0xec6   : > { %5479 = vmatpush.bf16.msrb.mxu1 %v11768_v6 }
 0xec8   : > { %v5112_v56 = vpop.f32.mrf.mxu3 }
 0xec9   : > { %v5116_v57 = vpack.c.bf16 %v5112_v56, %v5112_v56  ;;  %v11787_v56 = vld [vmem:[%s14172_s7 + $0x30] sm:$0xff] }
 0xeca   : > { %v5141_v58 = vpop.f32.mrf.mxu0  ;;  %5480 = vmatpush.bf16.msrb.mxu1 %v11767_v1 }
 0xecb   : > { %9958 = vmatmul.msk.bf16.vlgmr.msra.gmra.mxu2 %vm2161_vm0, %v5116_v57  ;;  %v11786_v57 = vld [vmem:[%s14172_s7 + $0x28] sm:$0xff]  ;;  %v11785_v58 = vld [vmem:[%s14172_s7 + $0x20] sm:$0xff] }
 0xecc   : > { %5501 = vmatpush.bf16.msra.mxu2 %v13467_v34 }
 0xece   : > { %5481 = vmatpush.bf16.msrb.mxu1 %v11766_v7 }
 0xed0   : > { %v5114_v59 = vpop.f32.mrf.mxu3 }
 0xed2   : > { %5482 = vmatpush.bf16.msrb.mxu1 %v11765_v8 }
 0xed5   : > { %9987 = vmatmul.msk.bf16.vlgmr.msra.gmra.mxu1 %vm5095_vm4, %v9986_v60 }
 0xed6   : > { %5617 = vmatpush.bf16.msra.mxu1 %v11776_v26  ;;  %v11794_v26 = vld [vmem:[%s14172_s7 + $0x68] sm:$0xff] }
 0xed8   : > { %v5247_v61 = vpop.f32.mrf.mxu3 }
 0xed9   : > { %v5251_v62 = vpack.c.bf16 %v5247_v61, %v5247_v61 }
 0xeda   : > { %5618 = vmatpush.bf16.msra.mxu1 %v11775_v29 }
 0xedb   : > { %9985 = vmatmul.msk.bf16.vlgmr.msrb.gmra.mxu0 %vm2161_vm0, %v5251_v62  ;;  %v12245_v62 = vld [vmem:[%s14173_s26] ss:$0 sm:$0xff]  ;;  %s14180_s26 = sld [smem:[#allocation54_spill]] }
 0xedc   : > { %5570 = vmatpush.bf16.msrb.mxu0 %v13467_v34  ;;  %v4611_v6 = vadd.f32 %v12245_v62, %v13454_v43  ;;  %v5705_v43 = vld [vmem:[%s14175_s10] sm:$0x3]  ;;  %v10351_v62 = vld [vmem:[%s14175_s10 + $0xe] sm:$0x3] }
 0xede   : > { %5619 = vmatpush.bf16.msra.mxu1 %v11774_v30 }
 0xee0   : > { %v5249_v63 = vpop.f32.mrf.mxu3 }
 0xee2   : > { %5620 = vmatpush.bf16.msra.mxu1 %v11773_v32 }
 0xee8   : > { %v13503_v0 = vpop.f32.mrf.mxu3 }
 0xeeb   : > { %10039 = vmatmul.msk.bf16.vlgmr.msra.gmra.mxu0 %vm5095_vm4, %v10038_v3 }
 0xef0   : > { %v5417_v4 = vpop.f32.mrf.mxu3 }
 0xefb   : > { %10093 = vmatmul.msk.bf16.vlgmr.msrb.gmra.mxu0 %vm5095_vm4, %v10092_v5  ;;  %v11792_v5 = vld [vmem:[%s14172_s7 + $0x58] sm:$0xff] }
 0xf42   : > { %v5189_v2 = vpop.f32.mrf.mxu1 }
 0xf4a   : > { %v5191_v9 = vpop.f32.mrf.mxu1 }
 0xf4e   : > { %v5229_v10 = vpop.f32.mrf.mxu2 }
 0xf4f   : > { %v5230_v11 = vadd.f32 %v5229_v10, %v5189_v2 }
 0xf52   : > { %v5316_v12 = vpop.f32.mrf.mxu1 }
 0xf53   : > { %v5320_v13 = vpack.c.bf16 %v5316_v12, %v5316_v12  ;;  %v11800_v12 = vld [vmem:[%s14172_s7 + $0x98] sm:$0xff] }
 0xf55   : > { %10012 = vmatmul.msk.bf16.vlgmr.msrb.gmra.mxu2 %vm2161_vm0, %v5320_v13  ;;  %v11791_v13 = vld [vmem:[%s14172_s7 + $0x50] sm:$0xff] }
 0xf56   : > { %5639 = vmatpush.bf16.msrb.mxu2 %v13467_v34  ;;  %v5231_v14 = vpop.f32.mrf.mxu2 }
 0xf57   : > { %v11784_v14 = vld [vmem:[%s14172_s7 + $0x18] sm:$0xff] }
 0xf58   : > { %v5297_v15 = vpop.f32.mrf.mxu0 }
 0xf59   : > { %v5301_v16 = vadd.f32 %v5297_v15, %v5230_v11  ;;  %v10147_v11 = vld [vmem:[%s14175_s10 + $0x2] sm:$0x3]  ;;  %v11799_v15 = vld [vmem:[%s14172_s7 + $0x90] sm:$0xff] }
 0xf5a   : > { %v5318_v17 = vpop.f32.mrf.mxu1 }
 0xf5b   : > { %v11790_v17 = vld [vmem:[%s14172_s7 + $0x48] sm:$0xff] }
 0xf60   : > { %v5299_v18 = vpop.f32.mrf.mxu0 }
 0xf61   : > { %v11798_v18 = vld [vmem:[%s14172_s7 + $0x88] sm:$0xff] }
 0xf65   : > { %10066 = vmatmul.msk.bf16.vlgmr.msra.gmra.mxu2 %vm5095_vm4, %v10065_v19  ;;  %v11782_v19 = vld [vmem:[%s14172_s7 + $0x8] sm:$0xff] }
 0xf66   : > { %5793 = vmatpush.bf16.msra.mxu2 %v11788_v54 }
 0xf68   : > { %v5434_v20 = vpop.f32.mrf.mxu0 }
 0xf69   : > { %v5438_v21 = vpack.c.bf16 %v5434_v20, %v5434_v20  ;;  %v11789_v20 = vld [vmem:[%s14172_s7 + $0x40] sm:$0xff] }
 0xf6a   : > { %5794 = vmatpush.bf16.msra.mxu2 %v11787_v56 }
 0xf6b   : > { %10064 = vmatmul.msk.bf16.vlgmr.msrb.gmra.mxu1 %vm2161_vm0, %v5438_v21  ;;  %v11797_v21 = vld [vmem:[%s14172_s7 + $0x80] sm:$0xff] }
 0xf6e   : > { %5795 = vmatpush.bf16.msra.mxu2 %v11786_v57 }
 0xf70   : > { %v5436_v22 = vpop.f32.mrf.mxu0 }
 0xf71   : > { %v11781_v22 = vld [vmem:[%s14172_s7] sm:$0xff] }
 0xf72   : > { %5796 = vmatpush.bf16.msra.mxu2 %v11785_v58 }
 0xf75   : > { %10120 = vmatmul.msk.bf16.vlgmr.msrb.gmra.mxu2 %vm5095_vm4, %v10119_v23  ;;  %v11796_v23 = vld [vmem:[%s14172_s7 + $0x78] sm:$0xff] }
 0xf78   : > { %v5572_v34 = vpop.f32.mrf.mxu0 }
 0xf79   : > { %v5576_v35 = vpack.c.bf16 %v5572_v34, %v5572_v34 }
 0xf7b   : > { %10118 = vmatmul.msk.bf16.vlgmr.msra.gmra.mxu1 %vm2161_vm0, %v5576_v35  ;;  %v10218_v35 = vld [vmem:[%s14175_s10 + $0x6] sm:$0x3] }
 0xf80   : > { %v5574_v39 = vpop.f32.mrf.mxu0 }
 0xf81   : > { %v10270_v39 = vld [vmem:[%s14175_s10 + $0x8] sm:$0x3] }
 0xfd8   : > { %v5366_v38 = vpop.f32.mrf.mxu2 }
 0xfd9   : > { %v5370_v40 = vadd.f32 %v5366_v38, %v5301_v16  ;;  %v11783_v16 = vld [vmem:[%s14172_s7 + $0x10] sm:$0xff] }
 0xfdb   : > { %v5419_v42 = vadd.f32 %v13503_v0, %v5370_v40  ;;  %v12247_v0 = vld [vmem:[%s14174_s28] ss:$0 sm:$0xff]  ;;  %s14182_s28 = sld [smem:[#allocation53_spill]] }
 0xfe0   : > { %v5368_v41 = vpop.f32.mrf.mxu2 }
 0xfe1   : > { %v11804_v41 = vld [vmem:[%s14172_s7 + $0xb8] sm:$0xff] }
 0xfe8   : > { %v5484_v44 = vpop.f32.mrf.mxu1  ;;  %v5503_v45 = vpop.f32.mrf.mxu2 }
 0xfe9   : > { %v5488_v46 = vadd.f32 %v5484_v44, %v5419_v42  ;;  %v5507_v47 = vpack.c.bf16 %v5503_v45, %v5503_v45  ;;  %v11803_v42 = vld [vmem:[%s14172_s7 + $0xb0] sm:$0xff]  ;;  %v11802_v44 = vld [vmem:[%s14172_s7 + $0xa8] sm:$0xff]  ;;  %v11801_v45 = vld [vmem:[%s14172_s7 + $0xa0] sm:$0xff] }
 0xfeb   : > { %10091 = vmatmul.msk.bf16.vlgmr.msrb.gmra.mxu3 %vm2161_vm0, %v5507_v47 }
 0xfec   : > { %5833 = vmatpush.bf16.msrb.mxu3 %v11784_v14 }
 0xff0   : > { %v5505_v48 = vpop.f32.mrf.mxu2  ;;  %v5486_v49 = vpop.f32.mrf.mxu1  ;;  %5834 = vmatpush.bf16.msrb.mxu3 %v11783_v16 }
 0xff1   : > { %v10324_v49 = vld [vmem:[%s14175_s10 + $0xc] sm:$0x3] }
 0xff4   : > { %5835 = vmatpush.bf16.msrb.mxu3 %v11782_v19 }
 0xff8   : > { %v5641_v50 = vpop.f32.mrf.mxu2  ;;  %v5622_v53 = vpop.f32.mrf.mxu1  ;;  %5836 = vmatpush.bf16.msrb.mxu3 %v11781_v22 }
 0xff9   : > { %v5645_v51 = vpack.c.bf16 %v5641_v50, %v5641_v50 }
 0xffb   : > { %10145 = vmatmul.msk.bf16.vlgmr.msra.gmra.mxu3 %vm2161_vm0, %v5645_v51 }
 0xffc   : > { %5970 = vmatpush.bf16.msra.mxu3 %v11796_v23 }
0x1000   : > { %v5643_v52 = vpop.f32.mrf.mxu2  ;;  %v5624_v55 = vpop.f32.mrf.mxu1  ;;  %5971 = vmatpush.bf16.msra.mxu3 %v11795_v25 }
0x1004   : > { %5972 = vmatpush.bf16.msra.mxu3 %v11794_v26 }
0x1008   : > { %5973 = vmatpush.bf16.msra.mxu3 %v11793_v27 }
0x106e   : > { %v5553_v59 = vpop.f32.mrf.mxu3 }
0x106f   : > { %v5557_v61 = vadd.f32 %v5553_v59, %v5488_v46 }
0x1071   : > { %v5626_v63 = vadd.f32 %v5622_v53, %v5557_v61 }
0x1076   : > { %v5555_v60 = vpop.f32.mrf.mxu3 }
0x1077   : > { %v10297_v60 = vld [vmem:[%s14175_s10 + $0xa] sm:$0x3] }
0x107e   : > { %v5691_v3 = vpop.f32.mrf.mxu3 }
0x107f   : > { %v5695_v4 = vadd.f32 %v5691_v3, %v5626_v63  ;;  %v11812_v63 = vld [vmem:[%s14172_s7 + $0xf8] sm:$0xff]  ;;  %v11811_v3 = vld [vmem:[%s14172_s7 + $0xf0] sm:$0xff] }
0x1081   : > { %v5700_v1 = vadd.f32 %v12247_v0, %v5695_v4  ;;  %v11808_v0 = vld [vmem:[%s14172_s7 + $0xd8] sm:$0xff]  ;;  %v11807_v4 = vld [vmem:[%s14172_s7 + $0xd0] sm:$0xff] }
0x1083   : > { %v5701_v7 = vadd.f32 %v5700_v1, %v4611_v6  ;;  %v11810_v6 = vld [vmem:[%s14172_s7 + $0xe8] sm:$0xff] }
0x1084   : > { %v11806_v1 = vld [vmem:[%s14172_s7 + $0xc8] sm:$0xff] }
0x1085   : > { %v5702_v2 = vmax.f32 %v5701_v7, 0.0 }
0x1086   : > { %v5693_v8 = vpop.f32.mrf.mxu3 }
0x1087   : > { %v13543_v9 = vpack.c.bf16 %v5702_v2, %v5702_v2  ;;  %v11809_v2 = vld [vmem:[%s14172_s7 + $0xe0] sm:$0xff] }
0x1089   : > { %v13548_v10 = vsel %vm5099_vm3, %v13543_v9, 0 }
0x108a   : > { %5719 = vmatpush.bf16.msra.mxu0 %v13548_v10  ;;  %5746 = vmatpush.bf16.msrb.mxu1 %v13548_v10 }
0x108b   : > { %5923 = vmatpush.bf16.msrb.mxu2 %v13548_v10 }
0x108d   : > { %10146 = vmatmul.msk.bf16.vlgmr.msra.gmra.mxu0 %vm5095_vm4, %v5705_v43  ;;  %10148 = vmatmul.msk.bf16.vlgmr.msrb.gmra.mxu1 %vm5095_vm4, %v10147_v11  ;;  %v11815_v11 = vld [vmem:[%s14172_s7 + $0x110] sm:$0xff] }
0x108e   : > { %5854 = vmatpush.bf16.msrb.mxu0 %v13548_v10  ;;  %5901 = vmatpush.bf16.msra.mxu1 %v11792_v5  ;;  %v11805_v5 = vld [vmem:[%s14172_s7 + $0xc0] sm:$0xff] }
0x1092   : > { %6019 = vmatpush.bf16.msra.mxu0 %v11800_v12  ;;  %5902 = vmatpush.bf16.msra.mxu1 %v11791_v13  ;;  %v11814_v12 = vld [vmem:[%s14172_s7 + $0x108] sm:$0xff]  ;;  %v11813_v13 = vld [vmem:[%s14172_s7 + $0x100] sm:$0xff] }
0x1096   : > { %6020 = vmatpush.bf16.msra.mxu0 %v11799_v15  ;;  %5903 = vmatpush.bf16.msra.mxu1 %v11790_v17 }
0x109a   : > { %6021 = vmatpush.bf16.msra.mxu0 %v11798_v18  ;;  %5904 = vmatpush.bf16.msra.mxu1 %v11789_v20 }
0x109d   : > { %10192 = vmatmul.msk.bf16.vlgmr.msrb.gmra.mxu0 %vm5095_vm4, %v10191_v24 }
0x109e   : > { %6041 = vmatpush.bf16.msrb.mxu1 %v13548_v10  ;;  %6022 = vmatpush.bf16.msra.mxu0 %v11797_v21 }
0x10a2   : > { %6157 = vmatpush.bf16.msrb.mxu0 %v11808_v0  ;;  %v11829_v0 = vld [vmem:[%s14176_s2 + $0x60] sm:$0xff] }
0x10a6   : > { %6158 = vmatpush.bf16.msrb.mxu0 %v11807_v4 }
0x10aa   : > { %6159 = vmatpush.bf16.msrb.mxu0 %v11806_v1 }
0x10ad   : > { %10269 = vmatmul.msk.bf16.vlgmr.msra.gmra.mxu0 %vm2161_vm0, %v13543_v9 }
0x10ae   : > { %6160 = vmatpush.bf16.msrb.mxu0 %v11805_v5 }
0x110a   : > { %v5721_v28 = vpop.f32.mrf.mxu0  ;;  %v5748_v29 = vpop.f32.mrf.mxu1 }
0x110b   : > { %v5725_v30 = vpack.c.bf16 %v5721_v28, %v5721_v28  ;;  %v5752_v31 = vpack.c.bf16 %v5748_v29, %v5748_v29  ;;  %v11824_v28 = vld [vmem:[%s14176_s2 + $0x38] sm:$0xff] }
0x110d   : > { %10173 = vmatmul.msk.bf16.vlgmr.msra.gmra.mxu2 %vm2161_vm0, %v5752_v31  ;;  %10190 = vmatmul.msk.bf16.vlgmr.msrb.gmra.mxu3 %vm2161_vm0, %v5725_v30  ;;  %v11823_v30 = vld [vmem:[%s14176_s2 + $0x30] sm:$0xff]  ;;  %v11822_v31 = vld [vmem:[%s14176_s2 + $0x28] sm:$0xff] }
0x110e   : > { %6110 = vmatpush.bf16.msrb.mxu3 %v13548_v10  ;;  %6088 = vmatpush.bf16.msra.mxu2 %v11804_v41 }
0x1112   : > { %v5723_v32 = vpop.f32.mrf.mxu0  ;;  %v5750_v33 = vpop.f32.mrf.mxu1  ;;  %6089 = vmatpush.bf16.msra.mxu2 %v11803_v42 }
0x1113   : > { %v11821_v32 = vld [vmem:[%s14176_s2 + $0x20] sm:$0xff] }
0x1116   : > { %6090 = vmatpush.bf16.msra.mxu2 %v11802_v44 }
0x111a   : > { %v5856_v34 = vpop.f32.mrf.mxu0  ;;  %6091 = vmatpush.bf16.msra.mxu2 %v11801_v45  ;;  %v11828_v45 = vld [vmem:[%s14176_s2 + $0x58] sm:$0xff] }
0x111b   : > { %v5860_v36 = vpack.c.bf16 %v5856_v34, %v5856_v34 }
0x111d   : > { %10217 = vmatmul.msk.bf16.vlgmr.msra.gmra.mxu1 %vm2161_vm0, %v5860_v36  ;;  %10219 = vmatmul.msk.bf16.vlgmr.msrb.gmra.mxu2 %vm5095_vm4, %v10218_v35 }
0x111e   : > { %6179 = vmatpush.bf16.msra.mxu1 %v13548_v10  ;;  %6226 = vmatpush.bf16.msrb.mxu2 %v11812_v63  ;;  %v11830_v63 = vld [vmem:[%s14176_s2 + $0x68] sm:$0xff] }
0x1122   : > { %v5858_v37 = vpop.f32.mrf.mxu0  ;;  %6227 = vmatpush.bf16.msrb.mxu2 %v11811_v3 }
0x1123   : > { %v12248_v37 = vld [vmem:[%s14177_s11] ss:$0 sm:$0xff]  ;;  %s14181_s11 = smov %s14180_s26 }
0x1126   : > { %6228 = vmatpush.bf16.msrb.mxu2 %v11810_v6 }
0x112a   : > { %v13585_v38 = vpop.f32.mrf.mxu0  ;;  %6229 = vmatpush.bf16.msrb.mxu2 %v11809_v2 }
0x112d   : > { %10271 = vmatmul.msk.bf16.vlgmr.msrb.gmra.mxu1 %vm5095_vm4, %v10270_v39 }
0x1132   : > { %v6026_v40 = vpop.f32.mrf.mxu0 }
0x113d   : > { %10325 = vmatmul.msk.bf16.vlgmr.msra.gmra.mxu1 %vm5095_vm4, %v10324_v49  ;;  %v11836_v49 = vld [vmem:[%s14176_s2 + $0x98] sm:$0xff] }
0x1190   : > { %v5798_v46 = vpop.f32.mrf.mxu2  ;;  %v5838_v47 = vpop.f32.mrf.mxu3 }
0x1191   : > { %v5839_v48 = vadd.f32 %v5838_v47, %v5798_v46  ;;  %v6312_v47 = vld [vmem:[%s14178_s12] sm:$0x3] }
0x1198   : > { %v5800_v50 = vpop.f32.mrf.mxu2  ;;  %v5840_v51 = vpop.f32.mrf.mxu3 }
0x1199   : > { %v11827_v50 = vld [vmem:[%s14176_s2 + $0x50] sm:$0xff]  ;;  %v11820_v51 = vld [vmem:[%s14176_s2 + $0x18] sm:$0xff] }
0x119a   : > { %v5906_v52 = vpop.f32.mrf.mxu1 }
0x119b   : > { %v5910_v53 = vadd.f32 %v5906_v52, %v5839_v48  ;;  %v10379_v48 = vld [vmem:[%s14178_s12 + $0x2] sm:$0x3]  ;;  %v11835_v52 = vld [vmem:[%s14176_s2 + $0x90] sm:$0xff] }
0x11a0   : > { %v5925_v54 = vpop.f32.mrf.mxu2 }
0x11a1   : > { %v5929_v55 = vpack.c.bf16 %v5925_v54, %v5925_v54  ;;  %v11826_v54 = vld [vmem:[%s14176_s2 + $0x48] sm:$0xff] }
0x11a2   : > { %v5908_v56 = vpop.f32.mrf.mxu1 }
0x11a3   : > { %10244 = vmatmul.msk.bf16.vlgmr.msra.gmra.mxu3 %vm2161_vm0, %v5929_v55  ;;  %v11834_v55 = vld [vmem:[%s14176_s2 + $0x88] sm:$0xff] }
0x11a4   : > { %6248 = vmatpush.bf16.msra.mxu3 %v13548_v10  ;;  %v11816_v10 = vld [vmem:[%s14172_s7 + $0x118] sm:$0xff]  ;;  %v11818_v56 = vld [vmem:[%s14176_s2 + $0x8] sm:$0xff] }
0x11a5   : > { %6295 = vmatpush.bf16.msra.mxu0 %v11816_v10  ;;  %v10450_v10 = vld [vmem:[%s14178_s12 + $0x6] sm:$0x3] }
0x11a8   : > { %v5927_v57 = vpop.f32.mrf.mxu2 }
0x11a9   : > { %6296 = vmatpush.bf16.msra.mxu0 %v11815_v11  ;;  %v11825_v57 = vld [vmem:[%s14176_s2 + $0x40] sm:$0xff] }
0x11aa   : > { %v6043_v58 = vpop.f32.mrf.mxu1 }
0x11ab   : > { %v6047_v59 = vpack.c.bf16 %v6043_v58, %v6043_v58  ;;  %v11833_v58 = vld [vmem:[%s14176_s2 + $0x80] sm:$0xff] }
0x11ad   : > { %10296 = vmatmul.msk.bf16.vlgmr.msra.gmra.mxu2 %vm2161_vm0, %v6047_v59  ;;  %6297 = vmatpush.bf16.msra.mxu0 %v11814_v12  ;;  %v11817_v59 = vld [vmem:[%s14176_s2] sm:$0xff]  ;;  %v10502_v12 = vld [vmem:[%s14178_s12 + $0x8] sm:$0x3] }
0x11b1   : > { %6298 = vmatpush.bf16.msra.mxu0 %v11813_v13 }
0x11b2   : > { %v6045_v61 = vpop.f32.mrf.mxu1 }
0x11b3   : > { %10298 = vmatmul.msk.bf16.vlgmr.msrb.gmra.mxu3 %vm5095_vm4, %v10297_v60  ;;  %v11832_v60 = vld [vmem:[%s14176_s2 + $0x78] sm:$0xff]  ;;  %v10423_v61 = vld [vmem:[%s14178_s12 + $0x4] sm:$0x3] }
0x11b4   : > { %6400 = vmatpush.bf16.msrb.mxu3 %v11824_v28 }
0x11b8   : > { %6401 = vmatpush.bf16.msrb.mxu3 %v11823_v30 }
0x11ba   : > { %v6181_v7 = vpop.f32.mrf.mxu1 }
0x11bb   : > { %v6185_v8 = vpack.c.bf16 %v6181_v7, %v6181_v7 }
0x11bc   : > { %6402 = vmatpush.bf16.msrb.mxu3 %v11822_v31 }
0x11bd   : > { %10350 = vmatmul.msk.bf16.vlgmr.msrb.gmra.mxu2 %vm2161_vm0, %v6185_v8 }
0x11c0   : > { %6403 = vmatpush.bf16.msrb.mxu3 %v11821_v32  ;;  %v10529_v32 = vld [vmem:[%s14178_s12 + $0xa] sm:$0x3] }
0x11c2   : > { %v6183_v43 = vpop.f32.mrf.mxu1 }
0x11c3   : > { %10352 = vmatmul.msk.bf16.vlgmr.msra.gmra.mxu3 %vm5095_vm4, %v10351_v62  ;;  %v11831_v62 = vld [vmem:[%s14176_s2 + $0x70] sm:$0xff] }
0x1226   : > { %v5975_v14 = vpop.f32.mrf.mxu3 }
0x1227   : > { %v5979_v15 = vadd.f32 %v5975_v14, %v5910_v53  ;;  %v11819_v53 = vld [vmem:[%s14176_s2 + $0x10] sm:$0xff]  ;;  %v11840_v14 = vld [vmem:[%s14176_s2 + $0xb8] sm:$0xff] }
0x1229   : > { %v6028_v17 = vadd.f32 %v13585_v38, %v5979_v15  ;;  %v11839_v15 = vld [vmem:[%s14176_s2 + $0xb0] sm:$0xff] }
0x122e   : > { %v5977_v16 = vpop.f32.mrf.mxu3 }
0x1230   : > { %v6093_v18 = vpop.f32.mrf.mxu2 }
0x1231   : > { %v6097_v19 = vadd.f32 %v6093_v18, %v6028_v17  ;;  %v11838_v17 = vld [vmem:[%s14176_s2 + $0xa8] sm:$0xff] }
0x1232   : > { %v10556_v18 = vld [vmem:[%s14178_s12 + $0xc] sm:$0x3] }
0x1236   : > { %v6112_v20 = vpop.f32.mrf.mxu3 }
0x1237   : > { %v6116_v21 = vpack.c.bf16 %v6112_v20, %v6112_v20 }
0x1238   : > { %v6095_v22 = vpop.f32.mrf.mxu2 }
0x1239   : > { %10323 = vmatmul.msk.bf16.vlgmr.msrb.gmra.mxu0 %vm2161_vm0, %v6116_v21 }
0x123a   : > { %6440 = vmatpush.bf16.msrb.mxu0 %v11820_v51 }
0x123e   : > { %v6114_v23 = vpop.f32.mrf.mxu3  ;;  %6441 = vmatpush.bf16.msrb.mxu0 %v11819_v53 }
0x1240   : > { %v6231_v27 = vpop.f32.mrf.mxu2 }
0x1242   : > { %6442 = vmatpush.bf16.msrb.mxu0 %v11818_v56 }
0x1246   : > { %v6250_v24 = vpop.f32.mrf.mxu3  ;;  %6443 = vmatpush.bf16.msrb.mxu0 %v11817_v59 }
0x1247   : > { %v6254_v25 = vpack.c.bf16 %v6250_v24, %v6250_v24 }
0x1248   : > { %v6233_v29 = vpop.f32.mrf.mxu2 }
0x1249   : > { %10377 = vmatmul.msk.bf16.vlgmr.msra.gmra.mxu0 %vm2161_vm0, %v6254_v25 }
0x124a   : > { %6577 = vmatpush.bf16.msra.mxu0 %v11832_v60 }
0x124e   : > { %v6252_v26 = vpop.f32.mrf.mxu3  ;;  %6578 = vmatpush.bf16.msra.mxu0 %v11831_v62 }
0x1252   : > { %6579 = vmatpush.bf16.msra.mxu0 %v11830_v63 }
0x1256   : > { %6580 = vmatpush.bf16.msra.mxu0 %v11829_v0 }
0x12b6   : > { %v6162_v33 = vpop.f32.mrf.mxu0 }
0x12b7   : > { %v6166_v35 = vadd.f32 %v6162_v33, %v6097_v19  ;;  %v11837_v19 = vld [vmem:[%s14176_s2 + $0xa0] sm:$0xff] }
0x12b9   : > { %v6235_v36 = vadd.f32 %v6231_v27, %v6166_v35  ;;  %v11848_v35 = vld [vmem:[%s14176_s2 + $0xf8] sm:$0xff] }
0x12be   : > { %v6164_v34 = vpop.f32.mrf.mxu0 }
0x12bf   : > { %v10583_v34 = vld [vmem:[%s14178_s12 + $0xe] sm:$0x3] }
0x12c6   : > { %v6300_v38 = vpop.f32.mrf.mxu0 }
0x12c7   : > { %v6304_v39 = vadd.f32 %v6300_v38, %v6235_v36  ;;  %v11844_v36 = vld [vmem:[%s14176_s2 + $0xd8] sm:$0xff]  ;;  %v11843_v38 = vld [vmem:[%s14176_s2 + $0xd0] sm:$0xff] }
0x12c9   : > { %v6309_v40 = vadd.f32 %v12248_v37, %v6304_v39  ;;  %v11847_v37 = vld [vmem:[%s14176_s2 + $0xf0] sm:$0xff]  ;;  %v11846_v39 = vld [vmem:[%s14176_s2 + $0xe8] sm:$0xff] }
0x12cb   : > { %v6310_v41 = vmax.f32 %v6309_v40, 0.0  ;;  %v11842_v40 = vld [vmem:[%s14176_s2 + $0xc8] sm:$0xff] }
0x12cd   : > { %v6311_v42 = vpack.c.bf16 %v6310_v41, %v6310_v41  ;;  %v11845_v41 = vld [vmem:[%s14176_s2 + $0xe0] sm:$0xff] }
0x12ce   : > { %v6302_v44 = vpop.f32.mrf.mxu0 }
0x12cf   : > { %v13625_v46 = vsel %vm5099_vm3, %v6311_v42, 0 }
0x12d0   : > { %6326 = vmatpush.bf16.msrb.mxu1 %v13625_v46  ;;  %6353 = vmatpush.bf16.msra.mxu2 %v13625_v46 }
0x12d1   : > { %6530 = vmatpush.bf16.msra.mxu3 %v13625_v46 }
0x12d3   : > { %10378 = vmatmul.msk.bf16.vlgmr.msrb.gmra.mxu1 %vm5095_vm4, %v6312_v47  ;;  %10380 = vmatmul.msk.bf16.vlgmr.msra.gmra.mxu2 %vm5095_vm4, %v10379_v48  ;;  %v11851_v48 = vld [vmem:[%s14176_s2 + $0x110] sm:$0xff] }
0x12d4   : > { %6461 = vmatpush.bf16.msra.mxu1 %v13625_v46  ;;  %6508 = vmatpush.bf16.msrb.mxu2 %v11828_v45  ;;  %v11841_v45 = vld [vmem:[%s14176_s2 + $0xc0] sm:$0xff] }
0x12d8   : > { %6626 = vmatpush.bf16.msrb.mxu1 %v11836_v49  ;;  %6509 = vmatpush.bf16.msrb.mxu2 %v11827_v50  ;;  %v11850_v49 = vld [vmem:[%s14176_s2 + $0x108] sm:$0xff]  ;;  %v11849_v50 = vld [vmem:[%s14176_s2 + $0x100] sm:$0xff] }
0x12dc   : > { %6627 = vmatpush.bf16.msrb.mxu1 %v11835_v52  ;;  %6510 = vmatpush.bf16.msrb.mxu2 %v11826_v54 }
0x12e0   : > { %6628 = vmatpush.bf16.msrb.mxu1 %v11834_v55  ;;  %6511 = vmatpush.bf16.msrb.mxu2 %v11825_v57 }
0x12e3   : > { %10424 = vmatmul.msk.bf16.vlgmr.msra.gmra.mxu1 %vm5095_vm4, %v10423_v61 }
0x12e4   : > { %6648 = vmatpush.bf16.msra.mxu2 %v13625_v46  ;;  %6629 = vmatpush.bf16.msrb.mxu1 %v11833_v58 }
0x12e8   : > { %6764 = vmatpush.bf16.msra.mxu1 %v11844_v36 }
0x12ec   : > { %6765 = vmatpush.bf16.msra.mxu1 %v11843_v38 }
0x12f0   : > { %6766 = vmatpush.bf16.msra.mxu1 %v11842_v40 }
0x12f3   : > { %10501 = vmatmul.msk.bf16.vlgmr.msrb.gmra.mxu1 %vm2161_vm0, %v6311_v42 }
0x12f4   : > { %6767 = vmatpush.bf16.msra.mxu1 %v11841_v45  ;;  %v10708_v45 = vld [vmem:[%s14183_s1 + $0x3] sm:$0x1] }
0x1350   : > { %v6328_v3 = vpop.f32.mrf.mxu1 }
0x1351   : > { %v6332_v4 = vpack.c.bf16 %v6328_v3, %v6328_v3 }
0x1353   : > { %10422 = vmatmul.msk.bf16.vlgmr.msrb.gmra.mxu0 %vm2161_vm0, %v6332_v4 }
0x1354   : > { %6717 = vmatpush.bf16.msrb.mxu0 %v13625_v46 }
0x1356   : > { %v6355_v6 = vpop.f32.mrf.mxu2 }
0x1357   : > { %v6359_v1 = vpack.c.bf16 %v6355_v6, %v6355_v6 }
0x1358   : > { %v6330_v7 = vpop.f32.mrf.mxu1 }
0x1359   : > { %10405 = vmatmul.msk.bf16.vlgmr.msrb.gmra.mxu3 %vm2161_vm0, %v6359_v1 }
0x135a   : > { %6695 = vmatpush.bf16.msrb.mxu3 %v11840_v14 }
0x135e   : > { %v6357_v2 = vpop.f32.mrf.mxu2  ;;  %6696 = vmatpush.bf16.msrb.mxu3 %v11839_v15 }
0x135f   : > { %v12249_v2 = vld [vmem:[%s14179_s15] ss:$0 sm:$0xff]  ;;  %s14184_s15 = sld [smem:[#allocation57_spill]] }
0x1360   : > { %v6463_v8 = vpop.f32.mrf.mxu1 }
0x1361   : > { %v6467_v5 = vpack.c.bf16 %v6463_v8, %v6463_v8  ;;  %v11856_v8 = vld [vmem:[#allocation11 + $0x18] sm:$0xff] }
0x1362   : > { %6697 = vmatpush.bf16.msrb.mxu3 %v11838_v17  ;;  %v11864_v17 = vld [vmem:[%s14180_s26 + $0xb8] sm:$0xff]  ;;  %s14185_s26 = sld [smem:[#allocation59_spill]] }
0x1363   : > { %10449 = vmatmul.msk.bf16.vlgmr.msrb.gmra.mxu2 %vm2161_vm0, %v6467_v5 }
0x1364   : > { %6786 = vmatpush.bf16.msrb.mxu2 %v13625_v46 }
0x1366   : > { %6698 = vmatpush.bf16.msrb.mxu3 %v11837_v19  ;;  %v6920_v19 = vld [vmem:[%s14182_s28] sm:$0x1]  ;;  %s14187_s28 = sld [smem:[#allocation55_spill]] }
0x1368   : > { %v6465_v43 = vpop.f32.mrf.mxu1 }
0x1369   : > { %10451 = vmatmul.msk.bf16.vlgmr.msra.gmra.mxu3 %vm5095_vm4, %v10450_v10  ;;  %v11855_v43 = vld [vmem:[#allocation11 + $0x10] sm:$0xff] }
0x136a   : > { %6833 = vmatpush.bf16.msra.mxu3 %v11848_v35 }
0x136e   : > { %6834 = vmatpush.bf16.msra.mxu3 %v11847_v37 }
0x1370   : > { %v13661_v11 = vpop.f32.mrf.mxu1 }
0x1372   : > { %6835 = vmatpush.bf16.msra.mxu3 %v11846_v39 }
0x1373   : > { %10503 = vmatmul.msk.bf16.vlgmr.msra.gmra.mxu2 %vm5095_vm4, %v10502_v12 }
0x1376   : > { %6836 = vmatpush.bf16.msra.mxu3 %v11845_v41 }
0x1378   : > { %v6633_v13 = vpop.f32.mrf.mxu1 }
0x1383   : > { %10557 = vmatmul.msk.bf16.vlgmr.msrb.gmra.mxu2 %vm5095_vm4, %v10556_v18 }
0x13d0   : > { %v6445_v16 = vpop.f32.mrf.mxu0 }
0x13d8   : > { %v6447_v20 = vpop.f32.mrf.mxu0 }
0x13d9   : > { %v6990_v20 = vld [vmem:[%s14183_s1] sm:$0x1] }
0x13dc   : > { %v6405_v21 = vpop.f32.mrf.mxu3 }
0x13dd   : > { %v6446_v22 = vadd.f32 %v6445_v16, %v6405_v21  ;;  %v11863_v21 = vld [vmem:[%s14181_s11 + $0xb0] sm:$0xff] }
0x13e4   : > { %v6407_v23 = vpop.f32.mrf.mxu3 }
0x13e5   : > { %v11861_v23 = vld [vmem:[%s14181_s11 + $0xa0] sm:$0xff] }
0x13e6   : > { %v6513_v24 = vpop.f32.mrf.mxu2 }
0x13e7   : > { %v6517_v25 = vadd.f32 %v6513_v24, %v6446_v22  ;;  %v11862_v22 = vld [vmem:[%s14181_s11 + $0xa8] sm:$0xff]  ;;  %v10681_v24 = vld [vmem:[%s14183_s1 + $0x2] sm:$0x1] }
0x13ec   : > { %v6532_v26 = vpop.f32.mrf.mxu3 }
0x13ed   : > { %v6536_v27 = vpack.c.bf16 %v6532_v26, %v6532_v26  ;;  %v11853_v26 = vld [vmem:[#allocation11] sm:$0xff] }
0x13ee   : > { %v6515_v28 = vpop.f32.mrf.mxu2 }
0x13ef   : > { %10476 = vmatmul.msk.bf16.vlgmr.msra.gmra.mxu0 %vm2161_vm0, %v6536_v27  ;;  %v11860_v27 = vld [vmem:[%s14181_s11 + $0x98] sm:$0xff] }
0x13f0   : > { %6855 = vmatpush.bf16.msra.mxu0 %v13625_v46  ;;  %v11852_v46 = vld [vmem:[%s14176_s2 + $0x118] sm:$0xff]  ;;  %s14188_s2 = sld [smem:[#allocation61_spill]] }
0x13f1   : > { %6902 = vmatpush.bf16.msrb.mxu1 %v11852_v46  ;;  %v11868_v28 = vld [vmem:[%s14181_s11 + $0xf8] sm:$0xff] }
0x13f4   : > { %v6534_v29 = vpop.f32.mrf.mxu3 }
0x13f5   : > { %6903 = vmatpush.bf16.msrb.mxu1 %v11851_v48  ;;  %v11859_v29 = vld [vmem:[%s14181_s11 + $0x90] sm:$0xff] }
0x13f6   : > { %v6650_v30 = vpop.f32.mrf.mxu2 }
0x13f7   : > { %v6654_v31 = vpack.c.bf16 %v6650_v30, %v6650_v30  ;;  %v11858_v30 = vld [vmem:[%s14181_s11 + $0x88] sm:$0xff] }
0x13f9   : > { %10528 = vmatmul.msk.bf16.vlgmr.msrb.gmra.mxu3 %vm2161_vm0, %v6654_v31  ;;  %6904 = vmatpush.bf16.msrb.mxu1 %v11850_v49  ;;  %v11857_v31 = vld [vmem:[%s14181_s11 + $0x80] sm:$0xff]  ;;  %v11872_v49 = vld [vmem:[%s14181_s11 + $0x118] sm:$0xff] }
0x13fa   : > { %6981 = vmatpush.bf16.msrb.mxu3 %v11856_v8 }
0x13fd   : > { %6905 = vmatpush.bf16.msrb.mxu1 %v11849_v50  ;;  %v11871_v50 = vld [vmem:[%s14181_s11 + $0x110] sm:$0xff] }
0x13fe   : > { %v6652_v33 = vpop.f32.mrf.mxu2  ;;  %6982 = vmatpush.bf16.msrb.mxu3 %v11855_v43  ;;  %v11888_v43 = vld [vmem:[%s14185_s26 + $0x138] sm:$0xff] }
0x13ff   : > { %10530 = vmatmul.msk.bf16.vlgmr.msrb.gmra.mxu0 %vm5095_vm4, %v10529_v32  ;;  %v11867_v32 = vld [vmem:[%s14181_s11 + $0xf0] sm:$0xff]  ;;  %v11866_v33 = vld [vmem:[%s14181_s11 + $0xe8] sm:$0xff] }
0x1406   : > { %v6788_v42 = vpop.f32.mrf.mxu2 }
0x1407   : > { %v6792_v44 = vpack.c.bf16 %v6788_v42, %v6788_v42 }
0x1409   : > { %10582 = vmatmul.msk.bf16.vlgmr.msra.gmra.mxu3 %vm2161_vm0, %v6792_v44 }
0x140e   : > { %v6790_v47 = vpop.f32.mrf.mxu2 }
0x140f   : > { %10584 = vmatmul.msk.bf16.vlgmr.msra.gmra.mxu0 %vm5095_vm4, %v10583_v34  ;;  %v11865_v34 = vld [vmem:[%s14181_s11 + $0xe0] sm:$0xff] }
0x146c   : > { %v6582_v51 = vpop.f32.mrf.mxu0 }
0x146d   : > { %v6586_v52 = vadd.f32 %v6582_v51, %v6517_v25  ;;  %v11854_v25 = vld [vmem:[#allocation11 + $0x8] sm:$0xff]  ;;  %v11870_v51 = vld [vmem:[%s14181_s11 + $0x108] sm:$0xff] }
0x146e   : > { %6983 = vmatpush.bf16.msrb.mxu3 %v11854_v25  ;;  %v11895_v25 = vld [vmem:[%s14188_s2 + $0x130] sm:$0xff] }
0x146f   : > { %v6635_v54 = vadd.f32 %v13661_v11, %v6586_v52  ;;  %v5704_v11 = vunpack.c.l.bf16 %v13543_v9  ;;  %v10637_v9 = vld [vmem:[%s14183_s1 + $0x1] sm:$0x1]  ;;  %s14186_s1 = smov %s14185_s26  ;;  %s14189_s26 = sld [smem:[#allocation52_spill]] }
0x1470   : > { %v11869_v52 = vld [vmem:[%s14181_s11 + $0x100] sm:$0xff] }
0x1472   : > { %6984 = vmatpush.bf16.msrb.mxu3 %v11853_v26  ;;  %v11894_v26 = vld [vmem:[%s14188_s2 + $0x128] sm:$0xff] }
0x1474   : > { %v6584_v53 = vpop.f32.mrf.mxu0 }
0x1475   : > { %v11880_v53 = vld [vmem:[%s14184_s15 + $0x138] sm:$0xff] }
0x1476   : > { %7116 = vmatpush.bf16.msra.mxu3 %v11860_v27  ;;  %v11893_v27 = vld [vmem:[%s14188_s2 + $0x120] sm:$0xff] }
0x147a   : > { %7117 = vmatpush.bf16.msra.mxu3 %v11859_v29  ;;  %v11891_v29 = vld [vmem:[%s14188_s2 + $0x110] sm:$0xff] }
0x147c   : > { %v6700_v55 = vpop.f32.mrf.mxu3  ;;  %v6719_v56 = vpop.f32.mrf.mxu0 }
0x147d   : > { %v6704_v57 = vadd.f32 %v6700_v55, %v6635_v54  ;;  %v6723_v58 = vpack.c.bf16 %v6719_v56, %v6719_v56  ;;  %v11879_v54 = vld [vmem:[%s14184_s15 + $0x130] sm:$0xff]  ;;  %v11878_v55 = vld [vmem:[%s14184_s15 + $0x128] sm:$0xff] }
0x147e   : > { %7118 = vmatpush.bf16.msra.mxu3 %v11858_v30  ;;  %v6949_v30 = vld [vmem:[%s14189_s26] sm:$0x1]  ;;  %s14194_s26 = sld [smem:[#allocation66_spill]] }
0x147f   : > { %10555 = vmatmul.msk.bf16.vlgmr.msra.gmra.mxu1 %vm2161_vm0, %v6723_v58 }
0x1482   : > { %7119 = vmatpush.bf16.msra.mxu3 %v11857_v31  ;;  %v7284_v31 = vld [vmem:[%s14190_s3] sm:$0x1]  ;;  %s14193_s3 = sld [smem:[#allocation60_spill]] }
0x1484   : > { %v6721_v59 = vpop.f32.mrf.mxu0  ;;  %v6702_v60 = vpop.f32.mrf.mxu3 }
0x1485   : > { %v11876_v59 = vld [vmem:[%s14184_s15 + $0x118] sm:$0xff] }
0x148c   : > { %v6857_v61 = vpop.f32.mrf.mxu0  ;;  %v6838_v0 = vpop.f32.mrf.mxu3 }
0x148d   : > { %v6861_v62 = vpack.c.bf16 %v6857_v61, %v6857_v61 }
0x148f   : > { %10609 = vmatmul.msk.bf16.vlgmr.msrb.gmra.mxu1 %vm2161_vm0, %v6861_v62  ;;  %v11875_v62 = vld [vmem:[%s14184_s15 + $0x110] sm:$0xff] }
0x1494   : > { %v6859_v63 = vpop.f32.mrf.mxu0  ;;  %v6840_v3 = vpop.f32.mrf.mxu3 }
0x14fc   : > { %v6769_v4 = vpop.f32.mrf.mxu1 }
0x14fd   : > { %v6773_v1 = vadd.f32 %v6769_v4, %v6704_v57  ;;  %v11877_v57 = vld [vmem:[%s14184_s15 + $0x120] sm:$0xff] }
0x14ff   : > { %v6842_v7 = vadd.f32 %v6838_v0, %v6773_v1 }
0x1504   : > { %v6771_v6 = vpop.f32.mrf.mxu1 }
0x150c   : > { %v6907_v5 = vpop.f32.mrf.mxu1 }
0x150d   : > { %v6911_v10 = vadd.f32 %v6907_v5, %v6842_v7  ;;  %v11874_v5 = vld [vmem:[%s14184_s15 + $0x108] sm:$0xff] }
0x150f   : > { %v6916_v12 = vadd.f32 %v12249_v2, %v6911_v10  ;;  %v11873_v10 = vld [vmem:[%s14184_s15 + $0x100] sm:$0xff] }
0x1511   : > { %v6917_v13 = vadd.f32 %v6916_v12, %v5704_v11  ;;  %v11887_v11 = vld [vmem:[%s14186_s1 + $0x130] sm:$0xff]  ;;  %v11886_v12 = vld [vmem:[%s14186_s1 + $0x128] sm:$0xff] }
0x1513   : > { %v6918_v14 = vmax.f32 %v6917_v13, 0.0  ;;  %v11885_v13 = vld [vmem:[%s14186_s1 + $0x120] sm:$0xff] }
0x1514   : > { %v6909_v15 = vpop.f32.mrf.mxu1 }
0x1515   : > { %v6919_v16 = vpack.c.bf16 %v6918_v14, %v6918_v14  ;;  %v11884_v14 = vld [vmem:[%s14186_s1 + $0x118] sm:$0xff]  ;;  %v11883_v15 = vld [vmem:[%s14186_s1 + $0x110] sm:$0xff] }
0x1517   : > { %v6925_v18 = vsel %vm5099_vm3, %v6919_v16, 0 }
0x1518   : > { %6934 = vmatpush.bf16.msra.mxu2 %v6925_v18  ;;  %7001 = vmatpush.bf16.msrb.mxu0 %v6925_v18 }
0x1519   : > { %7029 = vmatpush.bf16.msra.mxu1 %v6925_v18 }
0x151b   : > { %10610 = vmatmul.msk.bf16.vlgmr.msra.gmra.mxu2 %vm5095_vm4, %v6920_v19  ;;  %10628 = vmatmul.msk.bf16.vlgmr.msrb.gmra.mxu0 %vm5095_vm4, %v6990_v20 }
0x151c   : > { %7076 = vmatpush.bf16.msrb.mxu2 %v11864_v17  ;;  %7137 = vmatpush.bf16.msra.mxu0 %v6925_v18  ;;  %v7263_v17 = vld [vmem:[%s14187_s28] sm:$0x1]  ;;  %s14191_s28 = sld [smem:[#allocation64_spill]] }
0x151d   : > { %10638 = vmatmul.msk.bf16.vlgmr.msra.gmra.mxu1 %vm5095_vm4, %v10637_v9 }
0x151e   : > { %7184 = vmatpush.bf16.msrb.mxu1 %v11868_v28  ;;  %v11892_v28 = vld [vmem:[%s14188_s2 + $0x118] sm:$0xff] }
0x1520   : > { %7077 = vmatpush.bf16.msrb.mxu2 %v11863_v21  ;;  %7333 = vmatpush.bf16.msrb.mxu0 %v11880_v53  ;;  %v10929_v53 = vld [vmem:[#allocation13 + $0x60] sm:$0xf] }
0x1522   : > { %7185 = vmatpush.bf16.msrb.mxu1 %v11867_v32 }
0x1524   : > { %7078 = vmatpush.bf16.msrb.mxu2 %v11862_v22  ;;  %7334 = vmatpush.bf16.msrb.mxu0 %v11879_v54  ;;  %v11882_v22 = vld [vmem:[%s14186_s1 + $0x108] sm:$0xff] }
0x1526   : > { %7186 = vmatpush.bf16.msrb.mxu1 %v11866_v33 }
0x1528   : > { %7079 = vmatpush.bf16.msrb.mxu2 %v11861_v23  ;;  %7335 = vmatpush.bf16.msrb.mxu0 %v11878_v55  ;;  %v11881_v23 = vld [vmem:[%s14186_s1 + $0x100] sm:$0xff]  ;;  %s14192_s1 = smov %s14191_s28  ;;  %v11910_v55 = vld [vmem:[#allocation13 + $0x64] sm:$0xf0] }
0x152a   : > { %7187 = vmatpush.bf16.msrb.mxu1 %v11865_v34 }
0x152b   : > { %10682 = vmatmul.msk.bf16.vlgmr.msra.gmra.mxu0 %vm5095_vm4, %v10681_v24  ;;  %v11896_v24 = vld [vmem:[%s14188_s2 + $0x138] sm:$0xff] }
0x152c   : > { %7206 = vmatpush.bf16.msra.mxu2 %v6925_v18  ;;  %7336 = vmatpush.bf16.msrb.mxu0 %v11877_v57  ;;  %v10931_v57 = vld [vmem:[#allocation13 + $0x68] sm:$0xf0] }
0x152e   : > { %7416 = vmatpush.bf16.msra.mxu1 %v11888_v43  ;;  %v11003_v43 = vld [vmem:[%s14192_s1 + $0x258] sm:$0xf0] }
0x1530   : > { %7337 = vmatpush.bf16.msrb.mxu0 %v11876_v59 }
0x1532   : > { %7417 = vmatpush.bf16.msra.mxu1 %v11887_v11 }
0x1534   : > { %7338 = vmatpush.bf16.msrb.mxu0 %v11875_v62  ;;  %v11925_v62 = vld [vmem:[%s14192_s1 + $0x264] sm:$0xf] }
0x1536   : > { %7418 = vmatpush.bf16.msra.mxu1 %v11886_v12 }
0x1538   : > { %7339 = vmatpush.bf16.msrb.mxu0 %v11874_v5  ;;  %v11924_v5 = vld [vmem:[%s14192_s1 + $0x254] sm:$0xf0] }
0x153a   : > { %7419 = vmatpush.bf16.msra.mxu1 %v11885_v13  ;;  %v10913_v13 = vld [vmem:[#allocation13 + $0x40] sm:$0xf] }
0x153c   : > { %7340 = vmatpush.bf16.msrb.mxu0 %v11873_v10  ;;  %v11923_v10 = vld [vmem:[%s14192_s1 + $0x254] sm:$0xf] }
0x153e   : > { %7420 = vmatpush.bf16.msra.mxu1 %v11884_v14  ;;  %v11906_v14 = vld [vmem:[#allocation13 + $0x44] sm:$0xf0] }
0x1542   : > { %7421 = vmatpush.bf16.msra.mxu1 %v11883_v15  ;;  %v11905_v15 = vld [vmem:[#allocation13 + $0x44] sm:$0xf] }
0x1546   : > { %7422 = vmatpush.bf16.msra.mxu1 %v11882_v22 }
0x154a   : > { %7423 = vmatpush.bf16.msra.mxu1 %v11881_v23 }
0x1598   : > { %v7003_v35 = vpop.f32.mrf.mxu0 }
0x1599   : > { %v7007_v47 = vpack.c.bf16 %v7003_v35, %v7003_v35 }
0x159a   : > { %v7031_v36 = vpop.f32.mrf.mxu1 }
0x159b   : > { %v7035_v37 = vpack.c.bf16 %v7031_v36, %v7031_v36 }
0x159d   : > { %10663 = vmatmul.msk.bf16.vlgmr.msrb.gmra.mxu2 %vm2161_vm0, %v7035_v37 }
0x159e   : > { %v6936_v38 = vpop.f32.mrf.mxu2  ;;  %7497 = vmatpush.bf16.msrb.mxu2 %v11896_v24  ;;  %v10905_v24 = vld [vmem:[#allocation13 + $0x30] sm:$0xf] }
0x159f   : > { %v6940_v39 = vpack.c.bf16 %v6936_v38, %v6936_v38 }
0x15a0   : > { %v7005_v40 = vpop.f32.mrf.mxu0 }
0x15a1   : > { %10627 = vmatmul.msk.bf16.vlgmr.msrb.gmra.mxu3 %vm2161_vm0, %v6940_v39  ;;  %v11890_v39 = vld [vmem:[%s14188_s2 + $0x108] sm:$0xff]  ;;  %v11889_v40 = vld [vmem:[%s14188_s2 + $0x100] sm:$0xff] }
0x15a2   : > { %v7033_v41 = vpop.f32.mrf.mxu1  ;;  %7253 = vmatpush.bf16.msrb.mxu3 %v11872_v49  ;;  %7498 = vmatpush.bf16.msrb.mxu2 %v11895_v25  ;;  %v11904_v25 = vld [vmem:[#allocation13 + $0x34] sm:$0xf0] }
0x15a3   : > { %v10937_v41 = vld [vmem:[#allocation13 + $0x70] sm:$0xf] }
0x15a6   : > { %v6938_v42 = vpop.f32.mrf.mxu2  ;;  %7254 = vmatpush.bf16.msrb.mxu3 %v11871_v50  ;;  %7499 = vmatpush.bf16.msrb.mxu2 %v11894_v26  ;;  %v11903_v26 = vld [vmem:[#allocation13 + $0x34] sm:$0xf] }
0x15a7   : > { %v11912_v42 = vld [vmem:[#allocation13 + $0x74] sm:$0xf0] }
0x15a8   : > { %v7139_v44 = vpop.f32.mrf.mxu0 }
0x15a9   : > { %v7143_v46 = vpack.c.bf16 %v7139_v44, %v7139_v44  ;;  %v11911_v44 = vld [vmem:[#allocation13 + $0x74] sm:$0xf] }
0x15aa   : > { %7255 = vmatpush.bf16.msrb.mxu3 %v11870_v51  ;;  %7500 = vmatpush.bf16.msrb.mxu2 %v11893_v27  ;;  %v11927_v51 = vld [vmem:[%s14192_s1 + $0x274] sm:$0xf] }
0x15ab   : > { %10707 = vmatmul.msk.bf16.vlgmr.msrb.gmra.mxu1 %vm2161_vm0, %v7143_v46  ;;  %v10939_v46 = vld [vmem:[#allocation13 + $0x78] sm:$0xf0] }
0x15ac   : > { %v10942_v49 = vor.u32 %v11911_v44, %v10939_v46  ;;  %v11918_v44 = vld [vmem:[%s14192_s1 + $0x224] sm:$0xf0]  ;;  %v10979_v46 = vld [vmem:[%s14192_s1 + $0x228] sm:$0xf0] }
0x15ad   : > { %10709 = vmatmul.msk.bf16.vlgmr.msra.gmra.mxu2 %vm5095_vm4, %v10708_v45  ;;  %v10938_v45 = vor.u32 %v11912_v42, %v10937_v41  ;;  %v10899_v41 = vld [vmem:[#allocation13 + $0x28] sm:$0xf0]  ;;  %v10977_v42 = vld [vmem:[%s14192_s1 + $0x220] sm:$0xf] }
0x15ae   : > { %7256 = vmatpush.bf16.msrb.mxu3 %v11869_v52  ;;  %7501 = vmatpush.bf16.msrb.mxu2 %v11892_v28  ;;  %v11019_v52 = vld [vmem:[%s14192_s1 + $0x278] sm:$0xf0]  ;;  %v10907_v28 = vld [vmem:[#allocation13 + $0x38] sm:$0xf0] }
0x15af   : > { %v11022_v54 = vor.u32 %v11927_v51, %v11019_v52  ;;  %7628 = vmatpush.bf16.msra.mxu0 %v10942_v49  ;;  %v10978_v49 = vor.u32 %v11918_v44, %v10977_v42  ;;  %v7367_v51 = vld [vmem:[%s14193_s3] sm:$0x1]  ;;  %s14195_s3 = smov %s14194_s26 }
0x15b0   : > { %v7141_v48 = vpop.f32.mrf.mxu0  ;;  %v11957_v42 = vld [vmem:[%s14195_s3 + $0x4e4] sm:$0xf]  ;;  %v11171_v44 = vld [vmem:[%s14195_s3 + $0x4e8] sm:$0xf0] }
0x15b1   : > { %10680 = vmatmul.msk.bf16.vlgmr.msra.gmra.mxu3 %vm2161_vm0, %v7007_v47  ;;  %v11017_v47 = vld [vmem:[%s14191_s28 + $0x270] sm:$0xf]  ;;  %v11928_v48 = vld [vmem:[%s14192_s1 + $0x274] sm:$0xf0]  ;;  %s14196_s28 = sld [smem:[#allocation62_spill]] }
0x15b2   : > { %7502 = vmatpush.bf16.msrb.mxu2 %v11891_v29  ;;  %v11018_v50 = vor.u32 %v11928_v48, %v11017_v47  ;;  %7615 = vmatpush.bf16.msra.mxu3 %v10938_v45  ;;  %v10985_v29 = vld [vmem:[%s14192_s1 + $0x230] sm:$0xf]  ;;  %v11917_v45 = vld [vmem:[%s14192_s1 + $0x224] sm:$0xf] }
0x15b4   : > { %7744 = vmatpush.bf16.msrb.mxu1 %v11018_v50  ;;  %v10982_v50 = vor.u32 %v11917_v45, %v10979_v46  ;;  %v11174_v46 = vor.u32 %v11957_v42, %v11171_v44  ;;  %v11059_v44 = vld [vmem:[%s14195_s3 + $0x408] sm:$0xf0] }
0x15b6   : > { %7503 = vmatpush.bf16.msrb.mxu2 %v11890_v39  ;;  %v11901_v39 = vld [vmem:[#allocation13 + $0x24] sm:$0xf] }
0x15b7   : > { %v10902_v48 = vor.u32 %v11901_v39, %v10899_v41  ;;  %v11169_v39 = vld [vmem:[%s14195_s3 + $0x4e0] sm:$0xf] }
0x15ba   : > { %7504 = vmatpush.bf16.msrb.mxu2 %v11889_v40 }
0x15be   : > { %7757 = vmatpush.bf16.msra.mxu2 %v11022_v54 }
0x1620   : > { %v7081_v56 = vpop.f32.mrf.mxu2 }
0x1624   : > { %v6986_v58 = vpop.f32.mrf.mxu3 }
0x1625   : > { %v6987_v33 = vadd.f32 %v6986_v58, %v6949_v30  ;;  %v10930_v58 = vor.u32 %v11910_v55, %v10929_v53  ;;  %v11920_v30 = vld [vmem:[%s14192_s1 + $0x234] sm:$0xf0] }
0x1627   : > { %7616 = vmatpush.bf16.msra.mxu3 %v10930_v58  ;;  %v11900_v58 = vld [vmem:[#allocation13 + $0x14] sm:$0xf0] }
0x1628   : > { %v7083_v60 = vpop.f32.mrf.mxu2  ;;  %v7189_v61 = vpop.f32.mrf.mxu1 }
0x1629   : > { %v11009_v60 = vld [vmem:[%s14192_s1 + $0x260] sm:$0xf] }
0x162c   : > { %v6988_v63 = vpop.f32.mrf.mxu3 }
0x1630   : > { %v7208_v0 = vpop.f32.mrf.mxu2  ;;  %v7191_v4 = vpop.f32.mrf.mxu1 }
0x1631   : > { %v7212_v3 = vpack.c.bf16 %v7208_v0, %v7208_v0  ;;  %v11011_v0 = vld [vmem:[%s14192_s1 + $0x268] sm:$0xf0]  ;;  %v11908_v4 = vld [vmem:[#allocation13 + $0x54] sm:$0xf0] }
0x1633   : > { %10734 = vmatmul.msk.bf16.vlgmr.msrb.gmra.mxu3 %vm2161_vm0, %v7212_v3  ;;  %v10921_v3 = vld [vmem:[#allocation13 + $0x50] sm:$0xf] }
0x1634   : > { %v7121_v6 = vpop.f32.mrf.mxu3 }
0x1635   : > { %v7122_v1 = vadd.f32 %v7121_v6, %v7081_v56  ;;  %v11909_v56 = vld [vmem:[#allocation13 + $0x64] sm:$0xf]  ;;  %v11014_v6 = vor.u32 %v11925_v62, %v11011_v0 }
0x1636   : > { %v10934_v59 = vor.u32 %v11909_v56, %v10931_v57  ;;  %v10889_v57 = vld [vmem:[#allocation13 + $0x10] sm:$0xf]  ;;  %v10969_v62 = vld [vmem:[%s14192_s1 + $0x210] sm:$0xf] }
0x1637   : > { %v7193_v7 = vadd.f32 %v7189_v61, %v7122_v1  ;;  %v11926_v61 = vld [vmem:[%s14192_s1 + $0x264] sm:$0xf0]  ;;  %v11907_v1 = vld [vmem:[#allocation13 + $0x54] sm:$0xf]  ;;  %7758 = vmatpush.bf16.msra.mxu2 %v11014_v6 }
0x1638   : > { %v7210_v2 = vpop.f32.mrf.mxu2  ;;  %v11010_v63 = vor.u32 %v11926_v61, %v11009_v60  ;;  %7629 = vmatpush.bf16.msra.mxu0 %v10934_v59  ;;  %v11899_v59 = vld [vmem:[#allocation13 + $0x14] sm:$0xf]  ;;  %v10890_v60 = vor.u32 %v11900_v58, %v10889_v57  ;;  %v10891_v61 = vld [vmem:[#allocation13 + $0x18] sm:$0xf0] }
0x1639   : > { %v11001_v2 = vld [vmem:[%s14192_s1 + $0x250] sm:$0xf]  ;;  %v10894_v0 = vor.u32 %v11899_v59, %v10891_v61  ;;  %v10971_v6 = vld [vmem:[%s14192_s1 + $0x218] sm:$0xf0]  ;;  %v11153_v58 = vld [vmem:[%s14195_s3 + $0x4c0] sm:$0xf] }
0x163a   : > { %7745 = vmatpush.bf16.msrb.mxu1 %v11010_v63  ;;  %v11002_v12 = vor.u32 %v11924_v5, %v11001_v2  ;;  %v11916_v63 = vld [vmem:[%s14192_s1 + $0x214] sm:$0xf0]  ;;  %v11898_v2 = vld [vmem:[#allocation13 + $0x4] sm:$0xf0]  ;;  %v11953_v61 = vld [vmem:[%s14195_s3 + $0x4c4] sm:$0xf] }
0x163c   : > { %v7123_v8 = vpop.f32.mrf.mxu3 }
0x163d   : > { %v10922_v8 = vor.u32 %v11908_v4, %v10921_v3  ;;  %v10970_v3 = vor.u32 %v11916_v63, %v10969_v62  ;;  %v11915_v4 = vld [vmem:[%s14192_s1 + $0x214] sm:$0xf]  ;;  %v11155_v62 = vld [vmem:[%s14195_s3 + $0x4c8] sm:$0xf0] }
0x163e   : > { %7746 = vmatpush.bf16.msrb.mxu1 %v11002_v12 }
0x163f   : > { %7617 = vmatpush.bf16.msra.mxu3 %v10922_v8  ;;  %v11897_v8 = vld [vmem:[#allocation13 + $0x4] sm:$0xf] }
0x16b6   : > { %v7258_v16 = vpop.f32.mrf.mxu3 }
0x16b7   : > { %v7262_v18 = vadd.f32 %v7258_v16, %v7193_v7  ;;  %v10923_v7 = vld [vmem:[#allocation13 + $0x58] sm:$0xf0]  ;;  %v11006_v16 = vor.u32 %v11923_v10, %v11003_v43  ;;  %v10883_v10 = vld [vmem:[#allocation13 + $0x8] sm:$0xf0]  ;;  %v10961_v43 = vld [vmem:[%s14192_s1 + $0x200] sm:$0xf] }
0x16b8   : > { %v10926_v11 = vor.u32 %v11907_v1, %v10923_v7  ;;  %v10974_v1 = vor.u32 %v11915_v4, %v10971_v6  ;;  %v10881_v7 = vld [vmem:[#allocation13] sm:$0xf]  ;;  %v10886_v12 = vor.u32 %v11897_v8, %v10883_v10  ;;  %v11935_v4 = vld [vmem:[%s14195_s3 + $0x434] sm:$0xf]  ;;  %v11083_v6 = vld [vmem:[%s14195_s3 + $0x438] sm:$0xf0] }
0x16b9   : > { %v7264_v19 = vadd.f32 %v7263_v17, %v7262_v18  ;;  %v10915_v17 = vld [vmem:[#allocation13 + $0x48] sm:$0xf0]  ;;  %v10993_v18 = vld [vmem:[%s14192_s1 + $0x240] sm:$0xf]  ;;  %7759 = vmatpush.bf16.msra.mxu2 %v11006_v16  ;;  %v10882_v5 = vor.u32 %v11898_v2, %v10881_v7  ;;  %v11158_v7 = vor.u32 %v11953_v61, %v11155_v62  ;;  %v11145_v2 = vld [vmem:[%s14195_s3 + $0x4b0] sm:$0xf] }
0x16ba   : > { %7630 = vmatpush.bf16.msra.mxu0 %v10926_v11  ;;  %v10918_v22 = vor.u32 %v11905_v15, %v10915_v17  ;;  %v11914_v11 = vld [vmem:[%s14192_s1 + $0x204] sm:$0xf0]  ;;  %v10963_v15 = vld [vmem:[%s14192_s1 + $0x208] sm:$0xf0]  ;;  %v11113_v17 = vld [vmem:[%s14194_s26 + $0x470] sm:$0xf] }
0x16bb   : > { %v7265_v20 = vmax.f32 %v7264_v19, 0.0  ;;  %v11922_v19 = vld [vmem:[%s14192_s1 + $0x244] sm:$0xf0]  ;;  %v11951_v10 = vld [vmem:[%s14195_s3 + $0x4b4] sm:$0xf]  ;;  %s14197_s26 = sld [smem:[#allocation68_spill]] }
0x16bc   : > { %v10994_v23 = vor.u32 %v11922_v19, %v10993_v18  ;;  %v11944_v18 = vld [vmem:[%s14195_s3 + $0x474] sm:$0xf0]  ;;  %v11943_v19 = vld [vmem:[%s14195_s3 + $0x474] sm:$0xf] }
0x16bd   : > { %v7266_v9 = vpack.c.bf16 %v7265_v20, %v7265_v20  ;;  %v11921_v20 = vld [vmem:[%s14192_s1 + $0x244] sm:$0xf] }
0x16be   : > { %v7260_v21 = vpop.f32.mrf.mxu3  ;;  %7631 = vmatpush.bf16.msra.mxu0 %v10918_v22  ;;  %7747 = vmatpush.bf16.msrb.mxu1 %v10994_v23  ;;  %v11942_v22 = vld [vmem:[%s14195_s3 + $0x464] sm:$0xf0] }
0x16bf   : > { %7341 = vmatmul.bf16.vlgmr.msrb.gmra.mxu0 %v7266_v9  ;;  %v10995_v9 = vld [vmem:[%s14192_s1 + $0x248] sm:$0xf0]  ;;  %v10914_v21 = vor.u32 %v11906_v14, %v10913_v13  ;;  %v10962_v13 = vor.u32 %v11914_v11, %v10961_v43  ;;  %v11913_v14 = vld [vmem:[%s14192_s1 + $0x204] sm:$0xf]  ;;  %v11147_v43 = vld [vmem:[%s14195_s3 + $0x4b8] sm:$0xf0]  ;;  %v11086_v11 = vor.u32 %v11935_v4, %v11083_v6 }
0x16c0   : > { %v10998_v27 = vor.u32 %v11921_v20, %v10995_v9  ;;  %v10966_v16 = vor.u32 %v11913_v14, %v10963_v15  ;;  %v11114_v20 = vor.u32 %v11944_v18, %v11113_v17  ;;  %v11115_v9 = vld [vmem:[%s14195_s3 + $0x478] sm:$0xf0]  ;;  %v11933_v14 = vld [vmem:[%s14195_s3 + $0x424] sm:$0xf]  ;;  %v11075_v15 = vld [vmem:[%s14195_s3 + $0x428] sm:$0xf0]  ;;  %v11150_v17 = vor.u32 %v11951_v10, %v11147_v43 }
0x16c1   : > { %7618 = vmatpush.bf16.msra.mxu3 %v10914_v21  ;;  %v11105_v21 = vld [vmem:[%s14195_s3 + $0x460] sm:$0xf]  ;;  %v11118_v23 = vor.u32 %v11943_v19, %v11115_v9 }
0x16c2   : > { %7760 = vmatpush.bf16.msra.mxu2 %v10998_v27  ;;  %v11106_v27 = vor.u32 %v11942_v22, %v11105_v21  ;;  %v7448_v19 = vld [vmem:[%s14196_s28] sm:$0x1]  ;;  %s14199_s28 = sld [smem:[#allocation65_spill]] }
0x173c   : > { %v7342_v32 = vpop.f32.mrf.mxu0 }
0x173d   : > { %v7343_v34 = vadd.f32 %v7342_v32, %v7284_v31  ;;  %v11919_v31 = vld [vmem:[%s14192_s1 + $0x234] sm:$0xf]  ;;  %v10987_v32 = vld [vmem:[%s14192_s1 + $0x238] sm:$0xf0]  ;;  %s14198_s1 = smov %s14197_s26 }
0x173e   : > { %v10990_v40 = vor.u32 %v11919_v31, %v10987_v32  ;;  %v11992_v62 = vld [vmem:[%s14198_s1 + $0x4f4] sm:$0xf0]  ;;  %v11991_v6 = vld [vmem:[%s14198_s1 + $0x4f4] sm:$0xf]  ;;  %v11990_v10 = vld [vmem:[%s14198_s1 + $0x4e4] sm:$0xf0] }
0x173f   : > { %v7346_v35 = vadd.f32 %v7343_v34, %v6987_v33  ;;  %v10906_v33 = vor.u32 %v11904_v25, %v10905_v24  ;;  %v10910_v34 = vor.u32 %v11903_v26, %v10907_v28  ;;  %v11941_v24 = vld [vmem:[%s14195_s3 + $0x464] sm:$0xf]  ;;  %v11107_v25 = vld [vmem:[%s14195_s3 + $0x468] sm:$0xf0]  ;;  %v11177_v26 = vld [vmem:[%s14195_s3 + $0x4f0] sm:$0xf] }
0x1740   : > { %7761 = vmatpush.bf16.msra.mxu2 %v10990_v40  ;;  %v11960_v28 = vld [vmem:[%s14195_s3 + $0x4f4] sm:$0xf0]  ;;  %v11110_v31 = vor.u32 %v11941_v24, %v11107_v25  ;;  %v11958_v40 = vld [vmem:[%s14195_s3 + $0x4e4] sm:$0xf0] }
0x1741   : > { %v7347_v36 = vmax.f32 %v7346_v35, 0.0  ;;  %v10986_v35 = vor.u32 %v11920_v30, %v10985_v29  ;;  %7619 = vmatpush.bf16.msra.mxu3 %v10906_v33  ;;  %7632 = vmatpush.bf16.msra.mxu0 %v10910_v34  ;;  %v11959_v29 = vld [vmem:[%s14195_s3 + $0x4f4] sm:$0xf]  ;;  %v11179_v30 = vld [vmem:[%s14195_s3 + $0x4f8] sm:$0xf0]  ;;  %v11178_v32 = vor.u32 %v11960_v28, %v11177_v26  ;;  %v11170_v41 = vor.u32 %v11958_v40, %v11169_v39 }
0x1742   : > { %v11182_v33 = vor.u32 %v11959_v29, %v11179_v30  ;;  %v11097_v34 = vld [vmem:[%s14195_s3 + $0x450] sm:$0xf]  ;;  %v11931_v28 = vld [vmem:[%s14195_s3 + $0x414] sm:$0xf]  ;;  %v11067_v30 = vld [vmem:[%s14195_s3 + $0x418] sm:$0xf0] }
0x1743   : > { %v13753_v37 = vpack.c.bf16 %v7347_v36, %v7347_v36  ;;  %v10897_v36 = vld [vmem:[#allocation13 + $0x20] sm:$0xf]  ;;  %7748 = vmatpush.bf16.msrb.mxu1 %v10986_v35  ;;  %v11940_v35 = vld [vmem:[%s14195_s3 + $0x454] sm:$0xf0]  ;;  %v11057_v39 = vld [vmem:[%s14195_s3 + $0x400] sm:$0xf] }
0x1744   : > { %v7344_v38 = vpop.f32.mrf.mxu0  ;;  %7762 = vmatpush.bf16.msra.mxu2 %v10982_v50  ;;  %v11098_v45 = vor.u32 %v11940_v35, %v11097_v34  ;;  %v11161_v50 = vld [vmem:[%s14195_s3 + $0x4d0] sm:$0xf]  ;;  %v11949_v35 = vld [vmem:[%s14195_s3 + $0x4a4] sm:$0xf]  ;;  %v11930_v40 = vld [vmem:[%s14195_s3 + $0x404] sm:$0xf0] }
0x1745   : > { %7424 = vmatmul.bf16.vlgmr.msra.gmra.mxu1 %v13753_v37  ;;  %v11902_v38 = vld [vmem:[#allocation13 + $0x24] sm:$0xf0]  ;;  %7633 = vmatpush.bf16.msra.mxu0 %v10902_v48  ;;  %v11938_v48 = vld [vmem:[%s14195_s3 + $0x444] sm:$0xf0]  ;;  %v7349_v21 = vunpack.c.l.bf16 %v13753_v37  ;;  %v11932_v37 = vld [vmem:[%s14195_s3 + $0x414] sm:$0xf0]  ;;  %v11058_v42 = vor.u32 %v11930_v40, %v11057_v39 }
0x1746   : > { %v10898_v47 = vor.u32 %v11902_v38, %v10897_v36  ;;  %v11939_v36 = vld [vmem:[%s14195_s3 + $0x454] sm:$0xf]  ;;  %v11099_v38 = vld [vmem:[%s14195_s3 + $0x458] sm:$0xf0] }
0x1747   : > { %7749 = vmatpush.bf16.msrb.mxu1 %v10978_v49  ;;  %v11102_v49 = vor.u32 %v11939_v36, %v11099_v38  ;;  %v11139_v36 = vld [vmem:[%s14195_s3 + $0x4a8] sm:$0xf0]  ;;  %v11971_v39 = vld [vmem:[%s14198_s1 + $0x454] sm:$0xf]  ;;  %v11259_v40 = vld [vmem:[%s14198_s1 + $0x458] sm:$0xf0] }
0x1748   : > { %7620 = vmatpush.bf16.msra.mxu3 %v10898_v47  ;;  %7763 = vmatpush.bf16.msra.mxu2 %v10974_v1  ;;  %v11089_v47 = vld [vmem:[%s14195_s3 + $0x440] sm:$0xf]  ;;  %v11142_v38 = vor.u32 %v11949_v35, %v11139_v36  ;;  %v11321_v35 = vld [vmem:[%s14198_s1 + $0x4d0] sm:$0xf] }
0x1749   : > { %7634 = vmatpush.bf16.msra.mxu0 %v10894_v0  ;;  %v11090_v59 = vor.u32 %v11938_v48, %v11089_v47  ;;  %v11081_v0 = vld [vmem:[%s14195_s3 + $0x430] sm:$0xf]  ;;  %v11948_v47 = vld [vmem:[%s14195_s3 + $0x494] sm:$0xf0]  ;;  %v11947_v48 = vld [vmem:[%s14195_s3 + $0x494] sm:$0xf] }
0x174b   : > { %7750 = vmatpush.bf16.msrb.mxu1 %v10970_v3  ;;  %v11936_v3 = vld [vmem:[%s14195_s3 + $0x434] sm:$0xf0] }
0x174c   : > { %7621 = vmatpush.bf16.msra.mxu3 %v10890_v60  ;;  %7764 = vmatpush.bf16.msra.mxu2 %v10966_v16  ;;  %v11954_v60 = vld [vmem:[%s14195_s3 + $0x4c4] sm:$0xf0]  ;;  %v11082_v8 = vor.u32 %v11936_v3, %v11081_v0  ;;  %v11275_v0 = vld [vmem:[%s14198_s1 + $0x478] sm:$0xf0] }
0x174d   : > { %7635 = vmatpush.bf16.msra.mxu0 %v10886_v12  ;;  %v11154_v1 = vor.u32 %v11954_v60, %v11153_v58  ;;  %v11073_v12 = vld [vmem:[%s14195_s3 + $0x420] sm:$0xf]  ;;  %v11273_v58 = vld [vmem:[%s14197_s26 + $0x470] sm:$0xf]  ;;  %s14200_s26 = sld [smem:[#allocation67_spill]] }
0x174e   : > { %v11337_v60 = vld [vmem:[%s14198_s1 + $0x4f0] sm:$0xf] }
0x174f   : > { %7751 = vmatpush.bf16.msrb.mxu1 %v10962_v13  ;;  %v11934_v13 = vld [vmem:[%s14195_s3 + $0x424] sm:$0xf0]  ;;  %v11338_v3 = vor.u32 %v11992_v62, %v11337_v60  ;;  %v11968_v60 = vld [vmem:[%s14198_s1 + $0x434] sm:$0xf0] }
0x1750   : > { %7622 = vmatpush.bf16.msra.mxu3 %v10882_v5  ;;  %v11952_v5 = vld [vmem:[%s14195_s3 + $0x4b4] sm:$0xf0]  ;;  %v11074_v18 = vor.u32 %v11934_v13, %v11073_v12  ;;  %v11973_v12 = vld [vmem:[%s14198_s1 + $0x464] sm:$0xf]  ;;  %v11267_v13 = vld [vmem:[%s14198_s1 + $0x468] sm:$0xf0] }
0x1751   : > { %7986 = vmatpush.bf16.msrb.mxu0 %v11178_v32  ;;  %v11146_v16 = vor.u32 %v11952_v5, %v11145_v2  ;;  %v11137_v32 = vld [vmem:[%s14195_s3 + $0x4a0] sm:$0xf] }
0x1752   : > { %v11329_v5 = vld [vmem:[%s14198_s1 + $0x4e0] sm:$0xf] }
0x1753   : > { %7999 = vmatpush.bf16.msra.mxu1 %v11118_v23 }
0x1754   : > { %7973 = vmatpush.bf16.msrb.mxu3 %v11114_v20  ;;  %v11078_v20 = vor.u32 %v11933_v14, %v11075_v15  ;;  %v11989_v14 = vld [vmem:[%s14198_s1 + $0x4e4] sm:$0xf]  ;;  %v11270_v15 = vor.u32 %v11973_v12, %v11267_v13  ;;  %v11235_v13 = vld [vmem:[%s14198_s1 + $0x428] sm:$0xf0] }
0x1755   : > { %7987 = vmatpush.bf16.msrb.mxu0 %v11170_v41  ;;  %v11929_v41 = vld [vmem:[%s14195_s3 + $0x404] sm:$0xf] }
0x1756   : > { %v11965_v12 = vld [vmem:[%s14198_s1 + $0x424] sm:$0xf] }
0x1757   : > { %8000 = vmatpush.bf16.msra.mxu1 %v11110_v31  ;;  %v11070_v31 = vor.u32 %v11931_v28, %v11067_v30 }
0x1758   : > { %7974 = vmatpush.bf16.msrb.mxu3 %v11106_v27  ;;  %v11065_v27 = vld [vmem:[%s14195_s3 + $0x410] sm:$0xf] }
0x1759   : > { %v11066_v29 = vor.u32 %v11932_v37, %v11065_v27 }
0x175b   : > { %8001 = vmatpush.bf16.msra.mxu1 %v11102_v49 }
0x175c   : > { %7975 = vmatpush.bf16.msrb.mxu3 %v11098_v45  ;;  %v11062_v45 = vor.u32 %v11929_v41, %v11059_v44  ;;  %v11987_v44 = vld [vmem:[%s14198_s1 + $0x4d4] sm:$0xf] }
0x1760   : > { %7976 = vmatpush.bf16.msrb.mxu3 %v11090_v59  ;;  %v11976_v59 = vld [vmem:[%s14198_s1 + $0x474] sm:$0xf0] }
0x1761   : > { %v11274_v61 = vor.u32 %v11976_v59, %v11273_v58  ;;  %v11241_v59 = vld [vmem:[%s14198_s1 + $0x430] sm:$0xf] }
0x1762   : > { %v11242_v62 = vor.u32 %v11968_v60, %v11241_v59 }
0x1764   : > { %7977 = vmatpush.bf16.msrb.mxu3 %v11082_v8  ;;  %v11974_v8 = vld [vmem:[%s14198_s1 + $0x464] sm:$0xf0] }
0x1768   : > { %7978 = vmatpush.bf16.msrb.mxu3 %v11074_v18  ;;  %v7658_v18 = vld [vmem:[%s14199_s28] sm:$0x3]  ;;  %s14201_s28 = sld [smem:[#allocation70_spill]] }
0x176c   : > { %7979 = vmatpush.bf16.msrb.mxu3 %v11066_v29 }
0x176e   : > { %s14202_s2 = smov %s14201_s28 }
0x176f   : > { %v12022_v60 = vld [vmem:[%s14202_s2 + $0x4e4] sm:$0xf0] }
0x1770   : > { %7980 = vmatpush.bf16.msrb.mxu3 %v11058_v42  ;;  %v11262_v42 = vor.u32 %v11971_v39, %v11259_v40 }
0x17c2   : > { %v7425_v52 = vpop.f32.mrf.mxu1 }
0x17c3   : > { %v7426_v53 = vadd.f32 %v7425_v52, %v7367_v51  ;;  %v11956_v51 = vld [vmem:[%s14195_s3 + $0x4d4] sm:$0xf0]  ;;  %v11955_v52 = vld [vmem:[%s14195_s3 + $0x4d4] sm:$0xf] }
0x17c5   : > { %v7429_v54 = vmax.f32 %v7426_v53, 0.0  ;;  %v11937_v53 = vld [vmem:[%s14195_s3 + $0x444] sm:$0xf] }
0x17c7   : > { %v7430_v55 = vpack.c.bf16 %v7429_v54, %v7429_v54  ;;  %v11091_v54 = vld [vmem:[%s14195_s3 + $0x448] sm:$0xf0] }
0x17c8   : > { %v11094_v63 = vor.u32 %v11937_v53, %v11091_v54  ;;  %v11946_v53 = vld [vmem:[%s14195_s3 + $0x484] sm:$0xf0]  ;;  %v11945_v54 = vld [vmem:[%s14195_s3 + $0x484] sm:$0xf] }
0x17c9   : > { %7505 = vmatmul.bf16.vlgmr.msrb.gmra.mxu2 %v7430_v55  ;;  %v11163_v55 = vld [vmem:[%s14195_s3 + $0x4d8] sm:$0xf0] }
0x17ca   : > { %v7427_v56 = vpop.f32.mrf.mxu1  ;;  %8012 = vmatpush.bf16.msrb.mxu2 %v11182_v33  ;;  %v11166_v57 = vor.u32 %v11955_v52, %v11163_v55  ;;  %8002 = vmatpush.bf16.msra.mxu1 %v11094_v63  ;;  %v11950_v33 = vld [vmem:[%s14195_s3 + $0x4a4] sm:$0xf0]  ;;  %v11121_v52 = vld [vmem:[%s14195_s3 + $0x480] sm:$0xf]  ;;  %v11975_v63 = vld [vmem:[%s14198_s1 + $0x474] sm:$0xf] }
0x17cb   : > { %v11162_v56 = vor.u32 %v11956_v51, %v11161_v50  ;;  %v11138_v34 = vor.u32 %v11950_v33, %v11137_v32  ;;  %v11131_v50 = vld [vmem:[%s14195_s3 + $0x498] sm:$0xf0]  ;;  %v11122_v55 = vor.u32 %v11946_v53, %v11121_v52  ;;  %v11278_v4 = vor.u32 %v11975_v63, %v11275_v0  ;;  %v11257_v33 = vld [vmem:[%s14198_s1 + $0x450] sm:$0xf]  ;;  %v11969_v52 = vld [vmem:[%s14198_s1 + $0x444] sm:$0xf] }
0x17cc   : > { %v11134_v51 = vor.u32 %v11947_v48, %v11131_v50  ;;  %v11970_v48 = vld [vmem:[%s14198_s1 + $0x444] sm:$0xf0]  ;;  %v11251_v53 = vld [vmem:[%s14198_s1 + $0x448] sm:$0xf0]  ;;  %v11984_v63 = vld [vmem:[%s14198_s1 + $0x4b4] sm:$0xf0] }
0x17cd   : > { %7988 = vmatpush.bf16.msrb.mxu0 %v11162_v56  ;;  %v11123_v56 = vld [vmem:[%s14195_s3 + $0x488] sm:$0xf0]  ;;  %v11967_v0 = vld [vmem:[%s14198_s1 + $0x434] sm:$0xf] }
0x17ce   : > { %8013 = vmatpush.bf16.msrb.mxu2 %v11174_v46  ;;  %8003 = vmatpush.bf16.msra.mxu1 %v11086_v11  ;;  %v11129_v46 = vld [vmem:[%s14195_s3 + $0x490] sm:$0xf]  ;;  %v11330_v11 = vor.u32 %v11990_v10, %v11329_v5  ;;  %v11966_v5 = vld [vmem:[%s14198_s1 + $0x424] sm:$0xf0]  ;;  %v11297_v10 = vld [vmem:[%s14198_s1 + $0x4a0] sm:$0xf] }
0x17cf   : > { %v11130_v49 = vor.u32 %v11948_v47, %v11129_v46  ;;  %v11249_v47 = vld [vmem:[%s14198_s1 + $0x440] sm:$0xf] }
0x17d0   : > { %v11250_v50 = vor.u32 %v11970_v48, %v11249_v47  ;;  %v11497_v47 = vld [vmem:[%s14201_s28 + $0x4f0] sm:$0xf]  ;;  %v12024_v48 = vld [vmem:[%s14202_s2 + $0x4f4] sm:$0xf0]  ;;  %s14204_s28 = sld [smem:[#allocation72_spill]] }
0x17d1   : > { %7989 = vmatpush.bf16.msrb.mxu0 %v11154_v1  ;;  %v11339_v1 = vld [vmem:[%s14198_s1 + $0x4f8] sm:$0xf0] }
0x17d2   : > { %8014 = vmatpush.bf16.msrb.mxu2 %v11166_v57  ;;  %8004 = vmatpush.bf16.msra.mxu1 %v11078_v20  ;;  %v11126_v57 = vor.u32 %v11945_v54, %v11123_v56  ;;  %v11342_v2 = vor.u32 %v11991_v6, %v11339_v1  ;;  %v11985_v56 = vld [vmem:[%s14198_s1 + $0x4c4] sm:$0xf]  ;;  %v11983_v1 = vld [vmem:[%s14198_s1 + $0x4b4] sm:$0xf] }
0x17d5   : > { %7990 = vmatpush.bf16.msrb.mxu0 %v11146_v16  ;;  %v11331_v16 = vld [vmem:[%s14198_s1 + $0x4e8] sm:$0xf0] }
0x17d6   : > { %8015 = vmatpush.bf16.msrb.mxu2 %v11158_v7  ;;  %8005 = vmatpush.bf16.msra.mxu1 %v11070_v31  ;;  %v11265_v7 = vld [vmem:[%s14198_s1 + $0x460] sm:$0xf] }
0x17d7   : > { %v11266_v43 = vor.u32 %v11974_v8, %v11265_v7  ;;  %v11307_v7 = vld [vmem:[%s14198_s1 + $0x4b8] sm:$0xf0]  ;;  %v11233_v8 = vld [vmem:[%s14198_s1 + $0x420] sm:$0xf] }
0x17d9   : > { %7991 = vmatpush.bf16.msrb.mxu0 %v11138_v34  ;;  %v11972_v34 = vld [vmem:[%s14198_s1 + $0x454] sm:$0xf0] }
0x17da   : > { %8016 = vmatpush.bf16.msrb.mxu2 %v11150_v17  ;;  %8006 = vmatpush.bf16.msra.mxu1 %v11062_v45  ;;  %v11334_v17 = vor.u32 %v11989_v14, %v11331_v16  ;;  %v11258_v36 = vor.u32 %v11972_v34, %v11257_v33  ;;  %v11323_v45 = vld [vmem:[%s14198_s1 + $0x4d8] sm:$0xf0]  ;;  %v11981_v16 = vld [vmem:[%s14198_s1 + $0x4a4] sm:$0xf]  ;;  %v11281_v33 = vld [vmem:[%s14198_s1 + $0x480] sm:$0xf] }
0x17db   : > { %v11326_v46 = vor.u32 %v11987_v44, %v11323_v45  ;;  %v13927_v45 = vld [vmem:[%s14200_s26] sm:$0x3]  ;;  %s14203_s26 = sld [smem:[#allocation63_spill]] }
0x17dd   : > { %7992 = vmatpush.bf16.msrb.mxu0 %v11130_v49  ;;  %v11313_v49 = vld [vmem:[%s14198_s1 + $0x4c0] sm:$0xf] }
0x17de   : > { %8017 = vmatpush.bf16.msrb.mxu2 %v11142_v38  ;;  %v11988_v38 = vld [vmem:[%s14198_s1 + $0x4d4] sm:$0xf0] }
0x17df   : > { %v11322_v41 = vor.u32 %v11988_v38, %v11321_v35  ;;  %v11978_v35 = vld [vmem:[%s14198_s1 + $0x484] sm:$0xf0]  ;;  %v11219_v38 = vld [vmem:[%s14198_s1 + $0x408] sm:$0xf0] }
0x17e0   : > { %v11282_v39 = vor.u32 %v11978_v35, %v11281_v33  ;;  %v12016_v35 = vld [vmem:[%s14202_s2 + $0x4b4] sm:$0xf0] }
0x17e1   : > { %7993 = vmatpush.bf16.msrb.mxu0 %v11122_v55  ;;  %v11254_v55 = vor.u32 %v11969_v52, %v11251_v53  ;;  %v11433_v52 = vld [vmem:[%s14202_s2 + $0x470] sm:$0xf]  ;;  %v12008_v53 = vld [vmem:[%s14202_s2 + $0x474] sm:$0xf0] }
0x17e2   : > { %8018 = vmatpush.bf16.msrb.mxu2 %v11134_v51  ;;  %v11986_v51 = vld [vmem:[%s14198_s1 + $0x4c4] sm:$0xf0] }
0x17e3   : > { %v11314_v54 = vor.u32 %v11986_v51, %v11313_v49  ;;  %v12023_v49 = vld [vmem:[%s14202_s2 + $0x4f4] sm:$0xf]  ;;  %v11499_v51 = vld [vmem:[%s14202_s2 + $0x4f8] sm:$0xf0] }
0x17e6   : > { %8019 = vmatpush.bf16.msrb.mxu2 %v11126_v57  ;;  %v11315_v57 = vld [vmem:[%s14198_s1 + $0x4c8] sm:$0xf0] }
0x17e7   : > { %v11318_v58 = vor.u32 %v11985_v56, %v11315_v57  ;;  %v12007_v56 = vld [vmem:[%s14202_s2 + $0x474] sm:$0xf]  ;;  %v11435_v57 = vld [vmem:[%s14202_s2 + $0x478] sm:$0xf0] }
0x17e8   : > { %v11438_v59 = vor.u32 %v12007_v56, %v11435_v57 }
0x184c   : > { %v7506_v9 = vpop.f32.mrf.mxu2 }
0x184d   : > { %v7507_v22 = vadd.f32 %v7506_v9, %v7448_v19  ;;  %v7740_v19 = vperm.slane %v7658_v18, 0 }
0x184f   : > { %v7510_v23 = vadd.f32 %v7507_v22, %v7349_v21 }
0x1851   : > { %v7511_v24 = vmax.f32 %v7510_v23, 0.0  ;;  %v7741_v23 = vperm.slane %v7658_v18, 1 }
0x1853   : > { %v7512_v25 = vpack.c.bf16 %v7511_v24, %v7511_v24 }
0x1854   : > { %v7508_v26 = vpop.f32.mrf.mxu2 }
0x1855   : > { %7623 = vmatmul.bf16.vlgmr.msra.gmra.mxu3 %v7512_v25  ;;  %7636 = vmatmul.bf16.vlgmr.msra.gmra.mxu0 %v7512_v25 }
0x1856   : > { %7752 = vmatmul.bf16.vlgmr.msrb.gmra.mxu1 %v7512_v25  ;;  %7765 = vmatmul.bf16.vlgmr.msra.gmra.mxu2 %v7512_v25 }
0x1857   : > { %8238 = vmatpush.bf16.msra.mxu3 %v11274_v61  ;;  %8251 = vmatpush.bf16.msra.mxu0 %v11338_v3  ;;  %v11305_v61 = vld [vmem:[%s14198_s1 + $0x4b0] sm:$0xf]  ;;  %v11243_v3 = vld [vmem:[%s14198_s1 + $0x438] sm:$0xf0] }
0x1858   : > { %8264 = vmatpush.bf16.msrb.mxu1 %v11278_v4  ;;  %8277 = vmatpush.bf16.msra.mxu2 %v11342_v2  ;;  %v11306_v4 = vor.u32 %v11984_v63, %v11305_v61  ;;  %v11246_v6 = vor.u32 %v11967_v0, %v11243_v3  ;;  %v11310_v2 = vor.u32 %v11983_v1, %v11307_v7  ;;  %v12021_v61 = vld [vmem:[%s14202_s2 + $0x4e4] sm:$0xf]  ;;  %v11425_v3 = vld [vmem:[%s14202_s2 + $0x460] sm:$0xf]  ;;  %v11427_v7 = vld [vmem:[%s14202_s2 + $0x468] sm:$0xf0] }
0x185b   : > { %8239 = vmatpush.bf16.msra.mxu3 %v11266_v43  ;;  %8252 = vmatpush.bf16.msra.mxu0 %v11330_v11  ;;  %v11234_v43 = vor.u32 %v11966_v5, %v11233_v8  ;;  %v11982_v11 = vld [vmem:[%s14198_s1 + $0x4a4] sm:$0xf0]  ;;  %v12020_v8 = vld [vmem:[%s14202_s2 + $0x4d4] sm:$0xf0] }
0x185c   : > { %8265 = vmatpush.bf16.msrb.mxu1 %v11270_v15  ;;  %8278 = vmatpush.bf16.msra.mxu2 %v11334_v17  ;;  %v11298_v14 = vor.u32 %v11982_v11, %v11297_v10  ;;  %v11238_v15 = vor.u32 %v11965_v12, %v11235_v13  ;;  %v11299_v17 = vld [vmem:[%s14198_s1 + $0x4a8] sm:$0xf0]  ;;  %v11483_v11 = vld [vmem:[%s14202_s2 + $0x4d8] sm:$0xf0]  ;;  %v11417_v12 = vld [vmem:[%s14202_s2 + $0x450] sm:$0xf] }
0x185d   : > { %v11302_v18 = vor.u32 %v11981_v16, %v11299_v17  ;;  %v11419_v16 = vld [vmem:[%s14202_s2 + $0x458] sm:$0xf0] }
0x185f   : > { %8240 = vmatpush.bf16.msra.mxu3 %v11258_v36  ;;  %8253 = vmatpush.bf16.msra.mxu0 %v11322_v41  ;;  %v11961_v36 = vld [vmem:[%s14198_s1 + $0x404] sm:$0xf] }
0x1860   : > { %8266 = vmatpush.bf16.msrb.mxu1 %v11262_v42  ;;  %8279 = vmatpush.bf16.msra.mxu2 %v11326_v46  ;;  %v11222_v40 = vor.u32 %v11961_v36, %v11219_v38  ;;  %v11977_v41 = vld [vmem:[%s14198_s1 + $0x484] sm:$0xf]  ;;  %v11283_v42 = vld [vmem:[%s14198_s1 + $0x488] sm:$0xf0]  ;;  %v7969_v46 = vperm.slane %v13927_v45, 0  ;;  %v7970_v38 = vperm.slane %v13927_v45, 1 }
0x1861   : > { %v11286_v44 = vor.u32 %v11977_v41, %v11283_v42  ;;  %v12015_v41 = vld [vmem:[%s14202_s2 + $0x4b4] sm:$0xf]  ;;  %v11467_v42 = vld [vmem:[%s14202_s2 + $0x4b8] sm:$0xf0] }
0x1863   : > { %8241 = vmatpush.bf16.msra.mxu3 %v11250_v50  ;;  %8254 = vmatpush.bf16.msra.mxu0 %v11314_v54  ;;  %v11498_v50 = vor.u32 %v12024_v48, %v11497_v47  ;;  %v11502_v54 = vor.u32 %v12023_v49, %v11499_v51 }
0x1864   : > { %8267 = vmatpush.bf16.msrb.mxu1 %v11254_v55  ;;  %8280 = vmatpush.bf16.msra.mxu2 %v11318_v58  ;;  %v11434_v55 = vor.u32 %v12008_v53, %v11433_v52  ;;  %v11489_v58 = vld [vmem:[%s14202_s2 + $0x4e0] sm:$0xf] }
0x1865   : > { %v11490_v63 = vor.u32 %v12022_v60, %v11489_v58 }
0x1867   : > { %8242 = vmatpush.bf16.msra.mxu3 %v11242_v62  ;;  %8255 = vmatpush.bf16.msra.mxu0 %v11306_v4  ;;  %v11491_v62 = vld [vmem:[%s14202_s2 + $0x4e8] sm:$0xf0]  ;;  %v12006_v4 = vld [vmem:[%s14202_s2 + $0x464] sm:$0xf0] }
0x1868   : > { %8268 = vmatpush.bf16.msrb.mxu1 %v11246_v6  ;;  %8281 = vmatpush.bf16.msra.mxu2 %v11310_v2  ;;  %v11494_v0 = vor.u32 %v12021_v61, %v11491_v62  ;;  %v12005_v6 = vld [vmem:[%s14202_s2 + $0x464] sm:$0xf]  ;;  %v11426_v1 = vor.u32 %v12006_v4, %v11425_v3  ;;  %v11481_v2 = vld [vmem:[%s14202_s2 + $0x4d0] sm:$0xf]  ;;  %v12000_v3 = vld [vmem:[%s14202_s2 + $0x434] sm:$0xf0] }
0x1869   : > { %v11430_v10 = vor.u32 %v12005_v6, %v11427_v7  ;;  %v11482_v13 = vor.u32 %v12020_v8, %v11481_v2  ;;  %v11999_v4 = vld [vmem:[%s14202_s2 + $0x434] sm:$0xf]  ;;  %v11457_v2 = vld [vmem:[%s14202_s2 + $0x4a0] sm:$0xf]  ;;  %v12014_v8 = vld [vmem:[%s14202_s2 + $0x4a4] sm:$0xf0] }
0x186b   : > { %8243 = vmatpush.bf16.msra.mxu3 %v11234_v43  ;;  %8256 = vmatpush.bf16.msra.mxu0 %v11298_v14  ;;  %v12019_v43 = vld [vmem:[%s14202_s2 + $0x4d4] sm:$0xf]  ;;  %v12004_v14 = vld [vmem:[%s14202_s2 + $0x454] sm:$0xf0] }
0x186c   : > { %8269 = vmatpush.bf16.msrb.mxu1 %v11238_v15  ;;  %8282 = vmatpush.bf16.msra.mxu2 %v11302_v18  ;;  %v12003_v15 = vld [vmem:[%s14202_s2 + $0x454] sm:$0xf]  ;;  %v11486_v17 = vor.u32 %v12019_v43, %v11483_v11  ;;  %v11418_v18 = vor.u32 %v12004_v14, %v11417_v12  ;;  %v11459_v43 = vld [vmem:[%s14202_s2 + $0x4a8] sm:$0xf0]  ;;  %v11393_v12 = vld [vmem:[%s14202_s2 + $0x420] sm:$0xf] }
0x186d   : > { %v11997_v14 = vld [vmem:[%s14202_s2 + $0x424] sm:$0xf] }
0x18d2   : > { %v13874_v20 = vpop.f32.mrf.mxu0 }
0x18d3   : > { %v7753_v9 = vpop.f32.mrf.mxu1 }
0x18d4   : > { %v7754_v21 = vadd.f32 %v7753_v9, %v7740_v19  ;;  %v11225_v19 = vld [vmem:[%s14198_s1 + $0x410] sm:$0xf]  ;;  %v11964_v9 = vld [vmem:[%s14198_s1 + $0x414] sm:$0xf0] }
0x18d6   : > { %v7770_v22 = vmax.f32 %v7754_v21, 0.0  ;;  %v11289_v21 = vld [vmem:[%s14198_s1 + $0x490] sm:$0xf] }
0x18d8   : > { %v7772_v24 = vpack.c.bf16 %v7770_v22, %v7770_v22  ;;  %v13876_v25 = vpop.f32.mrf.mxu3  ;;  %v11226_v22 = vor.u32 %v11964_v9, %v11225_v19  ;;  %v11473_v19 = vld [vmem:[%s14202_s2 + $0x4c0] sm:$0xf]  ;;  %v12018_v9 = vld [vmem:[%s14202_s2 + $0x4c4] sm:$0xf0] }
0x18d9   : > { %v7766_v26 = vpop.f32.mrf.mxu2 }
0x18da   : > { %v7767_v27 = vadd.f32 %v7766_v26, %v7741_v23  ;;  %7981 = vmatmul.bf16.vlgmr.msrb.gmra.mxu3 %v7772_v24  ;;  %8007 = vmatmul.bf16.vlgmr.msra.gmra.mxu1 %v7772_v24  ;;  %v7639_v37 = vpop.f32.mrf.mxu0  ;;  %v11980_v23 = vld [vmem:[%s14198_s1 + $0x494] sm:$0xf0]  ;;  %v11963_v24 = vld [vmem:[%s14198_s1 + $0x414] sm:$0xf]  ;;  %v11227_v26 = vld [vmem:[%s14198_s1 + $0x418] sm:$0xf0] }
0x18db   : > { %v7755_v28 = vpop.f32.mrf.mxu1  ;;  %v11230_v37 = vor.u32 %v11963_v24, %v11227_v26  ;;  %8244 = vmatpush.bf16.msra.mxu3 %v11226_v22  ;;  %v11422_v22 = vor.u32 %v12003_v15, %v11419_v16  ;;  %v11409_v24 = vld [vmem:[%s14202_s2 + $0x440] sm:$0xf]  ;;  %v12002_v26 = vld [vmem:[%s14202_s2 + $0x444] sm:$0xf0]  ;;  %v11395_v16 = vld [vmem:[%s14202_s2 + $0x428] sm:$0xf0] }
0x18dc   : > { %v7771_v29 = vmax.f32 %v7767_v27, 0.0  ;;  %v11290_v27 = vor.u32 %v11980_v23, %v11289_v21  ;;  %v11979_v28 = vld [vmem:[%s14198_s1 + $0x494] sm:$0xf]  ;;  %v12017_v21 = vld [vmem:[%s14202_s2 + $0x4c4] sm:$0xf]  ;;  %v11410_v33 = vor.u32 %v12002_v26, %v11409_v24 }
0x18dd   : > { %8270 = vmatpush.bf16.msrb.mxu1 %v11230_v37  ;;  %v11475_v23 = vld [vmem:[%s14202_s2 + $0x4c8] sm:$0xf0]  ;;  %v11385_v24 = vld [vmem:[%s14202_s2 + $0x410] sm:$0xf]  ;;  %v11996_v26 = vld [vmem:[%s14202_s2 + $0x414] sm:$0xf0] }
0x18de   : > { %v7773_v30 = vpack.c.bf16 %v7771_v29, %v7771_v29  ;;  %v11291_v29 = vld [vmem:[%s14198_s1 + $0x498] sm:$0xf0]  ;;  %8257 = vmatpush.bf16.msra.mxu0 %v11290_v27  ;;  %v12001_v27 = vld [vmem:[%s14202_s2 + $0x444] sm:$0xf]  ;;  %v11411_v37 = vld [vmem:[%s14202_s2 + $0x448] sm:$0xf0] }
0x18e0   : > { %7994 = vmatmul.bf16.vlgmr.msrb.gmra.mxu0 %v7773_v30  ;;  %8020 = vmatmul.bf16.vlgmr.msrb.gmra.mxu2 %v7773_v30  ;;  %v7626_v31 = vpop.f32.mrf.mxu3  ;;  %v11294_v30 = vor.u32 %v11979_v28, %v11291_v29  ;;  %v11474_v28 = vor.u32 %v12018_v9, %v11473_v19  ;;  %v7529_v29 = vld [vmem:[%s14203_s26] sm:$0x3]  ;;  %v12012_v19 = vld [vmem:[%s14202_s2 + $0x494] sm:$0xf0]  ;;  %v12011_v9 = vld [vmem:[%s14202_s2 + $0x494] sm:$0xf] }
0x18e1   : > { %v7768_v32 = vpop.f32.mrf.mxu2  ;;  %v11217_v31 = vld [vmem:[%s14198_s1 + $0x400] sm:$0xf]  ;;  %8271 = vmatpush.bf16.msrb.mxu1 %v11222_v40  ;;  %v7611_v36 = vperm.slane %v7529_v29, 0  ;;  %v11414_v40 = vor.u32 %v12001_v27, %v11411_v37  ;;  %v7612_v47 = vperm.slane %v7529_v29, 1  ;;  %v11995_v27 = vld [vmem:[%s14202_s2 + $0x414] sm:$0xf]  ;;  %v11386_v37 = vor.u32 %v11996_v26, %v11385_v24 }
0x18e2   : > { %v11962_v32 = vld [vmem:[%s14198_s1 + $0x404] sm:$0xf0]  ;;  %8283 = vmatpush.bf16.msra.mxu2 %v11294_v30  ;;  %8258 = vmatpush.bf16.msra.mxu0 %v11282_v39  ;;  %s14205_s26 = sld [smem:[#allocation69_spill]] }
0x18e3   : > { %v11218_v34 = vor.u32 %v11962_v32, %v11217_v31  ;;  %v11478_v32 = vor.u32 %v12017_v21, %v11475_v23  ;;  %v7625_v51 = vadd.f32 %v13876_v25, %v7611_v36  ;;  %v7638_v45 = vadd.f32 %v13874_v20, %v7612_v47  ;;  %v11377_v36 = vld [vmem:[%s14202_s2 + $0x400] sm:$0xf]  ;;  %s14207_s1 = sld [smem:[#allocation71_spill]] }
0x18e4   : > { %v8590_v47 = vld [vmem:[%s14204_s28] sm:$0xf]  ;;  %s14206_s28 = sld [smem:[#allocation25_spill]] }
0x18e5   : > { %8245 = vmatpush.bf16.msra.mxu3 %v11218_v34  ;;  %8519 = vmatpush.bf16.msra.mxu1 %v11438_v59  ;;  %v11465_v34 = vld [vmem:[%s14202_s2 + $0x4b0] sm:$0xf] }
0x18e6   : > { %8284 = vmatpush.bf16.msra.mxu2 %v11286_v44  ;;  %8506 = vmatpush.bf16.msrb.mxu0 %v11498_v50  ;;  %v11466_v49 = vor.u32 %v12016_v35, %v11465_v34  ;;  %v11470_v50 = vor.u32 %v12015_v41, %v11467_v42  ;;  %v11443_v34 = vld [vmem:[%s14202_s2 + $0x488] sm:$0xf0] }
0x18e7   : > { %v11379_v41 = vld [vmem:[%s14202_s2 + $0x408] sm:$0xf0] }
0x18e9   : > { %8493 = vmatpush.bf16.msrb.mxu3 %v11434_v55  ;;  %8520 = vmatpush.bf16.msra.mxu1 %v11430_v10  ;;  %v12013_v10 = vld [vmem:[%s14202_s2 + $0x4a4] sm:$0xf] }
0x18ea   : > { %8532 = vmatpush.bf16.msrb.mxu2 %v11502_v54  ;;  %8507 = vmatpush.bf16.msrb.mxu0 %v11490_v63  ;;  %v11462_v11 = vor.u32 %v12013_v10, %v11459_v43  ;;  %v12029_v10 = vld [vmem:[#allocation14 + $0x20] sm:$0xff]  ;;  %v12036_v43 = vld [vmem:[#allocation14 + $0x58] sm:$0xff] }
0x18ed   : > { %8494 = vmatpush.bf16.msrb.mxu3 %v11426_v1  ;;  %8521 = vmatpush.bf16.msra.mxu1 %v11422_v22  ;;  %v11403_v1 = vld [vmem:[%s14202_s2 + $0x438] sm:$0xf0] }
0x18ee   : > { %8533 = vmatpush.bf16.msrb.mxu2 %v11494_v0  ;;  %8508 = vmatpush.bf16.msrb.mxu0 %v11482_v13  ;;  %v11401_v0 = vld [vmem:[%s14202_s2 + $0x430] sm:$0xf]  ;;  %v11406_v7 = vor.u32 %v11999_v4, %v11403_v1  ;;  %v11998_v13 = vld [vmem:[%s14202_s2 + $0x424] sm:$0xf0]  ;;  %v11451_v22 = vld [vmem:[%s14202_s2 + $0x498] sm:$0xf0] }
0x18ef   : > { %v11402_v6 = vor.u32 %v12000_v3, %v11401_v0  ;;  %v11394_v15 = vor.u32 %v11998_v13, %v11393_v12  ;;  %v11454_v23 = vor.u32 %v12011_v9, %v11451_v22  ;;  %v12032_v3 = vld [vmem:[#allocation14 + $0x38] sm:$0xff]  ;;  %v12035_v12 = vld [vmem:[#allocation14 + $0x50] sm:$0xff] }
0x18f0   : > { %v12027_v13 = vld [vmem:[#allocation14 + $0x10] sm:$0xff] }
0x18f1   : > { %8495 = vmatpush.bf16.msrb.mxu3 %v11418_v18  ;;  %8522 = vmatpush.bf16.msra.mxu1 %v11414_v40  ;;  %v11449_v18 = vld [vmem:[%s14202_s2 + $0x490] sm:$0xf] }
0x18f2   : > { %8534 = vmatpush.bf16.msrb.mxu2 %v11486_v17  ;;  %8509 = vmatpush.bf16.msrb.mxu0 %v11474_v28  ;;  %v11398_v17 = vor.u32 %v11997_v14, %v11395_v16  ;;  %v11450_v21 = vor.u32 %v12012_v19, %v11449_v18  ;;  %v11387_v28 = vld [vmem:[%s14202_s2 + $0x418] sm:$0xf0]  ;;  %v12034_v14 = vld [vmem:[#allocation14 + $0x48] sm:$0xff]  ;;  %v12033_v16 = vld [vmem:[#allocation14 + $0x40] sm:$0xff] }
0x18f3   : > { %v11390_v29 = vor.u32 %v11995_v27, %v11387_v28  ;;  %v8327_v18 = vld [vmem:[%s14207_s1] sm:$0x3] }
0x18f4   : > { %v8490_v9 = vperm.slane %v8327_v18, 1  ;;  %v8489_v22 = vperm.slane %v8327_v18, 0 }
0x18f5   : > { %8496 = vmatpush.bf16.msrb.mxu3 %v11410_v33  ;;  %8523 = vmatpush.bf16.msra.mxu1 %v11406_v7  ;;  %v12031_v7 = vld [vmem:[#allocation14 + $0x30] sm:$0xff] }
0x18f6   : > { %8535 = vmatpush.bf16.msrb.mxu2 %v11478_v32  ;;  %8510 = vmatpush.bf16.msrb.mxu0 %v11466_v49  ;;  %v12009_v32 = vld [vmem:[%s14202_s2 + $0x484] sm:$0xf]  ;;  %v12039_v49 = vld [vmem:[#allocation14 + $0x70] sm:$0xff] }
0x18f7   : > { %v11446_v35 = vor.u32 %v12009_v32, %v11443_v34 }
0x18f9   : > { %8497 = vmatpush.bf16.msrb.mxu3 %v11402_v6  ;;  %8524 = vmatpush.bf16.msra.mxu1 %v11398_v17  ;;  %v12025_v17 = vld [vmem:[#allocation14] sm:$0xff] }
0x18fa   : > { %8536 = vmatpush.bf16.msrb.mxu2 %v11470_v50  ;;  %v12038_v50 = vld [vmem:[#allocation14 + $0x68] sm:$0xff] }
0x18fd   : > { %8498 = vmatpush.bf16.msrb.mxu3 %v11394_v15  ;;  %8525 = vmatpush.bf16.msra.mxu1 %v11390_v29  ;;  %v12026_v15 = vld [vmem:[#allocation14 + $0x8] sm:$0xff] }
0x18fe   : > { %8537 = vmatpush.bf16.msrb.mxu2 %v11462_v11  ;;  %v12028_v11 = vld [vmem:[#allocation14 + $0x18] sm:$0xff] }
0x1901   : > { %8499 = vmatpush.bf16.msrb.mxu3 %v11386_v37 }
0x1902   : > { %8538 = vmatpush.bf16.msrb.mxu2 %v11454_v23 }
0x1906   : > { %8539 = vmatpush.bf16.msrb.mxu2 %v11446_v35 }
0x1957   : > { %v8008_v5 = vpop.f32.mrf.mxu1 }
0x1958   : > { %v8009_v52 = vadd.f32 %v8008_v5, %v7970_v38  ;;  %v11458_v5 = vor.u32 %v12014_v8, %v11457_v2  ;;  %v11994_v38 = vld [vmem:[%s14202_s2 + $0x404] sm:$0xf0]  ;;  %v12030_v2 = vld [vmem:[#allocation14 + $0x28] sm:$0xff] }
0x1959   : > { %v11378_v40 = vor.u32 %v11994_v38, %v11377_v36 }
0x195a   : > { %8511 = vmatpush.bf16.msrb.mxu0 %v11458_v5 }
0x195b   : > { %8500 = vmatpush.bf16.msrb.mxu3 %v11378_v40 }
0x195d   : > { %v7982_v30 = vpop.f32.mrf.mxu3  ;;  %v7995_v31 = vpop.f32.mrf.mxu0 }
0x195e   : > { %v7983_v39 = vadd.f32 %v7982_v30, %v7969_v46  ;;  %8512 = vmatpush.bf16.msrb.mxu0 %v11450_v21  ;;  %v11441_v30 = vld [vmem:[%s14202_s2 + $0x480] sm:$0xf] }
0x195f   : > { %v8010_v44 = vpop.f32.mrf.mxu1 }
0x1960   : > { %v7996_v48 = vadd.f32 %v7995_v31, %v7983_v39  ;;  %v12010_v31 = vld [vmem:[%s14202_s2 + $0x484] sm:$0xf0]  ;;  %v11993_v39 = vld [vmem:[%s14202_s2 + $0x404] sm:$0xf] }
0x1961   : > { %v11442_v33 = vor.u32 %v12010_v31, %v11441_v30  ;;  %v11382_v42 = vor.u32 %v11993_v39, %v11379_v41  ;;  %v12040_v44 = vld [vmem:[#allocation14 + $0x78] sm:$0xff] }
0x1962   : > { %v8025_v46 = vadd.f32 %v7996_v48, %v7625_v51  ;;  %v8597_v48 = vsel %vm8595_vm5, %v8590_v47, 0  ;;  %v12037_v51 = vld [vmem:[#allocation14 + $0x60] sm:$0xff]  ;;  %v12044_v47 = vld [vmem:[#allocation16 + $0x18] sm:$0xff] }
0x1963   : > { %v8021_v53 = vpop.f32.mrf.mxu2  ;;  %8513 = vmatpush.bf16.msrb.mxu0 %v11442_v33  ;;  %8526 = vmatpush.bf16.msra.mxu1 %v11382_v42 }
0x1964   : > { %v8022_v54 = vadd.f32 %v8021_v53, %v8009_v52  ;;  %v8027_v58 = vmax.f32 %v8025_v46, 0.0  ;;  %v8065_v52 = vld [vmem:[%s14205_s26] sm:$0x3]  ;;  %s1902_s26 = scalar_lea.vmem %s14206_s28, %s13192_s22  ;;  %s14208_s22 = sld [smem:[#allocation74_spill]] }
0x1965   : > { %v7984_v55 = vpop.f32.mrf.mxu3  ;;  %v7997_v56 = vpop.f32.mrf.mxu0  ;;  %v8235_v46 = vperm.slane %v8065_v52, 1  ;;  %v8588_v8 = vld [vmem:[%s1902_s26] sm:$0x1]  ;;  %s14210_s28 = sld [smem:[#allocation73_spill]]  ;;  %s1893_s26 = sand.u32 1, %s12594_s23  }
0x1966   : > { %v8026_v57 = vadd.f32 %v8022_v54, %v7638_v45  ;;  %v8234_v54 = vperm.slane %v8065_v52, 0  ;;  %v8589_v5 = vpack.c.bf16 %v8588_v8, %v8588_v8  ;;  %s1894_s4 = scalar_lea.vmem [#allocation17], %s1893_s26  ;;  %s8790_s7 = scalar_lea.sflag [#allocation4], %s1893_s26 }
0x1967   : > { %s8800_s5 = sshll.u32 %s1894_s4, 4  ;;  %s8801_s5 = int_to_ptr.vmem [resolvable:$true] %s8800_s5 }
0x1968   : > { %v8028_v59 = vmax.f32 %v8026_v57, 0.0 }
0x196a   : > { %v13972_v60 = vpack.c.bf16 %v8028_v59, %v8027_v58  ;;  %s14209_s1 = smov %s14208_s22  ;;  %s8798_s2 = scalar_lea.hbm %s14208_s22, %s13004_s0 }
0x196b   : > { %v8023_v25 = vpop.f32.mrf.mxu2  ;;  %s8802_s6 = sshll.u32 %s8798_s2, 4  ;;  %s12540_s0 = scalar_lea.hbm %s14209_s1, 2  ;;  %s8803_s6 = int_to_ptr.hbm [resolvable:$true] %s8802_s6 }
0x196c   : > { %v8067_v20 = vunpack.c.l.b16 %v13972_v60  ;;  %v8068_v61 = vunpack.c.h.b16 %v13972_v60  ;;  %v8031_v26 = vunpack.c.h.bf16 %v13972_v60  ;;  %v8030_v32 = vunpack.c.l.bf16 %v13972_v60  ;;  %v12041_v60 = vld [vmem:[#allocation16] sm:$0xff]  ;;  %s12534_s8 = sshra.s32 %s8803_s6, 4  ;;  %s12535_s8 = int_to_ptr.hbm [resolvable:$true] %s12534_s8 }
0x196d   : > { %s12536_s9 = scalar_lea.hbm %s12535_s8, 1  ;;  %p12541_p11 = scmp.lt.s32.totalorder %s12535_s8, %s14209_s1 }
0x196e   : > { %v8069_v62 = vpack.c.b16 %v8067_v20, %v8067_v20  ;;  %v8070_v63 = vpack.c.b16 %v8068_v61, %v8068_v61  ;;  %p12537_p10 = scmp.ne.s32.totalorder %s12535_s8, %s12536_s9  ;;  %p12542_p13 = scmp.lt.s32.totalorder %s12540_s0, %s12536_s9 }
0x1970   : > { %8246 = vmatmul.bf16.vlgmr.msra.gmra.mxu3 %v8069_v62  ;;  %8259 = vmatmul.bf16.vlgmr.msra.gmra.mxu0 %v8070_v63  ;;  %p12538_p12 = pnand %p12537_p10, %p13021_p5  ;;  %p12543_p1 = por %p12542_p13, %p12541_p11 }
0x1971   : > { %8272 = vmatmul.bf16.vlgmr.msrb.gmra.mxu1 %v8069_v62  ;;  %8285 = vmatmul.bf16.vlgmr.msra.gmra.mxu2 %v8070_v63 }
0x1972   : > { %8721 = vmatpush.bf16.msra.mxu0 %v12040_v44  ;;  %8606 = vmatpush.bf16.msra.mxu3 %v8597_v48  ;;  %v12043_v48 = vld [vmem:[#allocation16 + $0x10] sm:$0xff]  ;;  %p12539_p0 = pneg %p12538_p12 }
0x1973   : > { %8778 = vmatpush.bf16.msrb.mxu1 %v12044_v47 }
0x1974   : > { %p12544_p2 = pnand %p12543_p1, %p12539_p0 }
0x1976   : > { %8722 = vmatpush.bf16.msra.mxu0 %v12039_v49  ;;  %v12042_v49 = vld [vmem:[#allocation16 + $0x8] sm:$0xff] }
0x1977   : > { %8779 = vmatpush.bf16.msrb.mxu1 %v12043_v48 }
0x197a   : > { %8723 = vmatpush.bf16.msra.mxu0 %v12038_v50 }
0x197b   : > { %8780 = vmatpush.bf16.msrb.mxu1 %v12042_v49 }
0x197e   : > { %8724 = vmatpush.bf16.msra.mxu0 %v12037_v51 }
0x197f   : > { %8781 = vmatpush.bf16.msrb.mxu1 %v12041_v60 }
0x1982   : > { %8725 = vmatpush.bf16.msra.mxu0 %v12036_v43 }
0x1986   : > { %8726 = vmatpush.bf16.msra.mxu0 %v12035_v12 }
0x198a   : > { %8727 = vmatpush.bf16.msra.mxu0 %v12034_v14 }
0x198e   : > { %8728 = vmatpush.bf16.msra.mxu0 %v12033_v16 }
0x19ed   : > { %v8260_v53 = vpop.f32.mrf.mxu0 }
0x19ee   : > { %v8273_v45 = vpop.f32.mrf.mxu1 }
0x19ef   : > { %v8274_v55 = vadd.f32 %v8273_v45, %v8235_v46  ;;  %v8734_v45 = vld [vmem:[%s12966_s19] sm:$0x1] }
0x19f3   : > { %v8247_v56 = vpop.f32.mrf.mxu3 }
0x19f4   : > { %v8248_v57 = vadd.f32 %v8247_v56, %v8234_v54  ;;  %v8286_v58 = vpop.f32.mrf.mxu2 }
0x19f5   : > { %v8287_v59 = vadd.f32 %v8286_v58, %v8274_v55  ;;  %v8262_v25 = vpop.f32.mrf.mxu0  ;;  %v8746_v58 = vld [vmem:[%s14210_s28] sm:$0x1] }
0x19f6   : > { %v8261_v20 = vadd.f32 %v8260_v53, %v8248_v57  ;;  %v8275_v61 = vpop.f32.mrf.mxu1 }
0x19f7   : > { %v8291_v62 = vmax.f32 %v8287_v59, 0.0 }
0x19f8   : > { %v8290_v63 = vmax.f32 %v8261_v20, 0.0 }
0x19f9   : > { %v8293_v0 = vpack.c.bf16 %v8291_v62, %v8291_v62 }
0x19fa   : > { %v8292_v4 = vpack.c.bf16 %v8290_v63, %v8290_v63 }
0x19fb   : > { %8514 = vmatmul.bf16.vlgmr.msrb.gmra.mxu0 %v8293_v0  ;;  %8540 = vmatmul.bf16.vlgmr.msrb.gmra.mxu2 %v8293_v0  ;;  %v8249_v6 = vpop.f32.mrf.mxu3 }
0x19fc   : > { %v8288_v1 = vpop.f32.mrf.mxu2  ;;  %8501 = vmatmul.bf16.vlgmr.msrb.gmra.mxu3 %v8292_v4  ;;  %8527 = vmatmul.bf16.vlgmr.msra.gmra.mxu1 %v8292_v4 }
0x19fd   : > { %8708 = vmatpush.bf16.msrb.mxu3 %v12032_v3 }
0x1a01   : > { %8709 = vmatpush.bf16.msrb.mxu3 %v12031_v7 }
0x1a05   : > { %8710 = vmatpush.bf16.msrb.mxu3 %v12030_v2 }
0x1a09   : > { %8711 = vmatpush.bf16.msrb.mxu3 %v12029_v10 }
0x1a0c   : > { %11503 = vmatmul.msk.bf16.vlgmr.msra.gmra.mxu3 %vm8591_vm6, %v8589_v5 }
0x1a0d   : > { %8712 = vmatpush.bf16.msrb.mxu3 %v12028_v11 }
0x1a11   : > { %8713 = vmatpush.bf16.msrb.mxu3 %v12027_v13 }
0x1a15   : > { %8714 = vmatpush.bf16.msrb.mxu3 %v12026_v15 }
0x1a19   : > { %8715 = vmatpush.bf16.msrb.mxu3 %v12025_v17 }
0x1a78   : > { %v8515_v19 = vpop.f32.mrf.mxu0 }
0x1a79   : > { %v8528_v21 = vpop.f32.mrf.mxu1 }
0x1a7a   : > { %v8529_v23 = vadd.f32 %v8528_v21, %v8490_v9 }
0x1a7e   : > { %v8541_v24 = vpop.f32.mrf.mxu2 }
0x1a7f   : > { %v8542_v27 = vadd.f32 %v8541_v24, %v8529_v23  ;;  %v8502_v37 = vpop.f32.mrf.mxu3 }
0x1a80   : > { %v8503_v28 = vadd.f32 %v8502_v37, %v8489_v22  ;;  %v8517_v29 = vpop.f32.mrf.mxu0 }
0x1a81   : > { %v8546_v30 = vadd.f32 %v8542_v27, %v8031_v26  ;;  %v8530_v31 = vpop.f32.mrf.mxu1 }
0x1a82   : > { %v8516_v33 = vadd.f32 %v8515_v19, %v8503_v28 }
0x1a83   : > { %v8548_v34 = vmax.f32 %v8546_v30, 0.0 }
0x1a84   : > { %v8545_v35 = vadd.f32 %v8516_v33, %v8030_v32 }
0x1a85   : > { %v8555_v36 = vpack.c.bf16 %v8548_v34, %v8548_v34 }
0x1a86   : > { %v8547_v38 = vmax.f32 %v8545_v35, 0.0  ;;  %v8543_v39 = vpop.f32.mrf.mxu2 }
0x1a87   : > { %8729 = vmatmul.bf16.vlgmr.msra.gmra.mxu0 %v8555_v36  ;;  %v8504_v40 = vpop.f32.mrf.mxu3 }
0x1a88   : > { %v8554_v41 = vpack.c.bf16 %v8547_v38, %v8547_v38 }
0x1a8a   : > { %8716 = vmatmul.bf16.vlgmr.msrb.gmra.mxu3 %v8554_v41 }
0x1a8f   : > { %v8608_v42 = vpop.f32.mrf.mxu3 }
0x1a97   : > { %v8610_v44 = vpop.f32.mrf.mxu3 }
0x1b04   : > { %v8730_v50 = vpop.f32.mrf.mxu0 }
0x1b0c   : > { %v8732_v51 = vpop.f32.mrf.mxu0 }
0x1b0d   : > { %v8717_v52 = vpop.f32.mrf.mxu3 }
0x1b0e   : > { %v8718_v53 = vadd.f32 %v8717_v52, %v8608_v42 }
0x1b10   : > { %v8731_v46 = vadd.f32 %v8730_v50, %v8718_v53 }
0x1b12   : > { %v8735_v54 = vadd.f32 %v8734_v45, %v8731_v46 }
0x1b14   : > { %v8736_v55 = vmax.f32 %v8735_v54, 0.0 }
0x1b15   : > { %v8719_v56 = vpop.f32.mrf.mxu3 }
0x1b16   : > { %v8737_v57 = vpack.c.bf16 %v8736_v55, %v8736_v55 }
0x1b18   : > { %11584 = vmatmul.msk.bf16.vlgmr.msrb.gmra.mxu1 %vm2161_vm0, %v8737_v57 }
0x1b95   : > { %v8783_v59 = vpop.f32.mrf.mxu1 }
0x1b96   : > { %v8784_v25 = vadd.f32 %v8783_v59, %v8746_v58 }
0x1b98   : > { %8788 = vst.msk [vmem:[%s1894_s4] sm:$0x1] %vm8787_vm7, %v8784_v25 }
0x1b99   : > { %12547 = shalt.err (!%p12544_p2)
}
0x1b9a   : > { %12081 = dma.vmem_to_hbm [thread:$0]  (%p13021_p5), %s8801_s5, 16, %s8803_s6, %s8790_s7  }
0x1b9d   : > { %v8785_v20 = vpop.f32.mrf.mxu1 }
0x1b9e PF: > { %s14212_s4 = sld [smem:[#allocation77_spill]] }
0x1b9f   : > { %s14213_s2 = sld [smem:[#allocation75_spill]] }
0x1ba4   : > { %p12133_p3 = scmp.ge.s32.totalorder %s14212_s4, 2 }
0x1ba5   : > { %s8814_s28 = sand.u32 1, %s14213_s2  }
0x1ba6   : > { %p12112_p4 = pnand %p12133_p3, %p13025_p6  ;;  %s8815_s26 = scalar_lea.sflag [#allocation4], %s8814_s28 }
0x1ba8   : > { %p12113_p7 = pneg %p12112_p4 }
0x1baa   : > { %12585 = dma.done.wait (%p12113_p7), %s8815_s26, 16  }
0x1bab   : > { %12587 = vsyncadd (%p12113_p7), %s8815_s26, 4294967280  ;;  %s14215_s28 = sld [smem:[#allocation78_spill]]  ;;  %s14218_s22 = smov %s12594_s23 }
0x1bac   : > { %s14216_s9 = sld [smem:[#allocation76_spill]] }
0x1bad   : > { %s14217_s26 = sld [smem:[#allocation79_spill]] }
0x1bb1   : > { %p134_p8 = scmp.ge.s32.totalorder %s14215_s28, 4  }
0x1bb2   : > { %s14219_s23 = smov %s14216_s9 }
0x1bb3   :  { %136 = sbr.rel (!%p134_p8) target bundleno = 125 (0x7d), region = 533 }
0x1bb8   :  { %8820 = vsyncpa [#allocation3], 1 }
0x1bb9   :  { %8822 = vsyncpa [#allocation3 + $0x1], 1 }
0x1bba   :  { %8823 = vsyncpa [#allocation6], 1 }
0x1bbb   :  { %8824 = vsyncpa [#allocation9], 1 }
0x1bbc   :  { %8825 = vsyncpa [#allocation12], 1 }
0x1bbd   :  { %8826 = vsyncpa [#allocation15], 1 }
0x1bbe   :  { %8827 = vsyncpa [#allocation4], 1 }
0x1bbf   :  { %8829 = vsyncpa [#allocation4 + $0x1], 1 }

</bundles_post_ra>
